<compile_context>
chip_gen: v5e
topology: v5e:2x2
jax: 0.10.0
libtpu: 0.0.40
codegen_flags: <defaults>
</compile_context>

<pallas_src>
import functools

import jax
import jax.numpy as jnp
from jax.experimental import pallas as pl
from jax.experimental.pallas import tpu as pltpu


# ----------------------------------------------------------------------------
# shared math helpers (pure jnp -> usable in-kernel and in the reference)
# ----------------------------------------------------------------------------
def _gelu_tanh(x):
    c = 0.7978845608028654  # sqrt(2/pi)
    return 0.5 * x * (1.0 + jnp.tanh(c * (x + 0.044715 * x * x * x)))


def _silu(x):
    return x * jax.nn.sigmoid(x)


# ----------------------------------------------------------------------------
# fused EVCBlock kernel: one grid step == one batch element, all data (C, N)
# ----------------------------------------------------------------------------
def _evc_kernel(
    # activations ---------------------------------------------------------------
    x_ref,                                    # (C, H, W)  f32 raw NCHW slice
    # parameters (BN folded, channels-major, bf16 where they feed the MXU) -------
    w7_ref, b7_ref,                           # (C, 49*C) bf16 ; (C, 1)
    cbw1_ref, cbb1_ref,                       # (CE, C)  bf16 ; (CE, 1)
    cbw2_ref, cbb2_ref,                       # (CE, 9*CE) bf16 ; (CE, 1)
    cbw3_ref, cbb3_ref,                       # (C, CE)  bf16 ; (C, 1)
    cbwr_ref, cbbr_ref,                       # (C, C)   bf16 ; (C, 1)
    lvcw_ref, lvcb_ref,                       # (C, C)   bf16 ; (C, 1)
    cw_ref, cc_ref, esc_ref,                  # (K, C) f32 ; (K, 1) ; (K, 1)
    bn1ds_ref, bn1dt_ref,                     # (K, 1) ; (K, 1)
    fcw_ref, fcb_ref,                         # (C, C) f32 (Cout, Cin) ; (C, 1)
    gn1g_ref, gn1b_ref, gn2g_ref, gn2b_ref,   # (C, 1) each
    dws_ref, dwb_ref,                         # (C, 1) ; (C, 1)
    ls1_ref, ls2_ref,                         # (C, 1) ; (C, 1)
    mw1_ref, mb1_ref, mw2_ref, mb2_ref,       # (HID, C) bf16 ; (HID,1) ; (C,HID) bf16 ; (C,1)
    wa_ref, wb_ref, cnvb_ref,                 # (C, C) bf16 ; (C, C) bf16 ; (C, 1)
    # output ----------------------------------------------------------------------
    out_ref,                                  # (C, N)  channels-major == NCHW
    # scratch (flat "padded-width" halo buffers) ----------------------------------
    x7f_ref,                                  # (C,  (H+7)*(W+6)) f32  7x7 zero halo
    mpf_ref,                                  # (C,  (H+3)*(W+2)) f32  maxpool -inf halo
    cpf_ref,                                  # (CE, (H+3)*(W+2)) f32  3x3 zero halo
    *, H, W,
):
    f32 = jnp.float32
    bf16 = jnp.bfloat16
    C = x_ref.shape[0]
    CE = cbb1_ref.shape[0]
    N = H * W

    W7 = W + 6               # padded row width for the 7x7 conv
    L7 = H * W7              # flat conv-output length (garbage cols j>=W discarded)
    W1 = W + 2               # padded row width for 3x3 windows (maxpool / conv2)
    L1 = H * W1

    # ===== stem: 7x7 conv (flattened zero-halo im2col, ONE K=49*C matmul) ========
    # A single bulk zero of the small flat scratch stands in for the frame-only
    # init (one unmasked store; the interior rewrite is < 16 KiB).
    x7f_ref[...] = jnp.zeros(x7f_ref.shape, f32)
    for i in range(H):
        x7f_ref[:, pl.ds((3 + i) * W7 + 3, W)] = x_ref[:, i, :]
    x7f = x7f_ref[...].astype(bf16)
    col7 = jnp.concatenate(
        [x7f[:, dy * W7 + dx: dy * W7 + dx + L7] for dy in range(7) for dx in range(7)],
        axis=0)                                                       # (49*C, L7)
    y7 = jnp.dot(w7_ref[...], col7, preferred_element_type=f32)       # (C, L7)
    y7 = jnp.maximum(y7 + b7_ref[...], 0.0)                           # folded BN + ReLU

    # ===== maxpool 3x3 s1 p1 (-inf halo, same flattened-width trick) =============
    mpf_ref[...] = jnp.full(mpf_ref.shape, -jnp.inf, f32)
    for i in range(H):
        mpf_ref[:, pl.ds((1 + i) * W1 + 1, W)] = y7[:, i * W7: i * W7 + W]
    mpf = mpf_ref[...]
    r = mpf[:, 0:L1]
    for dy in range(3):
        for dx in range(3):
            if dy == 0 and dx == 0:
                continue
            o = dy * W1 + dx
            r = jnp.maximum(r, mpf[:, o: o + L1])
    x1 = jnp.concatenate([r[:, i * W1: i * W1 + W] for i in range(H)], axis=1)  # (C, N)
    x1b = x1.astype(bf16)

    # ===== LVC branch: ConvBlock (1x1 -> 3x3 -> 1x1, + 1x1 residual) =============
    h1 = jnp.maximum(jnp.dot(cbw1_ref[...], x1b, preferred_element_type=f32)
                     + cbb1_ref[...], 0.0)                            # (CE, N)
    cpf_ref[...] = jnp.zeros(cpf_ref.shape, f32)
    for i in range(H):
        cpf_ref[:, pl.ds((1 + i) * W1 + 1, W)] = h1[:, i * W: i * W + W]
    cpf = cpf_ref[...].astype(bf16)
    col3 = jnp.concatenate(
        [cpf[:, dy * W1 + dx: dy * W1 + dx + L1] for dy in range(3) for dx in range(3)],
        axis=0)                                                       # (9*CE, L1)
    h2p = jnp.dot(cbw2_ref[...], col3, preferred_element_type=f32)    # (CE, L1)
    h2p = jnp.maximum(h2p + cbb2_ref[...], 0.0)
    h2 = jnp.concatenate([h2p[:, i * W1: i * W1 + W] for i in range(H)], axis=1)  # (CE, N)
    main = jnp.dot(cbw3_ref[...], h2.astype(bf16), preferred_element_type=f32) + cbb3_ref[...]
    res = jnp.dot(cbwr_ref[...], x1b, preferred_element_type=f32) + cbbr_ref[...]
    xcb = jnp.maximum(main + res, 0.0)                                # (C, N)

    # ===== LVC: 1x1 conv+BN+ReLU, Encoding, BN1d+ReLU+Mean, fc channel gate ======
    z = jnp.maximum(jnp.dot(lvcw_ref[...], xcb.astype(bf16), preferred_element_type=f32)
                    + lvcb_ref[...], 0.0)                             # (C, N)
    cw = cw_ref[...]                                                  # (K, C) f32
    zz = jnp.sum(z * z, axis=0, keepdims=True)                        # (1, N)
    zc = jnp.dot(cw, z, preferred_element_type=f32)                   # (K, N)
    sl2 = esc_ref[...] * (zz - 2.0 * zc + cc_ref[...])                # scaled L2  (K, N)
    m = jnp.max(sl2, axis=0, keepdims=True)
    e = jnp.exp(sl2 - m)
    aw = e / jnp.sum(e, axis=0, keepdims=True)                        # softmax over codes
    wx = jax.lax.dot_general(aw, z, (((1,), (1,)), ((), ())),
                             preferred_element_type=f32)              # (K, C), K-contract = N
    wsum = jnp.sum(aw, axis=1, keepdims=True)                         # (K, 1)
    enc = jnp.maximum(bn1ds_ref[...] * (wx - wsum * cw) + bn1dt_ref[...], 0.0)   # (K, C)
    # fc gate computed directly as a (C, 1) column (no transpose needed):
    # gam[o] = sigmoid( mean_k sum_i fcwT[o,i]*enc[k,i] + fcb[o] )
    tmp = jax.lax.dot_general(fcw_ref[...], enc, (((1,), (1,)), ((), ())),
                              preferred_element_type=f32)             # (C, K)
    gam = jax.nn.sigmoid(jnp.mean(tmp, axis=1, keepdims=True) + fcb_ref[...])     # (C, 1)
    x_lvc = jnp.maximum(xcb + xcb * gam, 0.0)                         # (C, N)

    # ===== LightMLP branch (GroupNorm(1,C) == LayerNorm over the whole sample) ===
    mu1 = jnp.mean(x1, keepdims=True)
    v1 = jnp.mean((x1 - mu1) ** 2, keepdims=True)
    xn1 = (x1 - mu1) * jax.lax.rsqrt(v1 + 1e-5) * gn1g_ref[...] + gn1b_ref[...]
    # DWConv(k=1, groups=C) + BN + SiLU  ==  per-channel scale/shift + SiLU
    zdw = _silu(xn1 * dws_ref[...] + dwb_ref[...])
    x_a = x1 + ls1_ref[...] * zdw

    mu2 = jnp.mean(x_a, keepdims=True)
    v2 = jnp.mean((x_a - mu2) ** 2, keepdims=True)
    xn2 = (x_a - mu2) * jax.lax.rsqrt(v2 + 1e-5) * gn2g_ref[...] + gn2b_ref[...]
    hmid = _gelu_tanh(jnp.dot(mw1_ref[...], xn2.astype(bf16), preferred_element_type=f32)
                      + mb1_ref[...])                                 # (HID, N)
    mo = jnp.dot(mw2_ref[...], hmid.astype(bf16), preferred_element_type=f32) + mb2_ref[...]
    x_lmlp = x_a + ls2_ref[...] * mo                                  # (C, N)

    # ===== concat + cnv1 (split weight -> no concatenate, result already (C,N)) ==
    out = (jnp.dot(wa_ref[...], x_lvc.astype(bf16), preferred_element_type=f32)
           + jnp.dot(wb_ref[...], x_lmlp.astype(bf16), preferred_element_type=f32)
           + cnvb_ref[...])
    out_ref[...] = out.astype(out_ref.dtype)


# ----------------------------------------------------------------------------
# parameter construction and inference-mode BN folding (channels-major layout)
# ----------------------------------------------------------------------------
def bn_fold(gamma, beta, mean, var, eps):
    s = gamma / jnp.sqrt(var + eps)
    return s, beta - mean * s


def make_params(key, c1, c2):
    ks = iter(jax.random.split(key, 100))

    def rnd(shape, scale=0.1):
        return scale * jax.random.normal(next(ks), shape, jnp.float32)

    def bn(n):
        return dict(
            gamma=1.0 + 0.1 * jax.random.normal(next(ks), (n,), jnp.float32),
            beta=0.05 * jax.random.normal(next(ks), (n,), jnp.float32),
            mean=0.05 * jax.random.normal(next(ks), (n,), jnp.float32),
            var=jnp.abs(1.0 + 0.1 * jax.random.normal(next(ks), (n,), jnp.float32)),
        )

    cexp = c2 // 4            # ConvBlock bottleneck (expansion = 4)
    hidden = int(c1 * 4.0)    # MLP hidden (mlp_ratio = 4)
    K = 64                    # num_codes (hard-coded to 64 in the module)
    std_cw = 1.0 / (K * c1) ** 0.5

    return dict(
        w_conv1=rnd((7, 7, c1, c1), 0.05), bn1=bn(c1),
        cb_w1=rnd((c1, cexp), 0.2), cb_bn1=bn(cexp),
        cb_w2=rnd((3, 3, cexp, cexp), 0.2), cb_bn2=bn(cexp),
        cb_w3=rnd((cexp, c2), 0.2), cb_bn3=bn(c2),
        cb_wres=rnd((c1, c2), 0.2), cb_bnres=bn(c2),
        lvc_w=rnd((c1, c1), 0.2), lvc_bn=bn(c1),
        codewords=jax.random.uniform(next(ks), (K, c1), jnp.float32, -std_cw, std_cw),
        enc_scale=jax.random.uniform(next(ks), (K,), jnp.float32, -1.0, 0.0),
        bn1d=bn(K),
        fc_w=rnd((c1, c1), 0.2), fc_b=rnd((c1,), 0.1),
        gn1_g=1.0 + 0.1 * jax.random.normal(next(ks), (c1,), jnp.float32),
        gn1_b=0.05 * jax.random.normal(next(ks), (c1,), jnp.float32),
        gn2_g=1.0 + 0.1 * jax.random.normal(next(ks), (c1,), jnp.float32),
        gn2_b=0.05 * jax.random.normal(next(ks), (c1,), jnp.float32),
        dw_w=rnd((c2,), 0.3), dw_bn=bn(c2),          # DWConv k=1 groups=c => per-channel scale
        mlp_w1=rnd((c1, hidden), 0.1), mlp_b1=rnd((hidden,), 0.05),
        mlp_w2=rnd((hidden, c1), 0.1), mlp_b2=rnd((c1,), 0.05),
        ls1=jnp.full((c2,), 1e-5, jnp.float32),
        ls2=jnp.full((c2,), 1e-5, jnp.float32),
        cnv1_w=rnd((2 * c2, c2), 0.2), cnv1_b=rnd((c2,), 0.05),
    )


_PARAM_ORDER = (
    "w7", "b7", "cbw1", "cbb1", "cbw2", "cbb2", "cbw3", "cbb3", "cbwr", "cbbr",
    "lvcw", "lvcb", "cw", "cc", "esc", "bn1ds", "bn1dt", "fcw", "fcb",
    "gn1g", "gn1b", "gn2g", "gn2b", "dws", "dwb", "ls1", "ls2",
    "mw1", "mb1", "mw2", "mb2", "wa", "wb", "cnvb",
)


def fold_params(p, c1, c2):
    """Fold inference BatchNorms, transpose everything to (Cout, Cin) channels-major,
    reshape conv weights for tap-fused im2col, pre-cast MXU weights to bf16."""
    bf16 = jnp.bfloat16
    f32 = jnp.float32
    K = p["codewords"].shape[0]
    cexp = c2 // 4
    col = lambda v: v.reshape(-1, 1).astype(f32)
    cm = lambda w_io: jnp.transpose(w_io, (1, 0)).astype(bf16)     # (Cin,Cout)->(Cout,Cin)

    f = {}
    # stem conv 7x7 + BN (eps 1e-5) -> (Cout, 49*Cin), tap-major columns
    s, t = bn_fold(**p["bn1"], eps=1e-5)
    w7 = p["w_conv1"] * s[None, None, None, :]
    f["w7"] = jnp.transpose(w7, (3, 0, 1, 2)).reshape(c1, 49 * c1).astype(bf16)
    f["b7"] = col(t)
    # ConvBlock BNs use eps 1e-6
    s, t = bn_fold(**p["cb_bn1"], eps=1e-6)
    f["cbw1"] = cm(p["cb_w1"] * s[None, :]); f["cbb1"] = col(t)
    s, t = bn_fold(**p["cb_bn2"], eps=1e-6)
    w2 = p["cb_w2"] * s[None, None, None, :]
    f["cbw2"] = jnp.transpose(w2, (3, 0, 1, 2)).reshape(cexp, 9 * cexp).astype(bf16)
    f["cbb2"] = col(t)
    s, t = bn_fold(**p["cb_bn3"], eps=1e-6)
    f["cbw3"] = cm(p["cb_w3"] * s[None, :]); f["cbb3"] = col(t)
    s, t = bn_fold(**p["cb_bnres"], eps=1e-6)
    f["cbwr"] = cm(p["cb_wres"] * s[None, :]); f["cbbr"] = col(t)
    # LVC 1x1 + BN (eps 1e-5)
    s, t = bn_fold(**p["lvc_bn"], eps=1e-5)
    f["lvcw"] = cm(p["lvc_w"] * s[None, :]); f["lvcb"] = col(t)
    # Encoding (f32 for the distance/softmax path)
    f["cw"] = p["codewords"].astype(f32)
    f["cc"] = jnp.sum(p["codewords"] ** 2, axis=1, keepdims=True).astype(f32)
    f["esc"] = p["enc_scale"].reshape(K, 1).astype(f32)
    s, t = bn_fold(**p["bn1d"], eps=1e-5)
    f["bn1ds"] = s.reshape(K, 1).astype(f32); f["bn1dt"] = t.reshape(K, 1).astype(f32)
    # fc (Linear + Sigmoid): stored transposed (Cout, Cin) for the column-gate dot
    f["fcw"] = jnp.transpose(p["fc_w"], (1, 0)).astype(f32)
    f["fcb"] = col(p["fc_b"])
    # LightMLP
    f["gn1g"] = col(p["gn1_g"]); f["gn1b"] = col(p["gn1_b"])
    f["gn2g"] = col(p["gn2_g"]); f["gn2b"] = col(p["gn2_b"])
    s, t = bn_fold(**p["dw_bn"], eps=1e-5)
    f["dws"] = col(p["dw_w"] * s); f["dwb"] = col(t)
    f["ls1"] = col(p["ls1"]); f["ls2"] = col(p["ls2"])
    f["mw1"] = cm(p["mlp_w1"]); f["mb1"] = col(p["mlp_b1"])
    f["mw2"] = cm(p["mlp_w2"]); f["mb2"] = col(p["mlp_b2"])
    # final 1x1 conv: split the (2*c2, c2) weight -> no concat needed in-kernel
    f["wa"] = cm(p["cnv1_w"][:c2]); f["wb"] = cm(p["cnv1_w"][c2:])
    f["cnvb"] = col(p["cnv1_b"])
    return f


# ----------------------------------------------------------------------------
# wrapper
# ----------------------------------------------------------------------------
def evc_block_forward(x_nchw, folded, *, c1, c2):
    assert c1 == c2, "EVCBlock's forward is only well-formed for c1 == c2"
    B, _, H, W = x_nchw.shape
    N = H * W
    cexp = c2 // 4
    K = folded["cw"].shape[0]
    hid = folded["mw1"].shape[0]

    weights = [folded[k] for k in _PARAM_ORDER]

    def _const_spec(a):
        nd = a.ndim
        return pl.BlockSpec(a.shape, lambda b, _n=nd: (0,) * _n)

    # raw NCHW goes straight in: no wrapper transpose, no wrapper pad
    in_specs = [pl.BlockSpec((None, c1, H, W), lambda b: (b, 0, 0, 0))]
    in_specs += [_const_spec(a) for a in weights]

    flops = 2 * B * (
        c1 * 49 * c1 * H * (W + 6)                 # stem 7x7 (im2col)
        + cexp * c1 * N                            # ConvBlock 1x1 reduce
        + cexp * 9 * cexp * H * (W + 2)            # ConvBlock 3x3 (im2col)
        + c1 * cexp * N + c1 * c1 * N              # ConvBlock expand + residual
        + c1 * c1 * N                              # LVC 1x1
        + 2 * K * c1 * N                           # Encoding distance + aggregation
        + 2 * hid * c1 * N                         # MLP fc1 + fc2
        + 2 * c1 * c1 * N                          # final split 1x1
    )
    transcendentals = B * (K * N + 3 * c1 * N + hid * N)
    bytes_accessed = int(B * c1 * N * 4 + B * c2 * N * 4
                         + sum(int(w.size) * w.dtype.itemsize for w in weights))

    out = pl.pallas_call(
        functools.partial(_evc_kernel, H=H, W=W),
        grid=(B,),
        in_specs=in_specs,
        out_specs=pl.BlockSpec((None, c2, N), lambda b: (b, 0, 0)),
        out_shape=jax.ShapeDtypeStruct((B, c2, N), jnp.float32),
        scratch_shapes=[
            pltpu.VMEM((c1, (H + 7) * (W + 6)), jnp.float32),    # 7x7 zero halo (flat)
            pltpu.VMEM((c1, (H + 3) * (W + 2)), jnp.float32),    # maxpool -inf halo (flat)
            pltpu.VMEM((cexp, (H + 3) * (W + 2)), jnp.float32),  # 3x3 zero halo (flat)
        ],
        compiler_params=pltpu.CompilerParams(
            dimension_semantics=("parallel",),
            vmem_limit_bytes=64 * 1024 * 1024,
        ),
        cost_estimate=pl.CostEstimate(flops=int(flops),
                                      transcendentals=int(transcendentals),
                                      bytes_accessed=bytes_accessed),
    )(x_nchw.astype(jnp.float32), *weights)

    # channels-major output is already NCHW; this reshape is metadata-only.
    return out.reshape(B, c2, H, W)


# ----------------------------------------------------------------------------
# pure-JAX reference (same folded channels-major params, same bf16 MXU policy)
# ----------------------------------------------------------------------------
def evc_reference(x_nchw, f, *, c1, c2):
    B, _, H, W = x_nchw.shape
    N = H * W
    CE = c2 // 4
    f32 = jnp.float32
    hi = jax.lax.Precision.HIGHEST
    q = lambda a: a.astype(jnp.bfloat16).astype(f32)

    x = x_nchw.astype(f32)                                           # (B, C, H, W)

    def conv_cm(xb, w_cm, b_col, k, pad):
        cin = xb.shape[1]
        xp = jnp.pad(xb, ((0, 0), (0, 0), (pad, pad), (pad, pad)))
        cols = [xp[:, :, dy:dy + H, dx:dx + W].reshape(B, cin, N)
                for dy in range(k) for dx in range(k)]
        colm = jnp.concatenate(cols, axis=1)                         # (B, k*k*cin, N)
        y = jnp.einsum("oc,bcn->bon", q(w_cm.astype(f32)), q(colm), precision=hi)
        return y + b_col[None]

    mm = lambda w, v: jnp.einsum("oc,bcn->bon", q(w.astype(f32)), q(v), precision=hi)

    # stem + maxpool
    y = jnp.maximum(conv_cm(x, f["w7"], f["b7"], 7, 3), 0.0).reshape(B, c1, H, W)
    yp = jnp.pad(y, ((0, 0), (0, 0), (1, 1), (1, 1)), constant_values=-jnp.inf)
    x1 = yp[:, :, 0:H, 0:W]
    for dy in range(3):
        for dx in range(3):
            x1 = jnp.maximum(x1, yp[:, :, dy:dy + H, dx:dx + W])
    x1 = x1.reshape(B, c1, N)

    # ConvBlock
    h1 = jnp.maximum(mm(f["cbw1"], x1) + f["cbb1"][None], 0.0)
    h2 = jnp.maximum(conv_cm(h1.reshape(B, CE, H, W), f["cbw2"], f["cbb2"], 3, 1), 0.0)
    xcb = jnp.maximum(mm(f["cbw3"], h2) + f["cbb3"][None]
                      + mm(f["cbwr"], x1) + f["cbbr"][None], 0.0)

    # LVC / Encoding
    z = jnp.maximum(mm(f["lvcw"], xcb) + f["lvcb"][None], 0.0)       # (B, C, N)
    cw = f["cw"]
    zz = jnp.sum(z * z, axis=1, keepdims=True)
    zc = jnp.einsum("kc,bcn->bkn", cw, z, precision=hi)
    sl2 = f["esc"][None] * (zz - 2.0 * zc + f["cc"][None])
    aw = jax.nn.softmax(sl2, axis=1)
    wx = jnp.einsum("bkn,bcn->bkc", aw, z, precision=hi)
    wsum = jnp.sum(aw, axis=2)
    enc = jnp.maximum(f["bn1ds"][None] * (wx - wsum[:, :, None] * cw[None])
                      + f["bn1dt"][None], 0.0)
    tmp = jnp.einsum("oi,bki->bok", f["fcw"], enc, precision=hi)     # (B, C, K)
    gam = jax.nn.sigmoid(jnp.mean(tmp, axis=2, keepdims=True) + f["fcb"][None])
    x_lvc = jnp.maximum(xcb + xcb * gam, 0.0)

    # LightMLP
    def gnorm(v, g, b):
        mu = jnp.mean(v, axis=(1, 2), keepdims=True)
        var = jnp.mean((v - mu) ** 2, axis=(1, 2), keepdims=True)
        return (v - mu) * jax.lax.rsqrt(var + 1e-5) * g[None] + b[None]

    xn1 = gnorm(x1, f["gn1g"], f["gn1b"])
    zdw = _silu(xn1 * f["dws"][None] + f["dwb"][None])
    x_a = x1 + f["ls1"][None] * zdw
    xn2 = gnorm(x_a, f["gn2g"], f["gn2b"])
    hmid = _gelu_tanh(mm(f["mw1"], xn2) + f["mb1"][None])
    mo = mm(f["mw2"], hmid) + f["mb2"][None]
    x_lmlp = x_a + f["ls2"][None] * mo

    out = mm(f["wa"], x_lvc) + mm(f["wb"], x_lmlp) + f["cnvb"][None]
    return out.reshape(B, c2, H, W)


# ----------------------------------------------------------------------------
if __name__ == "__main__":
    c1 = c2 = 16          # EVCBlock requires c1 == c2 for its forward to be well-formed
    B, H, W = 2, 16, 16

    key = jax.random.PRNGKey(0)
    kx, kp = jax.random.split(key)
    x = jax.random.normal(kx, (B, c1, H, W), jnp.float32)
    params = make_params(kp, c1, c2)
    folded = fold_params(params, c1, c2)

    fwd = jax.jit(functools.partial(evc_block_forward, c1=c1, c2=c2))
    out = fwd(x, folded)
    jax.block_until_ready(out)
    assert out.shape == (B, c2, H, W) and out.dtype == jnp.float32

    # correctness check vs. a pure-JAX reference using the same folded params and
    # the same bf16-operand policy (tolerance covers accumulation-order and matmul
    # precision-mode differences between Mosaic and XLA).
    ref = evc_reference(x, folded, c1=c1, c2=c2)
    err = float(jnp.max(jnp.abs(out - ref)))
    scale = float(jnp.max(jnp.abs(ref)))
    assert err <= 0.05 * scale + 0.05, f"mismatch: max|diff|={err}, scale={scale}"

    print("KERNEL_OK")
</pallas_src>

<mosaic_0001>
module attributes {stable_mosaic.version = 11 : i64} {
  func.func @_evc_kernel(%arg0: i32, %arg1: memref<1x16x16x16xf32, #tpu.memory_space<vmem>>, %arg2: memref<16x784xbf16, #tpu.memory_space<vmem>>, %arg3: memref<16x1xf32, #tpu.memory_space<vmem>>, %arg4: memref<4x16xbf16, #tpu.memory_space<vmem>>, %arg5: memref<4x1xf32, #tpu.memory_space<vmem>>, %arg6: memref<4x36xbf16, #tpu.memory_space<vmem>>, %arg7: memref<4x1xf32, #tpu.memory_space<vmem>>, %arg8: memref<16x4xbf16, #tpu.memory_space<vmem>>, %arg9: memref<16x1xf32, #tpu.memory_space<vmem>>, %arg10: memref<16x16xbf16, #tpu.memory_space<vmem>>, %arg11: memref<16x1xf32, #tpu.memory_space<vmem>>, %arg12: memref<16x16xbf16, #tpu.memory_space<vmem>>, %arg13: memref<16x1xf32, #tpu.memory_space<vmem>>, %arg14: memref<64x16xf32, #tpu.memory_space<vmem>>, %arg15: memref<64x1xf32, #tpu.memory_space<vmem>>, %arg16: memref<64x1xf32, #tpu.memory_space<vmem>>, %arg17: memref<64x1xf32, #tpu.memory_space<vmem>>, %arg18: memref<64x1xf32, #tpu.memory_space<vmem>>, %arg19: memref<16x16xf32, #tpu.memory_space<vmem>>, %arg20: memref<16x1xf32, #tpu.memory_space<vmem>>, %arg21: memref<16x1xf32, #tpu.memory_space<vmem>>, %arg22: memref<16x1xf32, #tpu.memory_space<vmem>>, %arg23: memref<16x1xf32, #tpu.memory_space<vmem>>, %arg24: memref<16x1xf32, #tpu.memory_space<vmem>>, %arg25: memref<16x1xf32, #tpu.memory_space<vmem>>, %arg26: memref<16x1xf32, #tpu.memory_space<vmem>>, %arg27: memref<16x1xf32, #tpu.memory_space<vmem>>, %arg28: memref<16x1xf32, #tpu.memory_space<vmem>>, %arg29: memref<64x16xbf16, #tpu.memory_space<vmem>>, %arg30: memref<64x1xf32, #tpu.memory_space<vmem>>, %arg31: memref<16x64xbf16, #tpu.memory_space<vmem>>, %arg32: memref<16x1xf32, #tpu.memory_space<vmem>>, %arg33: memref<16x16xbf16, #tpu.memory_space<vmem>>, %arg34: memref<16x16xbf16, #tpu.memory_space<vmem>>, %arg35: memref<16x1xf32, #tpu.memory_space<vmem>>, %arg36: memref<1x16x256xf32, #tpu.memory_space<vmem>>, %arg37: memref<16x506xf32, #tpu.memory_space<vmem>>, %arg38: memref<16x342xf32, #tpu.memory_space<vmem>>, %arg39: memref<4x342xf32, #tpu.memory_space<vmem>>) attributes {dimension_semantics = [#tpu.dimension_semantics<parallel>], iteration_bounds = array<i64: 2>, scalar_prefetch = 0 : i64, scratch_operands = 3 : i64, tpu.core_type = #tpu.core_type<tc>, window_params = [{transform_indices = @transform_0, window_bounds = array<i64: 1, 16, 16, 16>}, {pipeline_mode = #tpu.pipeline_mode<synchronous>, transform_indices = @transform_1, window_bounds = array<i64: 16, 784>}, {pipeline_mode = #tpu.pipeline_mode<synchronous>, transform_indices = @transform_2, window_bounds = array<i64: 16, 1>}, {pipeline_mode = #tpu.pipeline_mode<synchronous>, transform_indices = @transform_3, window_bounds = array<i64: 4, 16>}, {pipeline_mode = #tpu.pipeline_mode<synchronous>, transform_indices = @transform_4, window_bounds = array<i64: 4, 1>}, {pipeline_mode = #tpu.pipeline_mode<synchronous>, transform_indices = @transform_5, window_bounds = array<i64: 4, 36>}, {pipeline_mode = #tpu.pipeline_mode<synchronous>, transform_indices = @transform_6, window_bounds = array<i64: 4, 1>}, {pipeline_mode = #tpu.pipeline_mode<synchronous>, transform_indices = @transform_7, window_bounds = array<i64: 16, 4>}, {pipeline_mode = #tpu.pipeline_mode<synchronous>, transform_indices = @transform_8, window_bounds = array<i64: 16, 1>}, {pipeline_mode = #tpu.pipeline_mode<synchronous>, transform_indices = @transform_9, window_bounds = array<i64: 16, 16>}, {pipeline_mode = #tpu.pipeline_mode<synchronous>, transform_indices = @transform_10, window_bounds = array<i64: 16, 1>}, {pipeline_mode = #tpu.pipeline_mode<synchronous>, transform_indices = @transform_11, window_bounds = array<i64: 16, 16>}, {pipeline_mode = #tpu.pipeline_mode<synchronous>, transform_indices = @transform_12, window_bounds = array<i64: 16, 1>}, {pipeline_mode = #tpu.pipeline_mode<synchronous>, transform_indices = @transform_13, window_bounds = array<i64: 64, 16>}, {pipeline_mode = #tpu.pipeline_mode<synchronous>, transform_indices = @transform_14, window_bounds = array<i64: 64, 1>}, {pipeline_mode = #tpu.pipeline_mode<synchronous>, transform_indices = @transform_15, window_bounds = array<i64: 64, 1>}, {pipeline_mode = #tpu.pipeline_mode<synchronous>, transform_indices = @transform_16, window_bounds = array<i64: 64, 1>}, {pipeline_mode = #tpu.pipeline_mode<synchronous>, transform_indices = @transform_17, window_bounds = array<i64: 64, 1>}, {pipeline_mode = #tpu.pipeline_mode<synchronous>, transform_indices = @transform_18, window_bounds = array<i64: 16, 16>}, {pipeline_mode = #tpu.pipeline_mode<synchronous>, transform_indices = @transform_19, window_bounds = array<i64: 16, 1>}, {pipeline_mode = #tpu.pipeline_mode<synchronous>, transform_indices = @transform_20, window_bounds = array<i64: 16, 1>}, {pipeline_mode = #tpu.pipeline_mode<synchronous>, transform_indices = @transform_21, window_bounds = array<i64: 16, 1>}, {pipeline_mode = #tpu.pipeline_mode<synchronous>, transform_indices = @transform_22, window_bounds = array<i64: 16, 1>}, {pipeline_mode = #tpu.pipeline_mode<synchronous>, transform_indices = @transform_23, window_bounds = array<i64: 16, 1>}, {pipeline_mode = #tpu.pipeline_mode<synchronous>, transform_indices = @transform_24, window_bounds = array<i64: 16, 1>}, {pipeline_mode = #tpu.pipeline_mode<synchronous>, transform_indices = @transform_25, window_bounds = array<i64: 16, 1>}, {pipeline_mode = #tpu.pipeline_mode<synchronous>, transform_indices = @transform_26, window_bounds = array<i64: 16, 1>}, {pipeline_mode = #tpu.pipeline_mode<synchronous>, transform_indices = @transform_27, window_bounds = array<i64: 16, 1>}, {pipeline_mode = #tpu.pipeline_mode<synchronous>, transform_indices = @transform_28, window_bounds = array<i64: 64, 16>}, {pipeline_mode = #tpu.pipeline_mode<synchronous>, transform_indices = @transform_29, window_bounds = array<i64: 64, 1>}, {pipeline_mode = #tpu.pipeline_mode<synchronous>, transform_indices = @transform_30, window_bounds = array<i64: 16, 64>}, {pipeline_mode = #tpu.pipeline_mode<synchronous>, transform_indices = @transform_31, window_bounds = array<i64: 16, 1>}, {pipeline_mode = #tpu.pipeline_mode<synchronous>, transform_indices = @transform_32, window_bounds = array<i64: 16, 16>}, {pipeline_mode = #tpu.pipeline_mode<synchronous>, transform_indices = @transform_33, window_bounds = array<i64: 16, 16>}, {pipeline_mode = #tpu.pipeline_mode<synchronous>, transform_indices = @transform_34, window_bounds = array<i64: 16, 1>}, {transform_indices = @transform_35, window_bounds = array<i64: 1, 16, 256>}]} {
    %cst = arith.constant 0.000000e+00 : f32
    %0 = vector.broadcast %cst : f32 to vector<16x506xf32>
    %c0 = arith.constant 0 : index
    %c0_0 = arith.constant 0 : index
    %1 = vector.load %arg37[%c0, %c0_0] : memref<16x506xf32, #tpu.memory_space<vmem>>, vector<16x506xf32>
    tpu.vector_store %arg37[%c0, %c0_0], %0 {strides = array<i32>} : memref<16x506xf32, #tpu.memory_space<vmem>>, vector<16x506xf32>,
    %c0_1 = arith.constant 0 : index
    %c0_2 = arith.constant 0 : index
    %c0_3 = arith.constant 0 : index
    %c0_4 = arith.constant 0 : index
    %2 = vector.load %arg1[%c0_1, %c0_2, %c0_3, %c0_4] : memref<1x16x16x16xf32, #tpu.memory_space<vmem>>, vector<1x16x1x16xf32>
    %3 = vector.shape_cast %2 : vector<1x16x1x16xf32> to vector<16x16xf32>
    %c0_5 = arith.constant 0 : index
    %c69 = arith.constant 69 : index
    %4 = vector.load %arg37[%c0_5, %c69] : memref<16x506xf32, #tpu.memory_space<vmem>>, vector<16x16xf32>
    tpu.vector_store %arg37[%c0_5, %c69], %3 {strides = array<i32>} : memref<16x506xf32, #tpu.memory_space<vmem>>, vector<16x16xf32>,
    %c0_6 = arith.constant 0 : index
    %c0_7 = arith.constant 0 : index
    %c1 = arith.constant 1 : index
    %c0_8 = arith.constant 0 : index
    %5 = vector.load %arg1[%c0_6, %c0_7, %c1, %c0_8] : memref<1x16x16x16xf32, #tpu.memory_space<vmem>>, vector<1x16x1x16xf32>
    %6 = vector.shape_cast %5 : vector<1x16x1x16xf32> to vector<16x16xf32>
    %c0_9 = arith.constant 0 : index
    %c91 = arith.constant 91 : index
    %7 = vector.load %arg37[%c0_9, %c91] : memref<16x506xf32, #tpu.memory_space<vmem>>, vector<16x16xf32>
    tpu.vector_store %arg37[%c0_9, %c91], %6 {strides = array<i32>} : memref<16x506xf32, #tpu.memory_space<vmem>>, vector<16x16xf32>,
    %c0_10 = arith.constant 0 : index
    %c0_11 = arith.constant 0 : index
    %c2 = arith.constant 2 : index
    %c0_12 = arith.constant 0 : index
    %8 = vector.load %arg1[%c0_10, %c0_11, %c2, %c0_12] : memref<1x16x16x16xf32, #tpu.memory_space<vmem>>, vector<1x16x1x16xf32>
    %9 = vector.shape_cast %8 : vector<1x16x1x16xf32> to vector<16x16xf32>
    %c0_13 = arith.constant 0 : index
    %c113 = arith.constant 113 : index
    %10 = vector.load %arg37[%c0_13, %c113] : memref<16x506xf32, #tpu.memory_space<vmem>>, vector<16x16xf32>
    tpu.vector_store %arg37[%c0_13, %c113], %9 {strides = array<i32>} : memref<16x506xf32, #tpu.memory_space<vmem>>, vector<16x16xf32>,
    %c0_14 = arith.constant 0 : index
    %c0_15 = arith.constant 0 : index
    %c3 = arith.constant 3 : index
    %c0_16 = arith.constant 0 : index
    %11 = vector.load %arg1[%c0_14, %c0_15, %c3, %c0_16] : memref<1x16x16x16xf32, #tpu.memory_space<vmem>>, vector<1x16x1x16xf32>
    %12 = vector.shape_cast %11 : vector<1x16x1x16xf32> to vector<16x16xf32>
    %c0_17 = arith.constant 0 : index
    %c135 = arith.constant 135 : index
    %13 = vector.load %arg37[%c0_17, %c135] : memref<16x506xf32, #tpu.memory_space<vmem>>, vector<16x16xf32>
    tpu.vector_store %arg37[%c0_17, %c135], %12 {strides = array<i32>} : memref<16x506xf32, #tpu.memory_space<vmem>>, vector<16x16xf32>,
    %c0_18 = arith.constant 0 : index
    %c0_19 = arith.constant 0 : index
    %c4 = arith.constant 4 : index
    %c0_20 = arith.constant 0 : index
    %14 = vector.load %arg1[%c0_18, %c0_19, %c4, %c0_20] : memref<1x16x16x16xf32, #tpu.memory_space<vmem>>, vector<1x16x1x16xf32>
    %15 = vector.shape_cast %14 : vector<1x16x1x16xf32> to vector<16x16xf32>
    %c0_21 = arith.constant 0 : index
    %c157 = arith.constant 157 : index
    %16 = vector.load %arg37[%c0_21, %c157] : memref<16x506xf32, #tpu.memory_space<vmem>>, vector<16x16xf32>
    tpu.vector_store %arg37[%c0_21, %c157], %15 {strides = array<i32>} : memref<16x506xf32, #tpu.memory_space<vmem>>, vector<16x16xf32>,
    %c0_22 = arith.constant 0 : index
    %c0_23 = arith.constant 0 : index
    %c5 = arith.constant 5 : index
    %c0_24 = arith.constant 0 : index
    %17 = vector.load %arg1[%c0_22, %c0_23, %c5, %c0_24] : memref<1x16x16x16xf32, #tpu.memory_space<vmem>>, vector<1x16x1x16xf32>
    %18 = vector.shape_cast %17 : vector<1x16x1x16xf32> to vector<16x16xf32>
    %c0_25 = arith.constant 0 : index
    %c179 = arith.constant 179 : index
    %19 = vector.load %arg37[%c0_25, %c179] : memref<16x506xf32, #tpu.memory_space<vmem>>, vector<16x16xf32>
    tpu.vector_store %arg37[%c0_25, %c179], %18 {strides = array<i32>} : memref<16x506xf32, #tpu.memory_space<vmem>>, vector<16x16xf32>,
    %c0_26 = arith.constant 0 : index
    %c0_27 = arith.constant 0 : index
    %c6 = arith.constant 6 : index
    %c0_28 = arith.constant 0 : index
    %20 = vector.load %arg1[%c0_26, %c0_27, %c6, %c0_28] : memref<1x16x16x16xf32, #tpu.memory_space<vmem>>, vector<1x16x1x16xf32>
    %21 = vector.shape_cast %20 : vector<1x16x1x16xf32> to vector<16x16xf32>
    %c0_29 = arith.constant 0 : index
    %c201 = arith.constant 201 : index
    %22 = vector.load %arg37[%c0_29, %c201] : memref<16x506xf32, #tpu.memory_space<vmem>>, vector<16x16xf32>
    tpu.vector_store %arg37[%c0_29, %c201], %21 {strides = array<i32>} : memref<16x506xf32, #tpu.memory_space<vmem>>, vector<16x16xf32>,
    %c0_30 = arith.constant 0 : index
    %c0_31 = arith.constant 0 : index
    %c7 = arith.constant 7 : index
    %c0_32 = arith.constant 0 : index
    %23 = vector.load %arg1[%c0_30, %c0_31, %c7, %c0_32] : memref<1x16x16x16xf32, #tpu.memory_space<vmem>>, vector<1x16x1x16xf32>
    %24 = vector.shape_cast %23 : vector<1x16x1x16xf32> to vector<16x16xf32>
    %c0_33 = arith.constant 0 : index
    %c223 = arith.constant 223 : index
    %25 = vector.load %arg37[%c0_33, %c223] : memref<16x506xf32, #tpu.memory_space<vmem>>, vector<16x16xf32>
    tpu.vector_store %arg37[%c0_33, %c223], %24 {strides = array<i32>} : memref<16x506xf32, #tpu.memory_space<vmem>>, vector<16x16xf32>,
    %c0_34 = arith.constant 0 : index
    %c0_35 = arith.constant 0 : index
    %c8 = arith.constant 8 : index
    %c0_36 = arith.constant 0 : index
    %26 = vector.load %arg1[%c0_34, %c0_35, %c8, %c0_36] : memref<1x16x16x16xf32, #tpu.memory_space<vmem>>, vector<1x16x1x16xf32>
    %27 = vector.shape_cast %26 : vector<1x16x1x16xf32> to vector<16x16xf32>
    %c0_37 = arith.constant 0 : index
    %c245 = arith.constant 245 : index
    %28 = vector.load %arg37[%c0_37, %c245] : memref<16x506xf32, #tpu.memory_space<vmem>>, vector<16x16xf32>
    tpu.vector_store %arg37[%c0_37, %c245], %27 {strides = array<i32>} : memref<16x506xf32, #tpu.memory_space<vmem>>, vector<16x16xf32>,
    %c0_38 = arith.constant 0 : index
    %c0_39 = arith.constant 0 : index
    %c9 = arith.constant 9 : index
    %c0_40 = arith.constant 0 : index
    %29 = vector.load %arg1[%c0_38, %c0_39, %c9, %c0_40] : memref<1x16x16x16xf32, #tpu.memory_space<vmem>>, vector<1x16x1x16xf32>
    %30 = vector.shape_cast %29 : vector<1x16x1x16xf32> to vector<16x16xf32>
    %c0_41 = arith.constant 0 : index
    %c267 = arith.constant 267 : index
    %31 = vector.load %arg37[%c0_41, %c267] : memref<16x506xf32, #tpu.memory_space<vmem>>, vector<16x16xf32>
    tpu.vector_store %arg37[%c0_41, %c267], %30 {strides = array<i32>} : memref<16x506xf32, #tpu.memory_space<vmem>>, vector<16x16xf32>,
    %c0_42 = arith.constant 0 : index
    %c0_43 = arith.constant 0 : index
    %c10 = arith.constant 10 : index
    %c0_44 = arith.constant 0 : index
    %32 = vector.load %arg1[%c0_42, %c0_43, %c10, %c0_44] : memref<1x16x16x16xf32, #tpu.memory_space<vmem>>, vector<1x16x1x16xf32>
    %33 = vector.shape_cast %32 : vector<1x16x1x16xf32> to vector<16x16xf32>
    %c0_45 = arith.constant 0 : index
    %c289 = arith.constant 289 : index
    %34 = vector.load %arg37[%c0_45, %c289] : memref<16x506xf32, #tpu.memory_space<vmem>>, vector<16x16xf32>
    tpu.vector_store %arg37[%c0_45, %c289], %33 {strides = array<i32>} : memref<16x506xf32, #tpu.memory_space<vmem>>, vector<16x16xf32>,
    %c0_46 = arith.constant 0 : index
    %c0_47 = arith.constant 0 : index
    %c11 = arith.constant 11 : index
    %c0_48 = arith.constant 0 : index
    %35 = vector.load %arg1[%c0_46, %c0_47, %c11, %c0_48] : memref<1x16x16x16xf32, #tpu.memory_space<vmem>>, vector<1x16x1x16xf32>
    %36 = vector.shape_cast %35 : vector<1x16x1x16xf32> to vector<16x16xf32>
    %c0_49 = arith.constant 0 : index
    %c311 = arith.constant 311 : index
    %37 = vector.load %arg37[%c0_49, %c311] : memref<16x506xf32, #tpu.memory_space<vmem>>, vector<16x16xf32>
    tpu.vector_store %arg37[%c0_49, %c311], %36 {strides = array<i32>} : memref<16x506xf32, #tpu.memory_space<vmem>>, vector<16x16xf32>,
    %c0_50 = arith.constant 0 : index
    %c0_51 = arith.constant 0 : index
    %c12 = arith.constant 12 : index
    %c0_52 = arith.constant 0 : index
    %38 = vector.load %arg1[%c0_50, %c0_51, %c12, %c0_52] : memref<1x16x16x16xf32, #tpu.memory_space<vmem>>, vector<1x16x1x16xf32>
    %39 = vector.shape_cast %38 : vector<1x16x1x16xf32> to vector<16x16xf32>
    %c0_53 = arith.constant 0 : index
    %c333 = arith.constant 333 : index
    %40 = vector.load %arg37[%c0_53, %c333] : memref<16x506xf32, #tpu.memory_space<vmem>>, vector<16x16xf32>
    tpu.vector_store %arg37[%c0_53, %c333], %39 {strides = array<i32>} : memref<16x506xf32, #tpu.memory_space<vmem>>, vector<16x16xf32>,
    %c0_54 = arith.constant 0 : index
    %c0_55 = arith.constant 0 : index
    %c13 = arith.constant 13 : index
    %c0_56 = arith.constant 0 : index
    %41 = vector.load %arg1[%c0_54, %c0_55, %c13, %c0_56] : memref<1x16x16x16xf32, #tpu.memory_space<vmem>>, vector<1x16x1x16xf32>
    %42 = vector.shape_cast %41 : vector<1x16x1x16xf32> to vector<16x16xf32>
    %c0_57 = arith.constant 0 : index
    %c355 = arith.constant 355 : index
    %43 = vector.load %arg37[%c0_57, %c355] : memref<16x506xf32, #tpu.memory_space<vmem>>, vector<16x16xf32>
    tpu.vector_store %arg37[%c0_57, %c355], %42 {strides = array<i32>} : memref<16x506xf32, #tpu.memory_space<vmem>>, vector<16x16xf32>,
    %c0_58 = arith.constant 0 : index
    %c0_59 = arith.constant 0 : index
    %c14 = arith.constant 14 : index
    %c0_60 = arith.constant 0 : index
    %44 = vector.load %arg1[%c0_58, %c0_59, %c14, %c0_60] : memref<1x16x16x16xf32, #tpu.memory_space<vmem>>, vector<1x16x1x16xf32>
    %45 = vector.shape_cast %44 : vector<1x16x1x16xf32> to vector<16x16xf32>
    %c0_61 = arith.constant 0 : index
    %c377 = arith.constant 377 : index
    %46 = vector.load %arg37[%c0_61, %c377] : memref<16x506xf32, #tpu.memory_space<vmem>>, vector<16x16xf32>
    tpu.vector_store %arg37[%c0_61, %c377], %45 {strides = array<i32>} : memref<16x506xf32, #tpu.memory_space<vmem>>, vector<16x16xf32>,
    %c0_62 = arith.constant 0 : index
    %c0_63 = arith.constant 0 : index
    %c15 = arith.constant 15 : index
    %c0_64 = arith.constant 0 : index
    %47 = vector.load %arg1[%c0_62, %c0_63, %c15, %c0_64] : memref<1x16x16x16xf32, #tpu.memory_space<vmem>>, vector<1x16x1x16xf32>
    %48 = vector.shape_cast %47 : vector<1x16x1x16xf32> to vector<16x16xf32>
    %c0_65 = arith.constant 0 : index
    %c399 = arith.constant 399 : index
    %49 = vector.load %arg37[%c0_65, %c399] : memref<16x506xf32, #tpu.memory_space<vmem>>, vector<16x16xf32>
    tpu.vector_store %arg37[%c0_65, %c399], %48 {strides = array<i32>} : memref<16x506xf32, #tpu.memory_space<vmem>>, vector<16x16xf32>,
    %c0_66 = arith.constant 0 : index
    %c0_67 = arith.constant 0 : index
    %50 = vector.load %arg37[%c0_66, %c0_67] : memref<16x506xf32, #tpu.memory_space<vmem>>, vector<16x506xf32>
    %51 = arith.truncf %50 : vector<16x506xf32> to vector<16x506xbf16>
    %52 = vector.extract_strided_slice %51 {offsets = [0, 0], sizes = [16, 352], strides = [1, 1]} : vector<16x506xbf16> to vector<16x352xbf16>
    %53 = vector.extract_strided_slice %51 {offsets = [0, 1], sizes = [16, 352], strides = [1, 1]} : vector<16x506xbf16> to vector<16x352xbf16>
    %54 = vector.extract_strided_slice %51 {offsets = [0, 2], sizes = [16, 352], strides = [1, 1]} : vector<16x506xbf16> to vector<16x352xbf16>
    %55 = vector.extract_strided_slice %51 {offsets = [0, 3], sizes = [16, 352], strides = [1, 1]} : vector<16x506xbf16> to vector<16x352xbf16>
    %56 = vector.extract_strided_slice %51 {offsets = [0, 4], sizes = [16, 352], strides = [1, 1]} : vector<16x506xbf16> to vector<16x352xbf16>
    %57 = vector.extract_strided_slice %51 {offsets = [0, 5], sizes = [16, 352], strides = [1, 1]} : vector<16x506xbf16> to vector<16x352xbf16>
    %58 = vector.extract_strided_slice %51 {offsets = [0, 6], sizes = [16, 352], strides = [1, 1]} : vector<16x506xbf16> to vector<16x352xbf16>
    %59 = vector.extract_strided_slice %51 {offsets = [0, 22], sizes = [16, 352], strides = [1, 1]} : vector<16x506xbf16> to vector<16x352xbf16>
    %60 = vector.extract_strided_slice %51 {offsets = [0, 23], sizes = [16, 352], strides = [1, 1]} : vector<16x506xbf16> to vector<16x352xbf16>
    %61 = vector.extract_strided_slice %51 {offsets = [0, 24], sizes = [16, 352], strides = [1, 1]} : vector<16x506xbf16> to vector<16x352xbf16>
    %62 = vector.extract_strided_slice %51 {offsets = [0, 25], sizes = [16, 352], strides = [1, 1]} : vector<16x506xbf16> to vector<16x352xbf16>
    %63 = vector.extract_strided_slice %51 {offsets = [0, 26], sizes = [16, 352], strides = [1, 1]} : vector<16x506xbf16> to vector<16x352xbf16>
    %64 = vector.extract_strided_slice %51 {offsets = [0, 27], sizes = [16, 352], strides = [1, 1]} : vector<16x506xbf16> to vector<16x352xbf16>
    %65 = vector.extract_strided_slice %51 {offsets = [0, 28], sizes = [16, 352], strides = [1, 1]} : vector<16x506xbf16> to vector<16x352xbf16>
    %66 = vector.extract_strided_slice %51 {offsets = [0, 44], sizes = [16, 352], strides = [1, 1]} : vector<16x506xbf16> to vector<16x352xbf16>
    %67 = vector.extract_strided_slice %51 {offsets = [0, 45], sizes = [16, 352], strides = [1, 1]} : vector<16x506xbf16> to vector<16x352xbf16>
    %68 = vector.extract_strided_slice %51 {offsets = [0, 46], sizes = [16, 352], strides = [1, 1]} : vector<16x506xbf16> to vector<16x352xbf16>
    %69 = vector.extract_strided_slice %51 {offsets = [0, 47], sizes = [16, 352], strides = [1, 1]} : vector<16x506xbf16> to vector<16x352xbf16>
    %70 = vector.extract_strided_slice %51 {offsets = [0, 48], sizes = [16, 352], strides = [1, 1]} : vector<16x506xbf16> to vector<16x352xbf16>
    %71 = vector.extract_strided_slice %51 {offsets = [0, 49], sizes = [16, 352], strides = [1, 1]} : vector<16x506xbf16> to vector<16x352xbf16>
    %72 = vector.extract_strided_slice %51 {offsets = [0, 50], sizes = [16, 352], strides = [1, 1]} : vector<16x506xbf16> to vector<16x352xbf16>
    %73 = vector.extract_strided_slice %51 {offsets = [0, 66], sizes = [16, 352], strides = [1, 1]} : vector<16x506xbf16> to vector<16x352xbf16>
    %74 = vector.extract_strided_slice %51 {offsets = [0, 67], sizes = [16, 352], strides = [1, 1]} : vector<16x506xbf16> to vector<16x352xbf16>
    %75 = vector.extract_strided_slice %51 {offsets = [0, 68], sizes = [16, 352], strides = [1, 1]} : vector<16x506xbf16> to vector<16x352xbf16>
    %76 = vector.extract_strided_slice %51 {offsets = [0, 69], sizes = [16, 352], strides = [1, 1]} : vector<16x506xbf16> to vector<16x352xbf16>
    %77 = vector.extract_strided_slice %51 {offsets = [0, 70], sizes = [16, 352], strides = [1, 1]} : vector<16x506xbf16> to vector<16x352xbf16>
    %78 = vector.extract_strided_slice %51 {offsets = [0, 71], sizes = [16, 352], strides = [1, 1]} : vector<16x506xbf16> to vector<16x352xbf16>
    %79 = vector.extract_strided_slice %51 {offsets = [0, 72], sizes = [16, 352], strides = [1, 1]} : vector<16x506xbf16> to vector<16x352xbf16>
    %80 = vector.extract_strided_slice %51 {offsets = [0, 88], sizes = [16, 352], strides = [1, 1]} : vector<16x506xbf16> to vector<16x352xbf16>
    %81 = vector.extract_strided_slice %51 {offsets = [0, 89], sizes = [16, 352], strides = [1, 1]} : vector<16x506xbf16> to vector<16x352xbf16>
    %82 = vector.extract_strided_slice %51 {offsets = [0, 90], sizes = [16, 352], strides = [1, 1]} : vector<16x506xbf16> to vector<16x352xbf16>
    %83 = vector.extract_strided_slice %51 {offsets = [0, 91], sizes = [16, 352], strides = [1, 1]} : vector<16x506xbf16> to vector<16x352xbf16>
    %84 = vector.extract_strided_slice %51 {offsets = [0, 92], sizes = [16, 352], strides = [1, 1]} : vector<16x506xbf16> to vector<16x352xbf16>
    %85 = vector.extract_strided_slice %51 {offsets = [0, 93], sizes = [16, 352], strides = [1, 1]} : vector<16x506xbf16> to vector<16x352xbf16>
    %86 = vector.extract_strided_slice %51 {offsets = [0, 94], sizes = [16, 352], strides = [1, 1]} : vector<16x506xbf16> to vector<16x352xbf16>
    %87 = vector.extract_strided_slice %51 {offsets = [0, 110], sizes = [16, 352], strides = [1, 1]} : vector<16x506xbf16> to vector<16x352xbf16>
    %88 = vector.extract_strided_slice %51 {offsets = [0, 111], sizes = [16, 352], strides = [1, 1]} : vector<16x506xbf16> to vector<16x352xbf16>
    %89 = vector.extract_strided_slice %51 {offsets = [0, 112], sizes = [16, 352], strides = [1, 1]} : vector<16x506xbf16> to vector<16x352xbf16>
    %90 = vector.extract_strided_slice %51 {offsets = [0, 113], sizes = [16, 352], strides = [1, 1]} : vector<16x506xbf16> to vector<16x352xbf16>
    %91 = vector.extract_strided_slice %51 {offsets = [0, 114], sizes = [16, 352], strides = [1, 1]} : vector<16x506xbf16> to vector<16x352xbf16>
    %92 = vector.extract_strided_slice %51 {offsets = [0, 115], sizes = [16, 352], strides = [1, 1]} : vector<16x506xbf16> to vector<16x352xbf16>
    %93 = vector.extract_strided_slice %51 {offsets = [0, 116], sizes = [16, 352], strides = [1, 1]} : vector<16x506xbf16> to vector<16x352xbf16>
    %94 = vector.extract_strided_slice %51 {offsets = [0, 132], sizes = [16, 352], strides = [1, 1]} : vector<16x506xbf16> to vector<16x352xbf16>
    %95 = vector.extract_strided_slice %51 {offsets = [0, 133], sizes = [16, 352], strides = [1, 1]} : vector<16x506xbf16> to vector<16x352xbf16>
    %96 = vector.extract_strided_slice %51 {offsets = [0, 134], sizes = [16, 352], strides = [1, 1]} : vector<16x506xbf16> to vector<16x352xbf16>
    %97 = vector.extract_strided_slice %51 {offsets = [0, 135], sizes = [16, 352], strides = [1, 1]} : vector<16x506xbf16> to vector<16x352xbf16>
    %98 = vector.extract_strided_slice %51 {offsets = [0, 136], sizes = [16, 352], strides = [1, 1]} : vector<16x506xbf16> to vector<16x352xbf16>
    %99 = vector.extract_strided_slice %51 {offsets = [0, 137], sizes = [16, 352], strides = [1, 1]} : vector<16x506xbf16> to vector<16x352xbf16>
    %100 = vector.extract_strided_slice %51 {offsets = [0, 138], sizes = [16, 352], strides = [1, 1]} : vector<16x506xbf16> to vector<16x352xbf16>
    %101 = tpu.concatenate %52, %53, %54, %55, %56, %57, %58, %59, %60, %61, %62, %63, %64, %65, %66, %67 in 0 : vector<16x352xbf16>, vector<16x352xbf16>, vector<16x352xbf16>, vector<16x352xbf16>, vector<16x352xbf16>, vector<16x352xbf16>, vector<16x352xbf16>, vector<16x352xbf16>, vector<16x352xbf16>, vector<16x352xbf16>, vector<16x352xbf16>, vector<16x352xbf16>, vector<16x352xbf16>, vector<16x352xbf16>, vector<16x352xbf16>, vector<16x352xbf16> -> vector<256x352xbf16>
    %102 = tpu.concatenate %68, %69, %70, %71, %72, %73, %74, %75, %76, %77, %78, %79, %80, %81, %82, %83 in 0 : vector<16x352xbf16>, vector<16x352xbf16>, vector<16x352xbf16>, vector<16x352xbf16>, vector<16x352xbf16>, vector<16x352xbf16>, vector<16x352xbf16>, vector<16x352xbf16>, vector<16x352xbf16>, vector<16x352xbf16>, vector<16x352xbf16>, vector<16x352xbf16>, vector<16x352xbf16>, vector<16x352xbf16>, vector<16x352xbf16>, vector<16x352xbf16> -> vector<256x352xbf16>
    %103 = tpu.concatenate %84, %85, %86, %87, %88, %89, %90, %91, %92, %93, %94, %95, %96, %97, %98, %99 in 0 : vector<16x352xbf16>, vector<16x352xbf16>, vector<16x352xbf16>, vector<16x352xbf16>, vector<16x352xbf16>, vector<16x352xbf16>, vector<16x352xbf16>, vector<16x352xbf16>, vector<16x352xbf16>, vector<16x352xbf16>, vector<16x352xbf16>, vector<16x352xbf16>, vector<16x352xbf16>, vector<16x352xbf16>, vector<16x352xbf16>, vector<16x352xbf16> -> vector<256x352xbf16>
    %104 = tpu.concatenate %101, %102, %103, %100 in 0 : vector<256x352xbf16>, vector<256x352xbf16>, vector<256x352xbf16>, vector<16x352xbf16> -> vector<784x352xbf16>
    %c0_68 = arith.constant 0 : index
    %c0_69 = arith.constant 0 : index
    %105 = vector.load %arg2[%c0_68, %c0_69] : memref<16x784xbf16, #tpu.memory_space<vmem>>, vector<16x784xbf16>
    %cst_70 = arith.constant dense<0.000000e+00> : vector<16x352xf32>
    %106 = tpu.matmul %105, %104, %cst_70 {dimension_numbers = #tpu.dot_dimension_numbers<[1], [0], [0], [1], [0, 0, 1, 1], [], []>} : vector<16x784xbf16>, vector<784x352xbf16>, vector<16x352xf32> -> vector<16x352xf32>
    %c0_71 = arith.constant 0 : index
    %c0_72 = arith.constant 0 : index
    %107 = vector.load %arg3[%c0_71, %c0_72] : memref<16x1xf32, #tpu.memory_space<vmem>>, vector<16x1xf32>
    %108 = vector.broadcast %107 : vector<16x1xf32> to vector<16x352xf32>
    %109 = arith.addf %106, %108 : vector<16x352xf32>
    %cst_73 = arith.constant 0.000000e+00 : f32
    %110 = vector.broadcast %cst_73 : f32 to vector<16x352xf32>
    %111 = arith.maximumf %109, %110 : vector<16x352xf32>
    %cst_74 = arith.constant 0xFF800000 : f32
    %112 = vector.broadcast %cst_74 : f32 to vector<16x342xf32>
    %c0_75 = arith.constant 0 : index
    %c0_76 = arith.constant 0 : index
    %113 = vector.load %arg38[%c0_75, %c0_76] : memref<16x342xf32, #tpu.memory_space<vmem>>, vector<16x342xf32>
    tpu.vector_store %arg38[%c0_75, %c0_76], %112 {strides = array<i32>} : memref<16x342xf32, #tpu.memory_space<vmem>>, vector<16x342xf32>,
    %114 = vector.extract_strided_slice %111 {offsets = [0, 0], sizes = [16, 16], strides = [1, 1]} : vector<16x352xf32> to vector<16x16xf32>
    %c0_77 = arith.constant 0 : index
    %c19 = arith.constant 19 : index
    %115 = vector.load %arg38[%c0_77, %c19] : memref<16x342xf32, #tpu.memory_space<vmem>>, vector<16x16xf32>
    tpu.vector_store %arg38[%c0_77, %c19], %114 {strides = array<i32>} : memref<16x342xf32, #tpu.memory_space<vmem>>, vector<16x16xf32>,
    %116 = vector.extract_strided_slice %111 {offsets = [0, 22], sizes = [16, 16], strides = [1, 1]} : vector<16x352xf32> to vector<16x16xf32>
    %c0_78 = arith.constant 0 : index
    %c37 = arith.constant 37 : index
    %117 = vector.load %arg38[%c0_78, %c37] : memref<16x342xf32, #tpu.memory_space<vmem>>, vector<16x16xf32>
    tpu.vector_store %arg38[%c0_78, %c37], %116 {strides = array<i32>} : memref<16x342xf32, #tpu.memory_space<vmem>>, vector<16x16xf32>,
    %118 = vector.extract_strided_slice %111 {offsets = [0, 44], sizes = [16, 16], strides = [1, 1]} : vector<16x352xf32> to vector<16x16xf32>
    %c0_79 = arith.constant 0 : index
    %c55 = arith.constant 55 : index
    %119 = vector.load %arg38[%c0_79, %c55] : memref<16x342xf32, #tpu.memory_space<vmem>>, vector<16x16xf32>
    tpu.vector_store %arg38[%c0_79, %c55], %118 {strides = array<i32>} : memref<16x342xf32, #tpu.memory_space<vmem>>, vector<16x16xf32>,
    %120 = vector.extract_strided_slice %111 {offsets = [0, 66], sizes = [16, 16], strides = [1, 1]} : vector<16x352xf32> to vector<16x16xf32>
    %c0_80 = arith.constant 0 : index
    %c73 = arith.constant 73 : index
    %121 = vector.load %arg38[%c0_80, %c73] : memref<16x342xf32, #tpu.memory_space<vmem>>, vector<16x16xf32>
    tpu.vector_store %arg38[%c0_80, %c73], %120 {strides = array<i32>} : memref<16x342xf32, #tpu.memory_space<vmem>>, vector<16x16xf32>,
    %122 = vector.extract_strided_slice %111 {offsets = [0, 88], sizes = [16, 16], strides = [1, 1]} : vector<16x352xf32> to vector<16x16xf32>
    %c0_81 = arith.constant 0 : index
    %c91_82 = arith.constant 91 : index
    %123 = vector.load %arg38[%c0_81, %c91_82] : memref<16x342xf32, #tpu.memory_space<vmem>>, vector<16x16xf32>
    tpu.vector_store %arg38[%c0_81, %c91_82], %122 {strides = array<i32>} : memref<16x342xf32, #tpu.memory_space<vmem>>, vector<16x16xf32>,
    %124 = vector.extract_strided_slice %111 {offsets = [0, 110], sizes = [16, 16], strides = [1, 1]} : vector<16x352xf32> to vector<16x16xf32>
    %c0_83 = arith.constant 0 : index
    %c109 = arith.constant 109 : index
    %125 = vector.load %arg38[%c0_83, %c109] : memref<16x342xf32, #tpu.memory_space<vmem>>, vector<16x16xf32>
    tpu.vector_store %arg38[%c0_83, %c109], %124 {strides = array<i32>} : memref<16x342xf32, #tpu.memory_space<vmem>>, vector<16x16xf32>,
    %126 = vector.extract_strided_slice %111 {offsets = [0, 132], sizes = [16, 16], strides = [1, 1]} : vector<16x352xf32> to vector<16x16xf32>
    %c0_84 = arith.constant 0 : index
    %c127 = arith.constant 127 : index
    %127 = vector.load %arg38[%c0_84, %c127] : memref<16x342xf32, #tpu.memory_space<vmem>>, vector<16x16xf32>
    tpu.vector_store %arg38[%c0_84, %c127], %126 {strides = array<i32>} : memref<16x342xf32, #tpu.memory_space<vmem>>, vector<16x16xf32>,
    %128 = vector.extract_strided_slice %111 {offsets = [0, 154], sizes = [16, 16], strides = [1, 1]} : vector<16x352xf32> to vector<16x16xf32>
    %c0_85 = arith.constant 0 : index
    %c145 = arith.constant 145 : index
    %129 = vector.load %arg38[%c0_85, %c145] : memref<16x342xf32, #tpu.memory_space<vmem>>, vector<16x16xf32>
    tpu.vector_store %arg38[%c0_85, %c145], %128 {strides = array<i32>} : memref<16x342xf32, #tpu.memory_space<vmem>>, vector<16x16xf32>,
    %130 = vector.extract_strided_slice %111 {offsets = [0, 176], sizes = [16, 16], strides = [1, 1]} : vector<16x352xf32> to vector<16x16xf32>
    %c0_86 = arith.constant 0 : index
    %c163 = arith.constant 163 : index
    %131 = vector.load %arg38[%c0_86, %c163] : memref<16x342xf32, #tpu.memory_space<vmem>>, vector<16x16xf32>
    tpu.vector_store %arg38[%c0_86, %c163], %130 {strides = array<i32>} : memref<16x342xf32, #tpu.memory_space<vmem>>, vector<16x16xf32>,
    %132 = vector.extract_strided_slice %111 {offsets = [0, 198], sizes = [16, 16], strides = [1, 1]} : vector<16x352xf32> to vector<16x16xf32>
    %c0_87 = arith.constant 0 : index
    %c181 = arith.constant 181 : index
    %133 = vector.load %arg38[%c0_87, %c181] : memref<16x342xf32, #tpu.memory_space<vmem>>, vector<16x16xf32>
    tpu.vector_store %arg38[%c0_87, %c181], %132 {strides = array<i32>} : memref<16x342xf32, #tpu.memory_space<vmem>>, vector<16x16xf32>,
    %134 = vector.extract_strided_slice %111 {offsets = [0, 220], sizes = [16, 16], strides = [1, 1]} : vector<16x352xf32> to vector<16x16xf32>
    %c0_88 = arith.constant 0 : index
    %c199 = arith.constant 199 : index
    %135 = vector.load %arg38[%c0_88, %c199] : memref<16x342xf32, #tpu.memory_space<vmem>>, vector<16x16xf32>
    tpu.vector_store %arg38[%c0_88, %c199], %134 {strides = array<i32>} : memref<16x342xf32, #tpu.memory_space<vmem>>, vector<16x16xf32>,
    %136 = vector.extract_strided_slice %111 {offsets = [0, 242], sizes = [16, 16], strides = [1, 1]} : vector<16x352xf32> to vector<16x16xf32>
    %c0_89 = arith.constant 0 : index
    %c217 = arith.constant 217 : index
    %137 = vector.load %arg38[%c0_89, %c217] : memref<16x342xf32, #tpu.memory_space<vmem>>, vector<16x16xf32>
    tpu.vector_store %arg38[%c0_89, %c217], %136 {strides = array<i32>} : memref<16x342xf32, #tpu.memory_space<vmem>>, vector<16x16xf32>,
    %138 = vector.extract_strided_slice %111 {offsets = [0, 264], sizes = [16, 16], strides = [1, 1]} : vector<16x352xf32> to vector<16x16xf32>
    %c0_90 = arith.constant 0 : index
    %c235 = arith.constant 235 : index
    %139 = vector.load %arg38[%c0_90, %c235] : memref<16x342xf32, #tpu.memory_space<vmem>>, vector<16x16xf32>
    tpu.vector_store %arg38[%c0_90, %c235], %138 {strides = array<i32>} : memref<16x342xf32, #tpu.memory_space<vmem>>, vector<16x16xf32>,
    %140 = vector.extract_strided_slice %111 {offsets = [0, 286], sizes = [16, 16], strides = [1, 1]} : vector<16x352xf32> to vector<16x16xf32>
    %c0_91 = arith.constant 0 : index
    %c253 = arith.constant 253 : index
    %141 = vector.load %arg38[%c0_91, %c253] : memref<16x342xf32, #tpu.memory_space<vmem>>, vector<16x16xf32>
    tpu.vector_store %arg38[%c0_91, %c253], %140 {strides = array<i32>} : memref<16x342xf32, #tpu.memory_space<vmem>>, vector<16x16xf32>,
    %142 = vector.extract_strided_slice %111 {offsets = [0, 308], sizes = [16, 16], strides = [1, 1]} : vector<16x352xf32> to vector<16x16xf32>
    %c0_92 = arith.constant 0 : index
    %c271 = arith.constant 271 : index
    %143 = vector.load %arg38[%c0_92, %c271] : memref<16x342xf32, #tpu.memory_space<vmem>>, vector<16x16xf32>
    tpu.vector_store %arg38[%c0_92, %c271], %142 {strides = array<i32>} : memref<16x342xf32, #tpu.memory_space<vmem>>, vector<16x16xf32>,
    %144 = vector.extract_strided_slice %111 {offsets = [0, 330], sizes = [16, 16], strides = [1, 1]} : vector<16x352xf32> to vector<16x16xf32>
    %c0_93 = arith.constant 0 : index
    %c289_94 = arith.constant 289 : index
    %145 = vector.load %arg38[%c0_93, %c289_94] : memref<16x342xf32, #tpu.memory_space<vmem>>, vector<16x16xf32>
    tpu.vector_store %arg38[%c0_93, %c289_94], %144 {strides = array<i32>} : memref<16x342xf32, #tpu.memory_space<vmem>>, vector<16x16xf32>,
    %c0_95 = arith.constant 0 : index
    %c0_96 = arith.constant 0 : index
    %146 = vector.load %arg38[%c0_95, %c0_96] : memref<16x342xf32, #tpu.memory_space<vmem>>, vector<16x342xf32>
    %147 = vector.extract_strided_slice %146 {offsets = [0, 0], sizes = [16, 288], strides = [1, 1]} : vector<16x342xf32> to vector<16x288xf32>
    %148 = vector.extract_strided_slice %146 {offsets = [0, 1], sizes = [16, 288], strides = [1, 1]} : vector<16x342xf32> to vector<16x288xf32>
    %149 = arith.maximumf %147, %148 : vector<16x288xf32>
    %150 = vector.extract_strided_slice %146 {offsets = [0, 2], sizes = [16, 288], strides = [1, 1]} : vector<16x342xf32> to vector<16x288xf32>
    %151 = arith.maximumf %149, %150 : vector<16x288xf32>
    %152 = vector.extract_strided_slice %146 {offsets = [0, 18], sizes = [16, 288], strides = [1, 1]} : vector<16x342xf32> to vector<16x288xf32>
    %153 = arith.maximumf %151, %152 : vector<16x288xf32>
    %154 = vector.extract_strided_slice %146 {offsets = [0, 19], sizes = [16, 288], strides = [1, 1]} : vector<16x342xf32> to vector<16x288xf32>
    %155 = arith.maximumf %153, %154 : vector<16x288xf32>
    %156 = vector.extract_strided_slice %146 {offsets = [0, 20], sizes = [16, 288], strides = [1, 1]} : vector<16x342xf32> to vector<16x288xf32>
    %157 = arith.maximumf %155, %156 : vector<16x288xf32>
    %158 = vector.extract_strided_slice %146 {offsets = [0, 36], sizes = [16, 288], strides = [1, 1]} : vector<16x342xf32> to vector<16x288xf32>
    %159 = arith.maximumf %157, %158 : vector<16x288xf32>
    %160 = vector.extract_strided_slice %146 {offsets = [0, 37], sizes = [16, 288], strides = [1, 1]} : vector<16x342xf32> to vector<16x288xf32>
    %161 = arith.maximumf %159, %160 : vector<16x288xf32>
    %162 = vector.extract_strided_slice %146 {offsets = [0, 38], sizes = [16, 288], strides = [1, 1]} : vector<16x342xf32> to vector<16x288xf32>
    %163 = arith.maximumf %161, %162 : vector<16x288xf32>
    %164 = vector.extract_strided_slice %163 {offsets = [0, 0], sizes = [16, 16], strides = [1, 1]} : vector<16x288xf32> to vector<16x16xf32>
    %165 = vector.extract_strided_slice %163 {offsets = [0, 18], sizes = [16, 16], strides = [1, 1]} : vector<16x288xf32> to vector<16x16xf32>
    %166 = vector.extract_strided_slice %163 {offsets = [0, 36], sizes = [16, 16], strides = [1, 1]} : vector<16x288xf32> to vector<16x16xf32>
    %167 = vector.extract_strided_slice %163 {offsets = [0, 54], sizes = [16, 16], strides = [1, 1]} : vector<16x288xf32> to vector<16x16xf32>
    %168 = vector.extract_strided_slice %163 {offsets = [0, 72], sizes = [16, 16], strides = [1, 1]} : vector<16x288xf32> to vector<16x16xf32>
    %169 = vector.extract_strided_slice %163 {offsets = [0, 90], sizes = [16, 16], strides = [1, 1]} : vector<16x288xf32> to vector<16x16xf32>
    %170 = vector.extract_strided_slice %163 {offsets = [0, 108], sizes = [16, 16], strides = [1, 1]} : vector<16x288xf32> to vector<16x16xf32>
    %171 = vector.extract_strided_slice %163 {offsets = [0, 126], sizes = [16, 16], strides = [1, 1]} : vector<16x288xf32> to vector<16x16xf32>
    %172 = vector.extract_strided_slice %163 {offsets = [0, 144], sizes = [16, 16], strides = [1, 1]} : vector<16x288xf32> to vector<16x16xf32>
    %173 = vector.extract_strided_slice %163 {offsets = [0, 162], sizes = [16, 16], strides = [1, 1]} : vector<16x288xf32> to vector<16x16xf32>
    %174 = vector.extract_strided_slice %163 {offsets = [0, 180], sizes = [16, 16], strides = [1, 1]} : vector<16x288xf32> to vector<16x16xf32>
    %175 = vector.extract_strided_slice %163 {offsets = [0, 198], sizes = [16, 16], strides = [1, 1]} : vector<16x288xf32> to vector<16x16xf32>
    %176 = vector.extract_strided_slice %163 {offsets = [0, 216], sizes = [16, 16], strides = [1, 1]} : vector<16x288xf32> to vector<16x16xf32>
    %177 = vector.extract_strided_slice %163 {offsets = [0, 234], sizes = [16, 16], strides = [1, 1]} : vector<16x288xf32> to vector<16x16xf32>
    %178 = vector.extract_strided_slice %163 {offsets = [0, 252], sizes = [16, 16], strides = [1, 1]} : vector<16x288xf32> to vector<16x16xf32>
    %179 = vector.extract_strided_slice %163 {offsets = [0, 270], sizes = [16, 16], strides = [1, 1]} : vector<16x288xf32> to vector<16x16xf32>
    %180 = tpu.concatenate %164, %165, %166, %167, %168, %169, %170, %171, %172, %173, %174, %175, %176, %177, %178, %179 in 1 : vector<16x16xf32>, vector<16x16xf32>, vector<16x16xf32>, vector<16x16xf32>, vector<16x16xf32>, vector<16x16xf32>, vector<16x16xf32>, vector<16x16xf32>, vector<16x16xf32>, vector<16x16xf32>, vector<16x16xf32>, vector<16x16xf32>, vector<16x16xf32>, vector<16x16xf32>, vector<16x16xf32>, vector<16x16xf32> -> vector<16x256xf32>
    %181 = arith.truncf %180 : vector<16x256xf32> to vector<16x256xbf16>
    %c0_97 = arith.constant 0 : index
    %c0_98 = arith.constant 0 : index
    %182 = vector.load %arg4[%c0_97, %c0_98] : memref<4x16xbf16, #tpu.memory_space<vmem>>, vector<4x16xbf16>
    %cst_99 = arith.constant dense<0.000000e+00> : vector<4x256xf32>
    %183 = tpu.matmul %182, %181, %cst_99 {dimension_numbers = #tpu.dot_dimension_numbers<[1], [0], [0], [1], [0, 0, 1, 1], [], []>} : vector<4x16xbf16>, vector<16x256xbf16>, vector<4x256xf32> -> vector<4x256xf32>
    %c0_100 = arith.constant 0 : index
    %c0_101 = arith.constant 0 : index
    %184 = vector.load %arg5[%c0_100, %c0_101] : memref<4x1xf32, #tpu.memory_space<vmem>>, vector<4x1xf32>
    %185 = vector.broadcast %184 : vector<4x1xf32> to vector<4x256xf32>
    %186 = arith.addf %183, %185 : vector<4x256xf32>
    %cst_102 = arith.constant 0.000000e+00 : f32
    %187 = vector.broadcast %cst_102 : f32 to vector<4x256xf32>
    %188 = arith.maximumf %186, %187 : vector<4x256xf32>
    %cst_103 = arith.constant 0.000000e+00 : f32
    %189 = vector.broadcast %cst_103 : f32 to vector<4x342xf32>
    %c0_104 = arith.constant 0 : index
    %c0_105 = arith.constant 0 : index
    %190 = vector.load %arg39[%c0_104, %c0_105] : memref<4x342xf32, #tpu.memory_space<vmem>>, vector<4x342xf32>
    tpu.vector_store %arg39[%c0_104, %c0_105], %189 {strides = array<i32>} : memref<4x342xf32, #tpu.memory_space<vmem>>, vector<4x342xf32>,
    %191 = vector.extract_strided_slice %188 {offsets = [0, 0], sizes = [4, 16], strides = [1, 1]} : vector<4x256xf32> to vector<4x16xf32>
    %c0_106 = arith.constant 0 : index
    %c19_107 = arith.constant 19 : index
    %192 = vector.load %arg39[%c0_106, %c19_107] : memref<4x342xf32, #tpu.memory_space<vmem>>, vector<4x16xf32>
    tpu.vector_store %arg39[%c0_106, %c19_107], %191 {strides = array<i32>} : memref<4x342xf32, #tpu.memory_space<vmem>>, vector<4x16xf32>,
    %193 = vector.extract_strided_slice %188 {offsets = [0, 16], sizes = [4, 16], strides = [1, 1]} : vector<4x256xf32> to vector<4x16xf32>
    %c0_108 = arith.constant 0 : index
    %c37_109 = arith.constant 37 : index
    %194 = vector.load %arg39[%c0_108, %c37_109] : memref<4x342xf32, #tpu.memory_space<vmem>>, vector<4x16xf32>
    tpu.vector_store %arg39[%c0_108, %c37_109], %193 {strides = array<i32>} : memref<4x342xf32, #tpu.memory_space<vmem>>, vector<4x16xf32>,
    %195 = vector.extract_strided_slice %188 {offsets = [0, 32], sizes = [4, 16], strides = [1, 1]} : vector<4x256xf32> to vector<4x16xf32>
    %c0_110 = arith.constant 0 : index
    %c55_111 = arith.constant 55 : index
    %196 = vector.load %arg39[%c0_110, %c55_111] : memref<4x342xf32, #tpu.memory_space<vmem>>, vector<4x16xf32>
    tpu.vector_store %arg39[%c0_110, %c55_111], %195 {strides = array<i32>} : memref<4x342xf32, #tpu.memory_space<vmem>>, vector<4x16xf32>,
    %197 = vector.extract_strided_slice %188 {offsets = [0, 48], sizes = [4, 16], strides = [1, 1]} : vector<4x256xf32> to vector<4x16xf32>
    %c0_112 = arith.constant 0 : index
    %c73_113 = arith.constant 73 : index
    %198 = vector.load %arg39[%c0_112, %c73_113] : memref<4x342xf32, #tpu.memory_space<vmem>>, vector<4x16xf32>
    tpu.vector_store %arg39[%c0_112, %c73_113], %197 {strides = array<i32>} : memref<4x342xf32, #tpu.memory_space<vmem>>, vector<4x16xf32>,
    %199 = vector.extract_strided_slice %188 {offsets = [0, 64], sizes = [4, 16], strides = [1, 1]} : vector<4x256xf32> to vector<4x16xf32>
    %c0_114 = arith.constant 0 : index
    %c91_115 = arith.constant 91 : index
    %200 = vector.load %arg39[%c0_114, %c91_115] : memref<4x342xf32, #tpu.memory_space<vmem>>, vector<4x16xf32>
    tpu.vector_store %arg39[%c0_114, %c91_115], %199 {strides = array<i32>} : memref<4x342xf32, #tpu.memory_space<vmem>>, vector<4x16xf32>,
    %201 = vector.extract_strided_slice %188 {offsets = [0, 80], sizes = [4, 16], strides = [1, 1]} : vector<4x256xf32> to vector<4x16xf32>
    %c0_116 = arith.constant 0 : index
    %c109_117 = arith.constant 109 : index
    %202 = vector.load %arg39[%c0_116, %c109_117] : memref<4x342xf32, #tpu.memory_space<vmem>>, vector<4x16xf32>
    tpu.vector_store %arg39[%c0_116, %c109_117], %201 {strides = array<i32>} : memref<4x342xf32, #tpu.memory_space<vmem>>, vector<4x16xf32>,
    %203 = vector.extract_strided_slice %188 {offsets = [0, 96], sizes = [4, 16], strides = [1, 1]} : vector<4x256xf32> to vector<4x16xf32>
    %c0_118 = arith.constant 0 : index
    %c127_119 = arith.constant 127 : index
    %204 = vector.load %arg39[%c0_118, %c127_119] : memref<4x342xf32, #tpu.memory_space<vmem>>, vector<4x16xf32>
    tpu.vector_store %arg39[%c0_118, %c127_119], %203 {strides = array<i32>} : memref<4x342xf32, #tpu.memory_space<vmem>>, vector<4x16xf32>,
    %205 = vector.extract_strided_slice %188 {offsets = [0, 112], sizes = [4, 16], strides = [1, 1]} : vector<4x256xf32> to vector<4x16xf32>
    %c0_120 = arith.constant 0 : index
    %c145_121 = arith.constant 145 : index
    %206 = vector.load %arg39[%c0_120, %c145_121] : memref<4x342xf32, #tpu.memory_space<vmem>>, vector<4x16xf32>
    tpu.vector_store %arg39[%c0_120, %c145_121], %205 {strides = array<i32>} : memref<4x342xf32, #tpu.memory_space<vmem>>, vector<4x16xf32>,
    %207 = vector.extract_strided_slice %188 {offsets = [0, 128], sizes = [4, 16], strides = [1, 1]} : vector<4x256xf32> to vector<4x16xf32>
    %c0_122 = arith.constant 0 : index
    %c163_123 = arith.constant 163 : index
    %208 = vector.load %arg39[%c0_122, %c163_123] : memref<4x342xf32, #tpu.memory_space<vmem>>, vector<4x16xf32>
    tpu.vector_store %arg39[%c0_122, %c163_123], %207 {strides = array<i32>} : memref<4x342xf32, #tpu.memory_space<vmem>>, vector<4x16xf32>,
    %209 = vector.extract_strided_slice %188 {offsets = [0, 144], sizes = [4, 16], strides = [1, 1]} : vector<4x256xf32> to vector<4x16xf32>
    %c0_124 = arith.constant 0 : index
    %c181_125 = arith.constant 181 : index
    %210 = vector.load %arg39[%c0_124, %c181_125] : memref<4x342xf32, #tpu.memory_space<vmem>>, vector<4x16xf32>
    tpu.vector_store %arg39[%c0_124, %c181_125], %209 {strides = array<i32>} : memref<4x342xf32, #tpu.memory_space<vmem>>, vector<4x16xf32>,
    %211 = vector.extract_strided_slice %188 {offsets = [0, 160], sizes = [4, 16], strides = [1, 1]} : vector<4x256xf32> to vector<4x16xf32>
    %c0_126 = arith.constant 0 : index
    %c199_127 = arith.constant 199 : index
    %212 = vector.load %arg39[%c0_126, %c199_127] : memref<4x342xf32, #tpu.memory_space<vmem>>, vector<4x16xf32>
    tpu.vector_store %arg39[%c0_126, %c199_127], %211 {strides = array<i32>} : memref<4x342xf32, #tpu.memory_space<vmem>>, vector<4x16xf32>,
    %213 = vector.extract_strided_slice %188 {offsets = [0, 176], sizes = [4, 16], strides = [1, 1]} : vector<4x256xf32> to vector<4x16xf32>
    %c0_128 = arith.constant 0 : index
    %c217_129 = arith.constant 217 : index
    %214 = vector.load %arg39[%c0_128, %c217_129] : memref<4x342xf32, #tpu.memory_space<vmem>>, vector<4x16xf32>
    tpu.vector_store %arg39[%c0_128, %c217_129], %213 {strides = array<i32>} : memref<4x342xf32, #tpu.memory_space<vmem>>, vector<4x16xf32>,
    %215 = vector.extract_strided_slice %188 {offsets = [0, 192], sizes = [4, 16], strides = [1, 1]} : vector<4x256xf32> to vector<4x16xf32>
    %c0_130 = arith.constant 0 : index
    %c235_131 = arith.constant 235 : index
    %216 = vector.load %arg39[%c0_130, %c235_131] : memref<4x342xf32, #tpu.memory_space<vmem>>, vector<4x16xf32>
    tpu.vector_store %arg39[%c0_130, %c235_131], %215 {strides = array<i32>} : memref<4x342xf32, #tpu.memory_space<vmem>>, vector<4x16xf32>,
    %217 = vector.extract_strided_slice %188 {offsets = [0, 208], sizes = [4, 16], strides = [1, 1]} : vector<4x256xf32> to vector<4x16xf32>
    %c0_132 = arith.constant 0 : index
    %c253_133 = arith.constant 253 : index
    %218 = vector.load %arg39[%c0_132, %c253_133] : memref<4x342xf32, #tpu.memory_space<vmem>>, vector<4x16xf32>
    tpu.vector_store %arg39[%c0_132, %c253_133], %217 {strides = array<i32>} : memref<4x342xf32, #tpu.memory_space<vmem>>, vector<4x16xf32>,
    %219 = vector.extract_strided_slice %188 {offsets = [0, 224], sizes = [4, 16], strides = [1, 1]} : vector<4x256xf32> to vector<4x16xf32>
    %c0_134 = arith.constant 0 : index
    %c271_135 = arith.constant 271 : index
    %220 = vector.load %arg39[%c0_134, %c271_135] : memref<4x342xf32, #tpu.memory_space<vmem>>, vector<4x16xf32>
    tpu.vector_store %arg39[%c0_134, %c271_135], %219 {strides = array<i32>} : memref<4x342xf32, #tpu.memory_space<vmem>>, vector<4x16xf32>,
    %221 = vector.extract_strided_slice %188 {offsets = [0, 240], sizes = [4, 16], strides = [1, 1]} : vector<4x256xf32> to vector<4x16xf32>
    %c0_136 = arith.constant 0 : index
    %c289_137 = arith.constant 289 : index
    %222 = vector.load %arg39[%c0_136, %c289_137] : memref<4x342xf32, #tpu.memory_space<vmem>>, vector<4x16xf32>
    tpu.vector_store %arg39[%c0_136, %c289_137], %221 {strides = array<i32>} : memref<4x342xf32, #tpu.memory_space<vmem>>, vector<4x16xf32>,
    %c0_138 = arith.constant 0 : index
    %c0_139 = arith.constant 0 : index
    %223 = vector.load %arg39[%c0_138, %c0_139] : memref<4x342xf32, #tpu.memory_space<vmem>>, vector<4x342xf32>
    %224 = arith.truncf %223 : vector<4x342xf32> to vector<4x342xbf16>
    %225 = vector.extract_strided_slice %224 {offsets = [0, 0], sizes = [4, 288], strides = [1, 1]} : vector<4x342xbf16> to vector<4x288xbf16>
    %226 = vector.extract_strided_slice %224 {offsets = [0, 1], sizes = [4, 288], strides = [1, 1]} : vector<4x342xbf16> to vector<4x288xbf16>
    %227 = vector.extract_strided_slice %224 {offsets = [0, 2], sizes = [4, 288], strides = [1, 1]} : vector<4x342xbf16> to vector<4x288xbf16>
    %228 = vector.extract_strided_slice %224 {offsets = [0, 18], sizes = [4, 288], strides = [1, 1]} : vector<4x342xbf16> to vector<4x288xbf16>
    %229 = vector.extract_strided_slice %224 {offsets = [0, 19], sizes = [4, 288], strides = [1, 1]} : vector<4x342xbf16> to vector<4x288xbf16>
    %230 = vector.extract_strided_slice %224 {offsets = [0, 20], sizes = [4, 288], strides = [1, 1]} : vector<4x342xbf16> to vector<4x288xbf16>
    %231 = vector.extract_strided_slice %224 {offsets = [0, 36], sizes = [4, 288], strides = [1, 1]} : vector<4x342xbf16> to vector<4x288xbf16>
    %232 = vector.extract_strided_slice %224 {offsets = [0, 37], sizes = [4, 288], strides = [1, 1]} : vector<4x342xbf16> to vector<4x288xbf16>
    %233 = vector.extract_strided_slice %224 {offsets = [0, 38], sizes = [4, 288], strides = [1, 1]} : vector<4x342xbf16> to vector<4x288xbf16>
    %234 = tpu.concatenate %225, %226, %227, %228, %229, %230, %231, %232, %233 in 0 : vector<4x288xbf16>, vector<4x288xbf16>, vector<4x288xbf16>, vector<4x288xbf16>, vector<4x288xbf16>, vector<4x288xbf16>, vector<4x288xbf16>, vector<4x288xbf16>, vector<4x288xbf16> -> vector<36x288xbf16>
    %c0_140 = arith.constant 0 : index
    %c0_141 = arith.constant 0 : index
    %235 = vector.load %arg6[%c0_140, %c0_141] : memref<4x36xbf16, #tpu.memory_space<vmem>>, vector<4x36xbf16>
    %cst_142 = arith.constant dense<0.000000e+00> : vector<4x288xf32>
    %236 = tpu.matmul %235, %234, %cst_142 {dimension_numbers = #tpu.dot_dimension_numbers<[1], [0], [0], [1], [0, 0, 1, 1], [], []>} : vector<4x36xbf16>, vector<36x288xbf16>, vector<4x288xf32> -> vector<4x288xf32>
    %c0_143 = arith.constant 0 : index
    %c0_144 = arith.constant 0 : index
    %237 = vector.load %arg7[%c0_143, %c0_144] : memref<4x1xf32, #tpu.memory_space<vmem>>, vector<4x1xf32>
    %238 = vector.broadcast %237 : vector<4x1xf32> to vector<4x288xf32>
    %239 = arith.addf %236, %238 : vector<4x288xf32>
    %cst_145 = arith.constant 0.000000e+00 : f32
    %240 = vector.broadcast %cst_145 : f32 to vector<4x288xf32>
    %241 = arith.maximumf %239, %240 : vector<4x288xf32>
    %242 = vector.extract_strided_slice %241 {offsets = [0, 0], sizes = [4, 16], strides = [1, 1]} : vector<4x288xf32> to vector<4x16xf32>
    %243 = vector.extract_strided_slice %241 {offsets = [0, 18], sizes = [4, 16], strides = [1, 1]} : vector<4x288xf32> to vector<4x16xf32>
    %244 = vector.extract_strided_slice %241 {offsets = [0, 36], sizes = [4, 16], strides = [1, 1]} : vector<4x288xf32> to vector<4x16xf32>
    %245 = vector.extract_strided_slice %241 {offsets = [0, 54], sizes = [4, 16], strides = [1, 1]} : vector<4x288xf32> to vector<4x16xf32>
    %246 = vector.extract_strided_slice %241 {offsets = [0, 72], sizes = [4, 16], strides = [1, 1]} : vector<4x288xf32> to vector<4x16xf32>
    %247 = vector.extract_strided_slice %241 {offsets = [0, 90], sizes = [4, 16], strides = [1, 1]} : vector<4x288xf32> to vector<4x16xf32>
    %248 = vector.extract_strided_slice %241 {offsets = [0, 108], sizes = [4, 16], strides = [1, 1]} : vector<4x288xf32> to vector<4x16xf32>
    %249 = vector.extract_strided_slice %241 {offsets = [0, 126], sizes = [4, 16], strides = [1, 1]} : vector<4x288xf32> to vector<4x16xf32>
    %250 = vector.extract_strided_slice %241 {offsets = [0, 144], sizes = [4, 16], strides = [1, 1]} : vector<4x288xf32> to vector<4x16xf32>
    %251 = vector.extract_strided_slice %241 {offsets = [0, 162], sizes = [4, 16], strides = [1, 1]} : vector<4x288xf32> to vector<4x16xf32>
    %252 = vector.extract_strided_slice %241 {offsets = [0, 180], sizes = [4, 16], strides = [1, 1]} : vector<4x288xf32> to vector<4x16xf32>
    %253 = vector.extract_strided_slice %241 {offsets = [0, 198], sizes = [4, 16], strides = [1, 1]} : vector<4x288xf32> to vector<4x16xf32>
    %254 = vector.extract_strided_slice %241 {offsets = [0, 216], sizes = [4, 16], strides = [1, 1]} : vector<4x288xf32> to vector<4x16xf32>
    %255 = vector.extract_strided_slice %241 {offsets = [0, 234], sizes = [4, 16], strides = [1, 1]} : vector<4x288xf32> to vector<4x16xf32>
    %256 = vector.extract_strided_slice %241 {offsets = [0, 252], sizes = [4, 16], strides = [1, 1]} : vector<4x288xf32> to vector<4x16xf32>
    %257 = vector.extract_strided_slice %241 {offsets = [0, 270], sizes = [4, 16], strides = [1, 1]} : vector<4x288xf32> to vector<4x16xf32>
    %258 = tpu.concatenate %242, %243, %244, %245, %246, %247, %248, %249, %250, %251, %252, %253, %254, %255, %256, %257 in 1 : vector<4x16xf32>, vector<4x16xf32>, vector<4x16xf32>, vector<4x16xf32>, vector<4x16xf32>, vector<4x16xf32>, vector<4x16xf32>, vector<4x16xf32>, vector<4x16xf32>, vector<4x16xf32>, vector<4x16xf32>, vector<4x16xf32>, vector<4x16xf32>, vector<4x16xf32>, vector<4x16xf32>, vector<4x16xf32> -> vector<4x256xf32>
    %c0_146 = arith.constant 0 : index
    %c0_147 = arith.constant 0 : index
    %259 = vector.load %arg8[%c0_146, %c0_147] : memref<16x4xbf16, #tpu.memory_space<vmem>>, vector<16x4xbf16>
    %260 = arith.truncf %258 : vector<4x256xf32> to vector<4x256xbf16>
    %cst_148 = arith.constant dense<0.000000e+00> : vector<16x256xf32>
    %261 = tpu.matmul %259, %260, %cst_148 {dimension_numbers = #tpu.dot_dimension_numbers<[1], [0], [0], [1], [0, 0, 1, 1], [], []>} : vector<16x4xbf16>, vector<4x256xbf16>, vector<16x256xf32> -> vector<16x256xf32>
    %c0_149 = arith.constant 0 : index
    %c0_150 = arith.constant 0 : index
    %262 = vector.load %arg9[%c0_149, %c0_150] : memref<16x1xf32, #tpu.memory_space<vmem>>, vector<16x1xf32>
    %263 = vector.broadcast %262 : vector<16x1xf32> to vector<16x256xf32>
    %264 = arith.addf %261, %263 : vector<16x256xf32>
    %c0_151 = arith.constant 0 : index
    %c0_152 = arith.constant 0 : index
    %265 = vector.load %arg10[%c0_151, %c0_152] : memref<16x16xbf16, #tpu.memory_space<vmem>>, vector<16x16xbf16>
    %cst_153 = arith.constant dense<0.000000e+00> : vector<16x256xf32>
    %266 = tpu.matmul %265, %181, %cst_153 {dimension_numbers = #tpu.dot_dimension_numbers<[1], [0], [0], [1], [0, 0, 1, 1], [], []>} : vector<16x16xbf16>, vector<16x256xbf16>, vector<16x256xf32> -> vector<16x256xf32>
    %c0_154 = arith.constant 0 : index
    %c0_155 = arith.constant 0 : index
    %267 = vector.load %arg11[%c0_154, %c0_155] : memref<16x1xf32, #tpu.memory_space<vmem>>, vector<16x1xf32>
    %268 = vector.broadcast %267 : vector<16x1xf32> to vector<16x256xf32>
    %269 = arith.addf %266, %268 : vector<16x256xf32>
    %270 = arith.addf %264, %269 : vector<16x256xf32>
    %cst_156 = arith.constant 0.000000e+00 : f32
    %271 = vector.broadcast %cst_156 : f32 to vector<16x256xf32>
    %272 = arith.maximumf %270, %271 : vector<16x256xf32>
    %c0_157 = arith.constant 0 : index
    %c0_158 = arith.constant 0 : index
    %273 = vector.load %arg12[%c0_157, %c0_158] : memref<16x16xbf16, #tpu.memory_space<vmem>>, vector<16x16xbf16>
    %274 = arith.truncf %272 : vector<16x256xf32> to vector<16x256xbf16>
    %cst_159 = arith.constant dense<0.000000e+00> : vector<16x256xf32>
    %275 = tpu.matmul %273, %274, %cst_159 {dimension_numbers = #tpu.dot_dimension_numbers<[1], [0], [0], [1], [0, 0, 1, 1], [], []>} : vector<16x16xbf16>, vector<16x256xbf16>, vector<16x256xf32> -> vector<16x256xf32>
    %c0_160 = arith.constant 0 : index
    %c0_161 = arith.constant 0 : index
    %276 = vector.load %arg13[%c0_160, %c0_161] : memref<16x1xf32, #tpu.memory_space<vmem>>, vector<16x1xf32>
    %277 = vector.broadcast %276 : vector<16x1xf32> to vector<16x256xf32>
    %278 = arith.addf %275, %277 : vector<16x256xf32>
    %cst_162 = arith.constant 0.000000e+00 : f32
    %279 = vector.broadcast %cst_162 : f32 to vector<16x256xf32>
    %280 = arith.maximumf %278, %279 : vector<16x256xf32>
    %c0_163 = arith.constant 0 : index
    %c0_164 = arith.constant 0 : index
    %281 = vector.load %arg14[%c0_163, %c0_164] : memref<64x16xf32, #tpu.memory_space<vmem>>, vector<64x16xf32>
    %282 = arith.mulf %280, %280 : vector<16x256xf32>
    %cst_165 = arith.constant dense<0.000000e+00> : vector<256xf32>
    %283 = vector.multi_reduction <add>, %282, %cst_165 [0] : vector<16x256xf32> to vector<256xf32>
    %284 = vector.shape_cast %283 : vector<256xf32> to vector<1x256xf32>
    %cst_166 = arith.constant dense<0.000000e+00> : vector<64x256xf32>
    %285 = tpu.matmul %281, %280, %cst_166 {dimension_numbers = #tpu.dot_dimension_numbers<[1], [0], [0], [1], [0, 0, 1, 1], [], []>} : vector<64x16xf32>, vector<16x256xf32>, vector<64x256xf32> -> vector<64x256xf32>
    %c0_167 = arith.constant 0 : index
    %c0_168 = arith.constant 0 : index
    %286 = vector.load %arg16[%c0_167, %c0_168] : memref<64x1xf32, #tpu.memory_space<vmem>>, vector<64x1xf32>
    %cst_169 = arith.constant 2.000000e+00 : f32
    %287 = vector.broadcast %cst_169 : f32 to vector<64x256xf32>
    %288 = arith.mulf %287, %285 : vector<64x256xf32>
    %289 = vector.broadcast %284 : vector<1x256xf32> to vector<64x256xf32>
    %290 = arith.subf %289, %288 : vector<64x256xf32>
    %c0_170 = arith.constant 0 : index
    %c0_171 = arith.constant 0 : index
    %291 = vector.load %arg15[%c0_170, %c0_171] : memref<64x1xf32, #tpu.memory_space<vmem>>, vector<64x1xf32>
    %292 = vector.broadcast %291 : vector<64x1xf32> to vector<64x256xf32>
    %293 = arith.addf %290, %292 : vector<64x256xf32>
    %294 = vector.broadcast %286 : vector<64x1xf32> to vector<64x256xf32>
    %295 = arith.mulf %294, %293 : vector<64x256xf32>
    %cst_172 = arith.constant dense<0xFF800000> : vector<256xf32>
    %296 = vector.multi_reduction <maximumf>, %295, %cst_172 [0] : vector<64x256xf32> to vector<256xf32>
    %297 = vector.shape_cast %296 : vector<256xf32> to vector<1x256xf32>
    %298 = vector.broadcast %297 : vector<1x256xf32> to vector<64x256xf32>
    %299 = arith.subf %295, %298 : vector<64x256xf32>
    %300 = math.exp %299 : vector<64x256xf32>
    %cst_173 = arith.constant dense<0.000000e+00> : vector<256xf32>
    %301 = vector.multi_reduction <add>, %300, %cst_173 [0] : vector<64x256xf32> to vector<256xf32>
    %302 = vector.shape_cast %301 : vector<256xf32> to vector<1x256xf32>
    %303 = vector.broadcast %302 : vector<1x256xf32> to vector<64x256xf32>
    %304 = arith.divf %300, %303 : vector<64x256xf32>
    %cst_174 = arith.constant dense<0.000000e+00> : vector<64x16xf32>
    %305 = tpu.matmul %304, %280, %cst_174 {dimension_numbers = #tpu.dot_dimension_numbers<[1], [1], [0], [0], [0, 0, 1, 0], [], []>} : vector<64x256xf32>, vector<16x256xf32>, vector<64x16xf32> -> vector<64x16xf32>
    %cst_175 = arith.constant dense<0.000000e+00> : vector<64xf32>
    %306 = vector.multi_reduction <add>, %304, %cst_175 [1] : vector<64x256xf32> to vector<64xf32>
    %307 = vector.shape_cast %306 : vector<64xf32> to vector<64x1xf32>
    %c0_176 = arith.constant 0 : index
    %c0_177 = arith.constant 0 : index
    %308 = vector.load %arg17[%c0_176, %c0_177] : memref<64x1xf32, #tpu.memory_space<vmem>>, vector<64x1xf32>
    %309 = vector.broadcast %307 : vector<64x1xf32> to vector<64x16xf32>
    %310 = arith.mulf %309, %281 : vector<64x16xf32>
    %311 = arith.subf %305, %310 : vector<64x16xf32>
    %312 = vector.broadcast %308 : vector<64x1xf32> to vector<64x16xf32>
    %313 = arith.mulf %312, %311 : vector<64x16xf32>
    %c0_178 = arith.constant 0 : index
    %c0_179 = arith.constant 0 : index
    %314 = vector.load %arg18[%c0_178, %c0_179] : memref<64x1xf32, #tpu.memory_space<vmem>>, vector<64x1xf32>
    %315 = vector.broadcast %314 : vector<64x1xf32> to vector<64x16xf32>
    %316 = arith.addf %313, %315 : vector<64x16xf32>
    %cst_180 = arith.constant 0.000000e+00 : f32
    %317 = vector.broadcast %cst_180 : f32 to vector<64x16xf32>
    %318 = arith.maximumf %316, %317 : vector<64x16xf32>
    %c0_181 = arith.constant 0 : index
    %c0_182 = arith.constant 0 : index
    %319 = vector.load %arg19[%c0_181, %c0_182] : memref<16x16xf32, #tpu.memory_space<vmem>>, vector<16x16xf32>
    %cst_183 = arith.constant dense<0.000000e+00> : vector<16x64xf32>
    %320 = tpu.matmul %319, %318, %cst_183 {dimension_numbers = #tpu.dot_dimension_numbers<[1], [1], [0], [0], [0, 0, 1, 0], [], []>} : vector<16x16xf32>, vector<64x16xf32>, vector<16x64xf32> -> vector<16x64xf32>
    %cst_184 = arith.constant dense<0.000000e+00> : vector<16xf32>
    %321 = vector.multi_reduction <add>, %320, %cst_184 [1] : vector<16x64xf32> to vector<16xf32>
    %322 = vector.shape_cast %321 : vector<16xf32> to vector<16x1xf32>
    %cst_185 = arith.constant 6.400000e+01 : f32
    %323 = vector.broadcast %cst_185 : f32 to vector<16x1xf32>
    %324 = arith.divf %322, %323 : vector<16x1xf32>
    %c0_186 = arith.constant 0 : index
    %c0_187 = arith.constant 0 : index
    %325 = vector.load %arg20[%c0_186, %c0_187] : memref<16x1xf32, #tpu.memory_space<vmem>>, vector<16x1xf32>
    %326 = arith.addf %324, %325 : vector<16x1xf32>
    %327 = arith.negf %326 : vector<16x1xf32>
    %328 = math.exp %327 : vector<16x1xf32>
    %cst_188 = arith.constant 1.000000e+00 : f32
    %329 = vector.broadcast %cst_188 : f32 to vector<16x1xf32>
    %330 = arith.addf %329, %328 : vector<16x1xf32>
    %331 = arith.divf %329, %330 : vector<16x1xf32>
    %332 = vector.broadcast %331 : vector<16x1xf32> to vector<16x256xf32>
    %333 = arith.mulf %272, %332 : vector<16x256xf32>
    %334 = arith.addf %272, %333 : vector<16x256xf32>
    %cst_189 = arith.constant 0.000000e+00 : f32
    %335 = vector.broadcast %cst_189 : f32 to vector<16x256xf32>
    %336 = arith.maximumf %334, %335 : vector<16x256xf32>
    %337 = vector.shape_cast %180 : vector<16x256xf32> to vector<1x16x256xf32>
    %cst_190 = arith.constant dense<0.000000e+00> : vector<1xf32>
    %338 = vector.multi_reduction <add>, %337, %cst_190 [1, 2] : vector<1x16x256xf32> to vector<1xf32>
    %339 = vector.shape_cast %338 : vector<1xf32> to vector<1x1x1xf32>
    %340 = vector.extract %339[0, 0, 0] : f32 from vector<1x1x1xf32>
    %341 = vector.broadcast %340 : f32 to vector<1x1xf32>
    %cst_191 = arith.constant 4.096000e+03 : f32
    %342 = vector.broadcast %cst_191 : f32 to vector<1x1xf32>
    %343 = arith.divf %341, %342 : vector<1x1xf32>
    %344 = vector.broadcast %343 : vector<1x1xf32> to vector<16x256xf32>
    %345 = arith.subf %180, %344 : vector<16x256xf32>
    %346 = arith.mulf %345, %345 : vector<16x256xf32>
    %347 = vector.shape_cast %346 : vector<16x256xf32> to vector<1x16x256xf32>
    %cst_192 = arith.constant dense<0.000000e+00> : vector<1xf32>
    %348 = vector.multi_reduction <add>, %347, %cst_192 [1, 2] : vector<1x16x256xf32> to vector<1xf32>
    %349 = vector.shape_cast %348 : vector<1xf32> to vector<1x1x1xf32>
    %350 = vector.extract %349[0, 0, 0] : f32 from vector<1x1x1xf32>
    %351 = vector.broadcast %350 : f32 to vector<1x1xf32>
    %cst_193 = arith.constant 4.096000e+03 : f32
    %352 = vector.broadcast %cst_193 : f32 to vector<1x1xf32>
    %353 = arith.divf %351, %352 : vector<1x1xf32>
    %354 = vector.broadcast %343 : vector<1x1xf32> to vector<16x256xf32>
    %355 = arith.subf %180, %354 : vector<16x256xf32>
    %cst_194 = arith.constant 9.99999974E-6 : f32
    %356 = vector.broadcast %cst_194 : f32 to vector<1x1xf32>
    %357 = arith.addf %353, %356 : vector<1x1xf32>
    %358 = math.rsqrt %357 : vector<1x1xf32>
    %359 = vector.broadcast %358 : vector<1x1xf32> to vector<16x256xf32>
    %360 = arith.mulf %355, %359 : vector<16x256xf32>
    %c0_195 = arith.constant 0 : index
    %c0_196 = arith.constant 0 : index
    %361 = vector.load %arg21[%c0_195, %c0_196] : memref<16x1xf32, #tpu.memory_space<vmem>>, vector<16x1xf32>
    %362 = vector.broadcast %361 : vector<16x1xf32> to vector<16x256xf32>
    %363 = arith.mulf %360, %362 : vector<16x256xf32>
    %c0_197 = arith.constant 0 : index
    %c0_198 = arith.constant 0 : index
    %364 = vector.load %arg22[%c0_197, %c0_198] : memref<16x1xf32, #tpu.memory_space<vmem>>, vector<16x1xf32>
    %365 = vector.broadcast %364 : vector<16x1xf32> to vector<16x256xf32>
    %366 = arith.addf %363, %365 : vector<16x256xf32>
    %c0_199 = arith.constant 0 : index
    %c0_200 = arith.constant 0 : index
    %367 = vector.load %arg25[%c0_199, %c0_200] : memref<16x1xf32, #tpu.memory_space<vmem>>, vector<16x1xf32>
    %368 = vector.broadcast %367 : vector<16x1xf32> to vector<16x256xf32>
    %369 = arith.mulf %366, %368 : vector<16x256xf32>
    %c0_201 = arith.constant 0 : index
    %c0_202 = arith.constant 0 : index
    %370 = vector.load %arg26[%c0_201, %c0_202] : memref<16x1xf32, #tpu.memory_space<vmem>>, vector<16x1xf32>
    %371 = vector.broadcast %370 : vector<16x1xf32> to vector<16x256xf32>
    %372 = arith.addf %369, %371 : vector<16x256xf32>
    %373 = arith.negf %372 : vector<16x256xf32>
    %374 = math.exp %373 : vector<16x256xf32>
    %cst_203 = arith.constant 1.000000e+00 : f32
    %375 = vector.broadcast %cst_203 : f32 to vector<16x256xf32>
    %376 = arith.addf %375, %374 : vector<16x256xf32>
    %377 = arith.divf %375, %376 : vector<16x256xf32>
    %378 = arith.mulf %372, %377 : vector<16x256xf32>
    %c0_204 = arith.constant 0 : index
    %c0_205 = arith.constant 0 : index
    %379 = vector.load %arg27[%c0_204, %c0_205] : memref<16x1xf32, #tpu.memory_space<vmem>>, vector<16x1xf32>
    %380 = vector.broadcast %379 : vector<16x1xf32> to vector<16x256xf32>
    %381 = arith.mulf %380, %378 : vector<16x256xf32>
    %382 = arith.addf %180, %381 : vector<16x256xf32>
    %383 = vector.shape_cast %382 : vector<16x256xf32> to vector<1x16x256xf32>
    %cst_206 = arith.constant dense<0.000000e+00> : vector<1xf32>
    %384 = vector.multi_reduction <add>, %383, %cst_206 [1, 2] : vector<1x16x256xf32> to vector<1xf32>
    %385 = vector.shape_cast %384 : vector<1xf32> to vector<1x1x1xf32>
    %386 = vector.extract %385[0, 0, 0] : f32 from vector<1x1x1xf32>
    %387 = vector.broadcast %386 : f32 to vector<1x1xf32>
    %cst_207 = arith.constant 4.096000e+03 : f32
    %388 = vector.broadcast %cst_207 : f32 to vector<1x1xf32>
    %389 = arith.divf %387, %388 : vector<1x1xf32>
    %390 = vector.broadcast %389 : vector<1x1xf32> to vector<16x256xf32>
    %391 = arith.subf %382, %390 : vector<16x256xf32>
    %392 = arith.mulf %391, %391 : vector<16x256xf32>
    %393 = vector.shape_cast %392 : vector<16x256xf32> to vector<1x16x256xf32>
    %cst_208 = arith.constant dense<0.000000e+00> : vector<1xf32>
    %394 = vector.multi_reduction <add>, %393, %cst_208 [1, 2] : vector<1x16x256xf32> to vector<1xf32>
    %395 = vector.shape_cast %394 : vector<1xf32> to vector<1x1x1xf32>
    %396 = vector.extract %395[0, 0, 0] : f32 from vector<1x1x1xf32>
    %397 = vector.broadcast %396 : f32 to vector<1x1xf32>
    %cst_209 = arith.constant 4.096000e+03 : f32
    %398 = vector.broadcast %cst_209 : f32 to vector<1x1xf32>
    %399 = arith.divf %397, %398 : vector<1x1xf32>
    %400 = vector.broadcast %389 : vector<1x1xf32> to vector<16x256xf32>
    %401 = arith.subf %382, %400 : vector<16x256xf32>
    %cst_210 = arith.constant 9.99999974E-6 : f32
    %402 = vector.broadcast %cst_210 : f32 to vector<1x1xf32>
    %403 = arith.addf %399, %402 : vector<1x1xf32>
    %404 = math.rsqrt %403 : vector<1x1xf32>
    %405 = vector.broadcast %404 : vector<1x1xf32> to vector<16x256xf32>
    %406 = arith.mulf %401, %405 : vector<16x256xf32>
    %c0_211 = arith.constant 0 : index
    %c0_212 = arith.constant 0 : index
    %407 = vector.load %arg23[%c0_211, %c0_212] : memref<16x1xf32, #tpu.memory_space<vmem>>, vector<16x1xf32>
    %408 = vector.broadcast %407 : vector<16x1xf32> to vector<16x256xf32>
    %409 = arith.mulf %406, %408 : vector<16x256xf32>
    %c0_213 = arith.constant 0 : index
    %c0_214 = arith.constant 0 : index
    %410 = vector.load %arg24[%c0_213, %c0_214] : memref<16x1xf32, #tpu.memory_space<vmem>>, vector<16x1xf32>
    %411 = vector.broadcast %410 : vector<16x1xf32> to vector<16x256xf32>
    %412 = arith.addf %409, %411 : vector<16x256xf32>
    %c0_215 = arith.constant 0 : index
    %c0_216 = arith.constant 0 : index
    %413 = vector.load %arg29[%c0_215, %c0_216] : memref<64x16xbf16, #tpu.memory_space<vmem>>, vector<64x16xbf16>
    %414 = arith.truncf %412 : vector<16x256xf32> to vector<16x256xbf16>
    %cst_217 = arith.constant dense<0.000000e+00> : vector<64x256xf32>
    %415 = tpu.matmul %413, %414, %cst_217 {dimension_numbers = #tpu.dot_dimension_numbers<[1], [0], [0], [1], [0, 0, 1, 1], [], []>} : vector<64x16xbf16>, vector<16x256xbf16>, vector<64x256xf32> -> vector<64x256xf32>
    %c0_218 = arith.constant 0 : index
    %c0_219 = arith.constant 0 : index
    %416 = vector.load %arg30[%c0_218, %c0_219] : memref<64x1xf32, #tpu.memory_space<vmem>>, vector<64x1xf32>
    %417 = vector.broadcast %416 : vector<64x1xf32> to vector<64x256xf32>
    %418 = arith.addf %415, %417 : vector<64x256xf32>
    %cst_220 = arith.constant 5.000000e-01 : f32
    %419 = vector.broadcast %cst_220 : f32 to vector<64x256xf32>
    %420 = arith.mulf %419, %418 : vector<64x256xf32>
    %cst_221 = arith.constant 4.471500e-02 : f32
    %421 = vector.broadcast %cst_221 : f32 to vector<64x256xf32>
    %422 = arith.mulf %421, %418 : vector<64x256xf32>
    %423 = arith.mulf %422, %418 : vector<64x256xf32>
    %424 = arith.mulf %423, %418 : vector<64x256xf32>
    %425 = arith.addf %418, %424 : vector<64x256xf32>
    %cst_222 = arith.constant 0.797884583 : f32
    %426 = vector.broadcast %cst_222 : f32 to vector<64x256xf32>
    %427 = arith.mulf %426, %425 : vector<64x256xf32>
    %428 = math.tanh %427 : vector<64x256xf32>
    %cst_223 = arith.constant 1.000000e+00 : f32
    %429 = vector.broadcast %cst_223 : f32 to vector<64x256xf32>
    %430 = arith.addf %429, %428 : vector<64x256xf32>
    %431 = arith.mulf %420, %430 : vector<64x256xf32>
    %c0_224 = arith.constant 0 : index
    %c0_225 = arith.constant 0 : index
    %432 = vector.load %arg31[%c0_224, %c0_225] : memref<16x64xbf16, #tpu.memory_space<vmem>>, vector<16x64xbf16>
    %433 = arith.truncf %431 : vector<64x256xf32> to vector<64x256xbf16>
    %cst_226 = arith.constant dense<0.000000e+00> : vector<16x256xf32>
    %434 = tpu.matmul %432, %433, %cst_226 {dimension_numbers = #tpu.dot_dimension_numbers<[1], [0], [0], [1], [0, 0, 1, 1], [], []>} : vector<16x64xbf16>, vector<64x256xbf16>, vector<16x256xf32> -> vector<16x256xf32>
    %c0_227 = arith.constant 0 : index
    %c0_228 = arith.constant 0 : index
    %435 = vector.load %arg32[%c0_227, %c0_228] : memref<16x1xf32, #tpu.memory_space<vmem>>, vector<16x1xf32>
    %436 = vector.broadcast %435 : vector<16x1xf32> to vector<16x256xf32>
    %437 = arith.addf %434, %436 : vector<16x256xf32>
    %c0_229 = arith.constant 0 : index
    %c0_230 = arith.constant 0 : index
    %438 = vector.load %arg28[%c0_229, %c0_230] : memref<16x1xf32, #tpu.memory_space<vmem>>, vector<16x1xf32>
    %439 = vector.broadcast %438 : vector<16x1xf32> to vector<16x256xf32>
    %440 = arith.mulf %439, %437 : vector<16x256xf32>
    %441 = arith.addf %382, %440 : vector<16x256xf32>
    %c0_231 = arith.constant 0 : index
    %c0_232 = arith.constant 0 : index
    %442 = vector.load %arg33[%c0_231, %c0_232] : memref<16x16xbf16, #tpu.memory_space<vmem>>, vector<16x16xbf16>
    %443 = arith.truncf %336 : vector<16x256xf32> to vector<16x256xbf16>
    %cst_233 = arith.constant dense<0.000000e+00> : vector<16x256xf32>
    %444 = tpu.matmul %442, %443, %cst_233 {dimension_numbers = #tpu.dot_dimension_numbers<[1], [0], [0], [1], [0, 0, 1, 1], [], []>} : vector<16x16xbf16>, vector<16x256xbf16>, vector<16x256xf32> -> vector<16x256xf32>
    %c0_234 = arith.constant 0 : index
    %c0_235 = arith.constant 0 : index
    %445 = vector.load %arg34[%c0_234, %c0_235] : memref<16x16xbf16, #tpu.memory_space<vmem>>, vector<16x16xbf16>
    %446 = arith.truncf %441 : vector<16x256xf32> to vector<16x256xbf16>
    %cst_236 = arith.constant dense<0.000000e+00> : vector<16x256xf32>
    %447 = tpu.matmul %445, %446, %cst_236 {dimension_numbers = #tpu.dot_dimension_numbers<[1], [0], [0], [1], [0, 0, 1, 1], [], []>} : vector<16x16xbf16>, vector<16x256xbf16>, vector<16x256xf32> -> vector<16x256xf32>
    %448 = arith.addf %444, %447 : vector<16x256xf32>
    %c0_237 = arith.constant 0 : index
    %c0_238 = arith.constant 0 : index
    %449 = vector.load %arg35[%c0_237, %c0_238] : memref<16x1xf32, #tpu.memory_space<vmem>>, vector<16x1xf32>
    %450 = vector.broadcast %449 : vector<16x1xf32> to vector<16x256xf32>
    %451 = arith.addf %448, %450 : vector<16x256xf32>
    %c0_239 = arith.constant 0 : index
    %c0_240 = arith.constant 0 : index
    %c0_241 = arith.constant 0 : index
    %452 = vector.load %arg36[%c0_239, %c0_240, %c0_241] : memref<1x16x256xf32, #tpu.memory_space<vmem>>, vector<1x16x256xf32>
    %453 = vector.shape_cast %452 : vector<1x16x256xf32> to vector<16x256xf32>
    %454 = vector.shape_cast %451 : vector<16x256xf32> to vector<1x16x256xf32>
    tpu.vector_store %arg36[%c0_239, %c0_240, %c0_241], %454 {strides = array<i32>} : memref<1x16x256xf32, #tpu.memory_space<vmem>>, vector<1x16x256xf32>,
    return
  }
  func.func @transform_0(%arg0: i32) -> (i32, i32, i32, i32) {
    %c0_i32 = arith.constant 0 : i32
    %c0_i32_0 = arith.constant 0 : i32
    %c0_i32_1 = arith.constant 0 : i32
    %c0_i32_2 = arith.constant 0 : i32
    return %arg0, %c0_i32, %c0_i32_0, %c0_i32_1 : i32, i32, i32, i32
  }
  func.func @transform_1(%arg0: i32) -> (i32, i32) {
    %c0_i32 = arith.constant 0 : i32
    %c0_i32_0 = arith.constant 0 : i32
    %c0_i32_1 = arith.constant 0 : i32
    return %c0_i32, %c0_i32_0 : i32, i32
  }
  func.func @transform_2(%arg0: i32) -> (i32, i32) {
    %c0_i32 = arith.constant 0 : i32
    %c0_i32_0 = arith.constant 0 : i32
    %c0_i32_1 = arith.constant 0 : i32
    return %c0_i32, %c0_i32_0 : i32, i32
  }
  func.func @transform_3(%arg0: i32) -> (i32, i32) {
    %c0_i32 = arith.constant 0 : i32
    %c0_i32_0 = arith.constant 0 : i32
    %c0_i32_1 = arith.constant 0 : i32
    return %c0_i32, %c0_i32_0 : i32, i32
  }
  func.func @transform_4(%arg0: i32) -> (i32, i32) {
    %c0_i32 = arith.constant 0 : i32
    %c0_i32_0 = arith.constant 0 : i32
    %c0_i32_1 = arith.constant 0 : i32
    return %c0_i32, %c0_i32_0 : i32, i32
  }
  func.func @transform_5(%arg0: i32) -> (i32, i32) {
    %c0_i32 = arith.constant 0 : i32
    %c0_i32_0 = arith.constant 0 : i32
    %c0_i32_1 = arith.constant 0 : i32
    return %c0_i32, %c0_i32_0 : i32, i32
  }
  func.func @transform_6(%arg0: i32) -> (i32, i32) {
    %c0_i32 = arith.constant 0 : i32
    %c0_i32_0 = arith.constant 0 : i32
    %c0_i32_1 = arith.constant 0 : i32
    return %c0_i32, %c0_i32_0 : i32, i32
  }
  func.func @transform_7(%arg0: i32) -> (i32, i32) {
    %c0_i32 = arith.constant 0 : i32
    %c0_i32_0 = arith.constant 0 : i32
    %c0_i32_1 = arith.constant 0 : i32
    return %c0_i32, %c0_i32_0 : i32, i32
  }
  func.func @transform_8(%arg0: i32) -> (i32, i32) {
    %c0_i32 = arith.constant 0 : i32
    %c0_i32_0 = arith.constant 0 : i32
    %c0_i32_1 = arith.constant 0 : i32
    return %c0_i32, %c0_i32_0 : i32, i32
  }
  func.func @transform_9(%arg0: i32) -> (i32, i32) {
    %c0_i32 = arith.constant 0 : i32
    %c0_i32_0 = arith.constant 0 : i32
    %c0_i32_1 = arith.constant 0 : i32
    return %c0_i32, %c0_i32_0 : i32, i32
  }
  func.func @transform_10(%arg0: i32) -> (i32, i32) {
    %c0_i32 = arith.constant 0 : i32
    %c0_i32_0 = arith.constant 0 : i32
    %c0_i32_1 = arith.constant 0 : i32
    return %c0_i32, %c0_i32_0 : i32, i32
  }
  func.func @transform_11(%arg0: i32) -> (i32, i32) {
    %c0_i32 = arith.constant 0 : i32
    %c0_i32_0 = arith.constant 0 : i32
    %c0_i32_1 = arith.constant 0 : i32
    return %c0_i32, %c0_i32_0 : i32, i32
  }
  func.func @transform_12(%arg0: i32) -> (i32, i32) {
    %c0_i32 = arith.constant 0 : i32
    %c0_i32_0 = arith.constant 0 : i32
    %c0_i32_1 = arith.constant 0 : i32
    return %c0_i32, %c0_i32_0 : i32, i32
  }
  func.func @transform_13(%arg0: i32) -> (i32, i32) {
    %c0_i32 = arith.constant 0 : i32
    %c0_i32_0 = arith.constant 0 : i32
    %c0_i32_1 = arith.constant 0 : i32
    return %c0_i32, %c0_i32_0 : i32, i32
  }
  func.func @transform_14(%arg0: i32) -> (i32, i32) {
    %c0_i32 = arith.constant 0 : i32
    %c0_i32_0 = arith.constant 0 : i32
    %c0_i32_1 = arith.constant 0 : i32
    return %c0_i32, %c0_i32_0 : i32, i32
  }
  func.func @transform_15(%arg0: i32) -> (i32, i32) {
    %c0_i32 = arith.constant 0 : i32
    %c0_i32_0 = arith.constant 0 : i32
    %c0_i32_1 = arith.constant 0 : i32
    return %c0_i32, %c0_i32_0 : i32, i32
  }
  func.func @transform_16(%arg0: i32) -> (i32, i32) {
    %c0_i32 = arith.constant 0 : i32
    %c0_i32_0 = arith.constant 0 : i32
    %c0_i32_1 = arith.constant 0 : i32
    return %c0_i32, %c0_i32_0 : i32, i32
  }
  func.func @transform_17(%arg0: i32) -> (i32, i32) {
    %c0_i32 = arith.constant 0 : i32
    %c0_i32_0 = arith.constant 0 : i32
    %c0_i32_1 = arith.constant 0 : i32
    return %c0_i32, %c0_i32_0 : i32, i32
  }
  func.func @transform_18(%arg0: i32) -> (i32, i32) {
    %c0_i32 = arith.constant 0 : i32
    %c0_i32_0 = arith.constant 0 : i32
    %c0_i32_1 = arith.constant 0 : i32
    return %c0_i32, %c0_i32_0 : i32, i32
  }
  func.func @transform_19(%arg0: i32) -> (i32, i32) {
    %c0_i32 = arith.constant 0 : i32
    %c0_i32_0 = arith.constant 0 : i32
    %c0_i32_1 = arith.constant 0 : i32
    return %c0_i32, %c0_i32_0 : i32, i32
  }
  func.func @transform_20(%arg0: i32) -> (i32, i32) {
    %c0_i32 = arith.constant 0 : i32
    %c0_i32_0 = arith.constant 0 : i32
    %c0_i32_1 = arith.constant 0 : i32
    return %c0_i32, %c0_i32_0 : i32, i32
  }
  func.func @transform_21(%arg0: i32) -> (i32, i32) {
    %c0_i32 = arith.constant 0 : i32
    %c0_i32_0 = arith.constant 0 : i32
    %c0_i32_1 = arith.constant 0 : i32
    return %c0_i32, %c0_i32_0 : i32, i32
  }
  func.func @transform_22(%arg0: i32) -> (i32, i32) {
    %c0_i32 = arith.constant 0 : i32
    %c0_i32_0 = arith.constant 0 : i32
    %c0_i32_1 = arith.constant 0 : i32
    return %c0_i32, %c0_i32_0 : i32, i32
  }
  func.func @transform_23(%arg0: i32) -> (i32, i32) {
    %c0_i32 = arith.constant 0 : i32
    %c0_i32_0 = arith.constant 0 : i32
    %c0_i32_1 = arith.constant 0 : i32
    return %c0_i32, %c0_i32_0 : i32, i32
  }
  func.func @transform_24(%arg0: i32) -> (i32, i32) {
    %c0_i32 = arith.constant 0 : i32
    %c0_i32_0 = arith.constant 0 : i32
    %c0_i32_1 = arith.constant 0 : i32
    return %c0_i32, %c0_i32_0 : i32, i32
  }
  func.func @transform_25(%arg0: i32) -> (i32, i32) {
    %c0_i32 = arith.constant 0 : i32
    %c0_i32_0 = arith.constant 0 : i32
    %c0_i32_1 = arith.constant 0 : i32
    return %c0_i32, %c0_i32_0 : i32, i32
  }
  func.func @transform_26(%arg0: i32) -> (i32, i32) {
    %c0_i32 = arith.constant 0 : i32
    %c0_i32_0 = arith.constant 0 : i32
    %c0_i32_1 = arith.constant 0 : i32
    return %c0_i32, %c0_i32_0 : i32, i32
  }
  func.func @transform_27(%arg0: i32) -> (i32, i32) {
    %c0_i32 = arith.constant 0 : i32
    %c0_i32_0 = arith.constant 0 : i32
    %c0_i32_1 = arith.constant 0 : i32
    return %c0_i32, %c0_i32_0 : i32, i32
  }
  func.func @transform_28(%arg0: i32) -> (i32, i32) {
    %c0_i32 = arith.constant 0 : i32
    %c0_i32_0 = arith.constant 0 : i32
    %c0_i32_1 = arith.constant 0 : i32
    return %c0_i32, %c0_i32_0 : i32, i32
  }
  func.func @transform_29(%arg0: i32) -> (i32, i32) {
    %c0_i32 = arith.constant 0 : i32
    %c0_i32_0 = arith.constant 0 : i32
    %c0_i32_1 = arith.constant 0 : i32
    return %c0_i32, %c0_i32_0 : i32, i32
  }
  func.func @transform_30(%arg0: i32) -> (i32, i32) {
    %c0_i32 = arith.constant 0 : i32
    %c0_i32_0 = arith.constant 0 : i32
    %c0_i32_1 = arith.constant 0 : i32
    return %c0_i32, %c0_i32_0 : i32, i32
  }
  func.func @transform_31(%arg0: i32) -> (i32, i32) {
    %c0_i32 = arith.constant 0 : i32
    %c0_i32_0 = arith.constant 0 : i32
    %c0_i32_1 = arith.constant 0 : i32
    return %c0_i32, %c0_i32_0 : i32, i32
  }
  func.func @transform_32(%arg0: i32) -> (i32, i32) {
    %c0_i32 = arith.constant 0 : i32
    %c0_i32_0 = arith.constant 0 : i32
    %c0_i32_1 = arith.constant 0 : i32
    return %c0_i32, %c0_i32_0 : i32, i32
  }
  func.func @transform_33(%arg0: i32) -> (i32, i32) {
    %c0_i32 = arith.constant 0 : i32
    %c0_i32_0 = arith.constant 0 : i32
    %c0_i32_1 = arith.constant 0 : i32
    return %c0_i32, %c0_i32_0 : i32, i32
  }
  func.func @transform_34(%arg0: i32) -> (i32, i32) {
    %c0_i32 = arith.constant 0 : i32
    %c0_i32_0 = arith.constant 0 : i32
    %c0_i32_1 = arith.constant 0 : i32
    return %c0_i32, %c0_i32_0 : i32, i32
  }
  func.func @transform_35(%arg0: i32) -> (i32, i32, i32) {
    %c0_i32 = arith.constant 0 : i32
    %c0_i32_0 = arith.constant 0 : i32
    %c0_i32_1 = arith.constant 0 : i32
    return %arg0, %c0_i32, %c0_i32_0 : i32, i32, i32
  }
}

</mosaic_0001>

<bundles_post_ra>
// kernel: evc_block_forward.1
= control target key start
LH: loop header
LB: loop body
LE: loop exit
PB: predicated region body
PF: predicated region fallthrough
CT: control target
= control target key end

     0   :  { %s6584_s6 = smov 1   ;;  %s6585_s10 = smov 2   ;;  %s9926_s0 = inlined_call_operand.smem [shape: u32[36], index: -1, kind: input, shape index: {}] }
   0x1   :  { %s6699_s5 = sld [smem:[%s9926_s0]]   ;;  %s6586_s14 = smov 3  }
   0x2   :  { %s6704_s9 = sld [smem:[%s9926_s0 + %s6584_s6]]   ;;  %s6587_s18 = smov 4  }
   0x3   :  { %s6709_s13 = sld [smem:[%s9926_s0 + %s6585_s10]]   ;;  %s6588_s22 = smov 5  }
   0x4   :  { %s6714_s17 = sld [smem:[%s9926_s0 + %s6586_s14]]   ;;  %s6589_s26 = smov 6  }
   0x5   :  { %s6719_s21 = sld [smem:[%s9926_s0 + %s6587_s18]]   ;;  %s6590_s30 = smov 7  }
   0x6   :  { %s6724_s25 = sld [smem:[%s9926_s0 + %s6588_s22]]   ;;  %s6591_s4 = smov 8  }
   0x7   :  { %10068 = sst [smem:[#allocation5_spill]] %s6699_s5  ;;  %s6592_s10 = smov 9  }
   0x8   :  { %10069 = sst [smem:[#allocation6_spill]] %s6704_s9  ;;  %s6593_s15 = smov 10  }
   0x9   :  { %10070 = sst [smem:[#allocation7_spill]] %s6709_s13  ;;  %s6594_s20 = smov 11  }
   0xa   :  { %10071 = sst [smem:[#allocation8_spill]] %s6714_s17  ;;  %s6596_s1 = smov 13  }
   0xb   :  { %10072 = sst [smem:[#allocation9_spill]] %s6719_s21  ;;  %s6597_s7 = smov 14  }
   0xc   :  { %s6729_s29 = sld [smem:[%s9926_s0 + %s6589_s26]]   ;;  %s6595_s26 = smov 12  }
   0xd   :  { %s6734_s3 = sld [smem:[%s9926_s0 + %s6590_s30]]   ;;  %s6599_s22 = smov 16  }
   0xe   :  { %s6739_s8 = sld [smem:[%s9926_s0 + %s6591_s4]]   ;;  %s6600_s28 = smov 17  }
   0xf   :  { %s6744_s14 = sld [smem:[%s9926_s0 + %s6592_s10]]  }
  0x10   :  { %s6749_s19 = sld [smem:[%s9926_s0 + %s6593_s15]]   ;;  %s6598_s15 = smov 15  }
  0x11   :  { %s6754_s24 = sld [smem:[%s9926_s0 + %s6594_s20]]  }
  0x12   :  { %s6759_s30 = sld [smem:[%s9926_s0 + %s6595_s26]]  }
  0x13   :  { %10073 = sst [smem:[#allocation10_spill]] %s6734_s3 }
  0x14   :  { %s6764_s6 = sld [smem:[%s9926_s0 + %s6596_s1]]  }
  0x15   :  { %s6769_s12 = sld [smem:[%s9926_s0 + %s6597_s7]]   ;;  %s6601_s7 = smov 18  }
  0x16   :  { %s6774_s20 = sld [smem:[%s9926_s0 + %s6598_s15]]   ;;  %s6602_s15 = smov 19  }
  0x17   :  { %10074 = sst [smem:[#allocation11_spill]] %s6754_s24 }
  0x18   :  { %s6779_s27 = sld [smem:[%s9926_s0 + %s6599_s22]]   ;;  %s6603_s22 = smov 20  }
  0x19   :  { %s6784_s4 = sld [smem:[%s9926_s0 + %s6600_s28]]   ;;  %s6604_s28 = smov 21  }
  0x1a   :  { %10075 = sst [smem:[#allocation12_spill]] %s6764_s6 }
  0x1b   :  { %10076 = sst [smem:[#allocation13_spill]] %s6769_s12 }
  0x1c   :  { %10077 = sst [smem:[#allocation14_spill]] %s6774_s20 }
  0x1d   :  { %s6789_s6 = sld [smem:[%s9926_s0 + %s6601_s7]]   ;;  %s6605_s7 = smov 22  }
  0x1e   :  { %10078 = sst [smem:[#allocation15_spill]] %s6779_s27 }
  0x1f   :  { %10079 = sst [smem:[#allocation16_spill]] %s6784_s4 }
  0x20   :  { %s6794_s24 = sld [smem:[%s9926_s0 + %s6602_s15]]   ;;  %s6606_s15 = smov 23  }
  0x21   :  { %s6799_s27 = sld [smem:[%s9926_s0 + %s6603_s22]]   ;;  %s6607_s22 = smov 24  }
  0x22   :  { %s6804_s4 = sld [smem:[%s9926_s0 + %s6604_s28]]   ;;  %s6608_s28 = smov 25  }
  0x23   :  { %10080 = sst [smem:[#allocation17_spill]] %s6789_s6 }
  0x24   :  { %s6809_s6 = sld [smem:[%s9926_s0 + %s6605_s7]]   ;;  %s6609_s7 = smov 26  }
  0x25   :  { %s6819_s20 = sld [smem:[%s9926_s0 + %s6607_s22]]   ;;  %s6611_s22 = smov 28  }
  0x26   :  { %10081 = sst [smem:[#allocation18_spill]] %s6794_s24 }
  0x27   :  { %s6814_s24 = sld [smem:[%s9926_s0 + %s6606_s15]]   ;;  %s6610_s15 = smov 27  }
  0x28   :  { %10082 = sst [smem:[#allocation19_spill]] %s6804_s4 }
  0x29   :  { %s6824_s3 = sld [smem:[%s9926_s0 + %s6608_s28]]   ;;  %s6612_s28 = smov 29  }
  0x2a   :  { %10083 = sst [smem:[#allocation20_spill]] %s6809_s6 }
  0x2b   :  { %10085 = sst [smem:[#allocation22_spill]] %s6819_s20 }
  0x2c   :  { %s6829_s6 = sld [smem:[%s9926_s0 + %s6609_s7]]   ;;  %s6613_s7 = smov 30  }
  0x2d   :  { %10084 = sst [smem:[#allocation21_spill]] %s6814_s24 }
  0x2e   :  { %s6834_s24 = sld [smem:[%s9926_s0 + %s6610_s15]]   ;;  %s6614_s15 = smov 31  }
  0x2f   :  { %10086 = sst [smem:[#allocation23_spill]] %s6824_s3 }
  0x30   :  { %s6839_s12 = sld [smem:[%s9926_s0 + %s6611_s22]]   ;;  %s6615_s22 = smov 32  }
  0x31   :  { %s6844_s3 = sld [smem:[%s9926_s0 + %s6612_s28]]   ;;  %s6616_s28 = smov 33  }
  0x32   :  { %10087 = sst [smem:[#allocation24_spill]] %s6829_s6 }
  0x33   :  { %s6849_s6 = sld [smem:[%s9926_s0 + %s6613_s7]]   ;;  %s6617_s7 = smov 34  }
  0x34   :  { %10088 = sst [smem:[#allocation25_spill]] %s6834_s24 }
  0x35   :  { %s6854_s24 = sld [smem:[%s9926_s0 + %s6614_s15]]   ;;  %s6618_s15 = smov 35  }
  0x36   :  { %10089 = sst [smem:[#allocation26_spill]] %s6839_s12 }
  0x37   :  { %10090 = sst [smem:[#allocation27_spill]] %s6844_s3 }
  0x38   :  { %s6859_s12 = sld [smem:[%s9926_s0 + %s6615_s22]]   ;;  %s6876_s22 = smov 0  }
  0x39   :  { %10091 = sst [smem:[#allocation28_spill]] %s6849_s6 }
  0x3a   :  { %s6864_s3 = sld [smem:[%s9926_s0 + %s6616_s28]]  }
  0x3b   :  { %10092 = sst [smem:[#allocation29_spill]] %s6854_s24 }
  0x3c   :  { %s6869_s6 = sld [smem:[%s9926_s0 + %s6617_s7]]  }
  0x3d   :  { %s6874_s24 = sld [smem:[%s9926_s0 + %s6618_s15]]  }
  0x3e   :  { %10093 = sst [smem:[#allocation30_spill]] %s6859_s12 }
  0x40   :  { %10094 = sst [smem:[#allocation31_spill]] %s6864_s3 }
  0x42   :  { %10095 = sst [smem:[#allocation32_spill]] %s6869_s6 }
  0x43   :  { %10096 = sst [smem:[#allocation33_spill]] %s6874_s24 }
  0x44 LB: > { %s10097_s13 = sld [smem:[#allocation7_spill]]  ;;  %s6171_s23 = sadd.s32 4294967295, %s6582_s22   ;;  %s6582_s22 = sphi %s6876_s22, %s81_s22  }
  0x45   : > { %s10098_s9 = sld [smem:[#allocation6_spill]]  ;;  %p6175_p0 = scmp.ge.s32.totalorder %s6582_s22, 1 }
  0x46   : > { %10099 = sst [smem:[#allocation34_spill]] %s6582_s22  ;;  %p973_p1 = scmp.lt.s32.totalorder %s6582_s22, 3 }
  0x48   : > { %p974_p2 = pnand %p6175_p0, %p973_p1 }
  0x4a   : > { %977 = sbr.rel (%p974_p2) target bundleno = 3882 (0xf2a), region = 160 }
  0x4f   : > { %p1061_p3 = scmp.lt.s32.totalorder %s6171_s23, 1  ;;  %s10100_s5 = sld [smem:[#allocation5_spill]]  ;;  %vm1114_vm0 = vcmask 1041409   ;;  %vm1117_vm1 = vcmask 1042434   ;;  %vm1120_vm2 = vcmask 1043459   ;;  %vm1123_vm3 = vcmask 1044484  }
  0x50   : > { %vm1126_vm4 = vcmask 1045509   ;;  %vm1129_vm5 = vcmask 1046534   ;;  %vm1132_vm6 = vcmask 1047559   ;;  %s6619_s28 = smov 117   ;;  %s9952_s1 = smov 7   ;;  %vm1711_vm7 = vcmask 39936  }
  0x51   : > { %s10331_s23 = smov (!%p1061_p3, %s6171_s23), 1  ;;  %s6621_s2 = smov 113   ;;  %vm1294_vm8 = vcmask 7168   ;;  %vm1364_vm9 = vcmask 187448   ;;  %vm1433_vm10 = vcmask 367848   ;;  %vm1781_vm11 = vcmask 220248  }
  0x52   : > { %10101 = sst [smem:[#allocation35_spill]] %s10331_s23  ;;  %s6310_s0 = sshll.u32 %s10331_s23, 8  ;;  %vm9983_vm12 = vcmask 400648   ;;  %vm9994_vm13 = vcmask 581048   ;;  %vm1154_vm14 = vcmask 695848   ;;  %vm1502_vm15 = vcmask 548248  }
  0x53   : > { %s9950_s7 = smov 11   ;;  %s9942_s10 = smov 29  }
  0x54   : > { %s9943_s11 = smov 33   ;;  %s6625_s15 = smov 51  }
  0x55   : > { %s6888_s26 = scalar_lea.vmem %s10100_s5, %s6310_s0  ;;  %s6626_s16 = smov 55  }
  0x56   : > { %v1643_v0 = vld [vmem:[%s6888_s26 + $0x8] sm:$0x1]  ;;  %v1644_v1 = vld [vmem:[%s6888_s26 + $0x18] sm:$0x1]  ;;  %v1298_v13 = vld [vmem:[%s6888_s26 + $0x3] sm:$0x1] }
  0x57   : > { %v1645_v2 = vld [vmem:[%s6888_s26 + $0x28] sm:$0x1]  ;;  %v1646_v3 = vld [vmem:[%s6888_s26 + $0x38] sm:$0x1]  ;;  %v1675_v8 = vrot.slane %v1644_v1, 7  ;;  %s6627_s18 = smov 69  }
  0x58   : > { %v1647_v4 = vld [vmem:[%s6888_s26 + $0x48] sm:$0x1]  ;;  %v1648_v5 = vld [vmem:[%s6888_s26 + $0x58] sm:$0x1]  ;;  %v1677_v9 = vrot.slane %v1645_v2, 6  ;;  %v1679_v10 = vrot.slane %v1646_v3, 5 }
  0x59   : > { %v1649_v6 = vld [vmem:[%s6888_s26 + $0x68] sm:$0x1]  ;;  %v1650_v7 = vld [vmem:[%s6888_s26 + $0x78] sm:$0x1]  ;;  %v1681_v11 = vrot.slane %v1647_v4, 4  ;;  %v1683_v12 = vrot.slane %v1648_v5, 3  ;;  %v1676_v14 = vsel %vm1114_vm0, %v1675_v8, %v1643_v0 }
  0x5a   : > { %v1685_v15 = vrot.slane %v1649_v6, 2  ;;  %v1687_v16 = vrot.slane %v1650_v7, 1  ;;  %v1299_v17 = vld [vmem:[%s6888_s26 + $0x13] sm:$0x1]  ;;  %v1300_v18 = vld [vmem:[%s6888_s26 + $0x23] sm:$0x1]  ;;  %v1678_v19 = vsel %vm1117_vm1, %v1677_v9, %v1676_v14 }
  0x5b   : > { %v1301_v20 = vld [vmem:[%s6888_s26 + $0x33] sm:$0x1]  ;;  %v1302_v21 = vld [vmem:[%s6888_s26 + $0x43] sm:$0x1]  ;;  %v1680_v23 = vsel %vm1120_vm2, %v1679_v10, %v1678_v19  ;;  %v1330_v26 = vrot.slane %v1299_v17, 7  ;;  %v1332_v27 = vrot.slane %v1300_v18, 6 }
  0x5c   : > { %v1303_v22 = vld [vmem:[%s6888_s26 + $0x53] sm:$0x1]  ;;  %v1304_v24 = vld [vmem:[%s6888_s26 + $0x63] sm:$0x1]  ;;  %v1682_v28 = vsel %vm1123_vm3, %v1681_v11, %v1680_v23  ;;  %v1334_v29 = vrot.slane %v1301_v20, 5  ;;  %v1336_v30 = vrot.slane %v1302_v21, 4 }
  0x5d   : > { %v1305_v25 = vld [vmem:[%s6888_s26 + $0x73] sm:$0x1]  ;;  %v1338_v31 = vrot.slane %v1303_v22, 3  ;;  %v1226_v32 = vld [vmem:[%s6888_s26 + $0x2] sm:$0x1]  ;;  %v1684_v33 = vsel %vm1126_vm4, %v1683_v12, %v1682_v28  ;;  %v1331_v34 = vsel %vm1114_vm0, %v1330_v26, %v1298_v13  ;;  %v1340_v35 = vrot.slane %v1304_v24, 2 }
  0x5e   : > { %v1342_v36 = vrot.slane %v1305_v25, 1  ;;  %v1227_v37 = vld [vmem:[%s6888_s26 + $0x12] sm:$0x1]  ;;  %v1228_v38 = vld [vmem:[%s6888_s26 + $0x22] sm:$0x1]  ;;  %v1686_v39 = vsel %vm1129_vm5, %v1685_v15, %v1684_v33  ;;  %v1333_v40 = vsel %vm1117_vm1, %v1332_v27, %v1331_v34  ;;  %s6628_s0 = smov 73  }
  0x5f   : > { %v1229_v41 = vld [vmem:[%s6888_s26 + $0x32] sm:$0x1]  ;;  %v1230_v42 = vld [vmem:[%s6888_s26 + $0x42] sm:$0x1]  ;;  %v1688_v44 = vsel %vm1132_vm6, %v1687_v16, %v1686_v39  ;;  %v1335_v45 = vsel %vm1120_vm2, %v1334_v29, %v1333_v40  ;;  %v1258_v48 = vrot.slane %v1227_v37, 7  ;;  %v1260_v49 = vrot.slane %v1228_v38, 6 }
  0x60   : > { %v1231_v43 = vld [vmem:[%s6888_s26 + $0x52] sm:$0x1]  ;;  %v1232_v46 = vld [vmem:[%s6888_s26 + $0x62] sm:$0x1]  ;;  %1703 = vrot.lane.b32.xlu1 %v1688_v44, %s6619_s28  ;;  %v1337_v50 = vsel %vm1123_vm3, %v1336_v30, %v1335_v45  ;;  %v1262_v51 = vrot.slane %v1229_v41, 5  ;;  %v1264_v52 = vrot.slane %v1230_v42, 4 }
  0x61   : > { %v1233_v47 = vld [vmem:[%s6888_s26 + $0x72] sm:$0x1]  ;;  %v1266_v53 = vrot.slane %v1231_v43, 3  ;;  %v1651_v54 = vld [vmem:[%s6888_s26 + $0x88] sm:$0x1]  ;;  %v1339_v55 = vsel %vm1126_vm4, %v1338_v31, %v1337_v50  ;;  %v1259_v56 = vsel %vm1114_vm0, %v1258_v48, %v1226_v32  ;;  %v1268_v57 = vrot.slane %v1232_v46, 2 }
  0x62   : > { %v1270_v58 = vrot.slane %v1233_v47, 1  ;;  %v1652_v59 = vld [vmem:[%s6888_s26 + $0x98] sm:$0x1]  ;;  %v1653_v60 = vld [vmem:[%s6888_s26 + $0xa8] sm:$0x1]  ;;  %v1341_v61 = vsel %vm1129_vm5, %v1340_v35, %v1339_v55  ;;  %v1261_v62 = vsel %vm1117_vm1, %v1260_v49, %v1259_v56  ;;  %s10043_s5 = smov 120  }
  0x63   : > { %v1654_v63 = vld [vmem:[%s6888_s26 + $0xb8] sm:$0x1]  ;;  %v1655_v0 = vld [vmem:[%s6888_s26 + $0xc8] sm:$0x1]  ;;  %v1343_v2 = vsel %vm1132_vm6, %v1342_v36, %v1341_v61  ;;  %v1263_v3 = vsel %vm1120_vm2, %v1262_v51, %v1261_v62  ;;  %v1689_v6 = vrot.slane %v1652_v59, 7  ;;  %v1691_v7 = vrot.slane %v1653_v60, 6 }
  0x64   : > { %v1656_v1 = vld [vmem:[%s6888_s26 + $0xd8] sm:$0x1]  ;;  %v1657_v4 = vld [vmem:[%s6888_s26 + $0xe8] sm:$0x1]  ;;  %1358 = vrot.lane.b32.xlu2 %v1343_v2, %s9952_s1  ;;  %v1265_v8 = vsel %vm1123_vm3, %v1264_v52, %v1263_v3  ;;  %v1693_v9 = vrot.slane %v1654_v63, 5  ;;  %v1695_v10 = vrot.slane %v1655_v0, 4 }
  0x65   : > { %v1658_v5 = vld [vmem:[%s6888_s26 + $0xf8] sm:$0x1]  ;;  %v1697_v11 = vrot.slane %v1656_v1, 3  ;;  %v1306_v12 = vld [vmem:[%s6888_s26 + $0x83] sm:$0x1]  ;;  %v1267_v13 = vsel %vm1126_vm4, %v1266_v53, %v1265_v8  ;;  %v1690_v14 = vsel %vm1114_vm0, %v1689_v6, %v1651_v54  ;;  %v1699_v15 = vrot.slane %v1657_v4, 2 }
  0x66   : > { %v1701_v16 = vrot.slane %v1658_v5, 1  ;;  %v1307_v17 = vld [vmem:[%s6888_s26 + $0x93] sm:$0x1]  ;;  %v1308_v18 = vld [vmem:[%s6888_s26 + $0xa3] sm:$0x1]  ;;  %v1269_v19 = vsel %vm1129_vm5, %v1268_v57, %v1267_v13  ;;  %v1692_v20 = vsel %vm1117_vm1, %v1691_v7, %v1690_v14  ;;  %s10216_s17 = sld [smem:[#allocation8_spill]] }
  0x67   : > { %v1309_v21 = vld [vmem:[%s6888_s26 + $0xb3] sm:$0x1]  ;;  %v1310_v22 = vld [vmem:[%s6888_s26 + $0xc3] sm:$0x1]  ;;  %v1271_v24 = vsel %vm1132_vm6, %v1270_v58, %v1269_v19  ;;  %v1694_v25 = vsel %vm1120_vm2, %v1693_v9, %v1692_v20  ;;  %v1344_v28 = vrot.slane %v1307_v17, 7  ;;  %v1346_v29 = vrot.slane %v1308_v18, 6 }
  0x68   : > { %v1311_v23 = vld [vmem:[%s6888_s26 + $0xd3] sm:$0x1]  ;;  %v1312_v26 = vld [vmem:[%s6888_s26 + $0xe3] sm:$0x1]  ;;  %1286 = vrot.lane.b32.xlu0 %v1271_v24, %s6621_s2  ;;  %v1696_v30 = vsel %vm1123_vm3, %v1695_v10, %v1694_v25  ;;  %v1348_v31 = vrot.slane %v1309_v21, 5  ;;  %v1350_v32 = vrot.slane %v1310_v22, 4 }
  0x69   : > { %v1313_v27 = vld [vmem:[%s6888_s26 + $0xf3] sm:$0x1]  ;;  %v1352_v33 = vrot.slane %v1311_v23, 3  ;;  %v1234_v34 = vld [vmem:[%s6888_s26 + $0x82] sm:$0x1]  ;;  %v1698_v35 = vsel %vm1126_vm4, %v1697_v11, %v1696_v30  ;;  %v1345_v36 = vsel %vm1114_vm0, %v1344_v28, %v1306_v12  ;;  %v1354_v37 = vrot.slane %v1312_v26, 2 }
  0x6a   : > { %v1356_v38 = vrot.slane %v1313_v27, 1  ;;  %v1235_v39 = vld [vmem:[%s6888_s26 + $0x92] sm:$0x1]  ;;  %v1236_v40 = vld [vmem:[%s6888_s26 + $0xa2] sm:$0x1]  ;;  %v1700_v41 = vsel %vm1129_vm5, %v1699_v15, %v1698_v35  ;;  %v1347_v42 = vsel %vm1117_vm1, %v1346_v29, %v1345_v36  ;;  %s10217_s21 = sld [smem:[#allocation9_spill]] }
  0x6b   : > { %v1237_v43 = vld [vmem:[%s6888_s26 + $0xb2] sm:$0x1]  ;;  %v1238_v44 = vld [vmem:[%s6888_s26 + $0xc2] sm:$0x1]  ;;  %v1702_v46 = vsel %vm1132_vm6, %v1701_v16, %v1700_v41  ;;  %v1349_v47 = vsel %vm1120_vm2, %v1348_v31, %v1347_v42  ;;  %v1272_v50 = vrot.slane %v1235_v39, 7  ;;  %v1274_v51 = vrot.slane %v1236_v40, 6 }
  0x6c   : > { %v1239_v45 = vld [vmem:[%s6888_s26 + $0xd2] sm:$0x1]  ;;  %v1240_v48 = vld [vmem:[%s6888_s26 + $0xe2] sm:$0x1]  ;;  %1705 = vrot.lane.b32.xlu1 %v1702_v46, %s6619_s28  ;;  %v1351_v52 = vsel %vm1123_vm3, %v1350_v32, %v1349_v47  ;;  %v1276_v53 = vrot.slane %v1237_v43, 5  ;;  %v1278_v54 = vrot.slane %v1238_v44, 4 }
  0x6d   : > { %v1241_v49 = vld [vmem:[%s6888_s26 + $0xf2] sm:$0x1]  ;;  %v1280_v55 = vrot.slane %v1239_v45, 3  ;;  %v1723_v56 = vld [vmem:[%s6888_s26 + $0x89] sm:$0x1]  ;;  %v1353_v57 = vsel %vm1126_vm4, %v1352_v33, %v1351_v52  ;;  %v1273_v58 = vsel %vm1114_vm0, %v1272_v50, %v1234_v34  ;;  %v1282_v59 = vrot.slane %v1240_v48, 2 }
  0x6e   : > { %v1284_v60 = vrot.slane %v1241_v49, 1  ;;  %v1724_v61 = vld [vmem:[%s6888_s26 + $0x99] sm:$0x1]  ;;  %v1725_v62 = vld [vmem:[%s6888_s26 + $0xa9] sm:$0x1]  ;;  %v1355_v63 = vsel %vm1129_vm5, %v1354_v37, %v1353_v57  ;;  %v1275_v0 = vsel %vm1117_vm1, %v1274_v51, %v1273_v58  ;;  %s6629_s28 = smov 77  }
  0x6f   : > { %v1726_v1 = vld [vmem:[%s6888_s26 + $0xb9] sm:$0x1]  ;;  %v1727_v2 = vld [vmem:[%s6888_s26 + $0xc9] sm:$0x1]  ;;  %v1357_v4 = vsel %vm1132_vm6, %v1356_v38, %v1355_v63  ;;  %v1277_v5 = vsel %vm1120_vm2, %v1276_v53, %v1275_v0  ;;  %v1761_v8 = vrot.slane %v1724_v61, 7  ;;  %v1763_v9 = vrot.slane %v1725_v62, 6 }
  0x70   : > { %v1728_v3 = vld [vmem:[%s6888_s26 + $0xd9] sm:$0x1]  ;;  %v1729_v6 = vld [vmem:[%s6888_s26 + $0xe9] sm:$0x1]  ;;  %1360 = vrot.lane.b32.xlu2 %v1357_v4, %s9952_s1  ;;  %v1279_v10 = vsel %vm1123_vm3, %v1278_v54, %v1277_v5  ;;  %v1765_v11 = vrot.slane %v1726_v1, 5  ;;  %v1767_v12 = vrot.slane %v1727_v2, 4 }
  0x71   : > { %v1730_v7 = vld [vmem:[%s6888_s26 + $0xf9] sm:$0x1]  ;;  %v1769_v13 = vrot.slane %v1728_v3, 3  ;;  %v1367_v14 = vld [vmem:[%s6888_s26 + $0x4] sm:$0x1]  ;;  %v1281_v15 = vsel %vm1126_vm4, %v1280_v55, %v1279_v10  ;;  %v1762_v16 = vsel %vm1114_vm0, %v1761_v8, %v1723_v56  ;;  %v1771_v17 = vrot.slane %v1729_v6, 2 }
  0x72   : > { %v1773_v18 = vrot.slane %v1730_v7, 1  ;;  %v1368_v19 = vld [vmem:[%s6888_s26 + $0x14] sm:$0x1]  ;;  %v1369_v20 = vld [vmem:[%s6888_s26 + $0x24] sm:$0x1]  ;;  %v1283_v21 = vsel %vm1129_vm5, %v1282_v59, %v1281_v15  ;;  %v1764_v22 = vsel %vm1117_vm1, %v1763_v9, %v1762_v16  ;;  %s9958_s1 = smov 126  }
  0x73   : > { %v1370_v23 = vld [vmem:[%s6888_s26 + $0x34] sm:$0x1]  ;;  %v1371_v24 = vld [vmem:[%s6888_s26 + $0x44] sm:$0x1]  ;;  %v1285_v26 = vsel %vm1132_vm6, %v1284_v60, %v1283_v21  ;;  %v1766_v27 = vsel %vm1120_vm2, %v1765_v11, %v1764_v22  ;;  %v1399_v30 = vrot.slane %v1368_v19, 7  ;;  %v1401_v31 = vrot.slane %v1369_v20, 6 }
  0x74   : > { %v1372_v25 = vld [vmem:[%s6888_s26 + $0x54] sm:$0x1]  ;;  %v1373_v28 = vld [vmem:[%s6888_s26 + $0x64] sm:$0x1]  ;;  %1288 = vrot.lane.b32.xlu0 %v1285_v26, %s6621_s2  ;;  %v1768_v32 = vsel %vm1123_vm3, %v1767_v12, %v1766_v27  ;;  %v1403_v33 = vrot.slane %v1370_v23, 5  ;;  %v1405_v34 = vrot.slane %v1371_v24, 4 }
  0x75   : > { %v1374_v29 = vld [vmem:[%s6888_s26 + $0x74] sm:$0x1]  ;;  %v1407_v35 = vrot.slane %v1372_v25, 3  ;;  %v1715_v36 = vld [vmem:[%s6888_s26 + $0x9] sm:$0x1]  ;;  %v1770_v37 = vsel %vm1126_vm4, %v1769_v13, %v1768_v32  ;;  %v1400_v38 = vsel %vm1114_vm0, %v1399_v30, %v1367_v14  ;;  %v1409_v39 = vrot.slane %v1373_v28, 2 }
  0x76   : > { %v1411_v40 = vrot.slane %v1374_v29, 1  ;;  %v1716_v41 = vld [vmem:[%s6888_s26 + $0x19] sm:$0x1]  ;;  %v1717_v42 = vld [vmem:[%s6888_s26 + $0x29] sm:$0x1]  ;;  %v1772_v43 = vsel %vm1129_vm5, %v1771_v17, %v1770_v37  ;;  %v1402_v44 = vsel %vm1117_vm1, %v1401_v31, %v1400_v38  ;;  %s9944_s2 = smov 91  }
  0x77   : > { %v1718_v45 = vld [vmem:[%s6888_s26 + $0x39] sm:$0x1]  ;;  %v1719_v46 = vld [vmem:[%s6888_s26 + $0x49] sm:$0x1]  ;;  %v1774_v48 = vsel %vm1132_vm6, %v1773_v18, %v1772_v43  ;;  %v1404_v49 = vsel %vm1120_vm2, %v1403_v33, %v1402_v44  ;;  %v1747_v52 = vrot.slane %v1716_v41, 7  ;;  %v1749_v53 = vrot.slane %v1717_v42, 6 }
  0x78   : > { %v1720_v47 = vld [vmem:[%s6888_s26 + $0x59] sm:$0x1]  ;;  %v1721_v50 = vld [vmem:[%s6888_s26 + $0x69] sm:$0x1]  ;;  %1777 = vrot.lane.b32.xlu1 %v1774_v48, %s9950_s7  ;;  %v1406_v54 = vsel %vm1123_vm3, %v1405_v34, %v1404_v49  ;;  %v1751_v55 = vrot.slane %v1718_v45, 5  ;;  %v1753_v56 = vrot.slane %v1719_v46, 4 }
  0x79   : > { %v1722_v51 = vld [vmem:[%s6888_s26 + $0x79] sm:$0x1]  ;;  %v1755_v57 = vrot.slane %v1720_v47, 3  ;;  %v1784_v58 = vld [vmem:[%s6888_s26 + $0xa] sm:$0x1]  ;;  %v1408_v59 = vsel %vm1126_vm4, %v1407_v35, %v1406_v54  ;;  %v1748_v60 = vsel %vm1114_vm0, %v1747_v52, %v1715_v36  ;;  %v1757_v61 = vrot.slane %v1721_v50, 2 }
  0x7a   : > { %v1759_v62 = vrot.slane %v1722_v51, 1  ;;  %v1785_v63 = vld [vmem:[%s6888_s26 + $0x1a] sm:$0x1]  ;;  %v1786_v0 = vld [vmem:[%s6888_s26 + $0x2a] sm:$0x1]  ;;  %v1410_v1 = vsel %vm1129_vm5, %v1409_v39, %v1408_v59  ;;  %v1750_v2 = vsel %vm1117_vm1, %v1749_v53, %v1748_v60  ;;  %s6679_s22 = smov 21  }
  0x7b   : > { %v1787_v3 = vld [vmem:[%s6888_s26 + $0x3a] sm:$0x1]  ;;  %v1788_v4 = vld [vmem:[%s6888_s26 + $0x4a] sm:$0x1]  ;;  %v1412_v6 = vsel %vm1132_vm6, %v1411_v40, %v1410_v1  ;;  %v1752_v7 = vsel %vm1120_vm2, %v1751_v55, %v1750_v2  ;;  %v1816_v10 = vrot.slane %v1785_v63, 7  ;;  %v1818_v11 = vrot.slane %v1786_v0, 6 }
  0x7c   : > { %v1789_v5 = vld [vmem:[%s6888_s26 + $0x5a] sm:$0x1]  ;;  %v1790_v8 = vld [vmem:[%s6888_s26 + $0x6a] sm:$0x1]  ;;  %1427 = vrot.lane.b32.xlu2 %v1412_v6, %s9942_s10  ;;  %v1754_v12 = vsel %vm1123_vm3, %v1753_v56, %v1752_v7  ;;  %v1820_v13 = vrot.slane %v1787_v3, 5  ;;  %v1822_v14 = vrot.slane %v1788_v4, 4 }
  0x7d   : > { %v1791_v9 = vld [vmem:[%s6888_s26 + $0x7a] sm:$0x1]  ;;  %v1824_v15 = vrot.slane %v1789_v5, 3  ;;  %v1792_v16 = vld [vmem:[%s6888_s26 + $0x8a] sm:$0x1]  ;;  %v1756_v17 = vsel %vm1126_vm4, %v1755_v57, %v1754_v12  ;;  %v1817_v18 = vsel %vm1114_vm0, %v1816_v10, %v1784_v58  ;;  %v1826_v19 = vrot.slane %v1790_v8, 2 }
  0x7e   : > { %v1828_v20 = vrot.slane %v1791_v9, 1  ;;  %v1793_v21 = vld [vmem:[%s6888_s26 + $0x9a] sm:$0x1]  ;;  %v1794_v22 = vld [vmem:[%s6888_s26 + $0xaa] sm:$0x1]  ;;  %v1758_v23 = vsel %vm1129_vm5, %v1757_v61, %v1756_v17  ;;  %v1819_v24 = vsel %vm1117_vm1, %v1818_v11, %v1817_v18  ;;  %s10218_s24 = smov 19  }
  0x7f   : > { %v1795_v25 = vld [vmem:[%s6888_s26 + $0xba] sm:$0x1]  ;;  %v1796_v26 = vld [vmem:[%s6888_s26 + $0xca] sm:$0x1]  ;;  %v1760_v28 = vsel %vm1132_vm6, %v1759_v62, %v1758_v23  ;;  %v1821_v29 = vsel %vm1120_vm2, %v1820_v13, %v1819_v24  ;;  %v1830_v32 = vrot.slane %v1793_v21, 7  ;;  %v1832_v33 = vrot.slane %v1794_v22, 6 }
  0x80   : > { %v1797_v27 = vld [vmem:[%s6888_s26 + $0xda] sm:$0x1]  ;;  %v1798_v30 = vld [vmem:[%s6888_s26 + $0xea] sm:$0x1]  ;;  %1775 = vrot.lane.b32.xlu0 %v1760_v28, %s9950_s7  ;;  %v1823_v34 = vsel %vm1123_vm3, %v1822_v14, %v1821_v29  ;;  %v1834_v35 = vrot.slane %v1795_v25, 5  ;;  %v1836_v36 = vrot.slane %v1796_v26, 4 }
  0x81   : > { %v1799_v31 = vld [vmem:[%s6888_s26 + $0xfa] sm:$0x1]  ;;  %v1838_v37 = vrot.slane %v1797_v27, 3  ;;  %v1375_v38 = vld [vmem:[%s6888_s26 + $0x84] sm:$0x1]  ;;  %v1825_v39 = vsel %vm1126_vm4, %v1824_v15, %v1823_v34  ;;  %v1831_v40 = vsel %vm1114_vm0, %v1830_v32, %v1792_v16  ;;  %v1840_v41 = vrot.slane %v1798_v30, 2 }
  0x82   : > { %v1842_v42 = vrot.slane %v1799_v31, 1  ;;  %v1376_v43 = vld [vmem:[%s6888_s26 + $0x94] sm:$0x1]  ;;  %v1377_v44 = vld [vmem:[%s6888_s26 + $0xa4] sm:$0x1]  ;;  %v1827_v45 = vsel %vm1129_vm5, %v1826_v19, %v1825_v39  ;;  %v1833_v46 = vsel %vm1117_vm1, %v1832_v33, %v1831_v40  ;;  %s9957_s7 = smov 86  }
  0x83   : > { %v1378_v47 = vld [vmem:[%s6888_s26 + $0xb4] sm:$0x1]  ;;  %v1379_v48 = vld [vmem:[%s6888_s26 + $0xc4] sm:$0x1]  ;;  %v1829_v50 = vsel %vm1132_vm6, %v1828_v20, %v1827_v45  ;;  %v1835_v51 = vsel %vm1120_vm2, %v1834_v35, %v1833_v46  ;;  %v1413_v54 = vrot.slane %v1376_v43, 7  ;;  %v1415_v55 = vrot.slane %v1377_v44, 6 }
  0x84   : > { %v1380_v49 = vld [vmem:[%s6888_s26 + $0xd4] sm:$0x1]  ;;  %v1381_v52 = vld [vmem:[%s6888_s26 + $0xe4] sm:$0x1]  ;;  %1844 = vrot.lane.b32.xlu1 %v1829_v50, %s9943_s11  ;;  %v1837_v56 = vsel %vm1123_vm3, %v1836_v36, %v1835_v51  ;;  %v1417_v57 = vrot.slane %v1378_v47, 5  ;;  %v1419_v58 = vrot.slane %v1379_v48, 4 }
  0x85   : > { %v1382_v53 = vld [vmem:[%s6888_s26 + $0xf4] sm:$0x1]  ;;  %v1421_v59 = vrot.slane %v1380_v49, 3  ;;  %v1444_v60 = vld [vmem:[%s6888_s26 + $0x85] sm:$0x1]  ;;  %v1839_v61 = vsel %vm1126_vm4, %v1838_v37, %v1837_v56  ;;  %v1414_v62 = vsel %vm1114_vm0, %v1413_v54, %v1375_v38  ;;  %v1423_v63 = vrot.slane %v1381_v52, 2 }
  0x86   : > { %v1425_v0 = vrot.slane %v1382_v53, 1  ;;  %v1445_v1 = vld [vmem:[%s6888_s26 + $0x95] sm:$0x1]  ;;  %v1446_v2 = vld [vmem:[%s6888_s26 + $0xa5] sm:$0x1]  ;;  %v1841_v3 = vsel %vm1129_vm5, %v1840_v41, %v1839_v61  ;;  %v1416_v4 = vsel %vm1117_vm1, %v1415_v55, %v1414_v62  ;;  %s6680_s23 = smov 23  }
  0x87   : > { %v1447_v5 = vld [vmem:[%s6888_s26 + $0xb5] sm:$0x1]  ;;  %v1448_v6 = vld [vmem:[%s6888_s26 + $0xc5] sm:$0x1]  ;;  %v1843_v8 = vsel %vm1132_vm6, %v1842_v42, %v1841_v3  ;;  %v1418_v9 = vsel %vm1120_vm2, %v1417_v57, %v1416_v4  ;;  %v1482_v12 = vrot.slane %v1445_v1, 7  ;;  %v1484_v13 = vrot.slane %v1446_v2, 6 }
  0x88   : > { %v1449_v7 = vld [vmem:[%s6888_s26 + $0xd5] sm:$0x1]  ;;  %v1450_v10 = vld [vmem:[%s6888_s26 + $0xe5] sm:$0x1]  ;;  %1846 = vrot.lane.b32.xlu2 %v1843_v8, %s9943_s11  ;;  %v1420_v14 = vsel %vm1123_vm3, %v1419_v58, %v1418_v9  ;;  %v1486_v15 = vrot.slane %v1447_v5, 5  ;;  %v1488_v16 = vrot.slane %v1448_v6, 4 }
  0x89   : > { %v1451_v11 = vld [vmem:[%s6888_s26 + $0xf5] sm:$0x1]  ;;  %v1490_v17 = vrot.slane %v1449_v7, 3  ;;  %v1853_v18 = vld [vmem:[%s6888_s26 + $0xb] sm:$0x1]  ;;  %v1422_v19 = vsel %vm1126_vm4, %v1421_v59, %v1420_v14  ;;  %v1483_v20 = vsel %vm1114_vm0, %v1482_v12, %v1444_v60  ;;  %v1492_v21 = vrot.slane %v1450_v10, 2 }
  0x8a   : > { %v1494_v22 = vrot.slane %v1451_v11, 1  ;;  %v1854_v23 = vld [vmem:[%s6888_s26 + $0x1b] sm:$0x1]  ;;  %v1855_v24 = vld [vmem:[%s6888_s26 + $0x2b] sm:$0x1]  ;;  %v1424_v25 = vsel %vm1129_vm5, %v1423_v63, %v1422_v19  ;;  %v1485_v26 = vsel %vm1117_vm1, %v1484_v13, %v1483_v20  ;;  %s9970_s11 = smov 108  }
  0x8b   : > { %v1856_v27 = vld [vmem:[%s6888_s26 + $0x3b] sm:$0x1]  ;;  %v1857_v28 = vld [vmem:[%s6888_s26 + $0x4b] sm:$0x1]  ;;  %v1426_v30 = vsel %vm1132_vm6, %v1425_v0, %v1424_v25  ;;  %v1487_v31 = vsel %vm1120_vm2, %v1486_v15, %v1485_v26  ;;  %v1885_v34 = vrot.slane %v1854_v23, 7  ;;  %v1887_v35 = vrot.slane %v1855_v24, 6 }
  0x8c   : > { %v1858_v29 = vld [vmem:[%s6888_s26 + $0x5b] sm:$0x1]  ;;  %v1859_v32 = vld [vmem:[%s6888_s26 + $0x6b] sm:$0x1]  ;;  %1429 = vrot.lane.b32.xlu0 %v1426_v30, %s9942_s10  ;;  %v1489_v36 = vsel %vm1123_vm3, %v1488_v16, %v1487_v31  ;;  %v1889_v37 = vrot.slane %v1856_v27, 5  ;;  %v1891_v38 = vrot.slane %v1857_v28, 4 }
  0x8d   : > { %v1860_v33 = vld [vmem:[%s6888_s26 + $0x7b] sm:$0x1]  ;;  %v1893_v39 = vrot.slane %v1858_v29, 3  ;;  %v1436_v40 = vld [vmem:[%s6888_s26 + $0x5] sm:$0x1]  ;;  %v1491_v41 = vsel %vm1126_vm4, %v1490_v17, %v1489_v36  ;;  %v1886_v42 = vsel %vm1114_vm0, %v1885_v34, %v1853_v18  ;;  %v1895_v43 = vrot.slane %v1859_v32, 2 }
  0x8e   : > { %v1897_v44 = vrot.slane %v1860_v33, 1  ;;  %v1437_v45 = vld [vmem:[%s6888_s26 + $0x15] sm:$0x1]  ;;  %v1438_v46 = vld [vmem:[%s6888_s26 + $0x25] sm:$0x1]  ;;  %v1493_v47 = vsel %vm1129_vm5, %v1492_v21, %v1491_v41  ;;  %v1888_v48 = vsel %vm1117_vm1, %v1887_v35, %v1886_v42  ;;  %s6639_s10 = smov 84  }
  0x8f   : > { %v1439_v49 = vld [vmem:[%s6888_s26 + $0x35] sm:$0x1]  ;;  %v1440_v50 = vld [vmem:[%s6888_s26 + $0x45] sm:$0x1]  ;;  %v1495_v52 = vsel %vm1132_vm6, %v1494_v22, %v1493_v47  ;;  %v1890_v53 = vsel %vm1120_vm2, %v1889_v37, %v1888_v48  ;;  %v1468_v56 = vrot.slane %v1437_v45, 7  ;;  %v1470_v57 = vrot.slane %v1438_v46, 6 }
  0x90   : > { %v1441_v51 = vld [vmem:[%s6888_s26 + $0x55] sm:$0x1]  ;;  %v1442_v54 = vld [vmem:[%s6888_s26 + $0x65] sm:$0x1]  ;;  %1498 = vrot.lane.b32.xlu1 %v1495_v52, %s6625_s15  ;;  %v1892_v58 = vsel %vm1123_vm3, %v1891_v38, %v1890_v53  ;;  %v1472_v59 = vrot.slane %v1439_v49, 5  ;;  %v1474_v60 = vrot.slane %v1440_v50, 4 }
  0x91   : > { %v1443_v55 = vld [vmem:[%s6888_s26 + $0x75] sm:$0x1]  ;;  %v1476_v61 = vrot.slane %v1441_v51, 3  ;;  %v1861_v62 = vld [vmem:[%s6888_s26 + $0x8b] sm:$0x1]  ;;  %v1894_v63 = vsel %vm1126_vm4, %v1893_v39, %v1892_v58  ;;  %v1469_v0 = vsel %vm1114_vm0, %v1468_v56, %v1436_v40  ;;  %v1478_v1 = vrot.slane %v1442_v54, 2 }
  0x92   : > { %v1480_v2 = vrot.slane %v1443_v55, 1  ;;  %v1862_v3 = vld [vmem:[%s6888_s26 + $0x9b] sm:$0x1]  ;;  %v1863_v4 = vld [vmem:[%s6888_s26 + $0xab] sm:$0x1]  ;;  %v1896_v5 = vsel %vm1129_vm5, %v1895_v43, %v1894_v63  ;;  %v1471_v6 = vsel %vm1117_vm1, %v1470_v57, %v1469_v0  ;;  %s6681_s12 = smov 31  }
  0x93   : > { %v1864_v7 = vld [vmem:[%s6888_s26 + $0xbb] sm:$0x1]  ;;  %v1865_v8 = vld [vmem:[%s6888_s26 + $0xcb] sm:$0x1]  ;;  %v1898_v10 = vsel %vm1132_vm6, %v1897_v44, %v1896_v5  ;;  %v1473_v11 = vsel %vm1120_vm2, %v1472_v59, %v1471_v6  ;;  %v1899_v14 = vrot.slane %v1862_v3, 7  ;;  %v1901_v15 = vrot.slane %v1863_v4, 6 }
  0x94   : > { %v1866_v9 = vld [vmem:[%s6888_s26 + $0xdb] sm:$0x1]  ;;  %v1867_v12 = vld [vmem:[%s6888_s26 + $0xeb] sm:$0x1]  ;;  %1913 = vrot.lane.b32.xlu2 %v1898_v10, %s6626_s16  ;;  %v1475_v16 = vsel %vm1123_vm3, %v1474_v60, %v1473_v11  ;;  %v1903_v17 = vrot.slane %v1864_v7, 5  ;;  %v1905_v18 = vrot.slane %v1865_v8, 4 }
  0x95   : > { %v1868_v13 = vld [vmem:[%s6888_s26 + $0xfb] sm:$0x1]  ;;  %v1907_v19 = vrot.slane %v1866_v9, 3  ;;  %v1089_v20 = vld [vmem:[%s6888_s26 + $0x80] sm:$0x1]  ;;  %v1477_v21 = vsel %vm1126_vm4, %v1476_v61, %v1475_v16  ;;  %v1900_v22 = vsel %vm1114_vm0, %v1899_v14, %v1861_v62  ;;  %v1909_v23 = vrot.slane %v1867_v12, 2 }
  0x96   : > { %v1911_v24 = vrot.slane %v1868_v13, 1  ;;  %v1090_v25 = vld [vmem:[%s6888_s26 + $0x90] sm:$0x1]  ;;  %v1091_v26 = vld [vmem:[%s6888_s26 + $0xa0] sm:$0x1]  ;;  %v1479_v27 = vsel %vm1129_vm5, %v1478_v1, %v1477_v21  ;;  %v1902_v28 = vsel %vm1117_vm1, %v1901_v15, %v1900_v22  ;;  %s6682_s3 = smov 25  }
  0x97   : > { %v1092_v29 = vld [vmem:[%s6888_s26 + $0xb0] sm:$0x1]  ;;  %v1093_v30 = vld [vmem:[%s6888_s26 + $0xc0] sm:$0x1]  ;;  %v1481_v32 = vsel %vm1132_vm6, %v1480_v2, %v1479_v27  ;;  %v1904_v33 = vsel %vm1120_vm2, %v1903_v17, %v1902_v28  ;;  %v1134_v36 = vrot.slane %v1090_v25, 7  ;;  %v1136_v37 = vrot.slane %v1091_v26, 6 }
  0x98   : > { %v1094_v31 = vld [vmem:[%s6888_s26 + $0xd0] sm:$0x1]  ;;  %v1095_v34 = vld [vmem:[%s6888_s26 + $0xe0] sm:$0x1]  ;;  %1496 = vrot.lane.b32.xlu0 %v1481_v32, %s6625_s15  ;;  %v1906_v38 = vsel %vm1123_vm3, %v1905_v18, %v1904_v33  ;;  %v1138_v39 = vrot.slane %v1092_v29, 5  ;;  %v1140_v40 = vrot.slane %v1093_v30, 4 }
  0x99   : > { %v1096_v35 = vld [vmem:[%s6888_s26 + $0xf0] sm:$0x1]  ;;  %v1142_v41 = vrot.slane %v1094_v31, 3  ;;  %v1081_v42 = vld [vmem:[%s6888_s26] sm:$0x1]  ;;  %v1908_v43 = vsel %vm1126_vm4, %v1907_v19, %v1906_v38  ;;  %v1135_v44 = vsel %vm1114_vm0, %v1134_v36, %v1089_v20  ;;  %v1144_v45 = vrot.slane %v1095_v34, 2 }
  0x9a   : > { %v1146_v46 = vrot.slane %v1096_v35, 1  ;;  %v1082_v47 = vld [vmem:[%s6888_s26 + $0x10] sm:$0x1]  ;;  %v1083_v48 = vld [vmem:[%s6888_s26 + $0x20] sm:$0x1]  ;;  %v1910_v49 = vsel %vm1129_vm5, %v1909_v23, %v1908_v43  ;;  %v1137_v50 = vsel %vm1117_vm1, %v1136_v37, %v1135_v44  ;;  %s9946_s15 = smov 95  }
  0x9b   : > { %v1084_v51 = vld [vmem:[%s6888_s26 + $0x30] sm:$0x1]  ;;  %v1085_v52 = vld [vmem:[%s6888_s26 + $0x40] sm:$0x1]  ;;  %v1912_v54 = vsel %vm1132_vm6, %v1911_v24, %v1910_v49  ;;  %v1139_v55 = vsel %vm1120_vm2, %v1138_v39, %v1137_v50  ;;  %v1113_v58 = vrot.slane %v1082_v47, 7  ;;  %v1116_v59 = vrot.slane %v1083_v48, 6 }
  0x9c   : > { %v1086_v53 = vld [vmem:[%s6888_s26 + $0x50] sm:$0x1]  ;;  %v1087_v56 = vld [vmem:[%s6888_s26 + $0x60] sm:$0x1]  ;;  %v1141_v60 = vsel %vm1123_vm3, %v1140_v40, %v1139_v55  ;;  %v1119_v61 = vrot.slane %v1084_v51, 5  ;;  %v1122_v62 = vrot.slane %v1085_v52, 4 }
  0x9d   : > { %v1088_v57 = vld [vmem:[%s6888_s26 + $0x70] sm:$0x1]  ;;  %v1125_v63 = vrot.slane %v1086_v53, 3  ;;  %v1505_v0 = vld [vmem:[%s6888_s26 + $0x6] sm:$0x1]  ;;  %v1143_v1 = vsel %vm1126_vm4, %v1142_v41, %v1141_v60  ;;  %v1115_v2 = vsel %vm1114_vm0, %v1113_v58, %v1081_v42  ;;  %v1128_v3 = vrot.slane %v1087_v56, 2 }
  0x9e   : > { %v1131_v4 = vrot.slane %v1088_v57, 1  ;;  %v1506_v5 = vld [vmem:[%s6888_s26 + $0x16] sm:$0x1]  ;;  %v1507_v6 = vld [vmem:[%s6888_s26 + $0x26] sm:$0x1]  ;;  %v1145_v7 = vsel %vm1129_vm5, %v1144_v45, %v1143_v1  ;;  %v1118_v8 = vsel %vm1117_vm1, %v1116_v59, %v1115_v2  ;;  %s6683_s6 = smov 27  }
  0x9f   : > { %v1508_v9 = vld [vmem:[%s6888_s26 + $0x36] sm:$0x1]  ;;  %v1509_v10 = vld [vmem:[%s6888_s26 + $0x46] sm:$0x1]  ;;  %v1147_v12 = vsel %vm1132_vm6, %v1146_v46, %v1145_v7  ;;  %v1121_v13 = vsel %vm1120_vm2, %v1119_v61, %v1118_v8  ;;  %v1537_v16 = vrot.slane %v1506_v5, 7  ;;  %v1539_v17 = vrot.slane %v1507_v6, 6 }
  0xa0   : > { %v1510_v11 = vld [vmem:[%s6888_s26 + $0x56] sm:$0x1]  ;;  %v1511_v14 = vld [vmem:[%s6888_s26 + $0x66] sm:$0x1]  ;;  %1915 = vrot.lane.b32.xlu0 %v1912_v54, %s6626_s16  ;;  %1150 = vrot.lane.b32.xlu2 %v1147_v12, %s6627_s18  ;;  %v1124_v18 = vsel %vm1123_vm3, %v1122_v62, %v1121_v13  ;;  %v1541_v19 = vrot.slane %v1508_v9, 5  ;;  %v1543_v20 = vrot.slane %v1509_v10, 4 }
  0xa1   : > { %v1512_v15 = vld [vmem:[%s6888_s26 + $0x76] sm:$0x1]  ;;  %v1545_v21 = vrot.slane %v1510_v11, 3  ;;  %v1922_v22 = vld [vmem:[%s6888_s26 + $0xc] sm:$0x1]  ;;  %v1127_v23 = vsel %vm1126_vm4, %v1125_v63, %v1124_v18  ;;  %v1538_v24 = vsel %vm1114_vm0, %v1537_v16, %v1505_v0  ;;  %v1547_v25 = vrot.slane %v1511_v14, 2 }
  0xa2   : > { %v1549_v26 = vrot.slane %v1512_v15, 1  ;;  %v1923_v27 = vld [vmem:[%s6888_s26 + $0x1c] sm:$0x1]  ;;  %v1924_v28 = vld [vmem:[%s6888_s26 + $0x2c] sm:$0x1]  ;;  %v1130_v29 = vsel %vm1129_vm5, %v1128_v3, %v1127_v23  ;;  %v1540_v30 = vsel %vm1117_vm1, %v1539_v17, %v1538_v24  ;;  %s9948_s16 = smov 99  }
  0xa3   : > { %v1925_v31 = vld [vmem:[%s6888_s26 + $0x3c] sm:$0x1]  ;;  %v1926_v32 = vld [vmem:[%s6888_s26 + $0x4c] sm:$0x1]  ;;  %v1133_v34 = vsel %vm1132_vm6, %v1131_v4, %v1130_v29  ;;  %v1542_v35 = vsel %vm1120_vm2, %v1541_v19, %v1540_v30  ;;  %v1954_v38 = vrot.slane %v1923_v27, 7  ;;  %v1956_v39 = vrot.slane %v1924_v28, 6 }
  0xa4   : > { %v1927_v33 = vld [vmem:[%s6888_s26 + $0x5c] sm:$0x1]  ;;  %v1928_v36 = vld [vmem:[%s6888_s26 + $0x6c] sm:$0x1]  ;;  %1148 = vrot.lane.b32.xlu1 %v1133_v34, %s6627_s18  ;;  %v1544_v40 = vsel %vm1123_vm3, %v1543_v20, %v1542_v35  ;;  %v1958_v41 = vrot.slane %v1925_v31, 5  ;;  %v1960_v42 = vrot.slane %v1926_v32, 4 }
  0xa5   : > { %v1929_v37 = vld [vmem:[%s6888_s26 + $0x7c] sm:$0x1]  ;;  %v1962_v43 = vrot.slane %v1927_v33, 3  ;;  %v1513_v44 = vld [vmem:[%s6888_s26 + $0x86] sm:$0x1]  ;;  %v1546_v45 = vsel %vm1126_vm4, %v1545_v21, %v1544_v40  ;;  %v1955_v46 = vsel %vm1114_vm0, %v1954_v38, %v1922_v22  ;;  %v1964_v47 = vrot.slane %v1928_v36, 2 }
  0xa6   : > { %v1966_v48 = vrot.slane %v1929_v37, 1  ;;  %v1514_v49 = vld [vmem:[%s6888_s26 + $0x96] sm:$0x1]  ;;  %v1515_v50 = vld [vmem:[%s6888_s26 + $0xa6] sm:$0x1]  ;;  %v1548_v51 = vsel %vm1129_vm5, %v1547_v25, %v1546_v45  ;;  %v1957_v52 = vsel %vm1117_vm1, %v1956_v39, %v1955_v46  ;;  %s6633_s18 = smov 121  }
  0xa7   : > { %v1516_v53 = vld [vmem:[%s6888_s26 + $0xb6] sm:$0x1]  ;;  %v1517_v54 = vld [vmem:[%s6888_s26 + $0xc6] sm:$0x1]  ;;  %v1550_v56 = vsel %vm1132_vm6, %v1549_v26, %v1548_v51  ;;  %v1959_v57 = vsel %vm1120_vm2, %v1958_v41, %v1957_v52  ;;  %v1551_v60 = vrot.slane %v1514_v49, 7  ;;  %v1553_v61 = vrot.slane %v1515_v50, 6 }
  0xa8   : > { %v1518_v55 = vld [vmem:[%s6888_s26 + $0xd6] sm:$0x1]  ;;  %v1519_v58 = vld [vmem:[%s6888_s26 + $0xe6] sm:$0x1]  ;;  %1565 = vrot.lane.b32.xlu0 %v1550_v56, %s6628_s0  ;;  %v1961_v62 = vsel %vm1123_vm3, %v1960_v42, %v1959_v57  ;;  %v1555_v63 = vrot.slane %v1516_v53, 5  ;;  %v1557_v0 = vrot.slane %v1517_v54, 4 }
  0xa9   : > { %v1520_v59 = vld [vmem:[%s6888_s26 + $0xf6] sm:$0x1]  ;;  %v1559_v1 = vrot.slane %v1518_v55, 3  ;;  %v1930_v2 = vld [vmem:[%s6888_s26 + $0x8c] sm:$0x1]  ;;  %v1963_v3 = vsel %vm1126_vm4, %v1962_v43, %v1961_v62  ;;  %v1552_v4 = vsel %vm1114_vm0, %v1551_v60, %v1513_v44  ;;  %v1561_v5 = vrot.slane %v1519_v58, 2 }
  0xaa   : > { %v1563_v6 = vrot.slane %v1520_v59, 1  ;;  %v1931_v7 = vld [vmem:[%s6888_s26 + $0x9c] sm:$0x1]  ;;  %v1932_v8 = vld [vmem:[%s6888_s26 + $0xac] sm:$0x1]  ;;  %v1965_v9 = vsel %vm1129_vm5, %v1964_v47, %v1963_v3  ;;  %v1554_v10 = vsel %vm1117_vm1, %v1553_v61, %v1552_v4  ;;  %s6685_s20 = smov 43  }
  0xab   : > { %v1933_v11 = vld [vmem:[%s6888_s26 + $0xbc] sm:$0x1]  ;;  %v1934_v12 = vld [vmem:[%s6888_s26 + $0xcc] sm:$0x1]  ;;  %v1967_v14 = vsel %vm1132_vm6, %v1966_v48, %v1965_v9  ;;  %v1556_v15 = vsel %vm1120_vm2, %v1555_v63, %v1554_v10  ;;  %v1968_v18 = vrot.slane %v1931_v7, 7  ;;  %v1970_v19 = vrot.slane %v1932_v8, 6 }
  0xac   : > { %v1935_v13 = vld [vmem:[%s6888_s26 + $0xdc] sm:$0x1]  ;;  %v1936_v16 = vld [vmem:[%s6888_s26 + $0xec] sm:$0x1]  ;;  %1982 = vrot.lane.b32.xlu2 %v1967_v14, %s6629_s28  ;;  %v1558_v20 = vsel %vm1123_vm3, %v1557_v0, %v1556_v15  ;;  %v1972_v21 = vrot.slane %v1933_v11, 5  ;;  %v1974_v22 = vrot.slane %v1934_v12, 4 }
  0xad   : > { %v1937_v17 = vld [vmem:[%s6888_s26 + $0xfc] sm:$0x1]  ;;  %v1976_v23 = vrot.slane %v1935_v13, 3  ;;  %v1165_v24 = vld [vmem:[%s6888_s26 + $0x81] sm:$0x1]  ;;  %v1560_v25 = vsel %vm1126_vm4, %v1559_v1, %v1558_v20  ;;  %v1969_v26 = vsel %vm1114_vm0, %v1968_v18, %v1930_v2  ;;  %v1978_v27 = vrot.slane %v1936_v16, 2 }
  0xae   : > { %v1980_v28 = vrot.slane %v1937_v17, 1  ;;  %v1166_v29 = vld [vmem:[%s6888_s26 + $0x91] sm:$0x1]  ;;  %v1167_v30 = vld [vmem:[%s6888_s26 + $0xa1] sm:$0x1]  ;;  %v1562_v31 = vsel %vm1129_vm5, %v1561_v5, %v1560_v25  ;;  %v1971_v32 = vsel %vm1117_vm1, %v1970_v19, %v1969_v26  ;;  %s6686_s4 = smov 41  }
  0xaf   : > { %v1168_v33 = vld [vmem:[%s6888_s26 + $0xb1] sm:$0x1]  ;;  %v1169_v34 = vld [vmem:[%s6888_s26 + $0xc1] sm:$0x1]  ;;  %v1564_v36 = vsel %vm1132_vm6, %v1563_v6, %v1562_v31  ;;  %v1973_v37 = vsel %vm1120_vm2, %v1972_v21, %v1971_v32  ;;  %v1203_v40 = vrot.slane %v1166_v29, 7  ;;  %v1205_v41 = vrot.slane %v1167_v30, 6 }
  0xb0   : > { %v1170_v35 = vld [vmem:[%s6888_s26 + $0xd1] sm:$0x1]  ;;  %v1171_v38 = vld [vmem:[%s6888_s26 + $0xe1] sm:$0x1]  ;;  %1567 = vrot.lane.b32.xlu1 %v1564_v36, %s6628_s0  ;;  %v1975_v42 = vsel %vm1123_vm3, %v1974_v22, %v1973_v37  ;;  %v1207_v43 = vrot.slane %v1168_v33, 5  ;;  %v1209_v44 = vrot.slane %v1169_v34, 4 }
  0xb1   : > { %v1172_v39 = vld [vmem:[%s6888_s26 + $0xf1] sm:$0x1]  ;;  %v1211_v45 = vrot.slane %v1170_v35, 3  ;;  %v1157_v46 = vld [vmem:[%s6888_s26 + $0x1] sm:$0x1]  ;;  %v1977_v47 = vsel %vm1126_vm4, %v1976_v23, %v1975_v42  ;;  %v1204_v48 = vsel %vm1114_vm0, %v1203_v40, %v1165_v24  ;;  %v1213_v49 = vrot.slane %v1171_v38, 2 }
  0xb2   : > { %v1215_v50 = vrot.slane %v1172_v39, 1  ;;  %v1158_v51 = vld [vmem:[%s6888_s26 + $0x11] sm:$0x1]  ;;  %v1159_v52 = vld [vmem:[%s6888_s26 + $0x21] sm:$0x1]  ;;  %v1979_v53 = vsel %vm1129_vm5, %v1978_v27, %v1977_v47  ;;  %v1206_v54 = vsel %vm1117_vm1, %v1205_v41, %v1204_v48  ;;  %s9954_s0 = smov 15  }
  0xb3   : > { %v1160_v55 = vld [vmem:[%s6888_s26 + $0x31] sm:$0x1]  ;;  %v1161_v56 = vld [vmem:[%s6888_s26 + $0x41] sm:$0x1]  ;;  %v1981_v58 = vsel %vm1132_vm6, %v1980_v28, %v1979_v53  ;;  %v1208_v59 = vsel %vm1120_vm2, %v1207_v43, %v1206_v54  ;;  %v1189_v62 = vrot.slane %v1158_v51, 7  ;;  %v1191_v63 = vrot.slane %v1159_v52, 6 }
  0xb4   : > { %v1162_v57 = vld [vmem:[%s6888_s26 + $0x51] sm:$0x1]  ;;  %v1163_v60 = vld [vmem:[%s6888_s26 + $0x61] sm:$0x1]  ;;  %1984 = vrot.lane.b32.xlu0 %v1981_v58, %s6629_s28  ;;  %v1210_v0 = vsel %vm1123_vm3, %v1209_v44, %v1208_v59  ;;  %v1193_v1 = vrot.slane %v1160_v55, 5  ;;  %v1195_v2 = vrot.slane %v1161_v56, 4 }
  0xb5   : > { %v1164_v61 = vld [vmem:[%s6888_s26 + $0x71] sm:$0x1]  ;;  %v1197_v3 = vrot.slane %v1162_v57, 3  ;;  %v1574_v4 = vld [vmem:[%s6888_s26 + $0x7] sm:$0x1]  ;;  %v1212_v5 = vsel %vm1126_vm4, %v1211_v45, %v1210_v0  ;;  %v1190_v6 = vsel %vm1114_vm0, %v1189_v62, %v1157_v46  ;;  %v1199_v7 = vrot.slane %v1163_v60, 2 }
  0xb6   : > { %v1201_v8 = vrot.slane %v1164_v61, 1  ;;  %v1575_v9 = vld [vmem:[%s6888_s26 + $0x17] sm:$0x1]  ;;  %v1576_v10 = vld [vmem:[%s6888_s26 + $0x27] sm:$0x1]  ;;  %v1214_v11 = vsel %vm1129_vm5, %v1213_v49, %v1212_v5  ;;  %v1192_v12 = vsel %vm1117_vm1, %v1191_v63, %v1190_v6  ;;  %s6637_s28 = smov 83  }
  0xb7   : > { %v1577_v13 = vld [vmem:[%s6888_s26 + $0x37] sm:$0x1]  ;;  %v1578_v14 = vld [vmem:[%s6888_s26 + $0x47] sm:$0x1]  ;;  %v1216_v16 = vsel %vm1132_vm6, %v1215_v50, %v1214_v11  ;;  %v1194_v17 = vsel %vm1120_vm2, %v1193_v1, %v1192_v12  ;;  %v1606_v20 = vrot.slane %v1575_v9, 7  ;;  %v1608_v21 = vrot.slane %v1576_v10, 6 }
  0xb8   : > { %v1579_v15 = vld [vmem:[%s6888_s26 + $0x57] sm:$0x1]  ;;  %v1580_v18 = vld [vmem:[%s6888_s26 + $0x67] sm:$0x1]  ;;  %1219 = vrot.lane.b32.xlu2 %v1216_v16, %s9944_s2  ;;  %v1196_v22 = vsel %vm1123_vm3, %v1195_v2, %v1194_v17  ;;  %v1610_v23 = vrot.slane %v1577_v13, 5  ;;  %v1612_v24 = vrot.slane %v1578_v14, 4 }
  0xb9   : > { %v1581_v19 = vld [vmem:[%s6888_s26 + $0x77] sm:$0x1]  ;;  %v1614_v25 = vrot.slane %v1579_v15, 3  ;;  %v1582_v26 = vld [vmem:[%s6888_s26 + $0x87] sm:$0x1]  ;;  %v1198_v27 = vsel %vm1126_vm4, %v1197_v3, %v1196_v22  ;;  %v1607_v28 = vsel %vm1114_vm0, %v1606_v20, %v1574_v4  ;;  %v1616_v29 = vrot.slane %v1580_v18, 2 }
  0xba   : > { %v1618_v30 = vrot.slane %v1581_v19, 1  ;;  %v1583_v31 = vld [vmem:[%s6888_s26 + $0x97] sm:$0x1]  ;;  %v1584_v32 = vld [vmem:[%s6888_s26 + $0xa7] sm:$0x1]  ;;  %v1200_v33 = vsel %vm1129_vm5, %v1199_v7, %v1198_v27  ;;  %v1609_v34 = vsel %vm1117_vm1, %v1608_v21, %v1607_v28 }
  0xbb   : > { %v1585_v35 = vld [vmem:[%s6888_s26 + $0xb7] sm:$0x1]  ;;  %v1586_v36 = vld [vmem:[%s6888_s26 + $0xc7] sm:$0x1]  ;;  %v1202_v38 = vsel %vm1132_vm6, %v1201_v8, %v1200_v33  ;;  %v1611_v39 = vsel %vm1120_vm2, %v1610_v23, %v1609_v34  ;;  %v1620_v42 = vrot.slane %v1583_v31, 7  ;;  %v1622_v43 = vrot.slane %v1584_v32, 6 }
  0xbc   : > { %v1587_v37 = vld [vmem:[%s6888_s26 + $0xd7] sm:$0x1]  ;;  %v1588_v40 = vld [vmem:[%s6888_s26 + $0xe7] sm:$0x1]  ;;  %1217 = vrot.lane.b32.xlu1 %v1202_v38, %s9944_s2  ;;  %v1613_v44 = vsel %vm1123_vm3, %v1612_v24, %v1611_v39  ;;  %v1624_v45 = vrot.slane %v1585_v35, 5  ;;  %v1626_v46 = vrot.slane %v1586_v36, 4 }
  0xbd   : > { %v1589_v41 = vld [vmem:[%s6888_s26 + $0xf7] sm:$0x1]  ;;  %v1628_v47 = vrot.slane %v1587_v37, 3  ;;  %v1999_v48 = vld [vmem:[%s6888_s26 + $0x8d] sm:$0x1]  ;;  %v1615_v49 = vsel %vm1126_vm4, %v1614_v25, %v1613_v44  ;;  %v1621_v50 = vsel %vm1114_vm0, %v1620_v42, %v1582_v26  ;;  %v1630_v51 = vrot.slane %v1588_v40, 2 }
  0xbe   : > { %v1632_v52 = vrot.slane %v1589_v41, 1  ;;  %v2000_v53 = vld [vmem:[%s6888_s26 + $0x9d] sm:$0x1]  ;;  %v2001_v54 = vld [vmem:[%s6888_s26 + $0xad] sm:$0x1]  ;;  %v1617_v55 = vsel %vm1129_vm5, %v1616_v29, %v1615_v49  ;;  %v1623_v56 = vsel %vm1117_vm1, %v1622_v43, %v1621_v50  ;;  %s9972_s2 = smov 124  }
  0xbf   : > { %v2002_v57 = vld [vmem:[%s6888_s26 + $0xbd] sm:$0x1]  ;;  %v2003_v58 = vld [vmem:[%s6888_s26 + $0xcd] sm:$0x1]  ;;  %v1619_v60 = vsel %vm1132_vm6, %v1618_v30, %v1617_v55  ;;  %v1625_v61 = vsel %vm1120_vm2, %v1624_v45, %v1623_v56  ;;  %v2037_v0 = vrot.slane %v2000_v53, 7  ;;  %v2039_v1 = vrot.slane %v2001_v54, 6 }
  0xc0   : > { %v2004_v59 = vld [vmem:[%s6888_s26 + $0xdd] sm:$0x1]  ;;  %v2005_v62 = vld [vmem:[%s6888_s26 + $0xed] sm:$0x1]  ;;  %1634 = vrot.lane.b32.xlu0 %v1619_v60, %s9946_s15  ;;  %v1627_v2 = vsel %vm1123_vm3, %v1626_v46, %v1625_v61  ;;  %v2041_v3 = vrot.slane %v2002_v57, 5  ;;  %v2043_v4 = vrot.slane %v2003_v58, 4 }
  0xc1   : > { %v2006_v63 = vld [vmem:[%s6888_s26 + $0xfd] sm:$0x1]  ;;  %v2045_v5 = vrot.slane %v2004_v59, 3  ;;  %v2060_v6 = vld [vmem:[%s6888_s26 + $0xe] sm:$0x1]  ;;  %v1629_v7 = vsel %vm1126_vm4, %v1628_v47, %v1627_v2  ;;  %v2038_v8 = vsel %vm1114_vm0, %v2037_v0, %v1999_v48  ;;  %v2047_v9 = vrot.slane %v2005_v62, 2 }
  0xc2   : > { %v2049_v10 = vrot.slane %v2006_v63, 1  ;;  %v2061_v11 = vld [vmem:[%s6888_s26 + $0x1e] sm:$0x1]  ;;  %v2062_v12 = vld [vmem:[%s6888_s26 + $0x2e] sm:$0x1]  ;;  %v1631_v13 = vsel %vm1129_vm5, %v1630_v51, %v1629_v7  ;;  %v2040_v14 = vsel %vm1117_vm1, %v2039_v1, %v2038_v8  ;;  %v7341_v51 = vpop.permute.xlu2 %1358 }
  0xc3   : > { %v2063_v15 = vld [vmem:[%s6888_s26 + $0x3e] sm:$0x1]  ;;  %v2064_v16 = vld [vmem:[%s6888_s26 + $0x4e] sm:$0x1]  ;;  %v1633_v18 = vsel %vm1132_vm6, %v1632_v52, %v1631_v13  ;;  %v2042_v19 = vsel %vm1120_vm2, %v2041_v3, %v2040_v14  ;;  %v2092_v22 = vrot.slane %v2061_v11, 7  ;;  %v2094_v23 = vrot.slane %v2062_v12, 6 }
  0xc4   : > { %v2065_v17 = vld [vmem:[%s6888_s26 + $0x5e] sm:$0x1]  ;;  %v2066_v20 = vld [vmem:[%s6888_s26 + $0x6e] sm:$0x1]  ;;  %1636 = vrot.lane.b32.xlu1 %v1633_v18, %s9946_s15  ;;  %v2044_v24 = vsel %vm1123_vm3, %v2043_v4, %v2042_v19  ;;  %v2096_v25 = vrot.slane %v2063_v15, 5  ;;  %v2098_v26 = vrot.slane %v2064_v16, 4 }
  0xc5   : > { %v2067_v21 = vld [vmem:[%s6888_s26 + $0x7e] sm:$0x1]  ;;  %v2100_v27 = vrot.slane %v2065_v17, 3  ;;  %v2132_v28 = vld [vmem:[%s6888_s26 + $0xf] sm:$0x1]  ;;  %v2046_v29 = vsel %vm1126_vm4, %v2045_v5, %v2044_v24  ;;  %v2093_v30 = vsel %vm1114_vm0, %v2092_v22, %v2060_v6  ;;  %v2102_v31 = vrot.slane %v2066_v20, 2 }
  0xc6   : > { %v2104_v32 = vrot.slane %v2067_v21, 1  ;;  %v2133_v33 = vld [vmem:[%s6888_s26 + $0x1f] sm:$0x1]  ;;  %v2134_v34 = vld [vmem:[%s6888_s26 + $0x2f] sm:$0x1]  ;;  %v2048_v35 = vsel %vm1129_vm5, %v2047_v9, %v2046_v29  ;;  %v2095_v36 = vsel %vm1117_vm1, %v2094_v23, %v2093_v30  ;;  %s9956_s15 = smov 85  }
  0xc7   : > { %v2135_v37 = vld [vmem:[%s6888_s26 + $0x3f] sm:$0x1]  ;;  %v2136_v38 = vld [vmem:[%s6888_s26 + $0x4f] sm:$0x1]  ;;  %v2050_v40 = vsel %vm1132_vm6, %v2049_v10, %v2048_v35  ;;  %v2097_v41 = vsel %vm1120_vm2, %v2096_v25, %v2095_v36  ;;  %v2164_v44 = vrot.slane %v2133_v33, 7  ;;  %v2166_v45 = vrot.slane %v2134_v34, 6 }
  0xc8   : > { %v2137_v39 = vld [vmem:[%s6888_s26 + $0x5f] sm:$0x1]  ;;  %v2138_v42 = vld [vmem:[%s6888_s26 + $0x6f] sm:$0x1]  ;;  %2053 = vrot.lane.b32.xlu0 %v2050_v40, %s9948_s16  ;;  %v2099_v46 = vsel %vm1123_vm3, %v2098_v26, %v2097_v41  ;;  %v2168_v47 = vrot.slane %v2135_v37, 5  ;;  %v2170_v48 = vrot.slane %v2136_v38, 4 }
  0xc9   : > { %v2139_v43 = vld [vmem:[%s6888_s26 + $0x7f] sm:$0x1]  ;;  %v2172_v49 = vrot.slane %v2137_v39, 3  ;;  %v2140_v50 = vld [vmem:[%s6888_s26 + $0x8f] sm:$0x1]  ;;  %v2101_v52 = vsel %vm1126_vm4, %v2100_v27, %v2099_v46  ;;  %v2165_v53 = vsel %vm1114_vm0, %v2164_v44, %v2132_v28  ;;  %v2174_v54 = vrot.slane %v2138_v42, 2 }
  0xca   : > { %v2176_v55 = vrot.slane %v2139_v43, 1  ;;  %v2141_v56 = vld [vmem:[%s6888_s26 + $0x9f] sm:$0x1]  ;;  %v2142_v57 = vld [vmem:[%s6888_s26 + $0xaf] sm:$0x1]  ;;  %v2103_v58 = vsel %vm1129_vm5, %v2102_v31, %v2101_v52  ;;  %v2167_v59 = vsel %vm1117_vm1, %v2166_v45, %v2165_v53  ;;  %v1361_v40 = vpop.permute.xlu2 %1360 }
  0xcb   : > { %v2143_v60 = vld [vmem:[%s6888_s26 + $0xbf] sm:$0x1]  ;;  %v2144_v61 = vld [vmem:[%s6888_s26 + $0xcf] sm:$0x1]  ;;  %v2105_v63 = vsel %vm1132_vm6, %v2104_v32, %v2103_v58  ;;  %v2169_v0 = vsel %vm1120_vm2, %v2168_v47, %v2167_v59  ;;  %v2178_v3 = vrot.slane %v2141_v56, 7  ;;  %v2180_v4 = vrot.slane %v2142_v57, 6 }
  0xcc   : > { %v2145_v62 = vld [vmem:[%s6888_s26 + $0xdf] sm:$0x1]  ;;  %v2146_v1 = vld [vmem:[%s6888_s26 + $0xef] sm:$0x1]  ;;  %2120 = vrot.lane.b32.xlu1 %v2105_v63, %s6633_s18  ;;  %v2171_v5 = vsel %vm1123_vm3, %v2170_v48, %v2169_v0  ;;  %v2182_v6 = vrot.slane %v2143_v60, 5  ;;  %v2184_v7 = vrot.slane %v2144_v61, 4 }
  0xcd   : > { %v2147_v2 = vld [vmem:[%s6888_s26 + $0xff] sm:$0x1]  ;;  %v2186_v8 = vrot.slane %v2145_v62, 3  ;;  %v1991_v9 = vld [vmem:[%s6888_s26 + $0xd] sm:$0x1]  ;;  %v2173_v10 = vsel %vm1126_vm4, %v2172_v49, %v2171_v5  ;;  %v2179_v11 = vsel %vm1114_vm0, %v2178_v3, %v2140_v50  ;;  %v2188_v12 = vrot.slane %v2146_v1, 2 }
  0xce   : > { %v2190_v13 = vrot.slane %v2147_v2, 1  ;;  %v1992_v14 = vld [vmem:[%s6888_s26 + $0x1d] sm:$0x1]  ;;  %v1993_v15 = vld [vmem:[%s6888_s26 + $0x2d] sm:$0x1]  ;;  %v2175_v16 = vsel %vm1129_vm5, %v2174_v54, %v2173_v10  ;;  %v2181_v17 = vsel %vm1117_vm1, %v2180_v4, %v2179_v11  ;;  %v6635_v63 = vmov 0.0  }
  0xcf   : > { %v1994_v18 = vld [vmem:[%s6888_s26 + $0x3d] sm:$0x1]  ;;  %v1995_v19 = vld [vmem:[%s6888_s26 + $0x4d] sm:$0x1]  ;;  %v2177_v21 = vsel %vm1132_vm6, %v2176_v55, %v2175_v16  ;;  %v2183_v22 = vsel %vm1120_vm2, %v2182_v6, %v2181_v17  ;;  %v2023_v25 = vrot.slane %v1992_v14, 7  ;;  %v2025_v26 = vrot.slane %v1993_v15, 6 }
  0xd0   : > { %v1996_v20 = vld [vmem:[%s6888_s26 + $0x5d] sm:$0x1]  ;;  %v1997_v23 = vld [vmem:[%s6888_s26 + $0x6d] sm:$0x1]  ;;  %2192 = vrot.lane.b32.xlu0 %v2177_v21, %s9954_s0  ;;  %v2185_v27 = vsel %vm1123_vm3, %v2184_v7, %v2183_v22  ;;  %v2027_v28 = vrot.slane %v1994_v18, 5  ;;  %v2029_v29 = vrot.slane %v1995_v19, 4 }
  0xd1   : > { %v1998_v24 = vld [vmem:[%s6888_s26 + $0x7d] sm:$0x1]  ;;  %v2031_v30 = vrot.slane %v1996_v20, 3  ;;  %v2068_v31 = vld [vmem:[%s6888_s26 + $0x8e] sm:$0x1]  ;;  %v2187_v32 = vsel %vm1126_vm4, %v2186_v8, %v2185_v27  ;;  %v2024_v33 = vsel %vm1114_vm0, %v2023_v25, %v1991_v9  ;;  %v2033_v34 = vrot.slane %v1997_v23, 2 }
  0xd2   : > { %v2035_v35 = vrot.slane %v1998_v24, 1  ;;  %v2069_v36 = vld [vmem:[%s6888_s26 + $0x9e] sm:$0x1]  ;;  %v2070_v37 = vld [vmem:[%s6888_s26 + $0xae] sm:$0x1]  ;;  %v2189_v38 = vsel %vm1129_vm5, %v2188_v12, %v2187_v32  ;;  %v2026_v39 = vsel %vm1117_vm1, %v2025_v26, %v2024_v33  ;;  %v7389_v53 = vpop.permute.xlu1 %1703  ;;  %1074 = vst [vmem:[#allocation2 + $0x10] sm:$0xff] %v6635_v63 }
  0xd3   : > { %v2071_v41 = vld [vmem:[%s6888_s26 + $0xbe] sm:$0x1]  ;;  %v2072_v42 = vld [vmem:[%s6888_s26 + $0xce] sm:$0x1]  ;;  %v2191_v44 = vsel %vm1132_vm6, %v2190_v13, %v2189_v38  ;;  %v2028_v45 = vsel %vm1120_vm2, %v2027_v28, %v2026_v39  ;;  %v2106_v47 = vrot.slane %v2069_v36, 7  ;;  %v2108_v48 = vrot.slane %v2070_v37, 6 }
  0xd4   : > { %v2073_v43 = vld [vmem:[%s6888_s26 + $0xde] sm:$0x1]  ;;  %v2074_v46 = vld [vmem:[%s6888_s26 + $0xee] sm:$0x1]  ;;  %2194 = vrot.lane.b32.xlu1 %v2191_v44, %s9954_s0  ;;  %v2030_v49 = vsel %vm1123_vm3, %v2029_v29, %v2028_v45  ;;  %v2110_v50 = vrot.slane %v2071_v41, 5  ;;  %v2112_v52 = vrot.slane %v2072_v42, 4 }
  0xd5   : > { %v2032_v54 = vsel %vm1126_vm4, %v2031_v30, %v2030_v49  ;;  %v2107_v55 = vsel %vm1114_vm0, %v2106_v47, %v2068_v31  ;;  %v2114_v56 = vrot.slane %v2073_v43, 3  ;;  %v2116_v57 = vrot.slane %v2074_v46, 2  ;;  %v2075_v59 = vld [vmem:[%s6888_s26 + $0xfe] sm:$0x1]  ;;  %1712 = vst.msk [vmem:[#allocation2 + $0x10] sm:$0xff] %vm1711_vm7, %v7389_v53  ;;  %s9966_s26 = smov 106  }
  0xd6   : > { %v2034_v58 = vsel %vm1129_vm5, %v2033_v34, %v2032_v54  ;;  %v2109_v60 = vsel %vm1117_vm1, %v2108_v48, %v2107_v55  ;;  %v2118_v2 = vrot.slane %v2075_v59, 1  ;;  %1072 = vst [vmem:[#allocation2] sm:$0xff] %v6635_v63  ;;  %v1428_v4 = vpop.permute.xlu2 %1427  ;;  %vm1988_vm0 = vcmask 761448   ;;  %s9960_s0 = smov 102  }
  0xd7   : > { %v2036_v61 = vsel %vm1132_vm6, %v2035_v35, %v2034_v58  ;;  %v2111_v62 = vsel %vm1120_vm2, %v2110_v50, %v2109_v60  ;;  %1073 = vst [vmem:[#allocation2 + $0x8] sm:$0xff] %v6635_v63  ;;  %vm9989_vm1 = vcmask 876248   ;;  %vm1292_vm2 = vcmask 1048456  }
  0xd8   : > { %2051 = vrot.lane.b32.xlu2 %v2036_v61, %s9948_s16  ;;  %v2113_v0 = vsel %vm1123_vm3, %v2112_v52, %v2111_v62  ;;  %1077 = vst [vmem:[#allocation2 + $0x20] sm:$0xff] %v6635_v63  ;;  %vm9990_vm3 = vcmask 728648   ;;  %s6643_s16 = smov 125  }
  0xd9   : > { %v2115_v1 = vsel %vm1126_vm4, %v2114_v56, %v2113_v0  ;;  %1078 = vst [vmem:[#allocation2 + $0x28] sm:$0xff] %v6635_v63  ;;  %vm10002_vm4 = vcmask 998400  }
  0xda   : > { %v2117_v3 = vsel %vm1129_vm5, %v2116_v57, %v2115_v1  ;;  %v1287_v5 = vpop.permute.xlu0 %1286  ;;  %1079 = vst [vmem:[#allocation2 + $0x30] sm:$0xff] %v6635_v63  ;;  %vm1640_vm5 = vcmask 909048  }
  0xdb   : > { %v2119_v6 = vsel %vm1132_vm6, %v2118_v2, %v2117_v3  ;;  %3949 = vst [vmem:[#allocation4] sm:$0xff] %v6635_v63  ;;  %vm1709_vm6 = vcmask 1048488  }
  0xdc   : > { %1295 = vst.msk [vmem:[#allocation2 + $0x8] sm:$0xff] %vm1294_vm8, %v1287_v5 }
  0xdd   : > { %1365 = vst.msk [vmem:[#allocation2 + $0x8] sm:$0xff] %vm1364_vm9, %v7341_v51 }
  0xde   : > { %v7412_v7 = vpop.permute.xlu1 %1705  ;;  %1434 = vst.msk [vmem:[#allocation2 + $0x8] sm:$0xff] %vm1433_vm10, %v1428_v4 }
  0xdf   : > { %1714 = vst.msk [vmem:[#allocation2 + $0x30] sm:$0xff] %vm1711_vm7, %v7412_v7  ;;  %vm2057_vm7 = vcmask 941848  }
  0xe0   : > { %2122 = vrot.lane.b32.xlu2 %v2119_v6, %s6633_s18  ;;  %1076 = vst.msk [vmem:[#allocation2 + $0x18] sm:$0xff] %vm10002_vm4, %v6635_v63  ;;  %s9968_s18 = smov 107  }
  0xe1   : > { %1080 = vst.msk [vmem:[#allocation2 + $0x38] sm:$0xff] %vm10002_vm4, %v6635_v63 }
  0xe2   : > { %v1847_v8 = vpop.permute.xlu2 %1846 }
  0xe6   : > { %v1289_v9 = vpop.permute.xlu0 %1288 }
  0xe7   : > { %1297 = vst.msk [vmem:[#allocation2 + $0x28] sm:$0xff] %vm1294_vm8, %v1289_v9  ;;  %vm2126_vm8 = vcmask 1048520  }
  0xe8   : > { %1366 = vst.msk [vmem:[#allocation2 + $0x28] sm:$0xff] %vm1364_vm9, %v1361_v40  ;;  %vm2128_vm9 = vcmask 72704  }
  0xea   : > { %v1778_v10 = vpop.permute.xlu1 %1777 }
  0xeb   : > { %1783 = vst.msk [vmem:[#allocation2 + $0x30] sm:$0xff] %vm1781_vm11, %v1778_v10 }
  0xec   : > { %1852 = vst.msk [vmem:[#allocation2 + $0x30] sm:$0xff] %vm9983_vm12, %v1847_v8 }
  0xee   : > { %v1914_v11 = vpop.permute.xlu2 %1913 }
  0xf2   : > { %v1776_v12 = vpop.permute.xlu0 %1775 }
  0xf3   : > { %1782 = vst.msk [vmem:[#allocation2 + $0x10] sm:$0xff] %vm1781_vm11, %v1776_v12  ;;  %vm2307_vm11 = vcmask 867328  }
  0xf6   : > { %v1845_v51 = vpop.permute.xlu1 %1844 }
  0xf7   : > { %1851 = vst.msk [vmem:[#allocation2 + $0x10] sm:$0xff] %vm9983_vm12, %v1845_v51  ;;  %vm2355_vm12 = vcmask 834560  }
  0xf8   : > { %1920 = vst.msk [vmem:[#allocation2 + $0x10] sm:$0xff] %vm9994_vm13, %v1914_v11 }
  0xfa   : > { %v1151_v13 = vpop.permute.xlu2 %1150 }
  0xfb   : > { %1156 = vst.msk [vmem:[#allocation2 + $0x20] sm:$0xff] %vm1154_vm14, %v1151_v13 }
  0xfe   : > { %v1430_v14 = vpop.permute.xlu0 %1429 }
  0xff   : > { %1435 = vst.msk [vmem:[#allocation2 + $0x28] sm:$0xff] %vm1433_vm10, %v1430_v14  ;;  %vm9988_vm10 = vcmask 253048  }
 0x102   : > { %v1499_v15 = vpop.permute.xlu1 %1498 }
 0x103   : > { %1504 = vst.msk [vmem:[#allocation2 + $0x28] sm:$0xff] %vm1502_vm15, %v1499_v15 }
 0x106   : > { %v1983_v16 = vpop.permute.xlu2 %1982 }
 0x107   : > { %1989 = vst.msk [vmem:[#allocation2 + $0x10] sm:$0xff] %vm1988_vm0, %v1983_v16 }
 0x10a   : > { %v1497_v17 = vpop.permute.xlu0 %1496 }
 0x10b   : > { %1503 = vst.msk [vmem:[#allocation2 + $0x8] sm:$0xff] %vm1502_vm15, %v1497_v17  ;;  %vm2396_vm15 = vcmask 687104  }
 0x112   : > { %v1220_v18 = vpop.permute.xlu2 %1219  ;;  %v1916_v19 = vpop.permute.xlu0 %1915 }
 0x113   : > { %1225 = vst.msk [vmem:[#allocation2 + $0x20] sm:$0xff] %vm9989_vm1, %v1220_v18 }
 0x114   : > { %1296 = vst.msk [vmem:[#allocation2 + $0x20] sm:$0xff] %vm1292_vm2, %v1289_v9 }
 0x115   : > { %1921 = vst.msk [vmem:[#allocation2 + $0x30] sm:$0xff] %vm9994_vm13, %v1916_v19  ;;  %vm10005_vm13 = vcmask 842752  }
 0x116   : > { %v1149_v20 = vpop.permute.xlu1 %1148 }
 0x117   : > { %1155 = vst.msk [vmem:[#allocation2] sm:$0xff] %vm1154_vm14, %v1149_v20  ;;  %vm2411_vm14 = vcmask 678912  }
 0x11a   : > { %v1566_v21 = vpop.permute.xlu0 %1565 }
 0x11b   : > { %1572 = vst.msk [vmem:[#allocation2 + $0x8] sm:$0xff] %vm9990_vm3, %v1566_v21  ;;  %v2205_v34 = vld [vmem:[#allocation2 + $0x20] sm:$0xff] }
 0x122   : > { %v1568_v22 = vpop.permute.xlu1 %1567 }
 0x123   : > { %1573 = vst.msk [vmem:[#allocation2 + $0x28] sm:$0xff] %vm9990_vm3, %v1568_v22  ;;  %vm2663_vm3 = vcmask 670720  }
 0x126   : > { %v1985_v23 = vpop.permute.xlu0 %1984 }
 0x127   : > { %1990 = vst.msk [vmem:[#allocation2 + $0x30] sm:$0xff] %vm1988_vm0, %v1985_v23  ;;  %vm2450_vm0 = vcmask 875520  }
 0x12e   : > { %v1218_v24 = vpop.permute.xlu1 %1217 }
 0x12f   : > { %1224 = vst.msk [vmem:[#allocation2] sm:$0xff] %vm9989_vm1, %v1218_v24  ;;  %vm9996_vm1 = vcmask 1006592  }
 0x130   : > { %1293 = vst.msk [vmem:[#allocation2] sm:$0xff] %vm1292_vm2, %v1287_v5  ;;  %vm10013_vm2 = vcmask 883712  }
 0x132   : > { %v1635_v25 = vpop.permute.xlu0 %1634  ;;  %v2052_v26 = vpop.permute.xlu2 %2051 }
 0x133   : > { %1641 = vst.msk [vmem:[#allocation2 + $0x8] sm:$0xff] %vm1640_vm5, %v1635_v25 }
 0x134   : > { %1710 = vst.msk [vmem:[#allocation2 + $0x8] sm:$0xff] %vm1709_vm6, %v7389_v53 }
 0x135   : > { %2058 = vst.msk [vmem:[#allocation2 + $0x10] sm:$0xff] %vm2057_vm7, %v2052_v26 }
 0x136   : > { %v1637_v27 = vpop.permute.xlu1 %1636 }
 0x137   : > { %1642 = vst.msk [vmem:[#allocation2 + $0x28] sm:$0xff] %vm1640_vm5, %v1637_v27  ;;  %v2201_v30 = vld [vmem:[#allocation2] sm:$0xff]  ;;  %vm2271_vm5 = vcmask 1014784  }
 0x138   : > { %1713 = vst.msk [vmem:[#allocation2 + $0x28] sm:$0xff] %vm1709_vm6, %v7412_v7  ;;  %vm2489_vm6 = vcmask 695296  }
 0x13a   : > { %v2054_v28 = vpop.permute.xlu0 %2053  ;;  %v2123_v29 = vpop.permute.xlu2 %2122 }
 0x13b   : > { %v2202_v31 = vld [vmem:[#allocation2 + $0x8] sm:$0xff]  ;;  %2059 = vst.msk [vmem:[#allocation2 + $0x30] sm:$0xff] %vm2057_vm7, %v2054_v28  ;;  %vm2259_vm7 = vcmask 1022976  }
 0x13c   : > { %v2209_v32 = vpack.c.bf16 %v2202_v31, %v2201_v30  ;;  %2130 = vst.msk [vmem:[#allocation2 + $0x30] sm:$0xff] %vm2126_vm8, %v2123_v29 }
 0x13d   : > { %2131 = vst.msk [vmem:[#allocation2 + $0x38] sm:$0xff] %vm2128_vm9, %v2123_v29 }
 0x13e   : > { %v2121_v33 = vpop.permute.xlu1 %2120  ;;  %v2217_v36 = vunpack.c.l.b16 %v2209_v32  ;;  %v2218_v37 = vunpack.c.h.b16 %v2209_v32 }
 0x13f   : > { %v2206_v35 = vld [vmem:[#allocation2 + $0x28] sm:$0xff]  ;;  %2127 = vst.msk [vmem:[#allocation2 + $0x10] sm:$0xff] %vm2126_vm8, %v2121_v33  ;;  %vm2477_vm8 = vcmask 703488  }
 0x140   : > { %v2211_v38 = vpack.c.bf16 %v2206_v35, %v2205_v34  ;;  %2129 = vst.msk [vmem:[#allocation2 + $0x18] sm:$0xff] %vm2128_vm9, %v2121_v33  ;;  %vm10065_vm9 = vcmask 1031168  }
 0x142   : > { %v2220_v39 = vunpack.c.l.b16 %v2211_v38  ;;  %v2221_v40 = vunpack.c.h.b16 %v2211_v38  ;;  %v2193_v41 = vpop.permute.xlu0 %2192 }
 0x143   : > { %2199 = vst.msk [vmem:[#allocation2 + $0x18] sm:$0xff] %vm9988_vm10, %v2193_v41  ;;  %v2207_v48 = vld [vmem:[#allocation2 + $0x30] sm:$0xff] }
 0x144   : > { %v7441_v42 = vpack.c.b16 %v2220_v39, %v2217_v36  ;;  %v7443_v43 = vpack.c.b16 %v2221_v40, %v2218_v37 }
 0x146   : > { %2303 = vrot.lane.b32.xlu0 %v7443_v43, %s9966_s26  ;;  %2301 = vrot.lane.b32.xlu2 %v7441_v42, %s9966_s26  ;;  %v2195_v44 = vpop.permute.xlu1 %2194  ;;  %v2203_v45 = vld [vmem:[#allocation2 + $0x10] sm:$0xff] }
 0x147   : > { %2200 = vst.msk [vmem:[#allocation2 + $0x38] sm:$0xff] %vm9988_vm10, %v2195_v44  ;;  %vm10066_vm10 = vcmask 1039360  }
 0x14a   : > { %v2204_v46 = vld [vmem:[#allocation2 + $0x18] sm:$0xff] }
 0x14b   : > { %v2210_v47 = vpack.c.bf16 %v2204_v46, %v2203_v45 }
 0x14d   : > { %v2219_v50 = vunpack.c.l.b16 %v2210_v47  ;;  %v2385_v52 = vunpack.c.h.b16 %v2210_v47 }
 0x14e   : > { %v2208_v49 = vld [vmem:[#allocation2 + $0x38] sm:$0xff]  ;;  %2405 = vrot.lane.b32.xlu0 %v7443_v43, %s6637_s28  ;;  %2403 = vrot.lane.b32.xlu2 %v7441_v42, %s6637_s28 }
 0x14f   : > { %v2212_v53 = vpack.c.bf16 %v2208_v49, %v2207_v48 }
 0x151   : > { %v2222_v54 = vunpack.c.l.b16 %v2212_v53  ;;  %v2386_v55 = vunpack.c.h.b16 %v2212_v53 }
 0x153   : > { %v7454_v56 = vpack.c.b16 %v2222_v54, %v2219_v50  ;;  %v7456_v57 = vpack.c.b16 %v2386_v55, %v2385_v52 }
 0x155   : > { %10102 = vst [vmem:[#allocation36_spill] sm:$0xff] %v7454_v56  ;;  %2305 = vrot.lane.b32.xlu1 %v7454_v56, %s9966_s26 }
 0x156   : > { %2444 = vrot.lane.b32.xlu0 %v7443_v43, %s9968_s18  ;;  %2442 = vrot.lane.b32.xlu2 %v7441_v42, %s9968_s18 }
 0x15d   : > { %2407 = vrot.lane.b32.xlu1 %v7454_v56, %s6637_s28 }
 0x15e   : > { %2390 = vrot.lane.b32.xlu0 %v7443_v43, %s6639_s10  ;;  %2388 = vrot.lane.b32.xlu2 %v7441_v42, %s6639_s10 }
 0x165   : > { %2446 = vrot.lane.b32.xlu1 %v7454_v56, %s9968_s18 }
 0x166   : > { %2432 = vrot.lane.b32.xlu0 %v7443_v43, %s9970_s11  ;;  %2430 = vrot.lane.b32.xlu2 %v7441_v42, %s9970_s11 }
 0x16d   : > { %2392 = vrot.lane.b32.xlu1 %v7454_v56, %s6639_s10 }
 0x16e   : > { %2267 = vrot.lane.b32.xlu0 %v7443_v43, %s9972_s2  ;;  %2265 = vrot.lane.b32.xlu2 %v7441_v42, %s9972_s2 }
 0x175   : > { %2434 = vrot.lane.b32.xlu1 %v7454_v56, %s9970_s11 }
 0x176   : > { %2483 = vrot.lane.b32.xlu0 %v7443_v43, %s9956_s15  ;;  %2481 = vrot.lane.b32.xlu2 %v7441_v42, %s9956_s15 }
 0x17d   : > { %2269 = vrot.lane.b32.xlu1 %v7454_v56, %s9972_s2 }
 0x17e   : > { %2255 = vrot.lane.b32.xlu0 %v7443_v43, %s6643_s16  ;;  %2253 = vrot.lane.b32.xlu2 %v7441_v42, %s6643_s16 }
 0x185   : > { %2485 = vrot.lane.b32.xlu1 %v7454_v56, %s9956_s15  ;;  %s9962_s15 = smov 127  }
 0x186   : > { %2471 = vrot.lane.b32.xlu0 %v7443_v43, %s9957_s7  ;;  %2469 = vrot.lane.b32.xlu2 %v7441_v42, %s9957_s7 }
 0x18d   : > { %2257 = vrot.lane.b32.xlu1 %v7454_v56, %s6643_s16 }
 0x18e   : > { %2243 = vrot.lane.b32.xlu0 %v7443_v43, %s9958_s1  ;;  %2241 = vrot.lane.b32.xlu2 %v7441_v42, %s9958_s1 }
 0x195   : > { %2473 = vrot.lane.b32.xlu1 %v7454_v56, %s9957_s7  ;;  %s9964_s7 = smov 103  }
 0x196   : > { %2351 = vrot.lane.b32.xlu0 %v7443_v43, %s9960_s0  ;;  %2349 = vrot.lane.b32.xlu2 %v7441_v42, %s9960_s0 }
 0x19d   : > { %2245 = vrot.lane.b32.xlu1 %v7454_v56, %s9958_s1  ;;  %s9974_s1 = smov 109  }
 0x19e   : > { %2231 = vrot.lane.b32.xlu0 %v7443_v43, %s9962_s15  ;;  %2229 = vrot.lane.b32.xlu2 %v7441_v42, %s9962_s15 }
 0x1a0   : > { %v2302_v58 = vpop.permute.xlu2 %2301 }
 0x1a5   : > { %2353 = vrot.lane.b32.xlu1 %v7454_v56, %s9960_s0  ;;  %s9999_s0 = smov 104  }
 0x1a6   : > { %2339 = vrot.lane.b32.xlu0 %v7443_v43, %s9964_s7  ;;  %2337 = vrot.lane.b32.xlu2 %v7441_v42, %s9964_s7 }
 0x1a8   : > { %v2404_v59 = vpop.permute.xlu2 %2403 }
 0x1ad   : > { %2233 = vrot.lane.b32.xlu1 %v7454_v56, %s9962_s15  ;;  %s9976_s15 = smov 110  }
 0x1ae   : > { %2507 = vrot.lane.b32.xlu0 %v7443_v43, %s9974_s1  ;;  %2505 = vrot.lane.b32.xlu2 %v7441_v42, %s9974_s1 }
 0x1b0   : > { %v7530_v60 = vpop.permute.xlu2 %2442 }
 0x1b5   : > { %2341 = vrot.lane.b32.xlu1 %v7454_v56, %s9964_s7  ;;  %s6652_s7 = smov 105  }
 0x1b6   : > { %2327 = vrot.lane.b32.xlu0 %v7443_v43, %s9999_s0  ;;  %2325 = vrot.lane.b32.xlu2 %v7441_v42, %s9999_s0 }
 0x1b8   : > { %v2304_v61 = vpop.permute.xlu0 %2303  ;;  %v2389_v62 = vpop.permute.xlu2 %2388 }
 0x1b9   : > { %v7539_v63 = vsel %vm2307_vm11, %v2302_v58, %v2304_v61 }
 0x1ba   : > { %3056 = vmatpush.bf16.msra.mxu0 %v7539_v63 }
 0x1bd   : > { %2509 = vrot.lane.b32.xlu1 %v7454_v56, %s9974_s1 }
 0x1be   : > { %2493 = vrot.lane.b32.xlu0 %v7441_v42, %s9976_s15  ;;  %2454 = vrot.lane.b32.xlu2 %v7456_v57, %s9966_s26  ;;  %s10033_s26 = smov 122  }
 0x1c0   : > { %v7548_v0 = vpop.permute.xlu0 %2405  ;;  %v7550_v1 = vpop.permute.xlu2 %2430 }
 0x1c1   : > { %v2412_v2 = vsel %vm2411_vm14, %v2404_v59, %v7548_v0 }
 0x1c2   : > { %3070 = vmatpush.bf16.msra.mxu1 %v2412_v2 }
 0x1c5   : > { %2329 = vrot.lane.b32.xlu1 %v7454_v56, %s9999_s0 }
 0x1c6   : > { %2313 = vrot.lane.b32.xlu0 %v7441_v42, %s6652_s7  ;;  %2497 = vrot.lane.b32.xlu2 %v7454_v56, %s9976_s15 }
 0x1c7   : > { %v7560_v3 = vpop.permute.xlu1 %2305 }
 0x1c8   : > { %10103 = vst [vmem:[#allocation37_spill] sm:$0xff] %v7560_v3  ;;  %v2445_v4 = vpop.permute.xlu0 %2444  ;;  %v7562_v5 = vpop.permute.xlu2 %2265  ;;  %v7631_v21 = vsel %vm2307_vm11, %v2304_v61, %v7560_v3 }
 0x1c9   : > { %10105 = vst [vmem:[#allocation39_spill] sm:$0xff] %v7631_v21  ;;  %v7660_v29 = vsel %vm2450_vm0, %v7530_v60, %v2445_v4 }
 0x1cd   : > { %2495 = vrot.lane.b32.xlu1 %v7443_v43, %s9976_s15 }
 0x1ce   : > { %2448 = vrot.lane.b32.xlu0 %v7456_v57, %s9968_s18  ;;  %2317 = vrot.lane.b32.xlu2 %v7454_v56, %s6652_s7  ;;  %s10035_s18 = smov 87  }
 0x1cf   : > { %v7570_v6 = vpop.permute.xlu1 %2407 }
 0x1d0   : > { %v7572_v7 = vpop.permute.xlu0 %2390  ;;  %v7574_v8 = vpop.permute.xlu2 %2481  ;;  %v7677_v33 = vsel %vm2411_vm14, %v7548_v0, %v7570_v6 }
 0x1d1   : > { %v7578_v9 = vsel %vm2396_vm15, %v2389_v62, %v7572_v7  ;;  %10110 = vst [vmem:[#allocation42_spill] sm:$0xff] %v7677_v33 }
 0x1d2   : > { %3071 = vmatpush.bf16.msra.mxu1 %v7578_v9 }
 0x1d5   : > { %2315 = vrot.lane.b32.xlu1 %v7443_v43, %s6652_s7 }
 0x1d6   : > { %2291 = vrot.lane.b32.xlu0 %v7443_v43, %s10033_s26  ;;  %2289 = vrot.lane.b32.xlu2 %v7441_v42, %s10033_s26 }
 0x1d7   : > { %v7587_v10 = vpop.permute.xlu1 %2446 }
 0x1d8   : > { %v2433_v11 = vpop.permute.xlu0 %2432  ;;  %v7589_v12 = vpop.permute.xlu2 %2253  ;;  %v7647_v25 = vsel %vm2450_vm0, %v2445_v4, %v7587_v10 }
 0x1d9   : > { %v7683_v34 = vsel %vm10013_vm2, %v7550_v1, %v2433_v11 }
 0x1dd   : > { %2436 = vrot.lane.b32.xlu1 %v7456_v57, %s9970_s11  ;;  %s9981_s11 = smov 123  }
 0x1de   : > { %2526 = vrot.lane.b32.xlu0 %v7443_v43, %s10035_s18  ;;  %2427 = vrot.lane.b32.xlu2 %v7456_v57, %s9972_s2  ;;  %s9978_s2 = smov 88  }
 0x1df   : > { %v7597_v51 = vpop.permute.xlu1 %2392 }
 0x1e0   : > { %v7599_v13 = vpop.permute.xlu0 %2267  ;;  %v7601_v14 = vpop.permute.xlu2 %2469  ;;  %v7704_v39 = vsel %vm2396_vm15, %v7572_v7, %v7597_v51 }
 0x1e1   : > { %10112 = vst [vmem:[#allocation44_spill] sm:$0xff] %v7704_v39  ;;  %v7721_v45 = vsel %vm2271_vm5, %v7562_v5, %v7599_v13 }
 0x1e5   : > { %2409 = vrot.lane.b32.xlu1 %v7456_v57, %s6637_s28  ;;  %s10108_s28 = smov 126  }
 0x1e6   : > { %2394 = vrot.lane.b32.xlu0 %v7456_v57, %s6639_s10  ;;  %2279 = vrot.lane.b32.xlu2 %v7443_v43, %s9981_s11  ;;  %s6657_s10 = smov 82  }
 0x1e7   : > { %v7609_v15 = vpop.permute.xlu1 %2434 }
 0x1e8   : > { %v7611_v16 = vpop.permute.xlu0 %2483  ;;  %v7613_v17 = vpop.permute.xlu2 %2241  ;;  %v7687_v35 = vsel %vm10013_vm2, %v2433_v11, %v7609_v15 }
 0x1e9   : > { %v2490_v49 = vsel %vm2489_vm6, %v7574_v8, %v7611_v16 }
 0x1ed   : > { %2528 = vrot.lane.b32.xlu1 %v7454_v56, %s10035_s18 }
 0x1ee   : > { %2519 = vrot.lane.b32.xlu0 %v7454_v56, %s9978_s2  ;;  %2517 = vrot.lane.b32.xlu2 %v7443_v43, %s9978_s2  ;;  %s10120_s2 = smov 102  }
 0x1ef   : > { %v7621_v18 = vpop.permute.xlu1 %2269 }
 0x1f0   : > { %10104 = vst [vmem:[#allocation38_spill] sm:$0xff] %v7621_v18  ;;  %v7623_v19 = vpop.permute.xlu0 %2255  ;;  %v7625_v20 = vpop.permute.xlu2 %2349  ;;  %v7755_v55 = vsel %vm2271_vm5, %v7599_v13, %v7621_v18 }
 0x1f1   : > { %10119 = vst [vmem:[#allocation49_spill] sm:$0xff] %v7755_v55  ;;  %v7772_v61 = vsel %vm2259_vm7, %v7589_v12, %v7623_v19 }
 0x1f5   : > { %2277 = vrot.lane.b32.xlu1 %v7441_v42, %s9981_s11  ;;  %s10124_s11 = smov 103  }
 0x1f6   : > { %2591 = vrot.lane.b32.xlu2 %v7539_v63, %s6657_s10  ;;  %2593 = vrot.lane.b32.xlu0 %v7631_v21, %s6657_s10 }
 0x1f7   : > { %v7637_v22 = vpop.permute.xlu1 %2485 }
 0x1f8   : > { %v7639_v23 = vpop.permute.xlu0 %2471  ;;  %v7641_v24 = vpop.permute.xlu2 %2229  ;;  %v7741_v50 = vsel %vm2489_vm6, %v7611_v16, %v7637_v22 }
 0x1fd   : > { %2424 = vrot.lane.b32.xlu1 %v7456_v57, %s6643_s16  ;;  %s10107_s16 = smov 85  }
 0x1fe   : > { %2655 = vrot.lane.b32.xlu0 %v2412_v2, %s6657_s10  ;;  %2585 = vrot.lane.b32.xlu2 %v7647_v25, %s6657_s10 }
 0x1ff   : > { %v7652_v26 = vpop.permute.xlu1 %2257 }
 0x200   : > { %10106 = vst [vmem:[#allocation40_spill] sm:$0xff] %v7652_v26  ;;  %v7654_v27 = vpop.permute.xlu0 %2243  ;;  %v7656_v28 = vpop.permute.xlu2 %2337  ;;  %v7806_v11 = vsel %vm2259_vm7, %v7623_v19, %v7652_v26 }
 0x201   : > { %10122 = vst [vmem:[#allocation51_spill] sm:$0xff] %v7806_v11 }
 0x205   : > { %2583 = vrot.lane.b32.xlu1 %v7660_v29, %s6657_s10 }
 0x206   : > { %2487 = vrot.lane.b32.xlu0 %v7456_v57, %s10107_s16  ;;  %2421 = vrot.lane.b32.xlu2 %v7456_v57, %s10108_s28  ;;  %s10113_s16 = smov 127  }
 0x207   : > { %v7668_v30 = vpop.permute.xlu1 %2473 }
 0x208   : > { %10109 = vst [vmem:[#allocation41_spill] sm:$0xff] %v7668_v30  ;;  %v7670_v31 = vpop.permute.xlu0 %2351  ;;  %v7672_v32 = vpop.permute.xlu2 %2505  ;;  %v7792_v4 = vsel %vm2477_vm8, %v7639_v23, %v7668_v30 }
 0x20d   : > { %2657 = vrot.lane.b32.xlu1 %v7677_v33, %s6657_s10 }
 0x20e   : > { %2575 = vrot.lane.b32.xlu2 %v7683_v34, %s6657_s10  ;;  %2577 = vrot.lane.b32.xlu0 %v7687_v35, %s6657_s10 }
 0x20f   : > { %v7693_v36 = vpop.permute.xlu1 %2245 }
 0x210   : > { %10111 = vst [vmem:[#allocation43_spill] sm:$0xff] %v7693_v36  ;;  %v7695_v37 = vpop.permute.xlu0 %2231  ;;  %v7697_v38 = vpop.permute.xlu2 %2325 }
 0x215   : > { %2511 = vrot.lane.b32.xlu1 %v7456_v57, %s9974_s1  ;;  %s10116_s1 = smov 86  }
 0x216   : > { %2649 = vrot.lane.b32.xlu2 %v7704_v39, %s6657_s10  ;;  %2418 = vrot.lane.b32.xlu0 %v7456_v57, %s10113_s16 }
 0x217   : > { %v7710_v40 = vpop.permute.xlu1 %2353 }
 0x218   : > { %10114 = vst [vmem:[#allocation45_spill] sm:$0xff] %v7710_v40  ;;  %v7712_v41 = vpop.permute.xlu0 %2339  ;;  %v7714_v44 = vpop.permute.xlu2 %2454 }
 0x219   : > { %v7899_v30 = vsel %vm10005_vm13, %v7656_v28, %v7712_v41 }
 0x21d   : > { %2647 = vrot.lane.b32.xlu1 %v7578_v9, %s6657_s10 }
 0x21e   : > { %2499 = vrot.lane.b32.xlu2 %v7456_v57, %s9976_s15  ;;  %2567 = vrot.lane.b32.xlu0 %v7721_v45, %s6657_s10  ;;  %s9979_s15 = smov 100  }
 0x21f   : > { %v7727_v46 = vpop.permute.xlu1 %2233 }
 0x220   : > { %10115 = vst [vmem:[#allocation46_spill] sm:$0xff] %v7727_v46  ;;  %v7729_v47 = vpop.permute.xlu0 %2507  ;;  %v7731_v48 = vpop.permute.xlu2 %2497  ;;  %v7918_v28 = vsel %vm10066_vm10, %v7695_v37, %v7727_v46 }
 0x225   : > { %2475 = vrot.lane.b32.xlu1 %v7456_v57, %s10116_s1  ;;  %s6658_s1 = smov 36  }
 0x226   : > { %2639 = vrot.lane.b32.xlu2 %v2490_v49, %s6657_s10  ;;  %2641 = vrot.lane.b32.xlu0 %v7741_v50, %s6657_s10 }
 0x227   : > { %v7746_v52 = vpop.permute.xlu1 %2341 }
 0x228   : > { %10117 = vst [vmem:[#allocation47_spill] sm:$0xff] %v7746_v52  ;;  %v7748_v53 = vpop.permute.xlu0 %2327  ;;  %v7750_v54 = vpop.permute.xlu2 %2317 }
 0x229   : > { %10118 = vst [vmem:[#allocation48_spill] sm:$0xff] %v7750_v54 }
 0x22d   : > { %2569 = vrot.lane.b32.xlu1 %v7755_v55, %s6657_s10 }
 0x22e   : > { %2818 = vrot.lane.b32.xlu2 %v7631_v21, %s6658_s1  ;;  %2373 = vrot.lane.b32.xlu0 %v7441_v42, %s9979_s15 }
 0x22f   : > { %v7763_v58 = vpop.permute.xlu1 %2509 }
 0x230   : > { %v7765_v59 = vpop.permute.xlu0 %2493  ;;  %v2290_v60 = vpop.permute.xlu2 %2289 }
 0x235   : > { %2816 = vrot.lane.b32.xlu1 %v7539_v63, %s6658_s1  ;;  %v2478_v63 = vsel %vm2477_vm8, %v7601_v14, %v7639_v23 }
 0x236   : > { %2466 = vrot.lane.b32.xlu2 %v7456_v57, %s10120_s2  ;;  %2559 = vrot.lane.b32.xlu0 %v7772_v61, %s6657_s10 }
 0x237   : > { %v7778_v62 = vpop.permute.xlu1 %2329 }
 0x238   : > { %10121 = vst [vmem:[#allocation50_spill] sm:$0xff] %v7778_v62  ;;  %v7780_v1 = vpop.permute.xlu0 %2313  ;;  %v7782_v2 = vpop.permute.xlu2 %2427 }
 0x23d   : > { %2375 = vrot.lane.b32.xlu1 %v7443_v43, %s9979_s15  ;;  %s6660_s15 = smov 101  }
 0x23e   : > { %2631 = vrot.lane.b32.xlu2 %v2478_v63, %s6657_s10  ;;  %2633 = vrot.lane.b32.xlu0 %v7792_v4, %s6657_s10 }
 0x23f   : > { %v7797_v5 = vpop.permute.xlu1 %2495 }
 0x240   : > { %v7799_v8 = vpop.permute.xlu0 %2448  ;;  %v7801_v9 = vpop.permute.xlu2 %2279 }
 0x245   : > { %2561 = vrot.lane.b32.xlu1 %v7806_v11, %s6657_s10 }
 0x246   : > { %2810 = vrot.lane.b32.xlu2 %v7647_v25, %s6658_s1  ;;  %2361 = vrot.lane.b32.xlu0 %v7441_v42, %s6660_s15  ;;  %v7827_v25 = vsel %vm10065_vm9, %v7613_v17, %v7654_v27  ;;  %v7842_v17 = vsel %vm2355_vm12, %v7625_v20, %v7670_v31  ;;  %v7862_v20 = vsel %vm10065_vm9, %v7654_v27, %v7693_v36 }
 0x247   : > { %v7814_v12 = vpop.permute.xlu1 %2315  ;;  %v7881_v27 = vsel %vm10066_vm10, %v7641_v24, %v7695_v37 }
 0x248   : > { %v7816_v13 = vpop.permute.xlu0 %2291  ;;  %v7818_v14 = vpop.permute.xlu2 %2517 }
 0x249   : > { %10123 = vst [vmem:[#allocation52_spill] sm:$0xff] %v7816_v13  ;;  %v2296_v19 = vsel %vm10002_vm4, %v2290_v60, %v7816_v13  ;;  %vm10010_vm4 = vcmask 850944  }
 0x24a   : > { %3057 = vmatpush.bf16.msra.mxu0 %v2296_v19 }
 0x24d   : > { %2808 = vrot.lane.b32.xlu1 %v7660_v29, %s6658_s1  ;;  %v7847_v29 = vsel %vm2355_vm12, %v7670_v31, %v7710_v40 }
 0x24e   : > { %2463 = vrot.lane.b32.xlu2 %v7456_v57, %s10124_s11  ;;  %2551 = vrot.lane.b32.xlu0 %v7827_v25, %s6657_s10  ;;  %10125 = vst [vmem:[#allocation53_spill] sm:$0xff] %v7847_v29 }
 0x24f   : > { %v7833_v49 = vpop.permute.xlu1 %2436 }
 0x250   : > { %v7835_v63 = vpop.permute.xlu0 %2526  ;;  %v2592_v60 = vpop.permute.xlu2 %2591 }
 0x255   : > { %2363 = vrot.lane.b32.xlu1 %v7443_v43, %s6660_s15 }
 0x256   : > { %2623 = vrot.lane.b32.xlu2 %v7842_v17, %s6657_s10  ;;  %2625 = vrot.lane.b32.xlu0 %v7847_v29, %s6657_s10 }
 0x257   : > { %v7853_v19 = vpop.permute.xlu1 %2409 }
 0x258   : > { %v7855_v11 = vpop.permute.xlu0 %2394  ;;  %v7857_v55 = vpop.permute.xlu2 %2585 }
 0x259   : > { %10126 = vst [vmem:[#allocation54_spill] sm:$0xff] %v7857_v55 }
 0x25d   : > { %2553 = vrot.lane.b32.xlu1 %v7862_v20, %s6657_s10 }
 0x25e   : > { %2802 = vrot.lane.b32.xlu2 %v7687_v35, %s6658_s1  ;;  %2293 = vrot.lane.b32.xlu0 %v7454_v56, %s10033_s26  ;;  %s6665_s26 = smov 119  }
 0x25f   : > { %v7870_v31 = vpop.permute.xlu1 %2528 }
 0x260   : > { %v7872_v29 = vpop.permute.xlu0 %2519  ;;  %v7874_v13 = vpop.permute.xlu2 %2421 }
 0x265   : > { %2800 = vrot.lane.b32.xlu1 %v7683_v34, %s6658_s1 }
 0x266   : > { %2530 = vrot.lane.b32.xlu2 %v7456_v57, %s10035_s18  ;;  %2543 = vrot.lane.b32.xlu0 %v7881_v27, %s6657_s10  ;;  %s6666_s18 = smov 111  }
 0x267   : > { %v2278_v35 = vpop.permute.xlu1 %2277 }
 0x268   : > { %v7887_v21 = vpop.permute.xlu0 %2593  ;;  %v2576_v40 = vpop.permute.xlu2 %2575  ;;  %v2284_v34 = vsel %vm9996_vm1, %v2278_v35, %v7801_v9  ;;  %v7904_v35 = vsel %vm10005_vm13, %v7712_v41, %v7746_v52  ;;  %vm2513_vm1 = vcmask 891904   ;;  %vm10064_vm13 = vcmask 900096  }
 0x269   : > { %10127 = vst [vmem:[#allocation55_spill] sm:$0xff] %v7887_v21  ;;  %3058 = vmatpush.bf16.msra.mxu0 %v2284_v34  ;;  %v2685_v24 = vsel %vm2663_vm3, %v2592_v60, %v7887_v21  ;;  %v2515_v41 = vsel %vm2513_vm1, %v7729_v47, %v7763_v58  ;;  %v2514_v21 = vsel %vm2513_vm1, %v7672_v32, %v7729_v47 }
 0x26a   : > { %3084 = vmatpush.bf16.msra.mxu2 %v2685_v24  ;;  %10128 = vst [vmem:[#allocation56_spill] sm:$0xff] %v7904_v35 }
 0x26d   : > { %2460 = vrot.lane.b32.xlu1 %v7456_v57, %s9999_s0  ;;  %3059 = vmatpush.bf16.msra.mxu0 %v7721_v45  ;;  %s10130_s0 = smov 123  }
 0x26e   : > { %2615 = vrot.lane.b32.xlu2 %v7899_v30, %s6657_s10  ;;  %2617 = vrot.lane.b32.xlu0 %v7904_v35, %s6657_s10 }
 0x26f   : > { %v7910_v60 = vpop.permute.xlu1 %2424 }
 0x270   : > { %v2656_v34 = vpop.permute.xlu0 %2655  ;;  %v7912_v45 = vpop.permute.xlu2 %2649 }
 0x271   : > { %10129 = vst [vmem:[#allocation57_spill] sm:$0xff] %v7912_v45  ;;  %3060 = vmatpush.bf16.msra.mxu0 %v7772_v61 }
 0x275   : > { %2545 = vrot.lane.b32.xlu1 %v7918_v28, %s6657_s10  ;;  %3061 = vmatpush.bf16.msra.mxu0 %v7827_v25 }
 0x276   : > { %2880 = vrot.lane.b32.xlu0 %v7548_v0, %s6658_s1  ;;  %2794 = vrot.lane.b32.xlu2 %v2515_v41, %s6658_s1 }
 0x277   : > { %v2584_v61 = vpop.permute.xlu1 %2583 }
 0x278   : > { %v7929_v24 = vpop.permute.xlu0 %2487  ;;  %v7931_v37 = vpop.permute.xlu2 %2499  ;;  %v2682_v35 = vsel %vm2663_vm3, %v2584_v61, %v7857_v55 }
 0x279   : > { %3062 = vmatpush.bf16.msra.mxu0 %v7881_v27  ;;  %3085 = vmatpush.bf16.msra.mxu2 %v2682_v35 }
 0x27d   : > { %2792 = vrot.lane.b32.xlu1 %v2514_v21, %s6658_s1  ;;  %3063 = vmatpush.bf16.msra.mxu0 %v7441_v42 }
 0x27e   : > { %2457 = vrot.lane.b32.xlu0 %v7456_v57, %s6652_s7  ;;  %2281 = vrot.lane.b32.xlu2 %v7454_v56, %s10130_s0  ;;  %s10133_s7 = smov 88  }
 0x27f   : > { %v7945_v0 = vpop.permute.xlu1 %2657 }
 0x280   : > { %10131 = vst [vmem:[#allocation58_spill] sm:$0xff] %v7945_v0  ;;  %v2640_v41 = vpop.permute.xlu2 %2639  ;;  %v7947_v61 = vpop.permute.xlu0 %2577  ;;  %v2709_v35 = vsel %vm2663_vm3, %v2656_v34, %v7945_v0  ;;  %v7975_v34 = vsel %vm10010_vm4, %v7748_v53, %v7778_v62 }
 0x281   : > { %10132 = vst [vmem:[#allocation59_spill] sm:$0xff] %v7947_v61  ;;  %3098 = vmatpush.bf16.msra.mxu3 %v2709_v35  ;;  %v2679_v21 = vsel %vm2663_vm3, %v2576_v40, %v7947_v61  ;;  %v7970_v40 = vsel %vm10010_vm4, %v7697_v38, %v7748_v53  ;;  %v2456_v38 = vsel %vm2307_vm11, %v7560_v3, %v7714_v44  ;;  %vm2319_vm11 = vcmask 859136  }
 0x282   : > { %3086 = vmatpush.bf16.msra.mxu2 %v2679_v21  ;;  %v2503_v53 = vsel %vm10064_vm13, %v7797_v5, %v7731_v48  ;;  %v2502_v3 = vsel %vm10064_vm13, %v7765_v59, %v7797_v5  ;;  %vm10055_vm4 = vcmask 818176  }
 0x285   : > { %2882 = vrot.lane.b32.xlu1 %v7677_v33, %s6658_s1 }
 0x286   : > { %2537 = vrot.lane.b32.xlu0 %v7443_v43, %s6657_s10  ;;  %2535 = vrot.lane.b32.xlu2 %v7441_v42, %s6657_s10 }
 0x287   : > { %v7959_v32 = vpop.permute.xlu1 %2511 }
 0x288   : > { %v7961_v47 = vpop.permute.xlu2 %2818  ;;  %v7963_v55 = vpop.permute.xlu0 %2418 }
 0x28d   : > { %2521 = vrot.lane.b32.xlu1 %v7456_v57, %s10133_s7  ;;  %s10137_s7 = smov 100  }
 0x28e   : > { %2607 = vrot.lane.b32.xlu2 %v7970_v40, %s6657_s10  ;;  %2609 = vrot.lane.b32.xlu0 %v7975_v34, %s6657_s10 }
 0x28f   : > { %v2648_v35 = vpop.permute.xlu1 %2647 }
 0x290   : > { %v7981_v21 = vpop.permute.xlu2 %2466  ;;  %v2568_v0 = vpop.permute.xlu0 %2567  ;;  %v2706_v33 = vsel %vm2663_vm3, %v2648_v35, %v7912_v45 }
 0x291   : > { %3099 = vmatpush.bf16.msra.mxu3 %v2706_v33 }
 0x295   : > { %2595 = vrot.lane.b32.xlu1 %v2456_v38, %s6657_s10 }
 0x296   : > { %2872 = vrot.lane.b32.xlu0 %v7572_v7, %s6658_s1  ;;  %2786 = vrot.lane.b32.xlu2 %v2503_v53, %s6658_s1  ;;  %v2453_v7 = vsel %vm2450_vm0, %v7587_v10, %v7799_v8  ;;  %v8011_v53 = vsel %vm2319_vm11, %v7780_v1, %v7814_v12  ;;  %vm10048_vm0 = vcmask 293888  }
 0x297   : > { %v7995_v61 = vpop.permute.xlu1 %2475 }
 0x298   : > { %v2632_v35 = vpop.permute.xlu2 %2631  ;;  %v7997_v33 = vpop.permute.xlu0 %2641 }
 0x299   : > { %10134 = vst [vmem:[#allocation60_spill] sm:$0xff] %v7997_v33  ;;  %v2703_v45 = vsel %vm2663_vm3, %v2640_v41, %v7997_v33 }
 0x29a   : > { %3100 = vmatpush.bf16.msra.mxu3 %v2703_v45 }
 0x29d   : > { %2784 = vrot.lane.b32.xlu1 %v2502_v3, %s6658_s1 }
 0x29e   : > { %2587 = vrot.lane.b32.xlu2 %v2453_v7, %s6657_s10  ;;  %2599 = vrot.lane.b32.xlu0 %v8011_v53, %s6657_s10 }
 0x29f   : > { %v8016_v45 = vpop.permute.xlu1 %2569 }
 0x2a0   : > { %10135 = vst [vmem:[#allocation61_spill] sm:$0xff] %v8016_v45  ;;  %v8018_v41 = vpop.permute.xlu2 %2810  ;;  %v2374_v59 = vpop.permute.xlu0 %2373  ;;  %v2676_v3 = vsel %vm2663_vm3, %v2568_v0, %v8016_v45  ;;  %v8035_v0 = vsel %vm2319_vm11, %v7814_v12, %v7750_v54 }
 0x2a1   : > { %3087 = vmatpush.bf16.msra.mxu2 %v2676_v3 }
 0x2a5   : > { %2874 = vrot.lane.b32.xlu1 %v7704_v39, %s6658_s1 }
 0x2a6   : > { %2776 = vrot.lane.b32.xlu2 %v7827_v25, %s6658_s1  ;;  %2778 = vrot.lane.b32.xlu0 %v7862_v20, %s6658_s1  ;;  %v8042_v25 = vsel %vm10013_vm2, %v7609_v15, %v7833_v49  ;;  %vm2367_vm2 = vcmask 826368  }
 0x2a7   : > { %v2817_v10 = vpop.permute.xlu1 %2816 }
 0x2a8   : > { %v8028_v1 = vpop.permute.xlu2 %2463  ;;  %v2560_v5 = vpop.permute.xlu0 %2559  ;;  %v2910_v33 = vsel %vm10048_vm0, %v2817_v10, %v7961_v47 }
 0x2a9   : > { %3112 = vmatpush.bf16.msrb.mxu0 %v2910_v33 }
 0x2ad   : > { %2601 = vrot.lane.b32.xlu1 %v8035_v0, %s6657_s10 }
 0x2ae   : > { %2866 = vrot.lane.b32.xlu2 %v7741_v50, %s6658_s1  ;;  %2579 = vrot.lane.b32.xlu0 %v8042_v25, %s6657_s10 }
 0x2af   : > { %v8048_v33 = vpop.permute.xlu1 %2375 }
 0x2b0   : > { %v2624_v3 = vpop.permute.xlu2 %2623  ;;  %v8050_v12 = vpop.permute.xlu0 %2633  ;;  %v2380_v10 = vsel %vm10055_vm4, %v2374_v59, %v8048_v33 }
 0x2b1   : > { %10136 = vst [vmem:[#allocation62_spill] sm:$0xff] %v8050_v12  ;;  %3072 = vmatpush.bf16.msra.mxu1 %v2380_v10  ;;  %v2700_v15 = vsel %vm2663_vm3, %v2632_v35, %v8050_v12 }
 0x2b2   : > { %3101 = vmatpush.bf16.msra.mxu3 %v2700_v15 }
 0x2b5   : > { %2864 = vrot.lane.b32.xlu1 %v7611_v16, %s6658_s1 }
 0x2b6   : > { %2770 = vrot.lane.b32.xlu2 %v7918_v28, %s6658_s1  ;;  %2820 = vrot.lane.b32.xlu0 %v2456_v38, %s6658_s1 }
 0x2b7   : > { %v8061_v50 = vpop.permute.xlu1 %2561 }
 0x2b8   : > { %v8063_v39 = vpop.permute.xlu2 %2802  ;;  %v2362_v45 = vpop.permute.xlu0 %2361  ;;  %v2673_v59 = vsel %vm2663_vm3, %v2560_v5, %v8061_v50 }
 0x2b9   : > { %3088 = vmatpush.bf16.msra.mxu2 %v2673_v59 }
 0x2bd   : > { %2768 = vrot.lane.b32.xlu1 %v7881_v27, %s6658_s1  ;;  %v8082_v27 = vsel %vm2411_vm14, %v7570_v6, %v7853_v19  ;;  %vm2532_vm14 = vcmask 711680  }
 0x2be   : > { %2858 = vrot.lane.b32.xlu2 %v7792_v4, %s6658_s1  ;;  %2377 = vrot.lane.b32.xlu0 %v7454_v56, %s10137_s7  ;;  %10138 = vst [vmem:[#allocation63_spill] sm:$0xff] %v8082_v27 }
 0x2bf   : > { %v2809_v16 = vpop.permute.xlu1 %2808 }
 0x2c0   : > { %v8073_v38 = vpop.permute.xlu2 %2530  ;;  %v2552_v35 = vpop.permute.xlu0 %2551  ;;  %v2907_v10 = vsel %vm10048_vm0, %v2809_v16, %v8018_v41 }
 0x2c1   : > { %3113 = vmatpush.bf16.msrb.mxu0 %v2907_v10 }
 0x2c5   : > { %2856 = vrot.lane.b32.xlu1 %v7639_v23, %s6658_s1 }
 0x2c6   : > { %2760 = vrot.lane.b32.xlu0 %v7441_v42, %s6658_s1  ;;  %2659 = vrot.lane.b32.xlu2 %v8082_v27, %s6657_s10  ;;  %v2429_v42 = vsel %vm2271_vm5, %v7621_v18, %v7782_v2  ;;  %v10143_v18 = vld [vmem:[#allocation41_spill] sm:$0xff]  ;;  %vm10150_vm5 = vcmask 998400  }
 0x2c7   : > { %v8088_v4 = vpop.permute.xlu1 %2363 }
 0x2c8   : > { %v2616_v5 = vpop.permute.xlu2 %2615  ;;  %v8090_v15 = vpop.permute.xlu0 %2625  ;;  %v2368_v23 = vsel %vm2367_vm2, %v2362_v45, %v8088_v4 }
 0x2c9   : > { %10139 = vst [vmem:[#allocation64_spill] sm:$0xff] %v8090_v15  ;;  %3073 = vmatpush.bf16.msra.mxu1 %v2368_v23  ;;  %v2697_v6 = vsel %vm2663_vm3, %v2624_v3, %v8090_v15  ;;  %v2533_v23 = vsel %vm2532_vm14, %v7835_v63, %v7870_v31 }
 0x2ca   : > { %3102 = vmatpush.bf16.msra.mxu3 %v2697_v6 }
 0x2cd   : > { %2571 = vrot.lane.b32.xlu1 %v2429_v42, %s6657_s10  ;;  %3074 = vmatpush.bf16.msra.mxu1 %v7842_v17  ;;  %v2426_v17 = vsel %vm2259_vm7, %v7652_v26, %v7910_v60  ;;  %vm10152_vm7 = vcmask 850944  }
 0x2ce   : > { %2848 = vrot.lane.b32.xlu0 %v7835_v63, %s6658_s1  ;;  %2812 = vrot.lane.b32.xlu2 %v2453_v7, %s6658_s1  ;;  %v8144_v63 = vsel %vm2396_vm15, %v7597_v51, %v7855_v11  ;;  %vm2523_vm15 = vcmask 719872  }
 0x2cf   : > { %v8104_v59 = vpop.permute.xlu1 %2553  ;;  %10142 = vst [vmem:[#allocation67_spill] sm:$0xff] %v8144_v63  ;;  %v2524_v51 = vsel %vm2523_vm15, %v7818_v14, %v7872_v29 }
 0x2d0   : > { %v8106_v45 = vpop.permute.xlu0 %2293  ;;  %v8108_v16 = vpop.permute.xlu2 %2794  ;;  %v2670_v3 = vsel %vm2663_vm3, %v2552_v35, %v8104_v59 }
 0x2d1   : > { %3075 = vmatpush.bf16.msra.mxu1 %v7899_v30  ;;  %3089 = vmatpush.bf16.msra.mxu2 %v2670_v3 }
 0x2d5   : > { %2762 = vrot.lane.b32.xlu1 %v7443_v43, %s6658_s1  ;;  %3076 = vmatpush.bf16.msra.mxu1 %v7970_v40 }
 0x2d6   : > { %2365 = vrot.lane.b32.xlu2 %v7454_v56, %s6660_s15  ;;  %2563 = vrot.lane.b32.xlu0 %v2426_v17, %s6657_s10  ;;  %s10031_s15 = smov 118  }
 0x2d7   : > { %v2801_v7 = vpop.permute.xlu1 %2800 }
 0x2d8   : > { %v2544_v10 = vpop.permute.xlu0 %2543  ;;  %v8122_v35 = vpop.permute.xlu2 %2281  ;;  %v2904_v30 = vsel %vm10048_vm0, %v2801_v7, %v8063_v39 }
 0x2d9   : > { %10140 = vst [vmem:[#allocation65_spill] sm:$0xff] %v8122_v35  ;;  %3077 = vmatpush.bf16.msra.mxu1 %v8011_v53  ;;  %3114 = vmatpush.bf16.msrb.mxu0 %v2904_v30 }
 0x2dd   : > { %2850 = vrot.lane.b32.xlu1 %v2533_v23, %s6658_s1  ;;  %v2492_v23 = vsel %vm2489_vm6, %v7637_v22, %v7929_v24  ;;  %v2423_v22 = vsel %vm10065_vm9, %v7693_v36, %v7874_v13  ;;  %v2504_v36 = vsel %vm10064_vm13, %v7731_v48, %v7931_v37  ;;  %v2420_v48 = vsel %vm10066_vm10, %v7727_v46, %v7963_v55 }
 0x2de   : > { %2804 = vrot.lane.b32.xlu2 %v8042_v25, %s6658_s1  ;;  %2840 = vrot.lane.b32.xlu0 %v7818_v14, %s6658_s1  ;;  %vm10151_vm6 = vcmask 1006592  }
 0x2df   : > { %v8135_v6 = vpop.permute.xlu1 %2460 }
 0x2e0   : > { %v8137_v42 = vpop.permute.xlu0 %2617  ;;  %v2536_v3 = vpop.permute.xlu2 %2535 }
 0x2e1   : > { %10141 = vst [vmem:[#allocation66_spill] sm:$0xff] %v8137_v42  ;;  %v2694_v17 = vsel %vm2663_vm3, %v2616_v5, %v8137_v42 }
 0x2e2   : > { %3103 = vmatpush.bf16.msra.mxu3 %v2694_v17  ;;  %v2516_v17 = vsel %vm2513_vm1, %v7763_v58, %v7959_v32 }
 0x2e5   : > { %2651 = vrot.lane.b32.xlu1 %v8144_v63, %s6657_s10 }
 0x2e6   : > { %2985 = vrot.lane.b32.xlu2 %v7443_v43, %s10031_s15  ;;  %2987 = vrot.lane.b32.xlu0 %v7454_v56, %s10031_s15 }
 0x2e7   : > { %v8152_v25 = vpop.permute.xlu1 %2545 }
 0x2e8   : > { %v2881_v7 = vpop.permute.xlu0 %2880  ;;  %v2608_v5 = vpop.permute.xlu2 %2607  ;;  %v2667_v30 = vsel %vm2663_vm3, %v2544_v10, %v8152_v25 }
 0x2e9   : > { %3090 = vmatpush.bf16.msra.mxu2 %v2667_v30 }
 0x2ed   : > { %2842 = vrot.lane.b32.xlu1 %v2524_v51, %s6658_s1 }
 0x2ee   : > { %2643 = vrot.lane.b32.xlu2 %v2492_v23, %s6657_s10  ;;  %2796 = vrot.lane.b32.xlu0 %v2516_v17, %s6658_s1 }
 0x2ef   : > { %v2793_v10 = vpop.permute.xlu1 %2792 }
 0x2f0   : > { %v8168_v30 = vpop.permute.xlu0 %2457  ;;  %v8170_v26 = vpop.permute.xlu2 %2786  ;;  %v2901_v14 = vsel %vm10048_vm0, %v2793_v10, %v8108_v16 }
 0x2f1   : > { %3115 = vmatpush.bf16.msrb.mxu0 %v2901_v14 }
 0x2f5   : > { %2555 = vrot.lane.b32.xlu1 %v2423_v22, %s6657_s10 }
 0x2f6   : > { %2834 = vrot.lane.b32.xlu2 %v7975_v34, %s6658_s1  ;;  %2884 = vrot.lane.b32.xlu0 %v8082_v27, %s6658_s1  ;;  %v2480_v27 = vsel %vm2477_vm8, %v10143_v18, %v7995_v61 }
 0x2f7   : > { %v8182_v58 = vpop.permute.xlu1 %2882 }
 0x2f8   : > { %v8184_v51 = vpop.permute.xlu0 %2537  ;;  %v8186_v17 = vpop.permute.xlu2 %2587  ;;  %v2934_v10 = vsel %vm10048_vm0, %v2881_v7, %v8182_v58 }
 0x2f9   : > { %3126 = vmatpush.bf16.msrb.mxu1 %v2934_v10  ;;  %v2664_v14 = vsel %vm2663_vm3, %v2536_v3, %v8184_v51 }
 0x2fa   : > { %3091 = vmatpush.bf16.msra.mxu2 %v2664_v14 }
 0x2fd   : > { %2832 = vrot.lane.b32.xlu1 %v7970_v40, %s6658_s1 }
 0x2fe   : > { %2788 = vrot.lane.b32.xlu0 %v2504_v36, %s6658_s1  ;;  %2635 = vrot.lane.b32.xlu2 %v2480_v27, %s6657_s10 }
 0x2ff   : > { %v8202_v7 = vpop.permute.xlu1 %2521 }
 0x300   : > { %v8204_v10 = vpop.permute.xlu0 %2609  ;;  %v2777_v3 = vpop.permute.xlu2 %2776 }
 0x301   : > { %10144 = vst [vmem:[#allocation41_spill] sm:$0xff] %v8204_v10  ;;  %v2691_v40 = vsel %vm2663_vm3, %v2608_v5, %v8204_v10  ;;  %v10145_v5 = vld [vmem:[#allocation45_spill] sm:$0xff] }
 0x302   : > { %3104 = vmatpush.bf16.msra.mxu3 %v2691_v40  ;;  %v2468_v40 = vsel %vm2355_vm12, %v10145_v5, %v7981_v21  ;;  %vm10146_vm12 = vcmask 842752  }
 0x305   : > { %2547 = vrot.lane.b32.xlu1 %v2420_v48, %s6657_s10 }
 0x306   : > { %2876 = vrot.lane.b32.xlu0 %v8144_v63, %s6658_s1  ;;  %2826 = vrot.lane.b32.xlu2 %v8035_v0, %s6658_s1 }
 0x307   : > { %v8216_v18 = vpop.permute.xlu1 %2595 }
 0x308   : > { %v2873_v36 = vpop.permute.xlu0 %2872  ;;  %v8218_v14 = vpop.permute.xlu2 %2866 }
 0x30d   : > { %2824 = vrot.lane.b32.xlu1 %v8011_v53, %s6658_s1  ;;  %v2465_v53 = vsel %vm10146_vm12, %v7746_v52, %v8028_v1  ;;  %v6192_v52 = vld [vmem:[%s10098_s9 + $0x24] sm:$0xf0]  ;;  %vm3445_vm12 = vcmask 417048  }
 0x30e   : > { %2780 = vrot.lane.b32.xlu0 %v2423_v22, %s6658_s1  ;;  %2627 = vrot.lane.b32.xlu2 %v2468_v40, %s6657_s10 }
 0x30f   : > { %v2785_v46 = vpop.permute.xlu1 %2784 }
 0x310   : > { %v8227_v63 = vpop.permute.xlu2 %2770  ;;  %v2600_v10 = vpop.permute.xlu0 %2599  ;;  %v2898_v42 = vsel %vm10048_vm0, %v2785_v46, %v8170_v26 }
 0x311   : > { %3116 = vmatpush.bf16.msrb.mxu0 %v2898_v42 }
 0x315   : > { %2539 = vrot.lane.b32.xlu1 %v7454_v56, %s6657_s10 }
 0x316   : > { %2619 = vrot.lane.b32.xlu0 %v2465_v53, %s6657_s10  ;;  %2597 = vrot.lane.b32.xlu2 %v7714_v44, %s6657_s10  ;;  %v6313_v53 = vld [vmem:[%s10098_s9 + $0xc] sm:$0xf] }
 0x317   : > { %v8239_v22 = vpop.permute.xlu1 %2874 }
 0x318   : > { %v8241_v40 = vpop.permute.xlu2 %2858  ;;  %v8243_v5 = vpop.permute.xlu0 %2778  ;;  %v2931_v46 = vsel %vm10048_vm0, %v2873_v36, %v8239_v22 }
 0x319   : > { %3127 = vmatpush.bf16.msrb.mxu1 %v2931_v46  ;;  %v2895_v42 = vsel %vm10048_vm0, %v2777_v3, %v8243_v5  ;;  %v8263_v46 = vor.u32 %v6313_v53, %v6192_v52 }
 0x31a   : > { %3117 = vmatpush.bf16.msrb.mxu0 %v2895_v42 }
 0x31b   : > { %10147 = vst [vmem:[#allocation68_spill] sm:$0xff] %v8263_v46 }
 0x31d   : > { %2868 = vrot.lane.b32.xlu1 %v2492_v23, %s6658_s1  ;;  %v10148_v23 = vld [vmem:[#allocation39_spill] sm:$0xff] }
 0x31e   : > { %2589 = vrot.lane.b32.xlu0 %v7799_v8, %s6657_s10  ;;  %2860 = vrot.lane.b32.xlu2 %v2480_v27, %s6658_s1  ;;  %v10149_v27 = vld [vmem:[#allocation52_spill] sm:$0xff] }
 0x31f   : > { %v8255_v15 = vpop.permute.xlu1 %2601  ;;  %v2297_v42 = vsel %vm10150_vm5, %v10149_v27, %v8106_v45  ;;  %v2462_v27 = vsel %vm10152_vm7, %v7778_v62, %v8135_v6  ;;  %v6316_v62 = vld [vmem:[%s10098_s9 + $0x20] sm:$0xf0]  ;;  %vm3454_vm5 = vcmask 564648   ;;  %vm10193_vm7 = vcmask 728648  }
 0x320   : > { %v8257_v12 = vpop.permute.xlu0 %2579  ;;  %v8259_v36 = vpop.permute.xlu2 %2659  ;;  %v2688_v3 = vsel %vm2663_vm3, %v2600_v10, %v8255_v15 }
 0x321   : > { %3105 = vmatpush.bf16.msra.mxu3 %v2688_v3 }
 0x324   : > { %3106 = vmatmul.bf16.vlgmr.msra.gmra.mxu3 %v8263_v46  ;;  %v2285_v46 = vsel %vm10151_vm6, %v7801_v9, %v8122_v35  ;;  %v10153_v9 = vld [vmem:[#allocation49_spill] sm:$0xff]  ;;  %vm10192_vm6 = vcmask 581048  }
 0x325   : > { %3154 = vmatpush.bf16.msrb.mxu3 %v10148_v23  ;;  %2772 = vrot.lane.b32.xlu1 %v2420_v48, %s6658_s1  ;;  %v6182_v48 = vld [vmem:[%s10098_s9] sm:$0xf]  ;;  %v6315_v23 = vld [vmem:[%s10098_s9 + $0x18] sm:$0xf0] }
 0x326   : > { %2764 = vrot.lane.b32.xlu0 %v7454_v56, %s6658_s1  ;;  %2661 = vrot.lane.b32.xlu2 %v7853_v19, %s6657_s10  ;;  %v8283_v56 = vor.u32 %v6315_v23, %v6182_v48  ;;  %v10154_v23 = vld [vmem:[#allocation51_spill] sm:$0xff] }
 0x327   : > { %v2865_v52 = vpop.permute.xlu1 %2864 }
 0x328   : > { %v8275_v10 = vpop.permute.xlu0 %2820  ;;  %v8277_v53 = vpop.permute.xlu2 %2812  ;;  %v2928_v3 = vsel %vm10048_vm0, %v2865_v52, %v8218_v14  ;;  %3064 = vmatmul.bf16.vlgmr.msra.gmra.mxu0 %v8283_v56 }
 0x329   : > { %3155 = vmatpush.bf16.msrb.mxu3 %v2297_v42  ;;  %3128 = vmatpush.bf16.msrb.mxu1 %v2928_v3  ;;  %v8296_v42 = vsel %vm2319_vm11, %v7750_v54, %v8168_v30  ;;  %v2534_v54 = vsel %vm2532_vm14, %v7870_v31, %v8073_v38  ;;  %vm2991_vm11 = vcmask 965632   ;;  %vm10063_vm14 = vcmask 130048  }
 0x32d   : > { %3156 = vmatpush.bf16.msrb.mxu3 %v2285_v46  ;;  %2611 = vrot.lane.b32.xlu1 %v2462_v27, %s6657_s10 }
 0x32e   : > { %2603 = vrot.lane.b32.xlu0 %v8296_v42, %s6657_s10  ;;  %2581 = vrot.lane.b32.xlu2 %v7833_v49, %s6657_s10 }
 0x32f   : > { %v2769_v46 = vpop.permute.xlu1 %2768 }
 0x330   : > { %v8303_v52 = vpop.permute.xlu0 %2377  ;;  %v8305_v3 = vpop.permute.xlu2 %2365  ;;  %v2892_v48 = vsel %vm10048_vm0, %v2769_v46, %v8227_v63 }
 0x331   : > { %3157 = vmatpush.bf16.msrb.mxu3 %v10153_v9  ;;  %3118 = vmatpush.bf16.msrb.mxu0 %v2892_v48  ;;  %v2525_v9 = vsel %vm2523_vm15, %v7872_v29, %v8202_v7  ;;  %vm3436_vm15 = vcmask 269448  }
 0x335   : > { %3158 = vmatpush.bf16.msrb.mxu3 %v10154_v23  ;;  %2852 = vrot.lane.b32.xlu1 %v2534_v54, %s6658_s1  ;;  %v6190_v54 = vld [vmem:[%s10098_s9 + $0x8] sm:$0xf] }
 0x336   : > { %2886 = vrot.lane.b32.xlu0 %v7853_v19, %s6658_s1  ;;  %2844 = vrot.lane.b32.xlu2 %v2525_v9, %s6658_s1  ;;  %v8327_v35 = vor.u32 %v6316_v62, %v6190_v54  ;;  %v2911_v62 = vsel %vm10048_vm0, %v7961_v47, %v8275_v10  ;;  %v10155_v9 = vld [vmem:[#allocation55_spill] sm:$0xff] }
 0x337   : > { %v2857_v46 = vpop.permute.xlu1 %2856 }
 0x338   : > { %v2761_v48 = vpop.permute.xlu0 %2760  ;;  %v8321_v23 = vpop.permute.xlu2 %2804  ;;  %v2925_v31 = vsel %vm10048_vm0, %v2857_v46, %v8241_v40  ;;  %3092 = vmatmul.bf16.vlgmr.msra.gmra.mxu2 %v8327_v35  ;;  %v2686_v46 = vsel %vm2663_vm3, %v10155_v9, %v8216_v18 }
 0x339   : > { %3159 = vmatpush.bf16.msrb.mxu3 %v7862_v20  ;;  %3129 = vmatpush.bf16.msrb.mxu1 %v2925_v31 }
 0x33d   : > { %3160 = vmatpush.bf16.msrb.mxu3 %v7918_v28  ;;  %2653 = vrot.lane.b32.xlu1 %v7855_v11, %s6657_s10 }
 0x33e   : > { %2822 = vrot.lane.b32.xlu0 %v7714_v44, %s6658_s1  ;;  %2645 = vrot.lane.b32.xlu2 %v7929_v24, %s6657_s10  ;;  %v2908_v44 = vsel %vm10048_vm0, %v8018_v41, %v8277_v53 }
 0x33f   : > { %v8341_v29 = vpop.permute.xlu1 %2571 }
 0x340   : > { %v2849_v19 = vpop.permute.xlu0 %2848  ;;  %v2986_v20 = vpop.permute.xlu2 %2985 }
 0x341   : > { %3161 = vmatpush.bf16.msrb.mxu3 %v7443_v43  ;;  %v2905_v43 = vsel %vm10048_vm0, %v8063_v39, %v8321_v23  ;;  %v10156_v39 = vld [vmem:[#allocation54_spill] sm:$0xff] }
 0x344   : > { %3162 = vmatmul.bf16.vlgmr.msrb.gmra.mxu3 %v8283_v56 }
 0x345   : > { %3210 = vmatpush.bf16.msra.mxu3 %v2911_v62  ;;  %2573 = vrot.lane.b32.xlu1 %v7782_v2, %s6657_s10 }
 0x346   : > { %2989 = vrot.lane.b32.xlu0 %v7456_v57, %s10031_s15  ;;  %2878 = vrot.lane.b32.xlu2 %v7855_v11, %s6658_s1  ;;  %v2683_v11 = vsel %vm2663_vm3, %v10156_v39, %v8186_v17  ;;  %s6664_s15 = smov 115  }
 0x347   : > { %v8356_v28 = vpop.permute.xlu1 %2762 }
 0x348   : > { %v8358_v47 = vpop.permute.xlu2 %2643  ;;  %v8360_v41 = vpop.permute.xlu0 %2563  ;;  %v2889_v2 = vsel %vm10048_vm0, %v2761_v48, %v8356_v28 }
 0x349   : > { %3211 = vmatpush.bf16.msra.mxu3 %v2908_v44  ;;  %3119 = vmatpush.bf16.msrb.mxu0 %v2889_v2  ;;  %v10158_v44 = vld [vmem:[#allocation61_spill] sm:$0xff]  ;;  %v6318_v2 = vld [vmem:[%s10098_s9 + $0x30] sm:$0xf0] }
 0x34d   : > { %3212 = vmatpush.bf16.msra.mxu3 %v2905_v43  ;;  %3182 = vmatpush.bf16.msra.mxu0 %v2686_v46  ;;  %v2677_v43 = vsel %vm2663_vm3, %v10158_v44, %v8341_v29  ;;  %v6312_v44 = vld [vmem:[%s10098_s9 + $0x4] sm:$0xf] }
 0x34e   : > { %2836 = vrot.lane.b32.xlu1 %v2462_v27, %s6658_s1  ;;  %2814 = vrot.lane.b32.xlu0 %v7799_v8, %s6658_s1  ;;  %v10157_v8 = vld [vmem:[#allocation59_spill] sm:$0xff] }
 0x34f   : > { %2637 = vrot.lane.b32.xlu2 %v7995_v61, %s6657_s10  ;;  %v8375_v48 = vpop.permute.xlu1 %2850  ;;  %v2680_v62 = vsel %vm2663_vm3, %v10157_v8, %v8257_v12 }
 0x350   : > { %v8377_v31 = vpop.permute.xlu2 %2834  ;;  %v2841_v54 = vpop.permute.xlu0 %2840  ;;  %v2922_v27 = vsel %vm10048_vm0, %v2849_v19, %v8375_v48  ;;  %v6206_v19 = vld [vmem:[%s10098_s9 + $0x18] sm:$0xf] }
 0x351   : > { %3183 = vmatpush.bf16.msra.mxu0 %v2683_v11  ;;  %3130 = vmatpush.bf16.msrb.mxu1 %v2922_v27  ;;  %v8403_v11 = vor.u32 %v6318_v2, %v6206_v19  ;;  %v10159_v27 = vld [vmem:[#allocation42_spill] sm:$0xff] }
 0x355   : > { %3184 = vmatpush.bf16.msra.mxu0 %v2680_v62 }
 0x356   : > { %2565 = vrot.lane.b32.xlu1 %v7910_v60, %s6657_s10  ;;  %2557 = vrot.lane.b32.xlu0 %v7874_v13, %s6657_s10 }
 0x357   : > { %2870 = vrot.lane.b32.xlu2 %v7929_v24, %s6658_s1  ;;  %v8395_v9 = vpop.permute.xlu1 %2651  ;;  %v2674_v24 = vsel %vm2663_vm3, %v8061_v50, %v8360_v41 }
 0x358   : > { %v8397_v46 = vpop.permute.xlu0 %2987  ;;  %v8399_v39 = vpop.permute.xlu2 %2635 }
 0x359   : > { %3185 = vmatpush.bf16.msra.mxu0 %v2677_v43  ;;  %v2992_v60 = vsel %vm2991_vm11, %v2986_v20, %v8397_v46  ;;  %v10160_v20 = vld [vmem:[#allocation44_spill] sm:$0xff]  ;;  %v6184_v43 = vld [vmem:[%s10098_s9 + $0x1c] sm:$0xf0] }
 0x35a   : > { %3147 = vmatpush.bf16.msrb.mxu2 %v2992_v60  ;;  %v8431_v19 = vor.u32 %v6312_v44, %v6184_v43 }
 0x35c   : > { %3078 = vmatmul.bf16.vlgmr.msra.gmra.mxu1 %v8431_v19 }
 0x35d   : > { %3186 = vmatpush.bf16.msra.mxu0 %v2674_v24  ;;  %6208 = vmatmul.msk.bf16.vlgmr.msrb.gmra.mxu2 %vm10063_vm14, %v8403_v11 }
 0x35e   : > { %3168 = vmatpush.bf16.msra.mxu2 %v10159_v27  ;;  %2828 = vrot.lane.b32.xlu1 %v8296_v42, %s6658_s1  ;;  %v6198_v27 = vld [vmem:[%s10098_s9 + $0x10] sm:$0xf] }
 0x35f   : > { %2862 = vrot.lane.b32.xlu0 %v7995_v61, %s6658_s1  ;;  %2806 = vrot.lane.b32.xlu2 %v7833_v49, %s6658_s1  ;;  %v8418_v8 = vpop.permute.xlu1 %2842  ;;  %v2381_v49 = vsel %vm10055_vm4, %v8048_v33, %v8303_v52 }
 0x360   : > { %v8420_v50 = vpop.permute.xlu0 %2796  ;;  %v8422_v62 = vpop.permute.xlu2 %2826  ;;  %v2919_v42 = vsel %vm10048_vm0, %v2841_v54, %v8418_v8 }
 0x361   : > { %3131 = vmatpush.bf16.msrb.mxu1 %v2919_v42  ;;  %v2902_v61 = vsel %vm10048_vm0, %v8108_v16, %v8420_v50  ;;  %v2369_v16 = vsel %vm2367_vm2, %v8088_v4, %v8305_v3  ;;  %vm3426_vm2 = vcmask 121856  }
 0x362   : > { %3169 = vmatpush.bf16.msra.mxu2 %v10160_v20  ;;  %3213 = vmatpush.bf16.msra.mxu3 %v2902_v61  ;;  %v6317_v20 = vld [vmem:[%s10098_s9 + $0x28] sm:$0xf0] }
 0x363   : > { %v8474_v44 = vor.u32 %v6317_v20, %v6198_v27 }
 0x365   : > { %3120 = vmatmul.bf16.vlgmr.msrb.gmra.mxu0 %v8474_v44 }
 0x366   : > { %3170 = vmatpush.bf16.msra.mxu2 %v2381_v49  ;;  %2629 = vrot.lane.b32.xlu1 %v7981_v21, %s6657_s10  ;;  %v10161_v21 = vld [vmem:[#allocation53_spill] sm:$0xff] }
 0x367   : > { %2798 = vrot.lane.b32.xlu0 %v7959_v32, %s6658_s1  ;;  %2621 = vrot.lane.b32.xlu2 %v8028_v1, %s6657_s10  ;;  %v8446_v33 = vpop.permute.xlu1 %2555  ;;  %v10162_v1 = vld [vmem:[#allocation56_spill] sm:$0xff]  ;;  %v6200_v49 = vld [vmem:[%s10098_s9 + $0x2c] sm:$0xf0] }
 0x368   : > { %v8448_v54 = vpop.permute.xlu0 %2884  ;;  %v8450_v2 = vpop.permute.xlu2 %2627  ;;  %v2671_v32 = vsel %vm2663_vm3, %v8104_v59, %v8446_v33 }
 0x369   : > { %3187 = vmatpush.bf16.msra.mxu0 %v2671_v32 }
 0x36a   : > { %3171 = vmatpush.bf16.msra.mxu2 %v2369_v16 }
 0x36e   : > { %3172 = vmatpush.bf16.msra.mxu2 %v10161_v21  ;;  %2549 = vrot.lane.b32.xlu1 %v7963_v55, %s6657_s10 }
 0x36f   : > { %2613 = vrot.lane.b32.xlu0 %v8135_v6, %s6657_s10  ;;  %2541 = vrot.lane.b32.xlu2 %v7456_v57, %s6657_s10  ;;  %v2833_v4 = vpop.permute.xlu1 %2832 }
 0x370   : > { %v8463_v60 = vpop.permute.xlu0 %2788  ;;  %v8465_v24 = vpop.permute.xlu2 %2597  ;;  %v2916_v59 = vsel %vm10048_vm0, %v2833_v4, %v8377_v31  ;;  %v10164_v4 = vld [vmem:[#allocation57_spill] sm:$0xff] }
 0x371   : > { %3132 = vmatpush.bf16.msrb.mxu1 %v2916_v59  ;;  %v2899_v42 = vsel %vm10048_vm0, %v8170_v26, %v8463_v60  ;;  %v2707_v59 = vsel %vm2663_vm3, %v10164_v4, %v8395_v9 }
 0x372   : > { %3173 = vmatpush.bf16.msra.mxu2 %v10162_v1  ;;  %3214 = vmatpush.bf16.msra.mxu3 %v2899_v42 }
 0x376   : > { %3174 = vmatpush.bf16.msra.mxu2 %v7975_v34  ;;  %2854 = vrot.lane.b32.xlu1 %v8073_v38, %s6658_s1  ;;  %v2935_v34 = vsel %vm10048_vm0, %v8182_v58, %v8448_v54  ;;  %v6314_v58 = vld [vmem:[%s10098_s9 + $0x14] sm:$0xf]  ;;  %s10044_s9 = smov 116  }
 0x377   : > { %2605 = vrot.lane.b32.xlu0 %v8168_v30, %s6657_s10  ;;  %2846 = vrot.lane.b32.xlu2 %v8202_v7, %s6658_s1  ;;  %v8485_v26 = vpop.permute.xlu1 %2547  ;;  %v6662_v7 = vmov 0   ;;  %v8515_v21 = vor.u32 %v6314_v58, %v6200_v49  ;;  %v10167_v58 = vld [vmem:[#allocation64_spill] sm:$0xff]  ;;  %s10037_s10 = smov 19  }
 0x378   : > { %v8490_v43 = vpop.permute.xlu0 %2876  ;;  %v8492_v61 = vpop.permute.xlu2 %2860  ;;  %v2668_v38 = vsel %vm2663_vm3, %v8152_v25, %v8485_v26  ;;  %6455 = vset.pattern.permute.xlu1 %v6662_v7  ;;  %6454 = vset.pattern.permute.xlu0 %v6662_v7  ;;  %v2698_v49 = vsel %vm2663_vm3, %v10167_v58, %v8450_v2 }
 0x379   : > { %3188 = vmatpush.bf16.msra.mxu0 %v2668_v38  ;;  %6456 = vset.pattern.permute.xlu2 %v6662_v7 }
 0x37a   : > { %3175 = vmatpush.bf16.msra.mxu2 %v8035_v0  ;;  %v2932_v0 = vsel %vm10048_vm0, %v8239_v22, %v8490_v43 }
 0x37d   : > { %3176 = vmatmul.bf16.vlgmr.msra.gmra.mxu2 %v8431_v19 }
 0x37e   : > { %3224 = vmatpush.bf16.msrb.mxu2 %v2935_v34  ;;  %2790 = vrot.lane.b32.xlu1 %v7931_v37, %s6658_s1  ;;  %v10163_v37 = vld [vmem:[#allocation58_spill] sm:$0xff] }
 0x37f   : > { %2774 = vrot.lane.b32.xlu0 %v7963_v55, %s6658_s1  ;;  %2838 = vrot.lane.b32.xlu2 %v8135_v6, %s6658_s1  ;;  %v2825_v25 = vpop.permute.xlu1 %2824  ;;  %v2710_v1 = vsel %vm2663_vm3, %v10163_v37, %v8259_v36  ;;  %v3005_v6 = vld [vmem:[%s10097_s13] sm:$0xff]  ;;  %v10168_v37 = vld [vmem:[#allocation66_spill] sm:$0xff] }
 0x380   : > { %v8509_v16 = vpop.permute.xlu0 %2780  ;;  %v8511_v22 = vpop.permute.xlu2 %2661  ;;  %v2913_v32 = vsel %vm10048_vm0, %v2825_v25, %v8422_v62 }
 0x381   : > { %3133 = vmatpush.bf16.msrb.mxu1 %v2913_v32  ;;  %v2896_v55 = vsel %vm10048_vm0, %v8243_v5, %v8509_v16  ;;  %v2926_v32 = vsel %vm10048_vm0, %v8241_v40, %v8492_v61 }
 0x382   : > { %3225 = vmatpush.bf16.msrb.mxu2 %v2932_v0  ;;  %3215 = vmatpush.bf16.msra.mxu3 %v2896_v55 }
 0x384   : > { %3134 = vmatmul.bf16.vlgmr.msrb.gmra.mxu1 %v8515_v21 }
 0x385   : > { %3196 = vmatpush.bf16.msra.mxu1 %v2710_v1 }
 0x386   : > { %2782 = vrot.lane.b32.xlu1 %v7874_v13, %s6658_s1  ;;  %v10165_v13 = vld [vmem:[#allocation60_spill] sm:$0xff] }
 0x387   : > { %2766 = vrot.lane.b32.xlu2 %v7456_v57, %s6658_s1  ;;  %v8532_v27 = vpop.permute.xlu1 %2539  ;;  %3009 = vperm.xlu0 %6454, %v3005_v6   ;;  %v2704_v42 = vsel %vm2663_vm3, %v10165_v13, %v8358_v47  ;;  %v10166_v57 = vld [vmem:[#allocation62_spill] sm:$0xff] }
 0x388   : > { %v8534_v5 = vpop.permute.xlu0 %2619  ;;  %v2665_v20 = vsel %vm2663_vm3, %v8184_v51, %v8532_v27  ;;  %v8542_v34 = vpop.permute.xlu2 %2581  ;;  %v2701_v38 = vsel %vm2663_vm3, %v10166_v57, %v8399_v39 }
 0x389   : > { %3197 = vmatpush.bf16.msra.mxu1 %v2707_v59  ;;  %3189 = vmatpush.bf16.msra.mxu0 %v2665_v20  ;;  %v2695_v1 = vsel %vm2663_vm3, %v10168_v37, %v8534_v5  ;;  %v10169_v59 = vld [vmem:[#allocation63_spill] sm:$0xff]  ;;  %v10175_v37 = vld [vmem:[#allocation45_spill] sm:$0xff] }
 0x38c   : > { %3190 = vmatmul.bf16.vlgmr.msra.gmra.mxu0 %v8327_v35 }
 0x38d   : > { %3198 = vmatpush.bf16.msra.mxu1 %v2704_v42  ;;  %v10170_v42 = vld [vmem:[#allocation41_spill] sm:$0xff] }
 0x38e   : > { %2830 = vrot.lane.b32.xlu1 %v8168_v30, %s6658_s1  ;;  %v3006_v30 = vld [vmem:[%s10097_s13 + $0x8] sm:$0xff]  ;;  %s10184_s1 = smov 15   ;;  %s10214_s13 = smov 106  }
 0x38f   : > { %v8550_v7 = vpop.permute.xlu1 %2868 }
 0x390   : > { %v8552_v51 = vpop.permute.xlu0 %2589  ;;  %v2929_v0 = vsel %vm10048_vm0, %v8218_v14, %v8550_v7  ;;  %v8561_v25 = vpop.permute.xlu2 %2844 }
 0x391   : > { %3199 = vmatpush.bf16.msra.mxu1 %v2701_v38  ;;  %3226 = vmatpush.bf16.msrb.mxu2 %v2929_v0  ;;  %v10172_v38 = vld [vmem:[#allocation37_spill] sm:$0xff] }
 0x395   : > { %3200 = vmatpush.bf16.msra.mxu1 %v2698_v49  ;;  %3227 = vmatpush.bf16.msrb.mxu2 %v2926_v32  ;;  %v10173_v32 = vld [vmem:[#allocation68_spill] sm:$0xff] }
 0x396   : > { %3014 = vperm.xlu1 %6455, %v3006_v30  }
 0x397   : > { %v8569_v14 = vpop.permute.xlu1 %2772 }
 0x398   : > { %v8571_v55 = vpop.permute.xlu0 %2764  ;;  %v2893_v6 = vsel %vm10048_vm0, %v8227_v63, %v8569_v14  ;;  %v8579_v4 = vpop.permute.xlu2 %2645  ;;  %v10171_v63 = vld [vmem:[#allocation67_spill] sm:$0xff] }
 0x399   : > { %3201 = vmatpush.bf16.msra.mxu1 %v2695_v1  ;;  %3216 = vmatpush.bf16.msra.mxu3 %v2893_v6  ;;  %v2890_v40 = vsel %vm10048_vm0, %v8356_v28, %v8571_v55 }
 0x39d   : > { %3217 = vmatpush.bf16.msra.mxu3 %v2890_v40 }
 0x39f   : > { %v8582_v20 = vpop.permute.xlu1 %2611 }
 0x3a0   : > { %v8584_v13 = vpop.permute.xlu0 %2603  ;;  %v2692_v57 = vsel %vm2663_vm3, %v10170_v42, %v8582_v20  ;;  %3218 = vmatmul.bf16.vlgmr.msra.gmra.mxu3 %v8474_v44  ;;  %v2879_v58 = vpop.permute.xlu2 %2878 }
 0x3a1   : > { %3266 = vmatpush.bf16.msrb.mxu3 %v10169_v59  ;;  %3202 = vmatpush.bf16.msra.mxu1 %v2692_v57  ;;  %v2689_v28 = vsel %vm2663_vm3, %v8255_v15, %v8584_v13  ;;  %v2920_v15 = vsel %vm10048_vm0, %v8418_v8, %v8561_v25  ;;  %v10177_v59 = vld [vmem:[#allocation47_spill] sm:$0xff] }
 0x3a5   : > { %3267 = vmatpush.bf16.msrb.mxu3 %v10171_v63  ;;  %3203 = vmatpush.bf16.msra.mxu1 %v2689_v28  ;;  %v2687_v63 = vsel %vm2663_vm3, %v8216_v18, %v8465_v24  ;;  %v10180_v28 = vld [vmem:[#allocation43_spill] sm:$0xff]  ;;  %v2684_v18 = vsel %vm2663_vm3, %v8186_v17, %v8552_v51  ;;  %v2681_v17 = vsel %vm2663_vm3, %v8257_v12, %v8542_v34 }
 0x3a7   : > { %v8596_v0 = vpop.permute.xlu1 %2852 }
 0x3a8   : > { %v2887_v49 = vpop.permute.xlu0 %2886  ;;  %v2923_v30 = vsel %vm10048_vm0, %v8375_v48, %v8596_v0  ;;  %3204 = vmatmul.bf16.vlgmr.msra.gmra.mxu1 %v10173_v32  ;;  %v10176_v48 = vld [vmem:[#allocation38_spill] sm:$0xff] }
 0x3a9   : > { %3252 = vmatpush.bf16.msrb.mxu1 %v10172_v38  ;;  %3268 = vmatpush.bf16.msrb.mxu3 %v8303_v52  ;;  %v10174_v52 = vld [vmem:[#allocation65_spill] sm:$0xff]  ;;  %v8609_v40 = vpop.permute.xlu2 %2637  ;;  %v2936_v38 = vsel %vm10048_vm0, %v8448_v54, %v2887_v49 }
 0x3aa   : > { %3228 = vmatpush.bf16.msrb.mxu2 %v2923_v30  ;;  %v10181_v30 = vld [vmem:[#allocation48_spill] sm:$0xff] }
 0x3ad   : > { %3253 = vmatpush.bf16.msrb.mxu1 %v8106_v45  ;;  %3269 = vmatpush.bf16.msrb.mxu3 %v8305_v3  ;;  %v10178_v45 = vld [vmem:[#allocation40_spill] sm:$0xff]  ;;  %v10179_v3 = vld [vmem:[#allocation50_spill] sm:$0xff] }
 0x3ae   : > { %3229 = vmatpush.bf16.msrb.mxu2 %v2920_v15 }
 0x3af   : > { %v2654_v1 = vpop.permute.xlu1 %2653 }
 0x3b0   : > { %v2823_v6 = vpop.permute.xlu0 %2822 }
 0x3b1   : > { %3254 = vmatpush.bf16.msrb.mxu1 %v10174_v52  ;;  %3270 = vmatpush.bf16.msrb.mxu3 %v10175_v37  ;;  %v2871_v15 = vpop.permute.xlu2 %2870  ;;  %v10182_v52 = vld [vmem:[#allocation46_spill] sm:$0xff]  ;;  %v2912_v37 = vsel %vm10048_vm0, %v8275_v10, %v2823_v6 }
 0x3b5   : > { %3255 = vmatpush.bf16.msrb.mxu1 %v10176_v48  ;;  %3271 = vmatpush.bf16.msrb.mxu3 %v10177_v59  ;;  %v10183_v48 = vld [vmem:[#allocation36_spill] sm:$0xff] }
 0x3b7   : > { %v2574_v42 = vpop.permute.xlu1 %2573 }
 0x3b8   : > { %v8615_v57 = vpop.permute.xlu0 %2989 }
 0x3b9   : > { %3256 = vmatpush.bf16.msrb.mxu1 %v10178_v45  ;;  %3272 = vmatpush.bf16.msrb.mxu3 %v10179_v3  ;;  %v2993_v8 = vsel %vm2991_vm11, %v8397_v46, %v8615_v57  ;;  %v2933_v46 = vsel %vm10048_vm0, %v8490_v43, %v2879_v58  ;;  %v2807_v43 = vpop.permute.xlu2 %2806  ;;  %vm10194_vm11 = vmmov %vm10192_vm6 }
 0x3ba   : > { %3245 = vmatpush.bf16.msrb.mxu0 %v2993_v8  ;;  %v2906_v34 = vsel %vm10048_vm0, %v8321_v23, %v2807_v43 }
 0x3bd   : > { %3257 = vmatpush.bf16.msrb.mxu1 %v10180_v28  ;;  %3273 = vmatpush.bf16.msrb.mxu3 %v10181_v30 }
 0x3be   : > { %3280 = vmatpush.bf16.msra.mxu0 %v2687_v63 }
 0x3bf   : > { %6209 = vmatmul.msk.bf16.vlgmr.msrb.gmra.mxu0 %vm10063_vm14, %v8403_v11 }
 0x3c0   : > { %3274 = vmatmul.bf16.vlgmr.msrb.gmra.mxu3 %v8431_v19  ;;  %v8636_v54 = vpop.permute.xlu1 %2836  ;;  %v2815_v24 = vpop.permute.xlu0 %2814  ;;  %v2930_v19 = vsel %vm10048_vm0, %v8550_v7, %v2871_v15 }
 0x3c1   : > { %3322 = vmatpush.bf16.msra.mxu3 %v2936_v38  ;;  %3258 = vmatpush.bf16.msrb.mxu1 %v10182_v52  ;;  %v2917_v49 = vsel %vm10048_vm0, %v8377_v31, %v8636_v54  ;;  %v2678_v31 = vsel %vm2663_vm3, %v8341_v29, %v2574_v42  ;;  %v2909_v10 = vsel %vm10048_vm0, %v8277_v53, %v2815_v24  ;;  %v2622_v7 = vpop.permute.xlu2 %2621  ;;  %v3107_v24 = vpop.f32.mrf.mxu3 }
 0x3c2   : > { %3281 = vmatpush.bf16.msra.mxu0 %v2684_v18  ;;  %3230 = vmatpush.bf16.msrb.mxu2 %v2917_v49  ;;  %v2696_v42 = vsel %vm2663_vm3, %v8534_v5, %v2622_v7 }
 0x3c5   : > { %3323 = vmatpush.bf16.msra.mxu3 %v2933_v46  ;;  %3259 = vmatpush.bf16.msrb.mxu1 %v10183_v48 }
 0x3c6   : > { %3282 = vmatpush.bf16.msra.mxu0 %v2681_v17 }
 0x3c8   : > { %3260 = vmatmul.bf16.vlgmr.msrb.gmra.mxu1 %v8283_v56  ;;  %v2566_v51 = vpop.permute.xlu1 %2565  ;;  %v2558_v58 = vpop.permute.xlu0 %2557 }
 0x3c9   : > { %3308 = vmatpush.bf16.msra.mxu1 %v2912_v37  ;;  %3324 = vmatpush.bf16.msra.mxu3 %v2930_v19  ;;  %v2675_v12 = vsel %vm2663_vm3, %v8360_v41, %v2566_v51  ;;  %v2672_v56 = vsel %vm2663_vm3, %v8446_v33, %v2558_v58  ;;  %v2711_v41 = vsel %vm2663_vm3, %v8259_v36, %v8511_v22  ;;  %v2542_v22 = vpop.permute.xlu2 %2541 }
 0x3ca   : > { %3283 = vmatpush.bf16.msra.mxu0 %v2678_v31  ;;  %v2708_v33 = vsel %vm2663_vm3, %v8395_v9, %v2654_v1  ;;  %v3109_v31 = vpop.f32.mrf.mxu3 }
 0x3cd   : > { %3309 = vmatpush.bf16.msra.mxu1 %v2909_v10 }
 0x3ce   : > { %3284 = vmatpush.bf16.msra.mxu0 %v2675_v12 }
 0x3d0   : > { %v8660_v29 = vpop.permute.xlu1 %2828 }
 0x3d1   : > { %3310 = vmatpush.bf16.msra.mxu1 %v2906_v34  ;;  %v2863_v53 = vpop.permute.xlu0 %2862  ;;  %v2914_v6 = vsel %vm10048_vm0, %v8422_v62, %v8660_v29  ;;  %v2705_v62 = vsel %vm2663_vm3, %v8358_v47, %v8579_v4  ;;  %v2847_v4 = vpop.permute.xlu2 %2846 }
 0x3d2   : > { %3285 = vmatpush.bf16.msra.mxu0 %v2672_v56  ;;  %3231 = vmatpush.bf16.msrb.mxu2 %v2914_v6  ;;  %v2927_v23 = vsel %vm10048_vm0, %v8492_v61, %v2863_v53  ;;  %v2702_v61 = vsel %vm2663_vm3, %v8399_v39, %v8609_v40 }
 0x3d3   : > { %3325 = vmatpush.bf16.msra.mxu3 %v2927_v23 }
 0x3d5   : > { %3232 = vmatmul.bf16.vlgmr.msrb.gmra.mxu2 %v8515_v21 }
 0x3d6   : > { %3294 = vmatpush.bf16.msra.mxu2 %v2711_v41 }
 0x3d8   : > { %v2630_v59 = vpop.permute.xlu1 %2629 }
 0x3d9   : > { %v2799_v45 = vpop.permute.xlu0 %2798  ;;  %v2699_v47 = vsel %vm2663_vm3, %v8450_v2, %v2630_v59  ;;  %v3079_v63 = vpop.f32.mrf.mxu1 }
 0x3da   : > { %3295 = vmatpush.bf16.msra.mxu2 %v2708_v33  ;;  %v2903_v36 = vsel %vm10048_vm0, %v8420_v50, %v2799_v45  ;;  %v2666_v50 = vsel %vm2663_vm3, %v8532_v27, %v2542_v22  ;;  %v2921_v27 = vsel %vm10048_vm0, %v8561_v25, %v2847_v4  ;;  %v3093_v25 = vpop.f32.mrf.mxu2  ;;  %v3163_v33 = vpop.f32.mrf.mxu3 }
 0x3db   : > { %3311 = vmatpush.bf16.msra.mxu1 %v2903_v36 }
 0x3de   : > { %3296 = vmatpush.bf16.msra.mxu2 %v2705_v62 }
 0x3e0   : > { %v2550_v3 = vpop.permute.xlu1 %2549 }
 0x3e1   : > { %v2614_v9 = vpop.permute.xlu0 %2613  ;;  %v2669_v1 = vsel %vm2663_vm3, %v8485_v26, %v2550_v3 }
 0x3e2   : > { %3297 = vmatpush.bf16.msra.mxu2 %v2702_v61  ;;  %3286 = vmatpush.bf16.msra.mxu0 %v2669_v1  ;;  %v2693_v2 = vsel %vm2663_vm3, %v8582_v20, %v2614_v9  ;;  %v3095_v52 = vpop.f32.mrf.mxu2  ;;  %v3165_v36 = vpop.f32.mrf.mxu3 }
 0x3e6   : > { %3298 = vmatpush.bf16.msra.mxu2 %v2699_v47  ;;  %3287 = vmatpush.bf16.msra.mxu0 %v2666_v50 }
 0x3e8   : > { %v2855_v39 = vpop.permute.xlu1 %2854 }
 0x3e9   : > { %3288 = vmatmul.bf16.vlgmr.msra.gmra.mxu0 %v8327_v35  ;;  %v2924_v26 = vsel %vm10048_vm0, %v8596_v0, %v2855_v39  ;;  %v2606_v40 = vpop.permute.xlu0 %2605  ;;  %v3065_v35 = vpop.f32.mrf.mxu0 }
 0x3ea   : > { %3299 = vmatpush.bf16.msra.mxu2 %v2696_v42  ;;  %3343 = vmatpush.bf16.msrb.mxu0 %v8615_v57  ;;  %v2690_v5 = vsel %vm2663_vm3, %v8584_v13, %v2606_v40  ;;  %v2839_v57 = vpop.permute.xlu2 %2838  ;;  %v3149_v17 = vpop.f32.mrf.mxu2  ;;  %vm3371_vm3 = vcmask 285848  }
 0x3eb   : > { %3326 = vmatpush.bf16.msra.mxu3 %v2924_v26  ;;  %v2918_v20 = vsel %vm10048_vm0, %v8636_v54, %v2839_v57 }
 0x3ee   : > { %3300 = vmatpush.bf16.msra.mxu2 %v2693_v2 }
 0x3ef   : > { %3327 = vmatpush.bf16.msra.mxu3 %v2921_v27 }
 0x3f0   : > { %v2791_v8 = vpop.permute.xlu1 %2790 }
 0x3f1   : > { %v2900_v0 = vsel %vm10048_vm0, %v8463_v60, %v2791_v8  ;;  %v2775_v28 = vpop.permute.xlu0 %2774  ;;  %v3067_v30 = vpop.f32.mrf.mxu0 }
 0x3f2   : > { %3301 = vmatpush.bf16.msra.mxu2 %v2690_v5  ;;  %3312 = vmatpush.bf16.msra.mxu1 %v2900_v0  ;;  %v3081_v60 = vpop.f32.mrf.mxu1  ;;  %v2767_v15 = vpop.permute.xlu2 %2766 }
 0x3f3   : > { %3328 = vmatpush.bf16.msra.mxu3 %v2918_v20  ;;  %v2891_v54 = vsel %vm10048_vm0, %v8571_v55, %v2767_v15 }
 0x3f5   : > { %3302 = vmatmul.bf16.vlgmr.msra.gmra.mxu2 %v10173_v32  ;;  %v2894_v32 = vsel %vm10048_vm0, %v8569_v14, %v2775_v28 }
 0x3f8   : > { %v2783_v38 = vpop.permute.xlu1 %2782 }
 0x3f9   : > { %v2897_v13 = vsel %vm10048_vm0, %v8509_v16, %v2783_v38  ;;  %6210 = vmatmul.msk.bf16.vlgmr.msrb.gmra.mxu0 %vm10063_vm14, %v8403_v11  ;;  %v8710_v18 = vpop.permute.xlu0 %3009  ;;  %v3121_v49 = vpop.f32.mrf.mxu0 }
 0x3fa   : > { %3313 = vmatpush.bf16.msra.mxu1 %v2897_v13  ;;  %v3066_v11 = vadd.f32 %v3065_v35, %v8710_v18  ;;  %v3164_v62 = vadd.f32 %v3163_v33, %v8710_v18 }
 0x3fc   : > { %v3080_v14 = vadd.f32 %v3079_v63, %v3066_v11 }
 0x3fe   : > { %3314 = vmatpush.bf16.msra.mxu1 %v2894_v32  ;;  %v3094_v19 = vadd.f32 %v3093_v25, %v3080_v14  ;;  %v6667_v32 = vmov -inf  }
 0x3ff   : > { %3360 = vst [vmem:[#allocation3 + $0x18] sm:$0xff] %v6667_v32 }
 0x400   : > { %v2831_v46 = vpop.permute.xlu1 %2830  ;;  %v3108_v51 = vadd.f32 %v3107_v24, %v3094_v19  ;;  %3356 = vst [vmem:[#allocation3] sm:$0xff] %v6667_v32 }
 0x401   : > { %v2915_v16 = vsel %vm10048_vm0, %v8660_v29, %v2831_v46  ;;  %v3135_v37 = vpop.f32.mrf.mxu1  ;;  %v3123_v58 = vpop.f32.mrf.mxu0  ;;  %3357 = vst [vmem:[#allocation3 + $0x8] sm:$0xff] %v6667_v32  ;;  %vm10056_vm0 = vcmask 916480  }
 0x402   : > { %3315 = vmatpush.bf16.msra.mxu1 %v2891_v54  ;;  %3329 = vmatpush.bf16.msra.mxu3 %v2915_v16  ;;  %v3122_v56 = vadd.f32 %v3121_v49, %v3108_v51  ;;  %3359 = vst.msk [vmem:[#allocation3 + $0x10] sm:$0xff] %vm2477_vm8, %v6667_v32 }
 0x403   : > { %3361 = vst [vmem:[#allocation3 + $0x20] sm:$0xff] %v6667_v32 }
 0x404   : > { %3362 = vst.msk [vmem:[#allocation3 + $0x28] sm:$0xff] %vm2477_vm8, %v6667_v32  ;;  %vm3380_vm8 = vcmask 433448  }
 0x405   : > { %3316 = vmatmul.bf16.vlgmr.msra.gmra.mxu1 %v8474_v44  ;;  %3330 = vmatmul.bf16.vlgmr.msra.gmra.mxu3 %v8515_v21  ;;  %v3151_v44 = vpop.f32.mrf.mxu2  ;;  %v3136_v21 = vadd.f32 %v3135_v37, %v3122_v56 }
 0x407   : > { %v3150_v41 = vadd.f32 %v3149_v17, %v3136_v21 }
 0x408   : > { %v8719_v48 = vpop.permute.xlu1 %3014 }
 0x409   : > { %v3068_v55 = vadd.f32 %v3067_v30, %v8719_v48  ;;  %v3137_v34 = vpop.f32.mrf.mxu1  ;;  %v8726_v23 = vmax.f32 %v3150_v41, 0.0  ;;  %v3191_v59 = vpop.f32.mrf.mxu0  ;;  %v3166_v3 = vadd.f32 %v3165_v36, %v8719_v48 }
 0x40b   : > { %v3082_v43 = vadd.f32 %v3081_v60, %v3068_v55 }
 0x40d   : > { %v3096_v10 = vadd.f32 %v3095_v52, %v3082_v43  ;;  %v3177_v45 = vpop.f32.mrf.mxu2 }
 0x40e   : > { %v3178_v22 = vadd.f32 %v3177_v45, %v3164_v62 }
 0x40f   : > { %v3110_v12 = vadd.f32 %v3109_v31, %v3096_v10 }
 0x410   : > { %v3192_v9 = vadd.f32 %v3191_v59, %v3178_v22 }
 0x411   : > { %v3124_v29 = vadd.f32 %v3123_v58, %v3110_v12  ;;  %v3193_v61 = vpop.f32.mrf.mxu0 }
 0x413   : > { %v3138_v7 = vadd.f32 %v3137_v34, %v3124_v29 }
 0x415   : > { %v3152_v53 = vadd.f32 %v3151_v44, %v3138_v7  ;;  %v3179_v47 = vpop.f32.mrf.mxu2 }
 0x416   : > { %v3180_v50 = vadd.f32 %v3179_v47, %v3166_v3 }
 0x417   : > { %v8722_v6 = vmax.f32 %v3152_v53, 0.0 }
 0x418   : > { %v3194_v39 = vadd.f32 %v3193_v61, %v3180_v50 }
 0x419   : > { %3367 = vrot.lane.b32.xlu0 %v8722_v6, %s10037_s10 }
 0x421   : > { %3374 = vrot.lane.b32.xlu0 %v8726_v23, %s10184_s1 }
 0x423   : > { %v3219_v42 = vpop.f32.mrf.mxu3 }
 0x425   : > { %v3205_v1 = vpop.f32.mrf.mxu1 }
 0x426   : > { %v3206_v4 = vadd.f32 %v3205_v1, %v3192_v9 }
 0x428   : > { %v3220_v26 = vadd.f32 %v3219_v42, %v3206_v4 }
 0x42b   : > { %v3221_v0 = vpop.f32.mrf.mxu3 }
 0x42d   : > { %v3207_v5 = vpop.f32.mrf.mxu1 }
 0x42e   : > { %v3208_v57 = vadd.f32 %v3207_v5, %v3194_v39 }
 0x430   : > { %v3222_v20 = vadd.f32 %v3221_v0, %v3208_v57 }
 0x43c   : > { %v3247_v2 = vpop.f32.mrf.mxu0 }
 0x443   : > { %v3275_v60 = vpop.f32.mrf.mxu3 }
 0x444   : > { %v3249_v28 = vpop.f32.mrf.mxu0 }
 0x445   : > { %v3261_v30 = vpop.f32.mrf.mxu1 }
 0x446   : > { %v3262_v11 = vadd.f32 %v3261_v30, %v8710_v18 }
 0x448   : > { %v3276_v49 = vadd.f32 %v3275_v60, %v3262_v11 }
 0x44b   : > { %v3277_v46 = vpop.f32.mrf.mxu3 }
 0x44d   : > { %v3263_v52 = vpop.f32.mrf.mxu1 }
 0x44e   : > { %v3264_v14 = vadd.f32 %v3263_v52, %v8719_v48 }
 0x450   : > { %v3278_v19 = vadd.f32 %v3277_v46, %v3264_v14 }
 0x458   : > { %v3233_v40 = vpop.f32.mrf.mxu2 }
 0x459   : > { %v3234_v27 = vadd.f32 %v3233_v40, %v3220_v26 }
 0x45b   : > { %v3248_v8 = vadd.f32 %v3247_v2, %v3234_v27 }
 0x45d   : > { %v3351_v35 = vmax.f32 %v3248_v8, 0.0 }
 0x45f   : > { %3418 = vrot.lane.b32.xlu2 %v3351_v35, %s10130_s0 }
 0x460   : > { %v3235_v63 = vpop.f32.mrf.mxu2 }
 0x461   : > { %v3236_v25 = vadd.f32 %v3235_v63, %v3222_v20 }
 0x463   : > { %v3250_v38 = vadd.f32 %v3249_v28, %v3236_v25 }
 0x465   : > { %v3354_v13 = vmax.f32 %v3250_v38, 0.0 }
 0x466   : > { %v3289_v15 = vpop.f32.mrf.mxu0 }
 0x467   : > { %3365 = vrot.lane.b32.xlu2 %v8726_v23, %s10037_s10  ;;  %3420 = vrot.lane.b32.xlu1 %v3354_v13, %s10130_s0  ;;  %s10185_s10 = smov 7   ;;  %s10186_s0 = smov 11   ;;  %v3290_v37 = vadd.f32 %v3289_v15, %v3276_v49 }
 0x468   : > { %3441 = vrot.lane.b32.xlu0 %v3354_v13, %s6664_s15 }
 0x46e   : > { %v3291_v54 = vpop.f32.mrf.mxu0 }
 0x46f   : > { %3432 = vrot.lane.b32.xlu2 %v3354_v13, %s6665_s26  ;;  %3430 = vrot.lane.b32.xlu1 %v3351_v35, %s6665_s26  ;;  %v3292_v10 = vadd.f32 %v3291_v54, %v3278_v19  ;;  %s10187_s26 = smov 107  }
 0x470   : > { %3448 = vrot.lane.b32.xlu0 %v3351_v35, %s6666_s18 }
 0x476   : > { %v3345_v17 = vpop.f32.mrf.mxu0 }
 0x477   : > { %3439 = vrot.lane.b32.xlu2 %v3351_v35, %s6664_s15  ;;  %3376 = vrot.lane.b32.xlu1 %v8722_v6, %s10184_s1  ;;  %s10188_s15 = smov 99   ;;  %s10191_s1 = smov 87  }
 0x478   : > { %3393 = vrot.lane.b32.xlu0 %v8722_v6, %s10185_s10  ;;  %v3303_v16 = vpop.f32.mrf.mxu2 }
 0x479   : > { %v3304_v43 = vadd.f32 %v3303_v16, %v3290_v37 }
 0x47e   : > { %v3347_v7 = vpop.f32.mrf.mxu0 }
 0x47f   : > { %3385 = vrot.lane.b32.xlu2 %v8722_v6, %s10186_s0  ;;  %3383 = vrot.lane.b32.xlu1 %v8726_v23, %s10186_s0  ;;  %s10204_s0 = smov 110  }
 0x480   : > { %3468 = vrot.lane.b32.xlu0 %v3351_v35, %s10124_s11  ;;  %v3305_v31 = vpop.f32.mrf.mxu2 }
 0x481   : > { %v3306_v18 = vadd.f32 %v3305_v31, %v3292_v10 }
 0x482   : > { %v3317_v24 = vpop.f32.mrf.mxu1 }
 0x483   : > { %v3318_v51 = vadd.f32 %v3317_v24, %v3304_v43 }
 0x487   : > { %3391 = vrot.lane.b32.xlu2 %v8726_v23, %s10185_s10  ;;  %3450 = vrot.lane.b32.xlu1 %v3354_v13, %s6666_s18  ;;  %s6668_s18 = smov 3   ;;  %s10189_s10 = smov 95  }
 0x488   : > { %v3331_v55 = vpop.f32.mrf.mxu3 }
 0x489   : > { %v3332_v34 = vadd.f32 %v3331_v55, %v3318_v51 }
 0x48a   : > { %v3319_v12 = vpop.f32.mrf.mxu1 }
 0x48b   : > { %v3368_v58 = vpop.permute.xlu0 %3367  ;;  %v3320_v48 = vadd.f32 %v3319_v12, %v3306_v18  ;;  %v3346_v29 = vadd.f32 %v3345_v17, %v3332_v34 }
 0x48c   : > { %3373 = vst.msk [vmem:[#allocation3 + $0x18] sm:$0xff] %vm3371_vm3, %v3368_v58 }
 0x48d   : > { %v3352_v53 = vmax.f32 %v3346_v29, 0.0 }
 0x48f   : > { %3459 = vrot.lane.b32.xlu2 %v3354_v13, %s10187_s26  ;;  %3457 = vrot.lane.b32.xlu1 %v3351_v35, %s10187_s26  ;;  %s10205_s26 = smov 109  }
 0x490   : > { %v3333_v56 = vpop.f32.mrf.mxu3 }
 0x491   : > { %v3334_v44 = vadd.f32 %v3333_v56, %v3320_v48 }
 0x493   : > { %v3348_v21 = vadd.f32 %v3347_v7, %v3334_v44 }
 0x495   : > { %v3355_v41 = vmax.f32 %v3348_v21, 0.0 }
 0x497   : > { %3472 = vrot.lane.b32.xlu2 %v3354_v13, %s10124_s11  ;;  %3470 = vrot.lane.b32.xlu1 %v3352_v53, %s10124_s11 }
 0x498   : > { %3474 = vrot.lane.b32.xlu0 %v3355_v41, %s10124_s11  ;;  %s10190_s11 = smov 91  }
 0x49f   : > { %3401 = vrot.lane.b32.xlu2 %v8722_v6, %s6668_s18  ;;  %3399 = vrot.lane.b32.xlu1 %v8726_v23, %s6668_s18  ;;  %s10206_s18 = smov 108  }
 0x4a0   : > { %3407 = vrot.lane.b32.xlu0 %v8726_v23, %s10113_s16 }
 0x4a7   : > { %3484 = vrot.lane.b32.xlu2 %v3352_v53, %s10188_s15  ;;  %3409 = vrot.lane.b32.xlu1 %v8722_v6, %s10113_s16  ;;  %v3375_v6 = vpop.permute.xlu0 %3374 }
 0x4a8   : > { %3486 = vrot.lane.b32.xlu0 %v3355_v41, %s10188_s15  ;;  %s10038_s15 = smov 92  }
 0x4af   : > { %3495 = vrot.lane.b32.xlu2 %v3355_v41, %s10189_s10  ;;  %3493 = vrot.lane.b32.xlu1 %v3352_v53, %s10189_s10  ;;  %s10040_s10 = smov 90  }
 0x4b0   : > { %3505 = vrot.lane.b32.xlu0 %v3352_v53, %s10190_s11 }
 0x4b7   : > { %3513 = vrot.lane.b32.xlu2 %v3352_v53, %s10191_s1  ;;  %3507 = vrot.lane.b32.xlu1 %v3355_v41, %s10190_s11 }
 0x4b8   : > { %3515 = vrot.lane.b32.xlu0 %v3355_v41, %s10191_s1  ;;  %s10209_s1 = smov 124  }
 0x4b9   : > { %v3419_v23 = vpop.permute.xlu2 %3418 }
 0x4ba   : > { %3427 = vst.msk [vmem:[#allocation3 + $0x8] sm:$0xff] %vm3426_vm2, %v3419_v23 }
 0x4c1   : > { %v3366_v33 = vpop.permute.xlu2 %3365 }
 0x4c2   : > { %3372 = vst.msk [vmem:[#allocation3] sm:$0xff] %vm3371_vm3, %v3366_v33  ;;  %vm10195_vm3 = vmmov %vm10193_vm7 }
 0x4c3   : > { %3381 = vst.msk [vmem:[#allocation3] sm:$0xff] %vm3380_vm8, %v3375_v6 }
 0x4c9   : > { %v3433_v59 = vpop.permute.xlu2 %3432 }
 0x4d1   : > { %v3440_v45 = vpop.permute.xlu2 %3439 }
 0x4d9   : > { %v3421_v62 = vpop.permute.xlu1 %3420  ;;  %v3386_v36 = vpop.permute.xlu2 %3385 }
 0x4da   : > { %3429 = vst.msk [vmem:[#allocation3 + $0x20] sm:$0xff] %vm3426_vm2, %v3421_v62  ;;  %v3442_v22 = vpop.permute.xlu0 %3441  ;;  %vm3463_vm2 = vcmask 712248  }
 0x4db   : > { %3438 = vst.msk [vmem:[#allocation3 + $0x20] sm:$0xff] %vm3436_vm15, %v3433_v59 }
 0x4dc   : > { %3447 = vst.msk [vmem:[#allocation3 + $0x20] sm:$0xff] %vm3445_vm12, %v3442_v22 }
 0x4e1   : > { %v3431_v61 = vpop.permute.xlu1 %3430  ;;  %v3392_v3 = vpop.permute.xlu2 %3391 }
 0x4e2   : > { %3437 = vst.msk [vmem:[#allocation3 + $0x8] sm:$0xff] %vm3436_vm15, %v3431_v61  ;;  %v3449_v9 = vpop.permute.xlu0 %3448  ;;  %vm10196_vm15 = vcmask 876248  }
 0x4e3   : > { %3446 = vst.msk [vmem:[#allocation3 + $0x8] sm:$0xff] %vm3445_vm12, %v3440_v45  ;;  %vm3481_vm12 = vcmask 859848  }
 0x4e4   : > { %3455 = vst.msk [vmem:[#allocation3 + $0x8] sm:$0xff] %vm3454_vm5, %v3449_v9 }
 0x4e9   : > { %v3460_v1 = vpop.permute.xlu2 %3459  ;;  %v3377_v47 = vpop.permute.xlu1 %3376 }
 0x4ea   : > { %3382 = vst.msk [vmem:[#allocation3 + $0x18] sm:$0xff] %vm3380_vm8, %v3377_v47  ;;  %v3394_v4 = vpop.permute.xlu0 %3393  ;;  %vm3501_vm8 = vcmask 105472  }
 0x4eb   : > { %3390 = vst.msk [vmem:[#allocation3 + $0x18] sm:$0xff] %vm10192_vm6, %v3386_v36  ;;  %vm10197_vm6 = vcmask 842752  }
 0x4ec   : > { %3398 = vst.msk [vmem:[#allocation3 + $0x18] sm:$0xff] %vm10193_vm7, %v3394_v4  ;;  %vm3490_vm7 = vcmask 1007448  }
 0x4f1   : > { %v3473_v50 = vpop.permute.xlu2 %3472  ;;  %v3384_v42 = vpop.permute.xlu1 %3383 }
 0x4f2   : > { %3389 = vst.msk [vmem:[#allocation3] sm:$0xff] %vm10194_vm11, %v3384_v42  ;;  %v3469_v27 = vpop.permute.xlu0 %3468  ;;  %vm10198_vm11 = vmmov %vm10197_vm6 }
 0x4f3   : > { %3397 = vst.msk [vmem:[#allocation3] sm:$0xff] %vm10195_vm3, %v3392_v3  ;;  %vm3424_vm3 = vcmask 1048568  }
 0x4f9   : > { %v3402_v39 = vpop.permute.xlu2 %3401  ;;  %v3451_v26 = vpop.permute.xlu1 %3450 }
 0x4fa   : > { %3406 = vst.msk [vmem:[#allocation3 + $0x18] sm:$0xff] %vm10196_vm15, %v3402_v39 }
 0x4fb   : > { %3456 = vst.msk [vmem:[#allocation3 + $0x20] sm:$0xff] %vm3454_vm5, %v3451_v26  ;;  %vm3413_vm5 = vcmask 1023848  }
 0x4fc   : > { %3465 = vst.msk [vmem:[#allocation3 + $0x20] sm:$0xff] %vm3463_vm2, %v3460_v1 }
 0x501   : > { %v3485_v2 = vpop.permute.xlu2 %3484  ;;  %v3458_v40 = vpop.permute.xlu1 %3457 }
 0x502   : > { %3464 = vst.msk [vmem:[#allocation3 + $0x8] sm:$0xff] %vm3463_vm2, %v3458_v40  ;;  %vm10199_vm2 = vmmov %vm10196_vm15  ;;  %vm3499_vm15 = vcmask 1048552  }
 0x509   : > { %v3496_v5 = vpop.permute.xlu2 %3495  ;;  %v3471_v57 = vpop.permute.xlu1 %3470 }
 0x50a   : > { %3504 = vst.msk [vmem:[#allocation3 + $0x28] sm:$0xff] %vm3501_vm8, %v3496_v5  ;;  %v3477_v8 = vsel %vm10197_vm6, %v3469_v27, %v3471_v57  ;;  %v3475_v35 = vpop.permute.xlu0 %3474  ;;  %vm10201_vm6 = vcmask 400648  }
 0x50b   : > { %3482 = vst.msk [vmem:[#allocation3 + $0x8] sm:$0xff] %vm3481_vm12, %v3477_v8  ;;  %v3478_v0 = vsel %vm10198_vm11, %v3473_v50, %v3475_v35  ;;  %vm3690_vm11 = vcmask 752640  }
 0x50c   : > { %3483 = vst.msk [vmem:[#allocation3 + $0x20] sm:$0xff] %vm3481_vm12, %v3478_v0  ;;  %vm10200_vm12 = vcmask 253048  }
 0x50d   : > { %3491 = vst.msk [vmem:[#allocation3 + $0x8] sm:$0xff] %vm3490_vm7, %v3485_v2 }
 0x511   : > { %v3400_v20 = vpop.permute.xlu1 %3399  ;;  %v3514_v15 = vpop.permute.xlu2 %3513 }
 0x512   : > { %3405 = vst.msk [vmem:[#allocation3] sm:$0xff] %vm10199_vm2, %v3400_v20  ;;  %v3408_v63 = vpop.permute.xlu0 %3407  ;;  %vm3748_vm2 = vcmask 736256  }
 0x513   : > { %3414 = vst.msk [vmem:[#allocation3] sm:$0xff] %vm3413_vm5, %v3408_v63 }
 0x514   : > { %3425 = vst.msk [vmem:[#allocation3] sm:$0xff] %vm3424_vm3, %v3419_v23 }
 0x519   : > { %v3410_v25 = vpop.permute.xlu1 %3409 }
 0x51a   : > { %3415 = vst.msk [vmem:[#allocation3 + $0x18] sm:$0xff] %vm3413_vm5, %v3410_v25  ;;  %v3487_v28 = vpop.permute.xlu0 %3486  ;;  %vm10207_vm5 = vcmask 883712  }
 0x51b   : > { %3428 = vst.msk [vmem:[#allocation3 + $0x18] sm:$0xff] %vm3424_vm3, %v3421_v62  ;;  %v8786_v38 = vld [vmem:[#allocation3] sm:$0xff]  ;;  %vm10067_vm3 = vcmask 744448  }
 0x51c   : > { %3492 = vst.msk [vmem:[#allocation3 + $0x20] sm:$0xff] %vm3490_vm7, %v3487_v28  ;;  %3533 = vrot.lane.b32.xlu1 %v8786_v38, %s10113_s16  ;;  %vm10202_vm7 = vmmov %vm10200_vm12 }
 0x51d   : > { %3503 = vst.msk [vmem:[#allocation3 + $0x20] sm:$0xff] %vm3499_vm15, %v3496_v5 }
 0x521   : > { %v3494_v13 = vpop.permute.xlu1 %3493 }
 0x522   : > { %3500 = vst.msk [vmem:[#allocation3 + $0x8] sm:$0xff] %vm3499_vm15, %v3494_v13  ;;  %v3506_v30 = vpop.permute.xlu0 %3505  ;;  %v8791_v60 = vld [vmem:[#allocation3 + $0x18] sm:$0xff]  ;;  %vm10208_vm15 = vmmov %vm10207_vm5 }
 0x523   : > { %3502 = vst.msk [vmem:[#allocation3 + $0x10] sm:$0xff] %vm3501_vm8, %v3494_v13  ;;  %3539 = vrot.lane.b32.xlu0 %v8791_v60, %s10113_s16  ;;  %vm10203_vm8 = vmmov %vm10201_vm6 }
 0x524   : > { %3511 = vst.msk [vmem:[#allocation3 + $0x10] sm:$0xff] %vm10200_vm12, %v3506_v30  ;;  %v8797_v32 = vld [vmem:[#allocation3 + $0x20] sm:$0xff]  ;;  %vm10212_vm12 = vmmov %vm10207_vm5 }
 0x525   : > { %3519 = vst.msk [vmem:[#allocation3 + $0x10] sm:$0xff] %vm10201_vm6, %v3514_v15  ;;  %3541 = vrot.lane.b32.xlu1 %v8797_v32, %s10113_s16  ;;  %vm10213_vm6 = vmmov %vm10207_vm5 }
 0x529   : > { %v3508_v52 = vpop.permute.xlu1 %3507  ;;  %v8802_v46 = vld [vmem:[#allocation3 + $0x8] sm:$0xff] }
 0x52a   : > { %3512 = vst.msk [vmem:[#allocation3 + $0x28] sm:$0xff] %vm10202_vm7, %v3508_v52  ;;  %v3516_v54 = vpop.permute.xlu0 %3515  ;;  %3535 = vrot.lane.b32.xlu2 %v8802_v46, %s10113_s16  ;;  %vm10062_vm7 = vcmask 261120  }
 0x52b   : > { %3520 = vst.msk [vmem:[#allocation3 + $0x28] sm:$0xff] %vm10203_vm8, %v3516_v54  ;;  %3564 = vrot.lane.b32.xlu0 %v8802_v46, %s10108_s28  ;;  %vm10061_vm8 = vcmask 392192  }
 0x52c   : > { %v8822_v16 = vld [vmem:[#allocation3 + $0x10] sm:$0xff] }
 0x52d   : > { %3568 = vrot.lane.b32.xlu1 %v8791_v60, %s10108_s28 }
 0x532   : > { %3562 = vrot.lane.b32.xlu2 %v8786_v38, %s10108_s28  ;;  %v8832_v11 = vld [vmem:[#allocation3 + $0x28] sm:$0xff] }
 0x533   : > { %3591 = vrot.lane.b32.xlu0 %v8786_v38, %s10204_s0 }
 0x535   : > { %3593 = vrot.lane.b32.xlu1 %v8802_v46, %s10204_s0 }
 0x53a   : > { %3570 = vrot.lane.b32.xlu2 %v8797_v32, %s10108_s28 }
 0x53b   : > { %3599 = vrot.lane.b32.xlu0 %v8797_v32, %s10204_s0 }
 0x53d   : > { %3537 = vrot.lane.b32.xlu1 %v8822_v16, %s10113_s16 }
 0x542   : > { %3597 = vrot.lane.b32.xlu2 %v8791_v60, %s10204_s0 }
 0x543   : > { %3620 = vrot.lane.b32.xlu0 %v8786_v38, %s10205_s26 }
 0x545   : > { %3622 = vrot.lane.b32.xlu1 %v8802_v46, %s10205_s26 }
 0x54a   : > { %3543 = vrot.lane.b32.xlu2 %v8832_v11, %s10113_s16 }
 0x54b   : > { %3628 = vrot.lane.b32.xlu0 %v8797_v32, %s10205_s26 }
 0x54d   : > { %3566 = vrot.lane.b32.xlu1 %v8822_v16, %s10108_s28 }
 0x552   : > { %3626 = vrot.lane.b32.xlu2 %v8791_v60, %s10205_s26 }
 0x553   : > { %3649 = vrot.lane.b32.xlu0 %v8786_v38, %s10206_s18 }
 0x555   : > { %3651 = vrot.lane.b32.xlu1 %v8802_v46, %s10206_s18 }
 0x55a   : > { %3572 = vrot.lane.b32.xlu2 %v8832_v11, %s10108_s28 }
 0x55b   : > { %3657 = vrot.lane.b32.xlu0 %v8797_v32, %s10206_s18 }
 0x55d   : > { %3595 = vrot.lane.b32.xlu1 %v8822_v16, %s10204_s0 }
 0x562   : > { %3655 = vrot.lane.b32.xlu2 %v8791_v60, %s10206_s18 }
 0x563   : > { %3678 = vrot.lane.b32.xlu0 %v8786_v38, %s10038_s15 }
 0x565   : > { %3680 = vrot.lane.b32.xlu1 %v8802_v46, %s10038_s15 }
 0x56a   : > { %3601 = vrot.lane.b32.xlu2 %v8832_v11, %s10204_s0 }
 0x56b   : > { %3686 = vrot.lane.b32.xlu0 %v8797_v32, %s10038_s15 }
 0x56d   : > { %3624 = vrot.lane.b32.xlu1 %v8822_v16, %s10205_s26 }
 0x572   : > { %3684 = vrot.lane.b32.xlu2 %v8791_v60, %s10038_s15 }
 0x573   : > { %3707 = vrot.lane.b32.xlu0 %v8786_v38, %s10190_s11 }
 0x575   : > { %3709 = vrot.lane.b32.xlu1 %v8802_v46, %s10190_s11 }
 0x57a   : > { %3630 = vrot.lane.b32.xlu2 %v8832_v11, %s10205_s26 }
 0x57b   : > { %3715 = vrot.lane.b32.xlu0 %v8797_v32, %s10190_s11 }
 0x57d   : > { %3653 = vrot.lane.b32.xlu1 %v8822_v16, %s10206_s18 }
 0x582   : > { %3713 = vrot.lane.b32.xlu2 %v8791_v60, %s10190_s11 }
 0x583   : > { %3736 = vrot.lane.b32.xlu0 %v8786_v38, %s10040_s10 }
 0x584   : > { %v8880_v24 = vpop.permute.xlu2 %3535 }
 0x585   : > { %3738 = vrot.lane.b32.xlu1 %v8802_v46, %s10040_s10 }
 0x58a   : > { %3659 = vrot.lane.b32.xlu2 %v8832_v11, %s10206_s18 }
 0x58b   : > { %3744 = vrot.lane.b32.xlu0 %v8797_v32, %s10040_s10 }
 0x58c   : > { %v3563_v49 = vpop.permute.xlu2 %3562 }
 0x58d   : > { %3682 = vrot.lane.b32.xlu1 %v8822_v16, %s10038_s15 }
 0x58e   : > { %v3534_v14 = vpop.permute.xlu1 %3533 }
 0x58f   : > { %v3546_v1 = vsel %vm10066_vm10, %v3534_v14, %v8880_v24 }
 0x590   : > { %v3556_v50 = vmax.f32 %v8786_v38, %v3546_v1 }
 0x592   : > { %3742 = vrot.lane.b32.xlu2 %v8791_v60, %s10040_s10 }
 0x593   : > { %3711 = vrot.lane.b32.xlu0 %v8822_v16, %s10190_s11 }
 0x594   : > { %v8894_v37 = vpop.permute.xlu2 %3570 }
 0x595   : > { %3717 = vrot.lane.b32.xlu1 %v8832_v11, %s10190_s11  ;;  %v3540_v17 = vpop.permute.xlu0 %3539 }
 0x597   : > { %v8898_v55 = vpop.permute.xlu1 %3541 }
 0x598   : > { %v3548_v2 = vsel %vm10066_vm10, %v3540_v17, %v8898_v55 }
 0x599   : > { %v3559_v35 = vmax.f32 %v8791_v60, %v3548_v2 }
 0x59a   : > { %3688 = vrot.lane.b32.xlu2 %v8832_v11, %s10038_s15  ;;  %s10210_s15 = smov 122  }
 0x59b   : > { %3746 = vrot.lane.b32.xlu0 %v8832_v11, %s10040_s10 }
 0x59c   : > { %v3598_v19 = vpop.permute.xlu2 %3597 }
 0x59d   : > { %v8904_v43 = vpop.permute.xlu0 %3564 }
 0x59e   : > { %v3575_v4 = vsel %vm10065_vm9, %v3563_v49, %v8904_v43 }
 0x59f   : > { %v3569_v31 = vpop.permute.xlu1 %3568  ;;  %v3585_v39 = vmax.f32 %v3556_v50, %v3575_v4 }
 0x5a0   : > { %v3577_v57 = vsel %vm10065_vm9, %v3569_v31, %v8894_v37 }
 0x5a1   : > { %v3588_v25 = vmax.f32 %v3559_v35, %v3577_v57 }
 0x5a2   : > { %3740 = vrot.lane.b32.xlu2 %v8822_v16, %s10040_s10  ;;  %s10211_s10 = smov 118  }
 0x5a4   : > { %v8908_v10 = vpop.permute.xlu2 %3543 }
 0x5a5   : > { %v3592_v51 = vpop.permute.xlu0 %3591 }
 0x5a7   : > { %v8910_v58 = vpop.permute.xlu1 %3593 }
 0x5a8   : > { %v3604_v42 = vsel %vm10064_vm13, %v3592_v51, %v8910_v58 }
 0x5a9   : > { %v3614_v27 = vmax.f32 %v3585_v39, %v3604_v42  ;;  %v3549_v39 = vsel %vm10066_vm10, %v8898_v55, %v8908_v10 }
 0x5aa   : > { %v3560_v55 = vmax.f32 %v8797_v32, %v3549_v39 }
 0x5ac   : > { %v3627_v12 = vpop.permute.xlu2 %3626 }
 0x5ad   : > { %v8912_v18 = vpop.permute.xlu0 %3599 }
 0x5ae   : > { %v3606_v20 = vsel %vm10064_vm13, %v3598_v19, %v8912_v18 }
 0x5af   : > { %v8914_v34 = vpop.permute.xlu1 %3537  ;;  %v3617_v15 = vmax.f32 %v3588_v25, %v3606_v20 }
 0x5b4   : > { %v8916_v56 = vpop.permute.xlu2 %3572 }
 0x5b5   : > { %v3621_v48 = vpop.permute.xlu0 %3620 }
 0x5b7   : > { %v8918_v29 = vpop.permute.xlu1 %3622 }
 0x5b8   : > { %v3633_v40 = vsel %vm2513_vm1, %v3621_v48, %v8918_v29 }
 0x5b9   : > { %v3643_v0 = vmax.f32 %v3614_v27, %v3633_v40 }
 0x5bc   : > { %v3656_v21 = vpop.permute.xlu2 %3655 }
 0x5bd   : > { %v8920_v44 = vpop.permute.xlu0 %3628 }
 0x5be   : > { %v3635_v13 = vsel %vm2513_vm1, %v3627_v12, %v8920_v44 }
 0x5bf   : > { %v8922_v7 = vpop.permute.xlu1 %3566  ;;  %v3646_v49 = vmax.f32 %v3617_v15, %v3635_v13 }
 0x5c0   : > { %v3576_v4 = vsel %vm10065_vm9, %v8904_v43, %v8922_v7 }
 0x5c4   : > { %v8926_v23 = vpop.permute.xlu2 %3601 }
 0x5c5   : > { %v3650_v53 = vpop.permute.xlu0 %3649 }
 0x5c7   : > { %v8924_v41 = vpop.permute.xlu1 %3651 }
 0x5c8   : > { %v3662_v8 = vsel %vm10207_vm5, %v3650_v53, %v8924_v41  ;;  %vm10060_vm5 = vcmask 523264  }
 0x5c9   : > { %v3672_v28 = vmax.f32 %v3643_v0, %v3662_v8 }
 0x5cc   : > { %v3685_v59 = vpop.permute.xlu2 %3684 }
 0x5cd   : > { %v8928_v33 = vpop.permute.xlu0 %3657 }
 0x5ce   : > { %v3664_v54 = vsel %vm10208_vm15, %v3656_v21, %v8928_v33  ;;  %vm10059_vm15 = vcmask 654336  }
 0x5cf   : > { %v8930_v6 = vpop.permute.xlu1 %3595  ;;  %v3675_v51 = vmax.f32 %v3646_v49, %v3664_v54 }
 0x5d0   : > { %v3605_v2 = vsel %vm10064_vm13, %v8910_v58, %v8930_v6  ;;  %v3607_v58 = vsel %vm10064_vm13, %v8912_v18, %v8926_v23 }
 0x5d4   : > { %v8936_v22 = vpop.permute.xlu2 %3630 }
 0x5d5   : > { %v3679_v45 = vpop.permute.xlu0 %3678  ;;  %v3636_v32 = vsel %vm2513_vm1, %v8920_v44, %v8936_v22 }
 0x5d7   : > { %v8932_v62 = vpop.permute.xlu1 %3680 }
 0x5d8   : > { %v3691_v63 = vsel %vm3690_vm11, %v3679_v45, %v8932_v62 }
 0x5d9   : > { %v3701_v60 = vmax.f32 %v3672_v28, %v3691_v63 }
 0x5dc   : > { %v3714_v47 = vpop.permute.xlu2 %3713 }
 0x5dd   : > { %v8934_v36 = vpop.permute.xlu0 %3686 }
 0x5de   : > { %v3693_v19 = vsel %vm3690_vm11, %v3685_v59, %v8934_v36 }
 0x5df   : > { %v8938_v61 = vpop.permute.xlu1 %3624  ;;  %v3704_v53 = vmax.f32 %v3675_v51, %v3693_v19 }
 0x5e4   : > { %v8966_v38 = vpop.permute.xlu2 %3659 }
 0x5e5   : > { %v3708_v3 = vpop.permute.xlu0 %3707  ;;  %v3665_v63 = vsel %vm10213_vm6, %v8928_v33, %v8966_v38  ;;  %vm10057_vm6 = vcmask 785408  }
 0x5e7   : > { %v8940_v9 = vpop.permute.xlu1 %3709 }
 0x5e8   : > { %v3720_v30 = vsel %vm10067_vm3, %v3708_v3, %v8940_v9 }
 0x5e9   : > { %v3730_v14 = vmax.f32 %v3701_v60, %v3720_v30 }
 0x5ec   : > { %v3743_v21 = vpop.permute.xlu2 %3742 }
 0x5ed   : > { %v8949_v26 = vpop.permute.xlu0 %3715 }
 0x5ee   : > { %v3722_v48 = vsel %vm10067_vm3, %v3714_v47, %v8949_v26  ;;  %v3547_v47 = vsel %vm10066_vm10, %v8880_v24, %v8914_v34  ;;  %v3634_v24 = vsel %vm2513_vm1, %v8918_v29, %v8938_v61  ;;  %vm4017_vm10 = vcmask 855752  }
 0x5ef   : > { %v8955_v5 = vpop.permute.xlu1 %3653  ;;  %v3733_v45 = vmax.f32 %v3704_v53, %v3722_v48  ;;  %v3557_v50 = vmax.f32 %v8802_v46, %v3547_v47  ;;  %v3578_v46 = vsel %vm10065_vm9, %v8894_v37, %v8916_v56  ;;  %vm3996_vm9 = vcmask 265352  }
 0x5f0   : > { %v3663_v37 = vsel %vm10212_vm12, %v8924_v41, %v8955_v5  ;;  %v3589_v8 = vmax.f32 %v3560_v55, %v3578_v46  ;;  %vm10058_vm12 = vcmask 932864  }
 0x5f1   : > { %v3586_v40 = vmax.f32 %v3557_v50, %v3576_v4 }
 0x5f2   : > { %v3618_v0 = vmax.f32 %v3589_v8, %v3607_v58 }
 0x5f3   : > { %v3615_v43 = vmax.f32 %v3586_v40, %v3605_v2 }
 0x5f4   : > { %v9016_v27 = vpop.permute.xlu2 %3688  ;;  %v3647_v25 = vmax.f32 %v3618_v0, %v3636_v32 }
 0x5f5   : > { %v3737_v52 = vpop.permute.xlu0 %3736  ;;  %v3644_v29 = vmax.f32 %v3615_v43, %v3634_v24  ;;  %v3694_v44 = vsel %vm3690_vm11, %v8934_v36, %v9016_v27 }
 0x5f7   : > { %v8974_v17 = vpop.permute.xlu1 %3738  ;;  %v3673_v20 = vmax.f32 %v3644_v29, %v3663_v37 }
 0x5f8   : > { %v3749_v31 = vsel %vm3748_vm2, %v3737_v52, %v8974_v17 }
 0x5f9   : > { %v8980_v12 = vmax.f32 %v3730_v14, %v3749_v31 }
 0x5fb   : > { %3773 = vrot.lane.b32.xlu0 %v8980_v12, %s10209_s1  ;;  %3767 = vrot.lane.b32.xlu1 %v8980_v12, %s10108_s28 }
 0x5fc   : > { %v3741_v13 = vpop.permute.xlu2 %3740 }
 0x5fd   : > { %v3745_v3 = vpop.permute.xlu0 %3744  ;;  %v3750_v60 = vsel %vm3748_vm2, %v8974_v17, %v3741_v13 }
 0x5fe   : > { %v3751_v59 = vsel %vm3748_vm2, %v3743_v21, %v3745_v3 }
 0x5ff   : > { %v8989_v1 = vmax.f32 %v3733_v45, %v3751_v59  ;;  %v3683_v42 = vpop.permute.xlu1 %3682 }
 0x600   : > { %v3692_v35 = vsel %vm3690_vm11, %v8932_v62, %v3683_v42  ;;  %v3676_v62 = vmax.f32 %v3647_v25, %v3665_v63 }
 0x601   : > { %3769 = vrot.lane.b32.xlu2 %v8989_v1, %s10108_s28  ;;  %v3702_v41 = vmax.f32 %v3673_v20, %v3692_v35 }
 0x603   : > { %3781 = vrot.lane.b32.xlu0 %v8989_v1, %s10210_s15  ;;  %3775 = vrot.lane.b32.xlu1 %v8989_v1, %s10209_s1 }
 0x605   : > { %v3712_v57 = vpop.permute.xlu0 %3711 }
 0x606   : > { %v3721_v18 = vsel %vm10067_vm3, %v8940_v9, %v3712_v57  ;;  %v3705_v9 = vmax.f32 %v3676_v62, %v3694_v44 }
 0x607   : > { %v3718_v28 = vpop.permute.xlu1 %3717  ;;  %v3731_v30 = vmax.f32 %v3702_v41, %v3721_v18 }
 0x608   : > { %v3723_v33 = vsel %vm10067_vm3, %v8949_v26, %v3718_v28  ;;  %v3558_v26 = vmax.f32 %v8822_v16, %v8914_v34  ;;  %v3561_v34 = vmax.f32 %v8832_v11, %v8908_v10  ;;  %vm4027_vm3 = vcmask 367616  }
 0x609   : > { %3779 = vrot.lane.b32.xlu2 %v8980_v12, %s10210_s15  ;;  %v3760_v52 = vmax.f32 %v3731_v30, %v3750_v60  ;;  %v3734_v54 = vmax.f32 %v3705_v9, %v3723_v33  ;;  %v3911_v33 = vld [vmem:[%s10216_s17] sm:$0x3]  ;;  %s6677_s17 = smov 37  }
 0x60a   : > { %v3587_v14 = vmax.f32 %v3558_v26, %v8922_v7  ;;  %v3912_v9 = vld [vmem:[%s10217_s21] sm:$0xf]  ;;  %s6678_s21 = smov 35  }
 0x60b   : > { %3791 = vrot.lane.b32.xlu0 %v8980_v12, %s10211_s10  ;;  %3785 = vrot.lane.b32.xlu1 %v8980_v12, %s10043_s5 }
 0x60c   : > { %v3616_v17 = vmax.f32 %v3587_v14, %v8930_v6  ;;  %v3590_v6 = vmax.f32 %v3561_v34, %v8916_v56 }
 0x60d   : > { %v3747_v15 = vpop.permute.xlu0 %3746 }
 0x60e   : > { %v3752_v36 = vsel %vm3748_vm2, %v3745_v3, %v3747_v15  ;;  %v3645_v19 = vmax.f32 %v3616_v17, %v8938_v61  ;;  %v3619_v61 = vmax.f32 %v3590_v6, %v8926_v23 }
 0x60f   : > { %v3763_v49 = vmax.f32 %v3734_v54, %v3752_v36 }
 0x610   : > { %v3674_v31 = vmax.f32 %v3645_v19, %v8955_v5  ;;  %v3648_v5 = vmax.f32 %v3619_v61, %v8936_v22 }
 0x611   : > { %3787 = vrot.lane.b32.xlu2 %v8989_v1, %s10043_s5  ;;  %s10046_s5 = smov 114  }
 0x612   : > { %v3703_v51 = vmax.f32 %v3674_v31, %v3683_v42  ;;  %v3677_v48 = vmax.f32 %v3648_v5, %v8966_v38 }
 0x613   : > { %3799 = vrot.lane.b32.xlu0 %v8989_v1, %s10044_s9  ;;  %3793 = vrot.lane.b32.xlu1 %v8989_v1, %s10211_s10 }
 0x614   : > { %v3732_v16 = vmax.f32 %v3703_v51, %v3712_v57  ;;  %v3706_v53 = vmax.f32 %v3677_v48, %v9016_v27 }
 0x616   : > { %v3761_v7 = vmax.f32 %v3732_v16, %v3741_v13  ;;  %v3735_v11 = vmax.f32 %v3706_v53, %v3718_v28 }
 0x618   : > { %v3764_v10 = vmax.f32 %v3735_v11, %v3747_v15 }
 0x619   : > { %3797 = vrot.lane.b32.xlu2 %v8980_v12, %s10044_s9  ;;  %s10047_s9 = smov 112  }
 0x61b   : > { %3809 = vrot.lane.b32.xlu0 %v8989_v1, %s10046_s5  ;;  %3805 = vrot.lane.b32.xlu1 %v8980_v12, %s10046_s5 }
 0x621   : > { %3807 = vrot.lane.b32.xlu2 %v3760_v52, %s10046_s5 }
 0x623   : > { %3820 = vrot.lane.b32.xlu0 %v3763_v49, %s10047_s9  ;;  %3811 = vrot.lane.b32.xlu1 %v3763_v49, %s10046_s5  ;;  %s10215_s5 = smov 104  }
 0x629   : > { %3818 = vrot.lane.b32.xlu2 %v3760_v52, %s10047_s9  ;;  %s10049_s9 = smov 98  }
 0x62b   : > { %3830 = vrot.lane.b32.xlu0 %v3760_v52, %s10206_s18  ;;  %3824 = vrot.lane.b32.xlu1 %v3760_v52, %s10204_s0 }
 0x631   : > { %3826 = vrot.lane.b32.xlu2 %v3763_v49, %s10204_s0 }
 0x633   : > { %3838 = vrot.lane.b32.xlu0 %v3763_v49, %s10214_s13  ;;  %3832 = vrot.lane.b32.xlu1 %v3763_v49, %s10206_s18 }
 0x639   : > { %3836 = vrot.lane.b32.xlu2 %v3760_v52, %s10214_s13 }
 0x63b   : > { %3848 = vrot.lane.b32.xlu0 %v3760_v52, %s10120_s2  ;;  %3842 = vrot.lane.b32.xlu1 %v3760_v52, %s10215_s5 }
 0x641   : > { %3844 = vrot.lane.b32.xlu2 %v3763_v49, %s10215_s5 }
 0x643   : > { %3858 = vrot.lane.b32.xlu0 %v3761_v7, %s10137_s7  ;;  %3850 = vrot.lane.b32.xlu1 %v3763_v49, %s10120_s2 }
 0x649   : > { %3856 = vrot.lane.b32.xlu2 %v3760_v52, %s10137_s7 }
 0x64b   : > { %3869 = vrot.lane.b32.xlu0 %v3761_v7, %s10049_s9  ;;  %3860 = vrot.lane.b32.xlu1 %v3763_v49, %s10137_s7 }
 0x651   : > { %3862 = vrot.lane.b32.xlu2 %v3764_v10, %s10137_s7 }
 0x653   : > { %3871 = vrot.lane.b32.xlu1 %v3764_v10, %s10049_s9  ;;  %s6676_s9 = smov 39  }
 0x659   : > { %3915 = vperm.xlu2 %6456, %v3912_v9  }
 0x65b   : > { %v3770_v56 = vpop.permute.xlu2 %3769 }
 0x65c   : > { %v3876_v40 = vsel %vm10063_vm14, %v8989_v1, %v3770_v56 }
 0x663   : > { %v3780_v23 = vpop.permute.xlu2 %3779 }
 0x66b   : > { %v3788_v38 = vpop.permute.xlu2 %3787 }
 0x66d   : > { %v3768_v22 = vpop.permute.xlu1 %3767  ;;  %v3774_v21 = vpop.permute.xlu0 %3773 }
 0x66e   : > { %v3875_v2 = vsel %vm10063_vm14, %v8980_v12, %v3768_v22 }
 0x66f   : > { %v3878_v27 = vsel %vm10062_vm7, %v3875_v2, %v3774_v21 }
 0x670   : > { %v3881_v43 = vsel %vm10061_vm8, %v3878_v27, %v3780_v23 }
 0x673   : > { %v3798_v59 = vpop.permute.xlu2 %3797 }
 0x675   : > { %v3776_v45 = vpop.permute.xlu1 %3775  ;;  %v3782_v3 = vpop.permute.xlu0 %3781 }
 0x676   : > { %v3879_v57 = vsel %vm10062_vm7, %v3876_v40, %v3776_v45 }
 0x677   : > { %v3882_v55 = vsel %vm10061_vm8, %v3879_v57, %v3782_v3 }
 0x678   : > { %v3885_v12 = vsel %vm10060_vm5, %v3882_v55, %v3788_v38 }
 0x67b   : > { %v3808_v50 = vpop.permute.xlu2 %3807 }
 0x67d   : > { %v3786_v47 = vpop.permute.xlu1 %3785  ;;  %v3792_v4 = vpop.permute.xlu0 %3791 }
 0x67e   : > { %v3884_v37 = vsel %vm10060_vm5, %v3881_v43, %v3786_v47 }
 0x67f   : > { %v3887_v1 = vsel %vm10059_vm15, %v3884_v37, %v3792_v4 }
 0x680   : > { %v3890_v0 = vsel %vm10057_vm6, %v3887_v1, %v3798_v59 }
 0x683   : > { %v3819_v58 = vpop.permute.xlu2 %3818 }
 0x685   : > { %v3794_v42 = vpop.permute.xlu1 %3793  ;;  %v3800_v39 = vpop.permute.xlu0 %3799 }
 0x686   : > { %v3888_v8 = vsel %vm10059_vm15, %v3885_v12, %v3794_v42 }
 0x687   : > { %v3891_v20 = vsel %vm10057_vm6, %v3888_v8, %v3800_v39 }
 0x68b   : > { %v3827_v28 = vpop.permute.xlu2 %3826 }
 0x68d   : > { %v3806_v46 = vpop.permute.xlu1 %3805  ;;  %v3810_v24 = vpop.permute.xlu0 %3809 }
 0x68e   : > { %v3814_v29 = vsel %vm10058_vm12, %v3806_v46, %v3808_v50 }
 0x68f   : > { %v9111_v18 = vsel %vm10056_vm0, %v3890_v0, %v3814_v29 }
 0x693   : > { %v3837_v13 = vpop.permute.xlu2 %3836 }
 0x695   : > { %v3812_v32 = vpop.permute.xlu1 %3811  ;;  %v3821_v35 = vpop.permute.xlu0 %3820 }
 0x696   : > { %v3815_v63 = vsel %vm10058_vm12, %v3810_v24, %v3812_v32  ;;  %v3896_v17 = vsel %vm10063_vm14, %v3821_v35, %v3827_v28  ;;  %v6567_v24 = vld [vmem:[#allocation4] sm:$0xff]  ;;  %vm3966_vm12 = vcmask 576952  }
 0x697   : > { %v9114_v25 = vsel %vm10056_vm0, %v3891_v20, %v3815_v63 }
 0x698   : > { %v9118_v41 = vpack.c.bf16 %v9114_v25, %v9111_v18 }
 0x69a   : > { %3928 = vmatpush.bf16.msrb.mxu2 %v9118_v41 }
 0x69b   : > { %v3845_v60 = vpop.permute.xlu2 %3844 }
 0x69d   : > { %v3825_v44 = vpop.permute.xlu1 %3824  ;;  %v3831_v62 = vpop.permute.xlu0 %3830  ;;  %6211 = vmatmul.msk.bf16.vlgmr.msrb.gmra.mxu2 %vm10063_vm14, %v3911_v33 }
 0x69e   : > { %v3895_v14 = vsel %vm10063_vm14, %v3819_v58, %v3825_v44 }
 0x69f   : > { %v3897_v19 = vsel %vm10062_vm7, %v3895_v14, %v3831_v62 }
 0x6a0   : > { %v3899_v34 = vsel %vm10061_vm8, %v3897_v19, %v3837_v13 }
 0x6a3   : > { %v3857_v49 = vpop.permute.xlu2 %3856 }
 0x6a5   : > { %v3833_v30 = vpop.permute.xlu1 %3832  ;;  %v3839_v15 = vpop.permute.xlu0 %3838 }
 0x6a6   : > { %v3898_v31 = vsel %vm10062_vm7, %v3896_v17, %v3833_v30  ;;  %vm3990_vm7 = vcmask 121860  }
 0x6a7   : > { %v3900_v16 = vsel %vm10061_vm8, %v3898_v31, %v3839_v15  ;;  %vm3989_vm8 = vcmask 1044472  }
 0x6a8   : > { %v3902_v48 = vsel %vm10060_vm5, %v3900_v16, %v3845_v60  ;;  %vm3991_vm13 = vmor %vm3990_vm7, %vm3989_vm8  ;;  %vm4022_vm7 = vcmask 1003352  }
 0x6ab   : > { %v3863_v7 = vpop.permute.xlu2 %3862 }
 0x6ad   : > { %v3843_v36 = vpop.permute.xlu1 %3842  ;;  %v3849_v52 = vpop.permute.xlu0 %3848 }
 0x6ae   : > { %v3901_v6 = vsel %vm10060_vm5, %v3899_v34, %v3843_v36  ;;  %vm3976_vm5 = vcmask 872152  }
 0x6af   : > { %v3903_v11 = vsel %vm10059_vm15, %v3901_v6, %v3849_v52 }
 0x6b3   : > { %v3916_v47 = vpop.permute.xlu2 %3915 }
 0x6b5   : > { %v3851_v54 = vpop.permute.xlu1 %3850  ;;  %v3859_v26 = vpop.permute.xlu0 %3858 }
 0x6b6   : > { %v3865_v61 = vsel %vm10055_vm4, %v3857_v49, %v3859_v26  ;;  %v3904_v10 = vsel %vm10059_vm15, %v3902_v48, %v3851_v54  ;;  %vm3971_vm15 = vcmask 724552  }
 0x6b7   : > { %v3905_v56 = vsel %vm10057_vm6, %v3903_v11, %v3865_v61  ;;  %v4192_v61 = vld [vmem:[%s6729_s29] sm:$0xf] }
 0x6bd   : > { %v3861_v51 = vpop.permute.xlu1 %3860  ;;  %v3870_v53 = vpop.permute.xlu0 %3869 }
 0x6be   : > { %v3866_v5 = vsel %vm10055_vm4, %v3861_v51, %v3863_v7  ;;  %v9139_v21 = vsel %vm10056_vm0, %v3905_v56, %v3870_v53  ;;  %vm3950_vm4 = vcmask 699392  }
 0x6bf   : > { %v3906_v22 = vsel %vm10057_vm6, %v3904_v10, %v3866_v5  ;;  %3951 = vst.msk [vmem:[#allocation4 + $0x8] sm:$0xf] %vm3950_vm4, %v6567_v24  ;;  %vm3961_vm6 = vcmask 429352   ;;  %vm3986_vm4 = vcmask 252928  }
 0x6c5   : > { %v3872_v23 = vpop.permute.xlu1 %3871 }
 0x6c6   : > { %v9142_v38 = vsel %vm10056_vm0, %v3906_v22, %v3872_v23  ;;  %vm3956_vm0 = vcmask 281752  }
 0x6c7   : > { %v9146_v45 = vpack.c.bf16 %v9142_v38, %v9139_v21 }
 0x6c9   : > { %3941 = vmatpush.bf16.msra.mxu0 %v9146_v45 }
 0x6cc   : > { %6212 = vmatmul.msk.bf16.vlgmr.msra.gmra.mxu0 %vm10063_vm14, %v3911_v33  ;;  %vm3981_vm14 = vcmask 1019752  }
 0x720   : > { %v3930_v3 = vpop.f32.mrf.mxu2 }
 0x721   : > { %v3931_v39 = vadd.f32 %v3930_v3, %v3916_v47 }
 0x723   : > { %v3947_v40 = vmax.f32 %v3931_v39, 0.0 }
 0x728   : > { %v3932_v59 = vpop.f32.mrf.mxu2 }
 0x749   : > { %v3943_v4 = vpop.f32.mrf.mxu0 }
 0x74a   : > { %v3944_v50 = vadd.f32 %v3943_v4, %v3916_v47 }
 0x74c   : > { %v3948_v42 = vmax.f32 %v3944_v50, 0.0 }
 0x74e   : > { %4009 = vrot.lane.b32.xlu1 %v3948_v42, %s6676_s9  ;;  %4004 = vrot.lane.b32.xlu0 %v3948_v42, %s6677_s17  ;;  %s10219_s9 = smov 33   ;;  %s10220_s17 = smov 29  }
 0x74f   : > { %3999 = vrot.lane.b32.xlu2 %v3948_v42, %s6678_s21  ;;  %s6684_s21 = smov 45  }
 0x751   : > { %v3945_v2 = vpop.f32.mrf.mxu0 }
 0x756   : > { %3958 = vrot.lane.b32.xlu1 %v3947_v40, %s6679_s22  ;;  %3953 = vrot.lane.b32.xlu0 %v3947_v40, %s10218_s24  ;;  %s6687_s22 = smov 47   ;;  %s6688_s24 = smov 49  }
 0x757   : > { %3963 = vrot.lane.b32.xlu2 %v3947_v40, %s6680_s23  ;;  %s10241_s23 = smov 114  }
 0x75e   : > { %3983 = vrot.lane.b32.xlu1 %v3947_v40, %s6681_s12  ;;  %3968 = vrot.lane.b32.xlu0 %v3947_v40, %s6682_s3  ;;  %s10221_s3 = smov 90   ;;  %s10238_s12 = smov 116  }
 0x75f   : > { %3973 = vrot.lane.b32.xlu2 %v3947_v40, %s6683_s6  ;;  %s10222_s6 = smov 92  }
 0x766   : > { %3993 = vrot.lane.b32.xlu1 %v3947_v40, %s10219_s9  ;;  %3978 = vrot.lane.b32.xlu0 %v3947_v40, %s10220_s17  ;;  %s10270_s9 = sld [smem:[#allocation11_spill]] }
 0x767   : > { %4024 = vrot.lane.b32.xlu2 %v3948_v42, %s6684_s21  ;;  %s10273_s17 = sld [smem:[#allocation12_spill]] }
 0x76e   : > { %4019 = vrot.lane.b32.xlu1 %v3948_v42, %s6685_s20  ;;  %4014 = vrot.lane.b32.xlu0 %v3948_v42, %s6686_s4  ;;  %s10239_s20 = smov 120   ;;  %s10240_s4 = smov 112  }
 0x76f   : > { %4034 = vrot.lane.b32.xlu2 %v3948_v42, %s6687_s22 }
 0x776   : > { %4039 = vrot.lane.b32.xlu0 %v3948_v42, %s6688_s24  ;;  %s10293_s24 = sld [smem:[#allocation27_spill]] }
 0x7a9   : > { %v4000_v27 = vpop.permute.xlu2 %3999 }
 0x7b1   : > { %v3964_v55 = vpop.permute.xlu2 %3963 }
 0x7b9   : > { %v3974_v37 = vpop.permute.xlu2 %3973 }
 0x7c0   : > { %v4010_v57 = vpop.permute.xlu1 %4009  ;;  %v4005_v46 = vpop.permute.xlu0 %4004 }
 0x7c1   : > { %v4025_v35 = vpop.permute.xlu2 %4024 }
 0x7c2   : > { %v4026_v20 = vrot.slane %v4025_v35, 4 }
 0x7c4   : > { %v4028_v44 = vsel %vm4027_vm3, %v4026_v20, %v4025_v35  ;;  %vm10224_vm3 = vcmask 744448  }
 0x7c8   : > { %v3959_v43 = vpop.permute.xlu1 %3958  ;;  %v3954_v58 = vpop.permute.xlu0 %3953 }
 0x7c9   : > { %3957 = vst.msk [vmem:[#allocation4] sm:$0xf] %vm3956_vm0, %v3954_v58  ;;  %vm4002_vm0 = vcmask 412952   ;;  %v4035_v62 = vpop.permute.xlu2 %4034 }
 0x7ca   : > { %3962 = vst.msk [vmem:[#allocation4] sm:$0xf] %vm3961_vm6, %v3959_v43  ;;  %vm4012_vm6 = vcmask 708152  }
 0x7cb   : > { %3967 = vst.msk [vmem:[#allocation4] sm:$0xf] %vm3966_vm12, %v3964_v55  ;;  %vm4007_vm12 = vcmask 560552  }
 0x7d0   : > { %v3984_v12 = vpop.permute.xlu1 %3983  ;;  %v3969_v1 = vpop.permute.xlu0 %3968 }
 0x7d1   : > { %3972 = vst.msk [vmem:[#allocation4] sm:$0xf] %vm3971_vm15, %v3969_v1  ;;  %v3985_v8 = vrot.slane %v3984_v12, 4  ;;  %vm4031_vm15 = vcmask 105476  }
 0x7d2   : > { %3977 = vst.msk [vmem:[#allocation4] sm:$0xf] %vm3976_vm5, %v3974_v37  ;;  %vm4030_vm5 = vcmask 1044456  }
 0x7d3   : > { %v3987_v0 = vsel %vm3986_vm4, %v3985_v8, %v3984_v12  ;;  %vm4032_vm8 = vmor %vm4031_vm15, %vm4030_vm5  ;;  %vm4037_vm4 = vcmask 248952   ;;  %vm10231_vm15 = vcmask 900096  }
 0x7d8   : > { %v3994_v29 = vpop.permute.xlu1 %3993  ;;  %v3979_v32 = vpop.permute.xlu0 %3978 }
 0x7d9   : > { %3982 = vst.msk [vmem:[#allocation4] sm:$0xf] %vm3981_vm14, %v3979_v32  ;;  %vm4150_vm14 = vcmask 1043456  }
 0x7da   : > { %3992 = vst.msk [vmem:[#allocation4] sm:$0xff] %vm3991_vm13, %v3987_v0  ;;  %vm4042_vm13 = vcmask 396552  }
 0x7db   : > { %3997 = vst.msk [vmem:[#allocation4 + $0x4] sm:$0xf] %vm3996_vm9, %v3994_v29  ;;  %vm10223_vm9 = vcmask 883712  }
 0x7dc   : > { %4003 = vst.msk [vmem:[#allocation4 + $0x4] sm:$0xf] %vm4002_vm0, %v4000_v27  ;;  %vm10225_vm0 = vmmov %vm10223_vm9 }
 0x7dd   : > { %4008 = vst.msk [vmem:[#allocation4 + $0x4] sm:$0xf] %vm4007_vm12, %v4005_v46  ;;  %vm10226_vm12 = vmmov %vm10224_vm3 }
 0x7de   : > { %4013 = vst.msk [vmem:[#allocation4 + $0x4] sm:$0xf] %vm4012_vm6, %v4010_v57  ;;  %vm10227_vm6 = vcmask 1039360  }
 0x7e0   : > { %v4020_v63 = vpop.permute.xlu1 %4019  ;;  %v4015_v28 = vpop.permute.xlu0 %4014 }
 0x7e1   : > { %4018 = vst.msk [vmem:[#allocation4 + $0x4] sm:$0xf] %vm4017_vm10, %v4015_v28  ;;  %vm4140_vm10 = vcmask 1041408  }
 0x7e2   : > { %4023 = vst.msk [vmem:[#allocation4 + $0x4] sm:$0xf] %vm4022_vm7, %v4020_v63  ;;  %vm10232_vm7 = vmmov %vm10231_vm15 }
 0x7e3   : > { %4033 = vst.msk [vmem:[#allocation4 + $0x4] sm:$0xff] %vm4032_vm8, %v4028_v44  ;;  %vm10233_vm8 = vcmask 293888  }
 0x7e4   : > { %4038 = vst.msk [vmem:[#allocation4 + $0x8] sm:$0xf] %vm4037_vm4, %v4035_v62  ;;  %vm10234_vm4 = vmmov %vm10233_vm8 }
 0x7e8   : > { %v4040_v13 = vpop.permute.xlu0 %4039 }
 0x7e9   : > { %4043 = vst.msk [vmem:[#allocation4 + $0x8] sm:$0xf] %vm4042_vm13, %v4040_v13  ;;  %vm10235_vm13 = vmmov %vm10234_vm4 }
 0x7ea   : > { %v4044_v30 = vld [vmem:[#allocation4] sm:$0xff] }
 0x7eb   : > { %4048 = vst [vmem:[#allocation1] ss:$2 sm:$0xff] %v4044_v30 }
 0x7f0   : > { %v4045_v15 = vld [vmem:[#allocation4 + $0x8] sm:$0xf] }
 0x7f1   : > { %4050 = vst [vmem:[#allocation1 + $0x10] ss:$2 sm:$0xff] %v4045_v15 }
 0x7f2   : > { %v4051_v33 = vld.sshfl [vmem:[#allocation1] sm:$0xff pattern:$0x75316420]  ;;  %v4052_v9 = vld.sshfl [vmem:[#allocation1 + $0x8] sm:$0xff pattern:$0x75316420] }
 0x7f3   : > { %v4057_v60 = vpack.c.bf16 %v4052_v9, %v4051_v33 }
 0x7f5   : > { %v4062_v36 = vunpack.c.h.b16 %v4057_v60  ;;  %v4061_v52 = vunpack.c.l.b16 %v4057_v60 }
 0x7f7   : > { %v9153_v54 = vpack.c.b16 %v4062_v36, %v4062_v36  ;;  %v9155_v49 = vpack.c.b16 %v4061_v52, %v4061_v52 }
 0x7f8   : > { %v4053_v26 = vld.sshfl [vmem:[#allocation1 + $0x10] sm:$0xff pattern:$0x75316420] }
 0x7f9   : > { %4133 = vrot.lane.b32.xlu1 %v9153_v54, %s10221_s3  ;;  %4097 = vrot.lane.b32.xlu2 %v9155_v49, %s10205_s26  ;;  %v4058_v14 = vpack.c.bf16 %v4053_v26, %v4053_v26  ;;  %v4068_v31 = vrot.slane %v9153_v54, 6  ;;  %v4087_v51 = vrot.slane %v9153_v54, 2  ;;  %v4067_v16 = vrot.slane %v9155_v49, 6 }
 0x7fa   : > { %4131 = vrot.lane.b32.xlu0 %v9155_v49, %s10221_s3  ;;  %v4086_v7 = vrot.slane %v9155_v49, 2 }
 0x7fb   : > { %v4063_v17 = vunpack.c.l.b16 %v4058_v14 }
 0x7fd   : > { %v9163_v19 = vpack.c.b16 %v4063_v17, %v4063_v17 }
 0x7ff   : > { %v4088_v34 = vrot.slane %v9163_v19, 2  ;;  %v4069_v6 = vrot.slane %v9163_v19, 6 }
 0x801   : > { %4099 = vrot.lane.b32.xlu1 %v9153_v54, %s10205_s26  ;;  %4135 = vrot.lane.b32.xlu2 %v9163_v19, %s10221_s3  ;;  %s10294_s3 = sld [smem:[#allocation29_spill]] }
 0x802   : > { %4113 = vrot.lane.b32.xlu0 %v9155_v49, %s10222_s6 }
 0x809   : > { %4115 = vrot.lane.b32.xlu1 %v9153_v54, %s10222_s6  ;;  %4101 = vrot.lane.b32.xlu2 %v9163_v19, %s10205_s26  ;;  %s10266_s26 = sld [smem:[#allocation20_spill]] }
 0x80a   : > { %4078 = vrot.lane.b32.xlu0 %v9155_v49, %s10108_s28 }
 0x811   : > { %4080 = vrot.lane.b32.xlu1 %v9153_v54, %s10108_s28  ;;  %4117 = vrot.lane.b32.xlu2 %v9163_v19, %s10222_s6  ;;  %s10295_s6 = sld [smem:[#allocation25_spill]] }
 0x812   : > { %4107 = vrot.lane.b32.xlu0 %v4068_v31, %s10206_s18 }
 0x819   : > { %4124 = vrot.lane.b32.xlu1 %v4087_v51, %s10190_s11  ;;  %4082 = vrot.lane.b32.xlu2 %v9163_v19, %s10108_s28 }
 0x81a   : > { %4105 = vrot.lane.b32.xlu0 %v4067_v16, %s10206_s18 }
 0x821   : > { %4072 = vrot.lane.b32.xlu1 %v4068_v31, %s10113_s16  ;;  %4126 = vrot.lane.b32.xlu2 %v4088_v34, %s10190_s11 }
 0x822   : > { %4122 = vrot.lane.b32.xlu0 %v4086_v7, %s10190_s11  ;;  %s10251_s11 = sld [smem:[#allocation10_spill]] }
 0x829   : > { %4074 = vrot.lane.b32.xlu2 %v4069_v6, %s10113_s16  ;;  %4109 = vrot.lane.b32.xlu1 %v4069_v6, %s10206_s18 }
 0x82a   : > { %4070 = vrot.lane.b32.xlu0 %v4067_v16, %s10113_s16  ;;  %s10245_s16 = sld [smem:[#allocation23_spill]] }
 0x831   : > { %4093 = vrot.lane.b32.xlu2 %v4088_v34, %s10204_s0  ;;  %4091 = vrot.lane.b32.xlu1 %v4087_v51, %s10204_s0 }
 0x832   : > { %4089 = vrot.lane.b32.xlu0 %v4086_v7, %s10204_s0  ;;  %v4191_v7 = vld [vmem:[%s6724_s25] sm:$0x3] }
 0x839   : > { %4195 = vperm.xlu1 %6455, %v4192_v61  }
 0x853   : > { %v4098_v5 = vpop.permute.xlu2 %4097 }
 0x85b   : > { %v4136_v48 = vpop.permute.xlu2 %4135 }
 0x85c   : > { %v4209_v53 = vsel %vm4140_vm10, %v4136_v48, 0 }
 0x85d   : > { %4242 = vmatpush.bf16.msrb.mxu3 %v4209_v53 }
 0x863   : > { %v4102_v23 = vpop.permute.xlu2 %4101 }
 0x86b   : > { %v4134_v11 = vpop.permute.xlu1 %4133  ;;  %v4118_v50 = vpop.permute.xlu2 %4117 }
 0x86c   : > { %v4139_v10 = vsel %vm3748_vm2, %v4134_v11, %v4136_v48  ;;  %v4132_v56 = vpop.permute.xlu0 %4131 }
 0x86d   : > { %v4206_v22 = vsel %vm4140_vm10, %v4139_v10, 0  ;;  %v4138_v3 = vsel %vm3748_vm2, %v4132_v56, %v4134_v11  ;;  %vm4157_vm2 = vcmask 1045504  }
 0x86e   : > { %v4203_v59 = vsel %vm4140_vm10, %v4138_v3, 0  ;;  %4229 = vmatpush.bf16.msra.mxu2 %v4206_v22 }
 0x86f   : > { %4216 = vmatpush.bf16.msrb.mxu1 %v4203_v59 }
 0x873   : > { %v4100_v47 = vpop.permute.xlu1 %4099  ;;  %v4083_v2 = vpop.permute.xlu2 %4082 }
 0x874   : > { %v4114_v4 = vpop.permute.xlu0 %4113  ;;  %v4103_v43 = vsel %vm2513_vm1, %v4098_v5, %v4100_v47  ;;  %v4104_v20 = vsel %vm2513_vm1, %v4100_v47, %v4102_v23  ;;  %vm10228_vm1 = vmmov %vm10227_vm6 }
 0x87b   : > { %v4116_v42 = vpop.permute.xlu1 %4115  ;;  %v4127_v57 = vpop.permute.xlu2 %4126 }
 0x87c   : > { %v4079_v39 = vpop.permute.xlu0 %4078  ;;  %v4120_v12 = vsel %vm3690_vm11, %v4114_v4, %v4116_v42  ;;  %v4121_v62 = vsel %vm3690_vm11, %v4116_v42, %v4118_v50  ;;  %vm10229_vm11 = vcmask 1031168  }
 0x87d   : > { %vm10230_vm5 = vmmov %vm10229_vm11 }
 0x883   : > { %v4081_v40 = vpop.permute.xlu1 %4080  ;;  %v4075_v8 = vpop.permute.xlu2 %4074 }
 0x884   : > { %v4108_v27 = vpop.permute.xlu0 %4107  ;;  %v4149_v13 = vsel %vm4140_vm10, %v9163_v19, %v4075_v8  ;;  %v4085_v16 = vsel %vm10229_vm11, %v4081_v40, %v4083_v2  ;;  %v4084_v6 = vsel %vm10230_vm5, %v4079_v39, %v4081_v40  ;;  %vm10255_vm11 = vcmask 785408  }
 0x885   : > { %v4156_v19 = vsel %vm4150_vm14, %v4149_v13, %v4083_v2  ;;  %vm10256_vm5 = vcmask 916480  }
 0x88b   : > { %v4125_v46 = vpop.permute.xlu1 %4124  ;;  %v4094_v52 = vpop.permute.xlu2 %4093 }
 0x88c   : > { %v4106_v24 = vpop.permute.xlu0 %4105  ;;  %v4130_v33 = vsel %vm10226_vm12, %v4125_v46, %v4127_v57  ;;  %v4165_v51 = vsel %vm4157_vm2, %v4156_v19, %v4094_v52  ;;  %vm10252_vm12 = vcmask 523264  }
 0x88d   : > { %v4111_v55 = vsel %vm10223_vm9, %v4106_v24, %v4108_v27  ;;  %vm10236_vm9 = vcmask 130048   ;;  %v4325_v24 = vld [vmem:[%s6739_s8] sm:$0xff] }
 0x88e   : > { %v4169_v58 = vsel %vm4140_vm10, %v4103_v43, %v4111_v55  ;;  %v4383_v55 = vld [vmem:[%s6749_s19 + $0x8] sm:$0xff] }
 0x88f   : > { %v4177_v32 = vsel %vm4150_vm14, %v4169_v58, %v4120_v12  ;;  %v4443_v43 = vld [vmem:[%s6759_s30 + $0x8] sm:$0xff]  ;;  %v4442_v58 = vld [vmem:[%s6759_s30] sm:$0xff]  ;;  %v5306_v12 = vadd.f32 %v9139_v21, %v9111_v18 }
 0x893   : > { %v4073_v37 = vpop.permute.xlu1 %4072 }
 0x894   : > { %v4123_v1 = vpop.permute.xlu0 %4122  ;;  %v4077_v9 = vsel %vm10227_vm6, %v4073_v37, %v4075_v8  ;;  %v5307_v8 = vadd.f32 %v5306_v12, %v9114_v25  ;;  %vm10253_vm6 = vcmask 654336  }
 0x895   : > { %v4129_v29 = vsel %vm10224_vm3, %v4123_v1, %v4125_v46  ;;  %v4146_v17 = vsel %vm4140_vm10, %v9153_v54, %v4077_v9  ;;  %vm10237_vm3 = vmmov %vm10236_vm9  ;;  %v4326_v46 = vld [vmem:[%s6739_s8 + $0x8] sm:$0xff] }
 0x896   : > { %v4183_v35 = vsel %vm4157_vm2, %v4177_v32, %v4129_v29  ;;  %v4154_v54 = vsel %vm4150_vm14, %v4146_v17, %v4085_v16  ;;  %v5365_v1 = vld [vmem:[%s6799_s27 + $0x8] sm:$0xff]  ;;  %v5308_v29 = vadd.f32 %v5307_v8, %v9142_v38 }
 0x897   : > { %4217 = vmatpush.bf16.msrb.mxu1 %v4183_v35 }
 0x89b   : > { %v4110_v0 = vpop.permute.xlu1 %4109 }
 0x89c   : > { %v4071_v63 = vpop.permute.xlu0 %4070  ;;  %v4112_v28 = vsel %vm10225_vm0, %v4108_v27, %v4110_v0  ;;  %v4175_v44 = vsel %vm4140_vm10, %v4102_v23, %v4110_v0  ;;  %vm10250_vm0 = vcmask 392192  }
 0x89d   : > { %v4172_v30 = vsel %vm4140_vm10, %v4104_v20, %v4112_v28  ;;  %v4181_v15 = vsel %vm4150_vm14, %v4175_v44, %v4118_v50  ;;  %v4076_v26 = vsel %vm10228_vm1, %v4071_v63, %v4073_v37  ;;  %v5364_v37 = vld [vmem:[%s6799_s27] sm:$0xff]  ;;  %vm10254_vm1 = vcmask 932864  }
 0x89e   : > { %v4189_v60 = vsel %vm4157_vm2, %v4181_v15, %v4127_v57  ;;  %v4179_v36 = vsel %vm4150_vm14, %v4172_v30, %v4121_v62  ;;  %v4143_v31 = vsel %vm4140_vm10, %v9155_v49, %v4076_v26  ;;  %v4382_v57 = vld [vmem:[%s6749_s19] sm:$0xff]  ;;  %v5413_v62 = vld [vmem:[%s10245_s16 + $0x8] sm:$0xff] }
 0x89f   : > { %4243 = vmatpush.bf16.msrb.mxu3 %v4189_v60  ;;  %v4186_v14 = vsel %vm4157_vm2, %v4179_v36, %v4130_v33  ;;  %v4152_v49 = vsel %vm4150_vm14, %v4143_v31, %v4084_v6  ;;  %v5412_v63 = vld [vmem:[%s10245_s16] sm:$0xff]  ;;  %vm10248_vm14 = vmmov %vm10237_vm3 }
 0x8a0   : > { %4230 = vmatpush.bf16.msra.mxu2 %v4186_v14 }
 0x8a3   : > { %v4092_v34 = vpop.permute.xlu1 %4091  ;;  %4244 = vmatpush.bf16.msrb.mxu3 %v4165_v51 }
 0x8a4   : > { %v4090_v61 = vpop.permute.xlu0 %4089  ;;  %v4096_v5 = vsel %vm10231_vm15, %v4092_v34, %v4094_v52  ;;  %vm4342_vm15 = vcmask 31744  }
 0x8a5   : > { %v4095_v48 = vsel %vm10232_vm7, %v4090_v61, %v4092_v34  ;;  %v4162_v53 = vsel %vm4157_vm2, %v4154_v54, %v4096_v5  ;;  %vm10258_vm7 = vmmov %vm10237_vm3 }
 0x8a6   : > { %v4159_v11 = vsel %vm4157_vm2, %v4152_v49, %v4095_v48  ;;  %4231 = vmatpush.bf16.msra.mxu2 %v4162_v53  ;;  %6215 = vmatmul.msk.bf16.vlgmr.msrb.gmra.mxu3 %vm10233_vm8, %v4191_v7  ;;  %vm10249_vm2 = vcmask 261120   ;;  %v6319_v48 = vld [vmem:[%s10251_s11] sm:$0xff]  ;;  %s10319_s11 = sld [smem:[#allocation18_spill]] }
 0x8a7   : > { %4423 = vmatpush.bf16.msra.mxu3 %v9146_v45  ;;  %4218 = vmatpush.bf16.msrb.mxu1 %v4159_v11  ;;  %v6320_v45 = vld [vmem:[%s6744_s14] sm:$0xff]  ;;  %vm10259_vm8 = vmmov %vm10249_vm2 }
 0x8a9   : > { %6214 = vmatmul.msk.bf16.vlgmr.msra.gmra.mxu2 %vm10234_vm4, %v4191_v7  ;;  %vm10260_vm4 = vmmov %vm10250_vm0 }
 0x8aa   : > { %4409 = vmatpush.bf16.msrb.mxu2 %v9118_v41  ;;  %6213 = vmatmul.msk.bf16.vlgmr.msrb.gmra.mxu1 %vm10235_vm13, %v4191_v7  ;;  %vm10261_vm13 = vmmov %vm10252_vm12 }
 0x8ab   : > { %v4196_v10 = vpop.permute.xlu1 %4195 }
 0x8b6   : > { %6227 = vmatmul.msk.bf16.vlgmr.msra.gmra.mxu3 %vm10237_vm3, %v6320_v45  ;;  %vm10263_vm3 = vcmask 818176  }
 0x8b9   : > { %6226 = vmatmul.msk.bf16.vlgmr.msrb.gmra.mxu2 %vm10236_vm9, %v6320_v45  ;;  %vm10262_vm9 = vmmov %vm10253_vm6 }
 0x927   : > { %v4220_v56 = vpop.f32.mrf.mxu1 }
 0x928   : > { %v4221_v23 = vadd.f32 %v4220_v56, %v4196_v10 }
 0x929   : > { %v4246_v22 = vpop.f32.mrf.mxu3 }
 0x92a   : > { %v9251_v3 = vmax.f32 %v4221_v23, 0.0  ;;  %v4247_v2 = vadd.f32 %v4246_v22, %v4196_v10 }
 0x92c   : > { %4260 = vrot.lane.b32.xlu1 %v9251_v3, %s10210_s15  ;;  %4257 = vrot.lane.b32.xlu0 %v9251_v3, %s10209_s1  ;;  %v4233_v41 = vpop.f32.mrf.mxu2  ;;  %v4252_v40 = vmax.f32 %v4247_v2, 0.0  ;;  %s10268_s15 = sld [smem:[#allocation16_spill]] }
 0x92d   : > { %4254 = vrot.lane.b32.xlu2 %v9251_v3, %s10108_s28  ;;  %v4234_v4 = vadd.f32 %v4233_v41, %v4196_v10  ;;  %s10242_s28 = smov 98  }
 0x92f   : > { %v4222_v59 = vpop.f32.mrf.mxu1  ;;  %v4251_v42 = vmax.f32 %v4234_v4, 0.0 }
 0x931   : > { %v4248_v47 = vpop.f32.mrf.mxu3  ;;  %v6457_v39 = vpack.i.bf16 %v4251_v42, %v9251_v3  ;;  %v6462_v27 = vpack.i.bf16 %v4252_v40, %v4251_v42 }
 0x934   : > { %4269 = vrot.lane.b32.xlu1 %v9251_v3, %s10238_s12  ;;  %4266 = vrot.lane.b32.xlu0 %v9251_v3, %s10211_s10  ;;  %v4235_v50 = vpop.f32.mrf.mxu2  ;;  %s10269_s10 = sld [smem:[#allocation15_spill]] }
 0x935   : > { %4263 = vrot.lane.b32.xlu2 %v9251_v3, %s10239_s20  ;;  %s10296_s20 = sld [smem:[#allocation26_spill]] }
 0x93c   : > { %4282 = vrot.lane.b32.xlu1 %v4251_v42, %s10204_s0  ;;  %4279 = vrot.lane.b32.xlu0 %v4251_v42, %s10240_s4  ;;  %s10257_s0 = sld [smem:[#allocation14_spill]] }
 0x93d   : > { %6458 = vrot.lane.b32.xlu2 %v6457_v39, %s10241_s23  ;;  %s10305_s4 = sld [smem:[#allocation17_spill]] }
 0x93e   : > { %s10317_s23 = sld [smem:[#allocation32_spill]] }
 0x942   : > { %v4626_v22 = vld [vmem:[%s10257_s0] sm:$0xff]  ;;  %v4628_v2 = vld [vmem:[%s10257_s0 + $0x10] sm:$0xff]  ;;  %v4631_v8 = vld [vmem:[%s10257_s0 + $0x28] sm:$0xff] }
 0x944   : > { %4291 = vrot.lane.b32.xlu1 %v4251_v42, %s10215_s5  ;;  %4288 = vrot.lane.b32.xlu0 %v4251_v42, %s10214_s13  ;;  %s10243_s5 = sld [smem:[#allocation19_spill]] }
 0x945   : > { %4285 = vrot.lane.b32.xlu2 %v4251_v42, %s10206_s18  ;;  %s10244_s13 = sld [smem:[#allocation22_spill]] }
 0x946   : > { %s10267_s18 = sld [smem:[#allocation21_spill]] }
 0x94a   : > { %v5380_v32 = vld [vmem:[%s10243_s5] sm:$0xff]  ;;  %v5381_v35 = vld [vmem:[%s10243_s5 + $0x8] sm:$0xff] }
 0x94b   : > { %v5396_v20 = vld [vmem:[%s10244_s13] sm:$0xff] }
 0x94c   : > { %4304 = vrot.lane.b32.xlu1 %v4252_v40, %s10242_s28  ;;  %6463 = vrot.lane.b32.xlu0 %v6462_v27, %s10137_s7  ;;  %s10247_s7 = sld [smem:[#allocation13_spill]] }
 0x94d   : > { %4294 = vrot.lane.b32.xlu2 %v4251_v42, %s10120_s2  ;;  %s10246_s2 = sld [smem:[#allocation24_spill]] }
 0x94e   : > { %s10318_s28 = sld [smem:[#allocation28_spill]] }
 0x952   : > { %v4666_v33 = vld [vmem:[%s10247_s7] sm:$0xff]  ;;  %v4668_v16 = vld [vmem:[%s10247_s7 + $0x10] sm:$0xff]  ;;  %v4667_v61 = vld [vmem:[%s10247_s7 + $0x8] sm:$0xff] }
 0x953   : > { %v5508_v44 = vld [vmem:[%s10246_s2] sm:$0xff]  ;;  %v5509_v36 = vld [vmem:[%s10246_s2 + $0x8] sm:$0xff]  ;;  %v4669_v45 = vld [vmem:[%s10247_s7 + $0x18] sm:$0xff] }
 0x954   : > { %4386 = vperm.xlu1 %6455, %v4382_v57   ;;  %4334 = vperm.xlu0 %6454, %v4326_v46   ;;  %v4670_v11 = vld [vmem:[%s10247_s7 + $0x20] sm:$0xff]  ;;  %v4671_v59 = vld [vmem:[%s10247_s7 + $0x28] sm:$0xff]  ;;  %v4673_v12 = vld [vmem:[%s10247_s7 + $0x38] sm:$0xff] }
 0x955   : > { %4329 = vperm.xlu2 %6456, %v4325_v24   ;;  %v4627_v24 = vld [vmem:[%s10257_s0 + $0x8] sm:$0xff] }
 0x95d   : > { %4391 = vperm.xlu2 %6456, %v4383_v55  }
 0x965   : > { %4451 = vperm.xlu2 %6456, %v4443_v43  }
 0x96d   : > { %4446 = vperm.xlu2 %6456, %v4442_v58  }
 0x975   : > { %5368 = vperm.xlu2 %6456, %v5364_v37  }
 0x97d   : > { %5373 = vperm.xlu2 %6456, %v5365_v1   ;;  %v4629_v1 = vld [vmem:[%s10257_s0 + $0x18] sm:$0xff] }
 0x97e   : > { %5309 = vadd.xlane.f32.xlu0 %v5308_v29  ;;  %v4630_v29 = vld [vmem:[%s10257_s0 + $0x20] sm:$0xff] }
 0x985   : > { %5384 = vperm.xlu2 %6456, %v5380_v32   ;;  %v4633_v32 = vld [vmem:[%s10257_s0 + $0x38] sm:$0xff] }
 0x987   : > { %v4255_v0 = vpop.permute.xlu2 %4254 }
 0x988   : > { %v4307_v15 = vsel %vm10248_vm14, %v9251_v3, %v4255_v0  ;;  %vm10264_vm14 = vmmov %vm10255_vm11  ;;  %v5579_v0 = vld [vmem:[%s10266_s26] sm:$0xff] }
 0x98d   : > { %5389 = vperm.xlu2 %6456, %v5381_v35   ;;  %v4632_v35 = vld [vmem:[%s10257_s0 + $0x30] sm:$0xff] }
 0x98f   : > { %v4264_v28 = vpop.permute.xlu2 %4263 }
 0x992   : > { %5400 = vperm.xlu0 %6454, %v5396_v20   ;;  %v5595_v20 = vld [vmem:[%s10267_s18] sm:$0xff] }
 0x995   : > { %5416 = vperm.xlu2 %6456, %v5412_v63  }
 0x997   : > { %v6459_v60 = vpop.permute.xlu2 %6458 }
 0x998   : > { %v6461_v26 = vunpack.i.h.bf16 %v6459_v60  ;;  %v6460_v14 = vunpack.i.l.bf16 %v6459_v60 }
 0x99a   : > { %5512 = vperm.xlu0 %6454, %v5508_v44   ;;  %v4277_v34 = vsel %vm10254_vm1, %v6460_v14, %v6461_v26  ;;  %v5112_v26 = vld [vmem:[%s10268_s15 + $0x20] sm:$0xff]  ;;  %v6689_v14 = vmov 4096.0  }
 0x99b   : > { %6467 = vrcp.f32 %v6689_v14 }
 0x99d   : > { %5421 = vperm.xlu2 %6456, %v5413_v62  }
 0x99e   : > { %v4261_v13 = vpop.permute.xlu1 %4260  ;;  %v4258_v30 = vpop.permute.xlu0 %4257 }
 0x99f   : > { %v4308_v9 = vsel %vm10249_vm2, %v4307_v15, %v4258_v30  ;;  %v4286_v10 = vpop.permute.xlu2 %4285  ;;  %vm10265_vm2 = vmmov %vm10256_vm5  ;;  %v5041_v15 = vld [vmem:[%s10269_s10 + $0x28] sm:$0xff] }
 0x9a0   : > { %v4309_v52 = vsel %vm10250_vm0, %v4308_v9, %v4261_v13  ;;  %vm10271_vm0 = vmmov %vm10258_vm7 }
 0x9a1   : > { %v4310_v31 = vsel %vm10252_vm12, %v4309_v52, %v4264_v28  ;;  %v5115_v28 = vld [vmem:[%s10268_s15 + $0x38] sm:$0xff]  ;;  %v5040_v52 = vld [vmem:[%s10269_s10 + $0x20] sm:$0xff]  ;;  %vm10272_vm12 = vmmov %vm10271_vm0 }
 0x9a2   : > { %4676 = vperm.xlu0 %6454, %v4666_v33   ;;  %vm10275_vm1 = vmmov %vm10271_vm0 }
 0x9a5   : > { %5517 = vperm.xlu2 %6456, %v5509_v36   ;;  %v5113_v36 = vld [vmem:[%s10268_s15 + $0x28] sm:$0xff] }
 0x9a6   : > { %v4270_v17 = vpop.permute.xlu1 %4269  ;;  %v4267_v19 = vpop.permute.xlu0 %4266 }
 0x9a7   : > { %v4311_v51 = vsel %vm10253_vm6, %v4310_v31, %v4267_v19  ;;  %v4295_v40 = vpop.permute.xlu2 %4294  ;;  %v6468_v19 = vpop.eup %6467  ;;  %vm10274_vm6 = vmmov %vm10271_vm0 }
 0x9a8   : > { %v4312_v7 = vsel %vm10255_vm11, %v4311_v51, %v4270_v17  ;;  %v5039_v17 = vld [vmem:[%s10269_s10 + $0x18] sm:$0xff]  ;;  %v5320_v31 = vmul.f32 4096.0, %v6468_v19  ;;  %vm10276_vm11 = vmmov %vm10271_vm0 }
 0x9a9   : > { %v4313_v6 = vsel %vm10256_vm5, %v4312_v7, %v4277_v34  ;;  %v4411_v34 = vpop.f32.mrf.mxu2  ;;  %vm10277_vm5 = vmmov %vm10271_vm0 }
 0x9aa   : > { %4686 = vperm.xlu0 %6454, %v4668_v16   ;;  %v4323_v5 = vpack.c.bf16 %v4313_v6, %v4313_v6  ;;  %v5321_v51 = vsub.f32 1.0, %v5320_v31 }
 0x9ac   : > { %v4347_v54 = vsel %vm4140_vm10, %v4323_v5, 0  ;;  %v5322_v16 = vmul.f32 %v6468_v19, %v5321_v51 }
 0x9ad   : > { %4681 = vperm.xlu2 %6456, %v4667_v61   ;;  %4359 = vmatpush.bf16.msrb.mxu0 %v4347_v54 }
 0x9ae   : > { %v4283_v49 = vpop.permute.xlu1 %4282  ;;  %v4280_v53 = vpop.permute.xlu0 %4279  ;;  %v5323_v6 = vadd.f32 %v6468_v19, %v5322_v16 }
 0x9af   : > { %v4314_v23 = vsel %vm10258_vm7, %v4280_v53, %v4283_v49  ;;  %v4330_v7 = vpop.permute.xlu2 %4329  ;;  %vm10279_vm7 = vmmov %vm10271_vm0 }
 0x9b0   : > { %6220 = vmatmul.msk.bf16.vlgmr.msrb.gmra.mxu0 %vm4342_vm15, %v6319_v48  ;;  %v4315_v41 = vsel %vm10259_vm8, %v4314_v23, %v4286_v10  ;;  %vm10280_vm8 = vmmov %vm10271_vm0 }
 0x9b2   : > { %4696 = vperm.xlu0 %6454, %v4670_v11   ;;  %v4413_v11 = vpop.f32.mrf.mxu2 }
 0x9b5   : > { %4691 = vperm.xlu2 %6456, %v4669_v45  }
 0x9b6   : > { %v4289_v56 = vpop.permute.xlu0 %4288  ;;  %v4292_v3 = vpop.permute.xlu1 %4291 }
 0x9b7   : > { %v4316_v47 = vsel %vm10260_vm4, %v4315_v41, %v4289_v56  ;;  %v4392_v45 = vpop.permute.xlu2 %4391  ;;  %vm10281_vm4 = vmmov %vm10271_vm0 }
 0x9b8   : > { %v4317_v4 = vsel %vm10261_vm13, %v4316_v47, %v4292_v3  ;;  %vm10282_vm13 = vmmov %vm10271_vm0 }
 0x9b9   : > { %v4318_v27 = vsel %vm10262_vm9, %v4317_v4, %v4295_v40  ;;  %v4414_v4 = vadd.f32 %v4413_v11, %v4392_v45  ;;  %v4496_v11 = vld [vmem:[%s10273_s17 + $0x10] sm:$0xff]  ;;  %vm10283_vm9 = vmmov %vm10271_vm0 }
 0x9ba   : > { %4732 = vperm.xlu0 %6454, %v4626_v22  }
 0x9bd   : > { %4701 = vperm.xlu2 %6456, %v4671_v59  }
 0x9be   : > { %v6464_v50 = vpop.permute.xlu0 %6463  ;;  %v4305_v46 = vpop.permute.xlu1 %4304 }
 0x9bf   : > { %v6466_v42 = vunpack.i.h.bf16 %v6464_v50  ;;  %v6465_v39 = vunpack.i.l.bf16 %v6464_v50 }
 0x9c1   : > { %v4302_v57 = vsel %vm10263_vm3, %v6465_v39, %v6466_v42  ;;  %vm10284_vm3 = vmmov %vm10271_vm0 }
 0x9c2   : > { %4742 = vperm.xlu0 %6454, %v4628_v2   ;;  %v4319_v55 = vsel %vm10264_vm14, %v4318_v27, %v4302_v57 }
 0x9c3   : > { %v4320_v43 = vsel %vm10265_vm2, %v4319_v55, %v4305_v46 }
 0x9c4   : > { %v4324_v58 = vpack.c.bf16 %v4320_v43, %v4320_v43 }
 0x9c5   : > { %4737 = vperm.xlu2 %6456, %v4627_v24  }
 0x9c6   : > { %v4350_v37 = vsel %vm4140_vm10, %v4324_v58, 0  ;;  %v9333_v63 = vpop.permute.xlu0 %4334  ;;  %vm5324_vm10 = vweird.f32 %v6468_v19  ;;  %v6321_v58 = vld [vmem:[%s10270_s9] sm:$0xff]  ;;  %s10324_s9 = sld [smem:[#allocation30_spill]] }
 0x9c7   : > { %4373 = vmatpush.bf16.msra.mxu1 %v4350_v37  ;;  %v9341_v5 = vsel %vm5324_vm10, %v6468_v19, %v5323_v6  ;;  %v4425_v37 = vpop.f32.mrf.mxu3 }
 0x9ca   : > { %4711 = vperm.xlu0 %6454, %v4673_v12   ;;  %6221 = vmatmul.msk.bf16.vlgmr.msra.gmra.mxu1 %vm4342_vm15, %v6319_v48  ;;  %v4387_v48 = vpop.permute.xlu1 %4386  ;;  %vm10278_vm15 = vmmov %vm10271_vm0 }
 0x9cb   : > { %v4412_v22 = vadd.f32 %v4411_v34, %v4387_v48 }
 0x9cd   : > { %4747 = vperm.xlu2 %6456, %v4629_v1  }
 0x9d2   : > { %4757 = vperm.xlu0 %6454, %v4631_v8   ;;  %v4427_v8 = vpop.f32.mrf.mxu3 }
 0x9d5   : > { %4752 = vperm.xlu2 %6456, %v4630_v29   ;;  %v4426_v29 = vadd.f32 %v4425_v37, %v4387_v48  ;;  %v4495_v48 = vld [vmem:[%s10273_s17 + $0x8] sm:$0xff] }
 0x9da   : > { %4767 = vperm.xlu0 %6454, %v4633_v32  }
 0x9dd   : > { %4762 = vperm.xlu2 %6456, %v4632_v35   ;;  %v4428_v35 = vadd.f32 %v4427_v8, %v4392_v45  ;;  %v4500_v8 = vld [vmem:[%s10273_s17 + $0x30] sm:$0xff] }
 0x9e2   : > { %5583 = vperm.xlu0 %6454, %v5579_v0  }
 0x9ea   : > { %5599 = vperm.xlu0 %6454, %v5595_v20  }
 0x9f1   : > { %v5310_v44 = vpop.xlane.xlu0 %5309 }
 0x9f2   : > { %v5311_v62 = vrot.slane %v5310_v44, 4  ;;  %5153 = vperm.xlu0 %6454, %v5115_v28  }
 0x9f4   : > { %v5312_v13 = vadd.f32 %v5311_v62, %v5310_v44  ;;  %v5397_v44 = vld [vmem:[%s10244_s13 + $0x8] sm:$0xff] }
 0x9f6   : > { %v5313_v30 = vrot.slane %v5312_v13, 2 }
 0x9f8   : > { %v5314_v33 = vadd.f32 %v5313_v30, %v5312_v13 }
 0x9fa   : > { %5087 = vperm.xlu0 %6454, %v5041_v15   ;;  %v5315_v9 = vrot.slane %v5314_v33, 1 }
 0x9fc   : > { %v5316_v60 = vadd.f32 %v5315_v9, %v5314_v33 }
 0x9fe   : > { %6331 = vpush %v5316_v60 }
 0xa02   : > { %5143 = vperm.xlu0 %6454, %v5113_v36  }
 0xa0a   : > { %5082 = vperm.xlu0 %6454, %v5040_v52  }
 0xa12   : > { %5138 = vperm.xlu0 %6454, %v5112_v26  }
 0xa1a   : > { %5077 = vperm.xlu0 %6454, %v5039_v17  }
 0xa2d   : > { %v4361_v61 = vpop.f32.mrf.mxu0 }
 0xa2e   : > { %v4362_v53 = vadd.f32 %v4361_v61, %v4330_v7  ;;  %v4494_v61 = vld [vmem:[%s10273_s17] sm:$0xff] }
 0xa2f   : > { %s6332_s1 = spop %6331 }
 0xa30   : > { %v5318_v54 = vstv %s6332_s1  ;;  %v4430_v50 = vadd.f32 %v4412_v22, %v4362_v53  ;;  %s10322_s1 = sld [smem:[#allocation31_spill]] }
 0xa31   : > { %v5326_v49 = vmul.f32 %v9341_v5, %v5318_v54 }
 0xa32   : > { %v9365_v46 = vmax.f32 %v4430_v50, 0.0 }
 0xa33   : > { %v9345_v10 = vsub.f32 %v9111_v18, %v5326_v49  ;;  %v9348_v56 = vsub.f32 %v9139_v21, %v5326_v49  ;;  %v9351_v23 = vsub.f32 %v9114_v25, %v5326_v49  ;;  %v9354_v41 = vsub.f32 %v9142_v38, %v5326_v49 }
 0xa35   : > { %v4363_v3 = vpop.f32.mrf.mxu0  ;;  %v5331_v59 = vmul.f32 %v9345_v10, %v9345_v10  ;;  %v5332_v47 = vmul.f32 %v9348_v56, %v9348_v56  ;;  %v5333_v39 = vmul.f32 %v9351_v23, %v9351_v23  ;;  %v5334_v27 = vmul.f32 %v9354_v41, %v9354_v41 }
 0xa36   : > { %v4364_v42 = vadd.f32 %v4363_v3, %v9333_v63 }
 0xa37   : > { %v5335_v2 = vadd.f32 %v5332_v47, %v5331_v59 }
 0xa38   : > { %v4432_v40 = vadd.f32 %v4414_v4, %v4364_v42  ;;  %v4497_v4 = vld [vmem:[%s10273_s17 + $0x18] sm:$0xff] }
 0xa39   : > { %v5336_v57 = vadd.f32 %v5335_v2, %v5333_v39 }
 0xa3a   : > { %v9367_v24 = vmax.f32 %v4432_v40, 0.0  ;;  %v4498_v40 = vld [vmem:[%s10273_s17 + $0x20] sm:$0xff] }
 0xa3b   : > { %v5337_v55 = vadd.f32 %v5336_v57, %v5334_v27 }
 0xa3c   : > { %v4440_v43 = vpack.c.bf16 %v9367_v24, %v9365_v46 }
 0xa3d   : > { %5338 = vadd.xlane.f32.xlu1 %v5337_v55 }
 0xa3e   : > { %4469 = vmatpush.bf16.msra.mxu0 %v4440_v43 }
 0xa41   : > { %6232 = vmatmul.msk.bf16.vlgmr.msra.gmra.mxu0 %vm10271_vm0, %v6321_v58 }
 0xa47   : > { %v4375_v12 = vpop.f32.mrf.mxu1 }
 0xa48   : > { %v4376_v1 = vadd.f32 %v4375_v12, %v4330_v7 }
 0xa4a   : > { %v4431_v0 = vadd.f32 %v4426_v29, %v4376_v1 }
 0xa4c   : > { %v9375_v62 = vmax.f32 %v4431_v0, 0.0 }
 0xa4f   : > { %v4377_v32 = vpop.f32.mrf.mxu1 }
 0xa50   : > { %v4378_v20 = vadd.f32 %v4377_v32, %v9333_v63  ;;  %v4452_v63 = vpop.permute.xlu2 %4451 }
 0xa52   : > { %v4433_v28 = vadd.f32 %v4428_v35, %v4378_v20 }
 0xa54   : > { %v9377_v13 = vmax.f32 %v4433_v28, 0.0  ;;  %v4501_v28 = vld [vmem:[%s10273_s17 + $0x38] sm:$0xff] }
 0xa56   : > { %5405 = vperm.xlu1 %6455, %v5397_v44   ;;  %v4441_v30 = vpack.c.bf16 %v9377_v13, %v9375_v62 }
 0xa58   : > { %4483 = vmatpush.bf16.msrb.mxu1 %v4441_v30  ;;  %v4447_v17 = vpop.permute.xlu2 %4446 }
 0xa5b   : > { %6233 = vmatmul.msk.bf16.vlgmr.msrb.gmra.mxu1 %vm10272_vm12, %v6321_v58  ;;  %v4499_v58 = vld [vmem:[%s10273_s17 + $0x28] sm:$0xff]  ;;  %vm10285_vm12 = vmmov %vm10271_vm0 }
 0xa60   : > { %v5369_v53 = vpop.permute.xlu2 %5368 }
 0xa68   : > { %v5374_v50 = vpop.permute.xlu2 %5373 }
 0xa70   : > { %v5385_v27 = vpop.permute.xlu2 %5384 }
 0xa78   : > { %v5390_v37 = vpop.permute.xlu2 %5389 }
 0xa80   : > { %v5417_v0 = vpop.permute.xlu2 %5416 }
 0xab0   : > { %v5339_v15 = vpop.xlane.xlu1 %5338 }
 0xab1   : > { %v5340_v33 = vrot.slane %v5339_v15, 4 }
 0xab3   : > { %v5341_v9 = vadd.f32 %v5340_v33, %v5339_v15 }
 0xab5   : > { %v5342_v60 = vrot.slane %v5341_v9, 2 }
 0xab7   : > { %v5343_v36 = vadd.f32 %v5342_v60, %v5341_v9 }
 0xab9   : > { %v5344_v52 = vrot.slane %v5343_v36, 1 }
 0xabb   : > { %v5345_v26 = vadd.f32 %v5344_v52, %v5343_v36 }
 0xabd   : > { %6333 = vpush %v5345_v26 }
 0xabe   : > { %v4471_v14 = vpop.f32.mrf.mxu0 }
 0xabf   : > { %v4472_v19 = vadd.f32 %v4471_v14, %v4447_v17 }
 0xac1   : > { %v4490_v51 = vmax.f32 %v4472_v19, 0.0 }
 0xac3   : > { %v4502_v7 = vmul.f32 %v4490_v51, %v4490_v51 }
 0xac6   : > { %v4473_v31 = vpop.f32.mrf.mxu0 }
 0xac7   : > { %v4474_v16 = vadd.f32 %v4473_v31, %v4452_v63  ;;  %v5401_v31 = vpop.permute.xlu0 %5400 }
 0xac9   : > { %v4492_v34 = vmax.f32 %v4474_v16, 0.0 }
 0xacb   : > { %v4504_v6 = vmul.f32 %v4492_v34, %v4492_v34  ;;  %4558 = vmatpush.msra.mxu2 %v4492_v34  ;;  %4944 = vmatpush.xpose.msrb.mxu0 %v4492_v34 }
 0xacc   : > { %6329 = vmatpush.xpose.msra.mxu1 %v4492_v34  ;;  %v5422_v34 = vpop.permute.xlu2 %5421 }
 0xacd   : > { %v9383_v54 = vadd.f32 %v4504_v6, %v4502_v7  ;;  %4559 = vmatpush.msra.mxu2 %v4490_v51 }
 0xace   : > { %6234 = vmatmul.msk.f32.vlgmr.msra.gmra.mxu2 %vm10274_vm6, %v4494_v61  ;;  %vm10286_vm6 = vmmov %vm10271_vm0 }
 0xacf   : > { %4945 = vmatpush.xpose.msrb.mxu0 %v4490_v51 }
 0xad0   : > { %6330 = vmatpush.xpose.msra.mxu1 %v4490_v51 }
 0xad6   : > { %6235 = vmatmul.msk.f32.gmra.mxu2 %vm10275_vm1, %v4495_v48  ;;  %vm10287_vm1 = vmmov %vm10271_vm0 }
 0xad8   : > { %v4485_v49 = vpop.f32.mrf.mxu1 }
 0xad9   : > { %v4486_v45 = vadd.f32 %v4485_v49, %v4447_v17 }
 0xadb   : > { %v4491_v3 = vmax.f32 %v4486_v45, 0.0 }
 0xadd   : > { %v4503_v42 = vmul.f32 %v4491_v3, %v4491_v3 }
 0xade   : > { %6236 = vmatmul.msk.f32.gmra.mxu2 %vm10276_vm11, %v4496_v11  ;;  %vm10288_vm11 = vmmov %vm10271_vm0 }
 0xae0   : > { %v4487_v22 = vpop.f32.mrf.mxu1 }
 0xae1   : > { %v4488_v59 = vadd.f32 %v4487_v22, %v4452_v63 }
 0xae3   : > { %v4493_v47 = vmax.f32 %v4488_v59, 0.0 }
 0xae5   : > { %v4505_v39 = vmul.f32 %v4493_v47, %v4493_v47  ;;  %4599 = vmatpush.msrb.mxu3 %v4493_v47  ;;  %4985 = vmatpush.xpose.msrb.mxu1 %v4493_v47 }
 0xae6   : > { %6237 = vmatmul.msk.f32.gmra.mxu2 %vm10277_vm5, %v4497_v4 }
 0xae7   : > { %v9392_v2 = vadd.f32 %v4505_v39, %v4503_v42  ;;  %4600 = vmatpush.msrb.mxu3 %v4491_v3 }
 0xae8   : > { %6242 = vmatmul.msk.f32.vlgmr.msrb.gmra.mxu3 %vm10278_vm15, %v4494_v61 }
 0xae9   : > { %4986 = vmatpush.xpose.msrb.mxu1 %v4491_v3 }
 0xaee   : > { %6238 = vmatmul.msk.f32.gmra.mxu2 %vm10279_vm7, %v4498_v40  ;;  %s6334_s21 = spop %6333 }
 0xaef   : > { %v5347_v57 = vstv %s6334_s21  ;;  %s10325_s21 = sld [smem:[#allocation35_spill]] }
 0xaf0   : > { %v5348_v55 = vmul.f32 %v5347_v57, %v9341_v5  ;;  %6243 = vmatmul.msk.f32.gmra.mxu3 %vm10280_vm8, %v4495_v48 }
 0xaf2   : > { %v5349_v43 = vadd.f32 1e-05, %v5348_v55 }
 0xaf4   : > { %6469 = vrsqrt.f32 %v5349_v43  ;;  %vm5356_vm2 = vweird.f32 %v5349_v43 }
 0xaf6   : > { %6239 = vmatmul.msk.f32.gmra.mxu2 %vm10281_vm4, %v4499_v58 }
 0xaf8   : > { %6244 = vmatmul.msk.f32.gmra.mxu3 %vm10282_vm13, %v4496_v11 }
 0xafa   : > { %v6470_v12 = vpop.eup %6469 }
 0xafb   : > { %v5351_v1 = vmul.f32 %v6470_v12, %v5349_v43  ;;  %vm5357_vm14 = vweird.f32 %v6470_v12 }
 0xafc   : > { %vm5358_vm10 = vmor %vm5356_vm2, %vm5357_vm14 }
 0xafd   : > { %v5352_v29 = vmul.f32 %v6470_v12, %v5351_v1 }
 0xafe   : > { %6240 = vmatmul.msk.f32.gmra.mxu2 %vm10283_vm9, %v4500_v8 }
 0xaff   : > { %v5353_v32 = vmul.f32 0.5, %v5352_v29 }
 0xb00   : > { %6245 = vmatmul.msk.f32.gmra.mxu3 %vm10284_vm3, %v4497_v4 }
 0xb01   : > { %v5354_v35 = vsub.f32 1.5, %v5353_v32 }
 0xb03   : > { %v5355_v20 = vmul.f32 %v6470_v12, %v5354_v35 }
 0xb05   : > { %v5359_v44 = vsel %vm5358_vm10, %v6470_v12, %v5355_v20 }
 0xb06   : > { %v5360_v30 = vmul.f32 %v5359_v44, %v9345_v10  ;;  %v5361_v15 = vmul.f32 %v5359_v44, %v9348_v56  ;;  %v5362_v33 = vmul.f32 %v5359_v44, %v9351_v23  ;;  %v5363_v9 = vmul.f32 %v5359_v44, %v9354_v41  ;;  %6241 = vmatmul.msk.f32.gmra.mxu2 %vm10271_vm0, %v4501_v28  ;;  %v5406_v10 = vpop.permute.xlu1 %5405 }
 0xb08   : > { %v5376_v60 = vmul.f32 %v5369_v53, %v5360_v30  ;;  %v5377_v36 = vmul.f32 %v5369_v53, %v5361_v15  ;;  %v5378_v63 = vmul.f32 %v5374_v50, %v5362_v33  ;;  %v5379_v52 = vmul.f32 %v5374_v50, %v5363_v9  ;;  %6246 = vmatmul.msk.f32.gmra.mxu3 %vm10285_vm12, %v4498_v40 }
 0xb0a   : > { %v5392_v26 = vadd.f32 %v5385_v27, %v5376_v60  ;;  %v5393_v14 = vadd.f32 %v5385_v27, %v5377_v36  ;;  %v5394_v17 = vadd.f32 %v5390_v37, %v5378_v63  ;;  %v5395_v19 = vadd.f32 %v5390_v37, %v5379_v52 }
 0xb0c   : > { %v5408_v51 = vmul.f32 %v5401_v31, %v5392_v26  ;;  %v5409_v56 = vmul.f32 %v5401_v31, %v5393_v14  ;;  %v5410_v16 = vmul.f32 %v5406_v10, %v5394_v17  ;;  %v5411_v23 = vmul.f32 %v5406_v10, %v5395_v19 }
 0xb0e   : > { %v9412_v41 = vadd.f32 %v5417_v0, %v5408_v51  ;;  %v9414_v7 = vadd.f32 %v5417_v0, %v5409_v56  ;;  %v9416_v6 = vadd.f32 %v5422_v34, %v5410_v16  ;;  %v9418_v61 = vadd.f32 %v5422_v34, %v5411_v23 }
 0xb10   : > { %6247 = vmatmul.msk.f32.gmra.mxu3 %vm10286_vm6, %v4499_v58  ;;  %v6262_v48 = vmul.f32 -1.442695, %v9412_v41  ;;  %v6263_v49 = vmul.f32 -1.442695, %v9414_v7  ;;  %v6264_v53 = vmul.f32 -1.442695, %v9416_v6 }
 0xb11   : > { %v6265_v11 = vmul.f32 -1.442695, %v9418_v61 }
 0xb12   : > { %6471 = vpow2.f32 %v6262_v48 }
 0xb13   : > { %6473 = vpow2.f32 %v6263_v49 }
 0xb14   : > { %6475 = vpow2.f32 %v6264_v53  ;;  %v5513_v53 = vpop.permute.xlu0 %5512 }
 0xb15   : > { %6477 = vpow2.f32 %v6265_v11 }
 0xb18   : > { %v6472_v45 = vpop.eup %6471  ;;  %6248 = vmatmul.msk.f32.gmra.mxu3 %vm10287_vm1, %v4500_v8 }
 0xb19   : > { %v6474_v22 = vpop.eup %6473  ;;  %v5440_v3 = vadd.f32 1.0, %v6472_v45 }
 0xb1a   : > { %v6476_v59 = vpop.eup %6475  ;;  %v5441_v47 = vadd.f32 1.0, %v6474_v22 }
 0xb1b   : > { %v6478_v4 = vpop.eup %6477  ;;  %v5442_v50 = vadd.f32 1.0, %v6476_v59  ;;  %6479 = vrcp.f32 %v5440_v3  ;;  %v5453_v39 = vand.u32 2147483647, %v5440_v3  ;;  %v5455_v40 = vand.u32 2147483648, %v5440_v3 }
 0xb1c   : > { %v9426_v42 = vadd.f32 1.0, %v6478_v4  ;;  %6481 = vrcp.f32 %v5441_v47  ;;  %vm5449_vm5 = vweird.f32 %v5440_v3  ;;  %vm5464_vm15 = vweird.f32 %v5441_v47  ;;  %v5518_v4 = vpop.permute.xlu2 %5517 }
 0xb1d   : > { %6483 = vrcp.f32 %v5442_v50  ;;  %v5468_v37 = vand.u32 2147483647, %v5441_v47  ;;  %v5470_v12 = vand.u32 2147483648, %v5441_v47  ;;  %vm9430_vm7 = vcmp.eq.f32.partialorder %v5453_v39, 8.507059e+37 }
 0xb1e   : > { %6485 = vrcp.f32 %v9426_v42  ;;  %v5456_v29 = vor.u32 1.1754944e-38, %v5455_v40  ;;  %vm5479_vm8 = vweird.f32 %v5442_v50  ;;  %v5483_v20 = vand.u32 2147483647, %v5442_v50 }
 0xb1f   : > { %vm9435_vm9 = vcmp.eq.f32.partialorder %v5468_v37, 8.507059e+37  ;;  %v5471_v60 = vor.u32 1.1754944e-38, %v5470_v12  ;;  %vm5494_vm2 = vweird.f32 %v9426_v42  ;;  %v5498_v14 = vand.u32 2147483647, %v9426_v42  ;;  %v5114_v37 = vld [vmem:[%s10268_s15 + $0x30] sm:$0xff] }
 0xb20   : > { %6249 = vmatmul.msk.f32.gmra.mxu3 %vm10288_vm11, %v4501_v28  ;;  %v5485_v28 = vand.u32 2147483648, %v5442_v50  ;;  %v5500_v17 = vand.u32 2147483648, %v9426_v42  ;;  %vm5484_vm6 = vcmp.eq.f32.partialorder %v5483_v20, 8.507059e+37  ;;  %v5038_v12 = vld [vmem:[%s10269_s10 + $0x10] sm:$0xff] }
 0xb21   : > { %v6480_v27 = vpop.eup %6479  ;;  %vm5499_vm11 = vcmp.eq.f32.partialorder %v5498_v14, 8.507059e+37 }
 0xb22   : > { %v6482_v57 = vpop.eup %6481  ;;  %v5445_v55 = vmul.f32 %v6480_v27, %v5440_v3  ;;  %vm5450_vm4 = vweird.f32 %v6480_v27  ;;  %v5486_v16 = vor.u32 1.1754944e-38, %v5485_v28  ;;  %v5501_v45 = vor.u32 1.1754944e-38, %v5500_v17 }
 0xb23   : > { %v6484_v43 = vpop.eup %6483  ;;  %v5460_v58 = vmul.f32 %v6482_v57, %v5441_v47  ;;  %vm5465_vm13 = vweird.f32 %v6482_v57  ;;  %vm5451_vm14 = vmor %vm5449_vm5, %vm5450_vm4 }
 0xb24   : > { %v5446_v1 = vsub.f32 1.0, %v5445_v55  ;;  %v5475_v32 = vmul.f32 %v6484_v43, %v5442_v50  ;;  %v6486_v35 = vpop.eup %6485  ;;  %vm5480_vm3 = vweird.f32 %v6484_v43  ;;  %vm5466_vm10 = vmor %vm5464_vm15, %vm5465_vm13  ;;  %v9480_v20 = vpop.permute.xlu2 %4681 }
 0xb25   : > { %v5461_v0 = vsub.f32 1.0, %v5460_v58  ;;  %v5490_v15 = vmul.f32 %v6486_v35, %v9426_v42  ;;  %vm5495_vm0 = vweird.f32 %v6486_v35  ;;  %vm5481_vm12 = vmor %vm5479_vm8, %vm5480_vm3  ;;  %v5596_v58 = vld [vmem:[%s10267_s18 + $0x8] sm:$0xff] }
 0xb26   : > { %v5447_v44 = vmul.f32 %v6480_v27, %v5446_v1  ;;  %v5476_v30 = vsub.f32 1.0, %v5475_v32  ;;  %vm5496_vm1 = vmor %vm5494_vm2, %vm5495_vm0  ;;  %vm10297_vm0 = vcmask 130048  }
 0xb27   : > { %v5462_v33 = vmul.f32 %v6482_v57, %v5461_v0  ;;  %v5491_v52 = vsub.f32 1.0, %v5490_v15 }
 0xb28   : > { %v5448_v36 = vadd.f32 %v6480_v27, %v5447_v44  ;;  %v5477_v63 = vmul.f32 %v6484_v43, %v5476_v30 }
 0xb29   : > { %v5463_v26 = vadd.f32 %v6482_v57, %v5462_v33  ;;  %v5492_v10 = vmul.f32 %v6486_v35, %v5491_v52  ;;  %v4514_v52 = vrot.slane %v9392_v2, 4 }
 0xb2a   : > { %v5452_v19 = vsel %vm5451_vm14, %v6480_v27, %v5448_v36  ;;  %v5478_v31 = vadd.f32 %v6484_v43, %v5477_v63  ;;  %v4507_v63 = vrot.slane %v9383_v54, 4 }
 0xb2b   : > { %v5457_v51 = vsel %vm9430_vm7, %v5456_v29, %v5452_v19  ;;  %v5467_v56 = vsel %vm5466_vm10, %v6482_v57, %v5463_v26  ;;  %v5493_v48 = vadd.f32 %v6486_v35, %v5492_v10  ;;  %v9476_v29 = vpop.permute.xlu0 %4676  ;;  %v4515_v19 = vadd.f32 %v4514_v52, %v9392_v2 }
 0xb2c   : > { %v5472_v23 = vsel %vm9435_vm9, %v5471_v60, %v5467_v56  ;;  %v5482_v34 = vsel %vm5481_vm12, %v6484_v43, %v5478_v31  ;;  %v5504_v49 = vmul.f32 %v5457_v51, %v9412_v41  ;;  %v9484_v15 = vpop.permute.xlu2 %4691  ;;  %v4508_v17 = vadd.f32 %v4507_v63, %v9383_v54  ;;  %vm10298_vm12 = vmmov %vm10297_vm0 }
 0xb2d   : > { %v5487_v11 = vsel %vm5484_vm6, %v5486_v16, %v5482_v34  ;;  %v5505_v22 = vmul.f32 %v5472_v23, %v9414_v7  ;;  %v5497_v3 = vsel %vm5496_vm1, %v6486_v35, %v5493_v48  ;;  %v4516_v56 = vrot.slane %v4515_v19, 2  ;;  %vm10299_vm6 = vmmov %vm10297_vm0 }
 0xb2e   : > { %v5506_v59 = vmul.f32 %v5487_v11, %v9416_v6  ;;  %v5520_v47 = vmul.f32 %v5513_v53, %v5504_v49  ;;  %v5502_v50 = vsel %vm5499_vm11, %v5501_v45, %v5497_v3  ;;  %v4509_v10 = vrot.slane %v4508_v17, 2  ;;  %vm10300_vm1 = vmmov %vm10297_vm0 }
 0xb2f   : > { %v5521_v39 = vmul.f32 %v5513_v53, %v5505_v22  ;;  %v5507_v41 = vmul.f32 %v5502_v50, %v9418_v61  ;;  %v4517_v49 = vadd.f32 %v4516_v56, %v4515_v19  ;;  %vm10301_vm11 = vmmov %vm10297_vm0 }
 0xb30   : > { %v5522_v40 = vmul.f32 %v5518_v4, %v5506_v59  ;;  %v9456_v42 = vadd.f32 %v5520_v47, %v9111_v18  ;;  %v4672_v18 = vld [vmem:[%s10247_s7 + $0x30] sm:$0xff]  ;;  %v4510_v16 = vadd.f32 %v4509_v10, %v4508_v17 }
 0xb31   : > { %v9459_v7 = vadd.f32 %v5521_v39, %v9139_v21  ;;  %v5523_v27 = vmul.f32 %v5518_v4, %v5507_v41  ;;  %v5580_v21 = vld [vmem:[%s10266_s26 + $0x8] sm:$0xff]  ;;  %v4518_v3 = vrot.slane %v4517_v49, 1 }
 0xb32   : > { %v9462_v6 = vadd.f32 %v5522_v40, %v9114_v25  ;;  %v4511_v11 = vrot.slane %v4510_v16, 1 }
 0xb33   : > { %v5528_v57 = vadd.f32 %v9459_v7, %v9456_v42  ;;  %v9467_v55 = vadd.f32 %v5523_v27, %v9142_v38  ;;  %v9478_v0 = vpop.permute.xlu0 %4686  ;;  %v9502_v40 = vadd.f32 %v4518_v3, %v4517_v49 }
 0xb34   : > { %v9488_v36 = vpop.permute.xlu2 %4701  ;;  %v9500_v2 = vadd.f32 %v4511_v11, %v4510_v16 }
 0xb35   : > { %v5529_v61 = vadd.f32 %v5528_v57, %v9462_v6 }
 0xb37   : > { %v5530_v43 = vadd.f32 %v5529_v61, %v9467_v55 }
 0xb39   : > { %5531 = vadd.xlane.f32.xlu1 %v5530_v43 }
 0xb3b   : > { %v9482_v30 = vpop.permute.xlu0 %4696 }
 0xb3c   : > { %v9496_v51 = vpop.permute.xlu2 %4737 }
 0xb43   : > { %v9486_v60 = vpop.permute.xlu0 %4732 }
 0xb44   : > { %v4748_v59 = vpop.permute.xlu2 %4747 }
 0xb4b   : > { %v9494_v31 = vpop.permute.xlu0 %4742 }
 0xb4c   : > { %v4753_v16 = vpop.permute.xlu2 %4752 }
 0xb51   : > { %v4561_v25 = vpop.f32.mrf.mxu2 }
 0xb52   : > { %4706 = vperm.xlu1 %6455, %v4672_v18   ;;  %v4634_v27 = vmul.f32 2.0, %v4561_v25 }
 0xb53   : > { %v9498_v22 = vpop.permute.xlu0 %4711 }
 0xb54   : > { %v4650_v25 = vsub.f32 %v9500_v2, %v4634_v27 }
 0xb59   : > { %v4564_v8 = vpop.f32.mrf.mxu2 }
 0xb5a   : > { %5588 = vperm.xlu1 %6455, %v5580_v21   ;;  %v4636_v57 = vmul.f32 2.0, %v4564_v8 }
 0xb61   : > { %v4567_v32 = vpop.f32.mrf.mxu2 }
 0xb62   : > { %5604 = vperm.xlu1 %6455, %v5596_v58   ;;  %v4638_v4 = vmul.f32 2.0, %v4567_v32 }
 0xb64   : > { %v4654_v19 = vsub.f32 %v9500_v2, %v4638_v4 }
 0xb69   : > { %v4570_v28 = vpop.f32.mrf.mxu2 }
 0xb6a   : > { %5148 = vperm.xlu1 %6455, %v5114_v37   ;;  %v4640_v50 = vmul.f32 2.0, %v4570_v28 }
 0xb6b   : > { %v4602_v1 = vpop.f32.mrf.mxu3 }
 0xb6c   : > { %v4635_v43 = vmul.f32 2.0, %v4602_v1  ;;  %v4656_v32 = vsub.f32 %v9500_v2, %v4640_v50  ;;  %v4652_v1 = vsub.f32 %v9500_v2, %v4636_v57 }
 0xb6e   : > { %v4720_v49 = vadd.f32 %v9484_v15, %v4656_v32  ;;  %v4716_v3 = vadd.f32 %v9480_v20, %v4652_v1 }
 0xb71   : > { %v4573_v33 = vpop.f32.mrf.mxu2 }
 0xb72   : > { %5072 = vperm.xlu1 %6455, %v5038_v12   ;;  %v4642_v18 = vmul.f32 2.0, %v4573_v33  ;;  %v4651_v33 = vsub.f32 %v9502_v40, %v4635_v43  ;;  %v9533_v43 = vmul.f32 %v4748_v59, %v4720_v49 }
 0xb73   : > { %v4605_v38 = vpop.f32.mrf.mxu3 }
 0xb74   : > { %v4637_v21 = vmul.f32 2.0, %v4605_v38  ;;  %v4715_v4 = vadd.f32 %v9476_v29, %v4651_v33 }
 0xb79   : > { %v4576_v26 = vpop.f32.mrf.mxu2 }
 0xb7a   : > { %v4644_v58 = vmul.f32 2.0, %v4576_v26  ;;  %v4653_v26 = vsub.f32 %v9502_v40, %v4637_v21  ;;  %v4772_v21 = vmul.f32 %v9496_v51, %v4716_v3 }
 0xb7b   : > { %v4608_v35 = vpop.f32.mrf.mxu3 }
 0xb7c   : > { %v4639_v39 = vmul.f32 2.0, %v4608_v35 }
 0xb7e   : > { %v4655_v35 = vsub.f32 %v9502_v40, %v4639_v39  ;;  %v4717_v39 = vadd.f32 %v9480_v20, %v4653_v26 }
 0xb81   : > { %v4579_v23 = vpop.f32.mrf.mxu2 }
 0xb82   : > { %v4646_v27 = vmul.f32 2.0, %v4579_v23 }
 0xb83   : > { %v4611_v44 = vpop.f32.mrf.mxu3 }
 0xb84   : > { %v4641_v41 = vmul.f32 2.0, %v4611_v44  ;;  %v4758_v44 = vpop.permute.xlu0 %4757 }
 0xb86   : > { %v4657_v28 = vsub.f32 %v9502_v40, %v4641_v41 }
 0xb88   : > { %v4721_v11 = vadd.f32 %v9484_v15, %v4657_v28 }
 0xb89   : > { %v4582_v37 = vpop.f32.mrf.mxu2 }
 0xb8a   : > { %v4648_v8 = vmul.f32 2.0, %v4582_v37 }
 0xb8b   : > { %v4614_v9 = vpop.f32.mrf.mxu3 }
 0xb8c   : > { %v4643_v63 = vmul.f32 2.0, %v4614_v9  ;;  %v4658_v9 = vsub.f32 %v9500_v2, %v4642_v18 }
 0xb8e   : > { %v4659_v10 = vsub.f32 %v9502_v40, %v4643_v63  ;;  %v4722_v50 = vadd.f32 %v9482_v30, %v4658_v9 }
 0xb93   : > { %v4617_v14 = vpop.f32.mrf.mxu3 }
 0xb94   : > { %v4645_v52 = vmul.f32 2.0, %v4617_v14  ;;  %v4660_v14 = vsub.f32 %v9500_v2, %v4644_v58  ;;  %v4773_v58 = vmul.f32 %v9496_v51, %v4717_v39 }
 0xb96   : > { %v4661_v56 = vsub.f32 %v9502_v40, %v4645_v52  ;;  %v4724_v41 = vadd.f32 %v9488_v36, %v4660_v14  ;;  %v4768_v52 = vpop.permute.xlu0 %4767 }
 0xb98   : > { %v4725_v15 = vadd.f32 %v9488_v36, %v4661_v56  ;;  %v4771_v36 = vmul.f32 %v9486_v60, %v4715_v4  ;;  %v9548_v37 = vmul.f32 %v4758_v44, %v4724_v41 }
 0xb9b   : > { %v4620_v34 = vpop.f32.mrf.mxu3 }
 0xb9c   : > { %v4647_v57 = vmul.f32 2.0, %v4620_v34  ;;  %v9545_v34 = vmul.f32 %v4753_v16, %v4722_v50 }
 0xb9e   : > { %v4663_v63 = vsub.f32 %v9502_v40, %v4647_v57 }
 0xba3   : > { %v4623_v12 = vpop.f32.mrf.mxu3 }
 0xba4   : > { %v4649_v38 = vmul.f32 2.0, %v4623_v12  ;;  %v9553_v12 = vmul.f32 %v4758_v44, %v4725_v15 }
 0xbac   : > { %v5532_v48 = vpop.xlane.xlu1 %5531 }
 0xbad   : > { %v5533_v53 = vrot.slane %v5532_v48, 4 }
 0xbaf   : > { %v5534_v45 = vadd.f32 %v5533_v53, %v5532_v48  ;;  %v4718_v48 = vadd.f32 %v9478_v0, %v4654_v19  ;;  %v4719_v53 = vadd.f32 %v9478_v0, %v4655_v35  ;;  %v4723_v0 = vadd.f32 %v9482_v30, %v4659_v10 }
 0xbb1   : > { %v5535_v54 = vrot.slane %v5534_v45, 2  ;;  %v9536_v18 = vmul.f32 %v9494_v31, %v4719_v53 }
 0xbb3   : > { %v5536_v47 = vadd.f32 %v5535_v54, %v5534_v45  ;;  %v4714_v45 = vadd.f32 %v9476_v29, %v4650_v25  ;;  %v4664_v54 = vsub.f32 %v9500_v2, %v4648_v8  ;;  %v9538_v29 = vmul.f32 %v4748_v59, %v4721_v11  ;;  %v4763_v25 = vpop.permute.xlu2 %4762 }
 0xbb4   : > { %v9551_v59 = vmul.f32 %v4753_v16, %v4723_v0 }
 0xbb5   : > { %v5537_v61 = vrot.slane %v5536_v47, 1  ;;  %v4770_v20 = vmul.f32 %v9486_v60, %v4714_v45  ;;  %v4728_v23 = vadd.f32 %v9498_v22, %v4664_v54  ;;  %v4799_v60 = vmax.f32 %v4771_v36, %v9536_v18 }
 0xbb6   : > { %v4800_v19 = vmax.f32 %v4773_v58, %v9538_v29 }
 0xbb7   : > { %v5538_v17 = vadd.f32 %v5537_v61, %v5536_v47  ;;  %v4665_v47 = vsub.f32 %v9502_v40, %v4649_v38  ;;  %v9531_v61 = vmul.f32 %v9494_v31, %v4718_v48  ;;  %v4662_v31 = vsub.f32 %v9500_v2, %v4646_v27 }
 0xbb8   : > { %v9560_v32 = vmul.f32 %v4768_v52, %v4728_v23  ;;  %v4802_v8 = vmax.f32 %v4800_v19, %v9553_v12  ;;  %v4801_v33 = vmax.f32 %v4799_v60, %v9551_v59 }
 0xbb9   : > { %6335 = vpush %v5538_v17  ;;  %v4729_v30 = vadd.f32 %v9498_v22, %v4665_v47  ;;  %v4786_v17 = vmax.f32 %v4770_v20, %v9531_v61  ;;  %v4787_v22 = vmax.f32 %v4772_v21, %v9533_v43 }
 0xbbb   : > { %v9562_v35 = vmul.f32 %v4768_v52, %v4729_v30  ;;  %v4789_v1 = vmax.f32 %v4787_v22, %v9548_v37  ;;  %v4788_v40 = vmax.f32 %v4786_v17, %v9545_v34 }
 0xbbd   : > { %v4791_v9 = vmax.f32 %v4789_v1, %v9560_v32  ;;  %v4804_v26 = vmax.f32 %v4802_v8, %v9562_v35 }
 0xbc4   : > { %v4707_v51 = vpop.permute.xlu1 %4706 }
 0xbc5   : > { %v4726_v2 = vadd.f32 %v4707_v51, %v4662_v31  ;;  %v4727_v28 = vadd.f32 %v4707_v51, %v4663_v63 }
 0xbc7   : > { %v4782_v38 = vmul.f32 %v4763_v25, %v4726_v2  ;;  %v9567_v44 = vmul.f32 %v4763_v25, %v4727_v28 }
 0xbc9   : > { %v4790_v14 = vmax.f32 %v4788_v40, %v4782_v38  ;;  %v4803_v10 = vmax.f32 %v4801_v33, %v9567_v44 }
 0xbcb   : > { %v4792_v56 = vmax.f32 %v4790_v14, %v4791_v9  ;;  %v4805_v16 = vmax.f32 %v4803_v10, %v4804_v26 }
 0xbcd   : > { %v4793_v48 = vrot.slane %v4792_v56, 4  ;;  %v4806_v49 = vrot.slane %v4805_v16, 4 }
 0xbcf   : > { %v4794_v53 = vmax.f32 %v4792_v56, %v4793_v48  ;;  %v4807_v11 = vmax.f32 %v4805_v16, %v4806_v49 }
 0xbd1   : > { %v4795_v45 = vrot.slane %v4794_v53, 2  ;;  %v4808_v3 = vrot.slane %v4807_v11, 2 }
 0xbd3   : > { %v4796_v54 = vmax.f32 %v4794_v53, %v4795_v45  ;;  %v4809_v47 = vmax.f32 %v4807_v11, %v4808_v3 }
 0xbd5   : > { %v4797_v4 = vrot.slane %v4796_v54, 1  ;;  %v4810_v50 = vrot.slane %v4809_v47, 1 }
 0xbd7   : > { %v4798_v39 = vmax.f32 %v4796_v54, %v4797_v4  ;;  %v4811_v41 = vmax.f32 %v4809_v47, %v4810_v50 }
 0xbd9   : > { %v4812_v27 = vsub.f32 %v4770_v20, %v4798_v39  ;;  %v4813_v0 = vsub.f32 %v4771_v36, %v4811_v41  ;;  %v4814_v15 = vsub.f32 %v4772_v21, %v4798_v39  ;;  %v4815_v57 = vsub.f32 %v4773_v58, %v4811_v41 }
 0xbda   : > { %v4816_v23 = vsub.f32 %v9531_v61, %v4798_v39  ;;  %v4817_v30 = vsub.f32 %v9536_v18, %v4811_v41  ;;  %v4818_v31 = vsub.f32 %v9533_v43, %v4798_v39  ;;  %v4819_v52 = vsub.f32 %v9538_v29, %v4811_v41 }
 0xbdb   : > { %v4828_v63 = vmul.f32 1.442695, %v4812_v27  ;;  %v4830_v17 = vmul.f32 1.442695, %v4813_v0  ;;  %v4832_v22 = vmul.f32 1.442695, %v4814_v15  ;;  %v4820_v19 = vsub.f32 %v9545_v34, %v4798_v39 }
 0xbdc   : > { %v4834_v60 = vmul.f32 1.442695, %v4815_v57  ;;  %v4836_v51 = vmul.f32 1.442695, %v4816_v23  ;;  %v4821_v20 = vsub.f32 %v9551_v59, %v4811_v41  ;;  %v4838_v21 = vmul.f32 1.442695, %v4817_v30 }
 0xbdd   : > { %6487 = vpow2.f32 %v4828_v63  ;;  %v4822_v61 = vsub.f32 %v9548_v37, %v4798_v39  ;;  %v4840_v18 = vmul.f32 1.442695, %v4818_v31  ;;  %v4823_v43 = vsub.f32 %v9553_v12, %v4811_v41 }
 0xbde   : > { %6489 = vpow2.f32 %v4830_v17  ;;  %v4842_v36 = vmul.f32 1.442695, %v4819_v52  ;;  %v4824_v29 = vsub.f32 %v4782_v38, %v4798_v39  ;;  %v4844_v58 = vmul.f32 1.442695, %v4820_v19 }
 0xbdf   : > { %6491 = vpow2.f32 %v4832_v22  ;;  %v4825_v2 = vsub.f32 %v9567_v44, %v4811_v41  ;;  %v4846_v34 = vmul.f32 1.442695, %v4821_v20  ;;  %v4826_v59 = vsub.f32 %v9560_v32, %v4798_v39 }
 0xbe0   : > { %6493 = vpow2.f32 %v4834_v60  ;;  %v4848_v25 = vmul.f32 1.442695, %v4822_v61  ;;  %v4850_v1 = vmul.f32 1.442695, %v4823_v43  ;;  %v4827_v12 = vsub.f32 %v9562_v35, %v4811_v41 }
 0xbe1   : > { %6495 = vpow2.f32 %v4836_v51  ;;  %v4852_v8 = vmul.f32 1.442695, %v4824_v29  ;;  %v4854_v44 = vmul.f32 1.442695, %v4825_v2  ;;  %v4856_v9 = vmul.f32 1.442695, %v4826_v59 }
 0xbe2   : > { %6497 = vpow2.f32 %v4838_v21  ;;  %v4858_v10 = vmul.f32 1.442695, %v4827_v12 }
 0xbe3   : > { %v9582_v28 = vpop.eup %6487  ;;  %6499 = vpow2.f32 %v4840_v18 }
 0xbe4   : > { %v9585_v37 = vpop.eup %6489  ;;  %6501 = vpow2.f32 %v4842_v36 }
 0xbe5   : > { %v9588_v40 = vpop.eup %6491  ;;  %6503 = vpow2.f32 %v4844_v58 }
 0xbe6   : > { %v9590_v38 = vpop.eup %6493  ;;  %6505 = vpow2.f32 %v4846_v34  ;;  %v4860_v33 = vadd.f32 %v9588_v40, %v9582_v28 }
 0xbe7   : > { %v9594_v32 = vpop.eup %6495  ;;  %6507 = vpow2.f32 %v4848_v25  ;;  %v4873_v26 = vadd.f32 %v9590_v38, %v9585_v37 }
 0xbe8   : > { %v9598_v14 = vpop.eup %6497  ;;  %6509 = vpow2.f32 %v4850_v1  ;;  %v4861_v35 = vadd.f32 %v9594_v32, %v4860_v33 }
 0xbe9   : > { %v9601_v56 = vpop.eup %6499  ;;  %6511 = vpow2.f32 %v4852_v8  ;;  %v4874_v16 = vadd.f32 %v9598_v14, %v4873_v26 }
 0xbea   : > { %s6336_s22 = spop %6335  ;;  %v9604_v48 = vpop.eup %6501  ;;  %6513 = vpow2.f32 %v4854_v44  ;;  %v4862_v49 = vadd.f32 %v9601_v56, %v4861_v35 }
 0xbeb   : > { %v5540_v53 = vstv %s6336_s22  ;;  %v9607_v11 = vpop.eup %6503  ;;  %6515 = vpow2.f32 %v4856_v9  ;;  %v4875_v45 = vadd.f32 %v9604_v48, %v4874_v16  ;;  %s10326_s22 = sld [smem:[#allocation33_spill]] }
 0xbec   : > { %v5541_v3 = vmul.f32 %v5540_v53, %v9341_v5  ;;  %v9611_v54 = vpop.eup %6505  ;;  %v4863_v47 = vadd.f32 %v9607_v11, %v4862_v49  ;;  %6517 = vpow2.f32 %v4858_v10 }
 0xbed   : > { %v9614_v4 = vpop.eup %6507  ;;  %v4876_v50 = vadd.f32 %v9611_v54, %v4875_v45 }
 0xbee   : > { %v9618_v39 = vsub.f32 %v9456_v42, %v5541_v3  ;;  %v9621_v41 = vsub.f32 %v9459_v7, %v5541_v3  ;;  %v9624_v27 = vsub.f32 %v9462_v6, %v5541_v3  ;;  %v9626_v0 = vpop.eup %6509  ;;  %v4864_v15 = vadd.f32 %v9614_v4, %v4863_v47 }
 0xbef   : > { %v9629_v57 = vpop.eup %6511  ;;  %v4877_v23 = vadd.f32 %v9626_v0, %v4876_v50  ;;  %v9633_v30 = vsub.f32 %v9467_v55, %v5541_v3 }
 0xbf0   : > { %v5546_v31 = vmul.f32 %v9618_v39, %v9618_v39  ;;  %v5547_v63 = vmul.f32 %v9621_v41, %v9621_v41  ;;  %v6514_v52 = vpop.eup %6513  ;;  %v4865_v17 = vadd.f32 %v9629_v57, %v4864_v15  ;;  %v5548_v19 = vmul.f32 %v9624_v27, %v9624_v27  ;;  %v5043_v15 = vld [vmem:[%s10269_s10 + $0x38] sm:$0xff] }
 0xbf1   : > { %v6516_v22 = vpop.eup %6515  ;;  %v4878_v60 = vadd.f32 %v6514_v52, %v4877_v23  ;;  %v5549_v61 = vmul.f32 %v9633_v30, %v9633_v30 }
 0xbf2   : > { %v5550_v51 = vadd.f32 %v5547_v63, %v5546_v31  ;;  %v6518_v20 = vpop.eup %6517  ;;  %v4866_v21 = vadd.f32 %v6516_v22, %v4865_v17 }
 0xbf3   : > { %v4879_v43 = vadd.f32 %v6518_v20, %v4878_v60 }
 0xbf4   : > { %v5551_v18 = vadd.f32 %v5550_v51, %v5548_v19  ;;  %v4867_v36 = vrot.slane %v4866_v21, 4 }
 0xbf5   : > { %v4880_v58 = vrot.slane %v4879_v43, 4 }
 0xbf6   : > { %v5552_v29 = vadd.f32 %v5551_v18, %v5549_v61  ;;  %v4868_v2 = vadd.f32 %v4867_v36, %v4866_v21 }
 0xbf7   : > { %v4881_v34 = vadd.f32 %v4880_v58, %v4879_v43 }
 0xbf8   : > { %5553 = vadd.xlane.f32.xlu2 %v5552_v29  ;;  %v4869_v59 = vrot.slane %v4868_v2, 2 }
 0xbf9   : > { %v4882_v25 = vrot.slane %v4881_v34, 2 }
 0xbfa   : > { %v4870_v1 = vadd.f32 %v4869_v59, %v4868_v2 }
 0xbfb   : > { %v4883_v12 = vadd.f32 %v4882_v25, %v4881_v34 }
 0xbfc   : > { %v4871_v8 = vrot.slane %v4870_v1, 1 }
 0xbfd   : > { %v4884_v44 = vrot.slane %v4883_v12, 1 }
 0xbfe   : > { %v4872_v33 = vadd.f32 %v4871_v8, %v4870_v1  ;;  %v5042_v8 = vld [vmem:[%s10269_s10 + $0x30] sm:$0xff] }
 0xbff   : > { %v4885_v9 = vadd.f32 %v4884_v44, %v4883_v12 }
 0xc00   : > { %6519 = vrcp.f32 %v4872_v33  ;;  %v4897_v53 = vand.u32 2147483648, %v4872_v33  ;;  %v4895_v47 = vand.u32 2147483647, %v4872_v33  ;;  %vm4891_vm7 = vweird.f32 %v4872_v33 }
 0xc01   : > { %6521 = vrcp.f32 %v4885_v9  ;;  %v4912_v50 = vand.u32 2147483648, %v4885_v9  ;;  %v4910_v31 = vand.u32 2147483647, %v4885_v9  ;;  %vm4906_vm4 = vweird.f32 %v4885_v9 }
 0xc02   : > { %v4898_v17 = vor.u32 1.1754944e-38, %v4897_v53  ;;  %vm4896_vm13 = vcmp.eq.f32.partialorder %v4895_v47, 8.507059e+37  ;;  %v5628_v53 = vld [vmem:[%s10293_s24 + $0x38] sm:$0xff] }
 0xc03   : > { %v4913_v51 = vor.u32 1.1754944e-38, %v4912_v50  ;;  %vm4911_vm3 = vcmp.eq.f32.partialorder %v4910_v31, 8.507059e+37 }
 0xc06   : > { %v6520_v26 = vpop.eup %6519 }
 0xc07   : > { %v6522_v35 = vpop.eup %6521  ;;  %v4887_v10 = vmul.f32 %v6520_v26, %v4872_v33  ;;  %vm4892_vm5 = vweird.f32 %v6520_v26 }
 0xc08   : > { %v4902_v16 = vmul.f32 %v6522_v35, %v4885_v9  ;;  %vm4907_vm15 = vweird.f32 %v6522_v35  ;;  %vm4893_vm8 = vmor %vm4891_vm7, %vm4892_vm5 }
 0xc09   : > { %v4888_v49 = vsub.f32 1.0, %v4887_v10  ;;  %vm4908_vm9 = vmor %vm4906_vm4, %vm4907_vm15  ;;  %v5624_v10 = vld [vmem:[%s10293_s24 + $0x18] sm:$0xff] }
 0xc0a   : > { %v4903_v45 = vsub.f32 1.0, %v4902_v16  ;;  %v5108_v16 = vld [vmem:[%s10268_s15] sm:$0xff]  ;;  %vm10302_vm5 = vmmov %vm10297_vm0 }
 0xc0b   : > { %v4889_v3 = vmul.f32 %v6520_v26, %v4888_v49  ;;  %v5622_v49 = vld [vmem:[%s10293_s24 + $0x8] sm:$0xff]  ;;  %vm10303_vm15 = vmmov %vm10297_vm0 }
 0xc0c   : > { %v4904_v23 = vmul.f32 %v6522_v35, %v4903_v45  ;;  %v5623_v45 = vld [vmem:[%s10293_s24 + $0x10] sm:$0xff]  ;;  %vm10304_vm7 = vmmov %vm10297_vm0 }
 0xc0d   : > { %v4890_v63 = vadd.f32 %v6520_v26, %v4889_v3  ;;  %v5621_v3 = vld [vmem:[%s10293_s24] sm:$0xff]  ;;  %vm10307_vm4 = vmmov %vm10297_vm0 }
 0xc0e   : > { %v4905_v60 = vadd.f32 %v6522_v35, %v4904_v23 }
 0xc0f   : > { %v4894_v19 = vsel %vm4893_vm8, %v6520_v26, %v4890_v63  ;;  %v5625_v26 = vld [vmem:[%s10293_s24 + $0x20] sm:$0xff]  ;;  %vm10306_vm8 = vmmov %vm10297_vm0 }
 0xc10   : > { %5097 = vperm.xlu2 %6456, %v5043_v15   ;;  %v4899_v21 = vsel %vm4896_vm13, %v4898_v17, %v4894_v19  ;;  %v4909_v61 = vsel %vm4908_vm9, %v6522_v35, %v4905_v60  ;;  %v5036_v35 = vld [vmem:[%s10269_s10] sm:$0xff]  ;;  %v5626_v60 = vld [vmem:[%s10293_s24 + $0x28] sm:$0xff]  ;;  %vm10308_vm13 = vmmov %vm10297_vm0 }
 0xc11   : > { %v4900_v18 = vmul.f32 %v9582_v28, %v4899_v21  ;;  %v4928_v43 = vmul.f32 %v6516_v22, %v4899_v21  ;;  %v4914_v36 = vsel %vm4911_vm3, %v4913_v51, %v4909_v61  ;;  %v4926_v29 = vmul.f32 %v9629_v57, %v4899_v21  ;;  %v5913_v19 = vld [vmem:[%s10294_s3] sm:$0xff]  ;;  %v5584_v51 = vpop.permute.xlu0 %5583  ;;  %vm10309_vm9 = vmmov %vm10297_vm0 }
 0xc12   : > { %v9647_v58 = vmul.f32 %v6518_v20, %v4914_v36  ;;  %v4927_v2 = vmul.f32 %v6514_v52, %v4914_v36  ;;  %v4916_v34 = vmul.f32 %v9588_v40, %v4899_v21  ;;  %v4917_v59 = vmul.f32 %v9590_v38, %v4914_v36  ;;  %vm10310_vm3 = vmmov %vm10297_vm0 }
 0xc13   : > { %4946 = vmatmul.f32.vlgmr.msrb.gmra.mxu0 %v4900_v18  ;;  %4967 = vmatmul.f32.vlgmr.msra.gmra.mxu1 %v4928_v43  ;;  %v4915_v25 = vmul.f32 %v9585_v37, %v4914_v36  ;;  %v4924_v1 = vmul.f32 %v9614_v4, %v4899_v21  ;;  %v4925_v12 = vmul.f32 %v9626_v0, %v4914_v36 }
 0xc14   : > { %v5033_v28 = vadd.f32 %v9647_v58, %v4928_v43  ;;  %v5030_v22 = vadd.f32 %v4927_v2, %v4926_v29  ;;  %v5015_v57 = vadd.f32 %v4917_v59, %v4916_v34  ;;  %v4918_v20 = vmul.f32 %v9594_v32, %v4899_v21 }
 0xc15   : > { %v5027_v52 = vadd.f32 %v4925_v12, %v4924_v1  ;;  %v4920_v40 = vmul.f32 %v9601_v56, %v4899_v21  ;;  %v4921_v38 = vmul.f32 %v9604_v48, %v4914_v36  ;;  %v4919_v44 = vmul.f32 %v9598_v14, %v4914_v36  ;;  %v5111_v56 = vld [vmem:[%s10268_s15 + $0x18] sm:$0xff]  ;;  %v5110_v14 = vld [vmem:[%s10268_s15 + $0x10] sm:$0xff]  ;;  %v5109_v48 = vld [vmem:[%s10268_s15 + $0x8] sm:$0xff] }
 0xc16   : > { %5034 = vadd.xlane.f32.xlu0 %v5033_v28  ;;  %5031 = vadd.xlane.f32.xlu1 %v5030_v22  ;;  %v4922_v37 = vmul.f32 %v9607_v11, %v4899_v21  ;;  %v4923_v4 = vmul.f32 %v9611_v54, %v4914_v36  ;;  %v5012_v0 = vadd.f32 %v4915_v25, %v4900_v18  ;;  %v5627_v11 = vld [vmem:[%s10293_s24 + $0x30] sm:$0xff]  ;;  %v5037_v54 = vld [vmem:[%s10269_s10 + $0x8] sm:$0xff]  ;;  %v5961_v18 = vld [vmem:[%s10295_s6] sm:$0xff] }
 0xc17   : > { %v5021_v33 = vadd.f32 %v4921_v38, %v4920_v40  ;;  %v5018_v32 = vadd.f32 %v4919_v44, %v4918_v20  ;;  %v5914_v21 = vld [vmem:[%s10294_s3 + $0x8] sm:$0xff] }
 0xc18   : > { %5092 = vperm.xlu2 %6456, %v5042_v8   ;;  %v5024_v9 = vadd.f32 %v4923_v4, %v4922_v37 }
 0xc19   : > { %v5600_v61 = vpop.permute.xlu0 %5599 }
 0xc1b   : > { %4949 = vmatmul.f32.gmra.mxu0 %v4916_v34  ;;  %4987 = vmatmul.f32.vlgmr.msrb.gmra.mxu1 %v4915_v25  ;;  %v5589_v34 = vpop.permute.xlu1 %5588 }
 0xc1e   : > { %5028 = vadd.xlane.f32.xlu1 %v5027_v52  ;;  %5016 = vadd.xlane.f32.xlu0 %v5015_v57 }
 0xc20   : > { %5133 = vperm.xlu2 %6456, %v5111_v56  }
 0xc23   : > { %4952 = vmatmul.f32.gmra.mxu0 %v4918_v20  ;;  %4990 = vmatmul.f32.gmra.mxu1 %v4917_v59  ;;  %v5605_v28 = vpop.permute.xlu1 %5604 }
 0xc26   : > { %5022 = vadd.xlane.f32.xlu1 %v5021_v33 }
 0xc28   : > { %5128 = vperm.xlu2 %6456, %v5110_v14  }
 0xc2b   : > { %4955 = vmatmul.f32.gmra.mxu0 %v4920_v40  ;;  %4993 = vmatmul.f32.gmra.mxu1 %v4919_v44  ;;  %v9702_v44 = vpop.permute.xlu1 %5148 }
 0xc32   : > { %5123 = vperm.xlu0 %6454, %v5109_v48  }
 0xc33   : > { %4958 = vmatmul.f32.gmra.mxu0 %v4922_v37  ;;  %4996 = vmatmul.f32.gmra.mxu1 %v4921_v38  ;;  %v9710_v56 = vpop.permute.xlu1 %5072 }
 0xc3a   : > { %5661 = vperm.xlu0 %6454, %v5627_v11  }
 0xc3b   : > { %4961 = vmatmul.f32.gmra.mxu0 %v4924_v1  ;;  %4999 = vmatmul.f32.gmra.mxu1 %v4923_v4 }
 0xc3f   : > { %5067 = vperm.xlu1 %6455, %v5037_v54  }
 0xc42   : > { %5651 = vperm.xlu0 %6454, %v5625_v26  }
 0xc43   : > { %4964 = vmatmul.f32.gmra.mxu0 %v4926_v29  ;;  %5002 = vmatmul.f32.gmra.mxu1 %v4925_v12  ;;  %v9682_v29 = vpop.permute.xlu0 %5153 }
 0xc47   : > { %5062 = vperm.xlu1 %6455, %v5036_v35  }
 0xc4a   : > { %5646 = vperm.xlu0 %6454, %v5624_v10  }
 0xc4b   : > { %5005 = vmatmul.f32.gmra.mxu1 %v4927_v2  ;;  %v9689_v1 = vpop.permute.xlu0 %5087 }
 0xc4f   : > { %5118 = vperm.xlu1 %6455, %v5108_v16  }
 0xc51   : > { %5025 = vadd.xlane.f32.xlu2 %v5024_v9 }
 0xc52   : > { %5636 = vperm.xlu0 %6454, %v5622_v49  }
 0xc53   : > { %5008 = vmatmul.f32.gmra.mxu1 %v9647_v58  ;;  %v5962_v58 = vld [vmem:[%s10295_s6 + $0x8] sm:$0xff]  ;;  %v9695_v8 = vpop.permute.xlu0 %5143 }
 0xc57   : > { %5666 = vperm.xlu1 %6455, %v5628_v53  }
 0xc59   : > { %5019 = vadd.xlane.f32.xlu2 %v5018_v32 }
 0xc5f   : > { %5641 = vperm.xlu1 %6455, %v5623_v45  }
 0xc61   : > { %5013 = vadd.xlane.f32.xlu2 %v5012_v0  ;;  %v9708_v0 = vpop.permute.xlu0 %5082 }
 0xc67   : > { %5631 = vperm.xlu1 %6455, %v5621_v3  }
 0xc69   : > { %v9712_v26 = vpop.permute.xlu0 %5138 }
 0xc6b   : > { %v5554_v47 = vpop.xlane.xlu2 %5553 }
 0xc6c   : > { %v5555_v50 = vrot.slane %v5554_v47, 4 }
 0xc6e   : > { %v5556_v15 = vadd.f32 %v5555_v50, %v5554_v47 }
 0xc70   : > { %v5557_v23 = vrot.slane %v5556_v15, 2 }
 0xc72   : > { %v5558_v31 = vadd.f32 %v5557_v23, %v5556_v15 }
 0xc73   : > { %v9697_v57 = vpop.permute.xlu2 %5097 }
 0xc74   : > { %v5559_v63 = vrot.slane %v5558_v31, 1 }
 0xc76   : > { %v5560_v17 = vadd.f32 %v5559_v63, %v5558_v31 }
 0xc78   : > { %6337 = vpush %v5560_v17 }
 0xc79   : > { %5656 = vperm.xlu2 %6456, %v5626_v60  }
 0xc7b   : > { %v5093_v33 = vpop.permute.xlu2 %5092 }
 0xc81   : > { %5917 = vperm.xlu2 %6456, %v5913_v19  }
 0xc83   : > { %v9714_v35 = vpop.permute.xlu2 %5133 }
 0xc89   : > { %5922 = vperm.xlu2 %6456, %v5914_v21   ;;  %v5032_v49 = vpop.xlane.xlu1 %5031 }
 0xc90   : > { %v9680_v43 = vpop.f32.mrf.mxu1  ;;  %v4947_v36 = vpop.f32.mrf.mxu0 }
 0xc91   : > { %5965 = vperm.xlu2 %6456, %v5961_v18  }
 0xc98   : > { %v4988_v2 = vpop.f32.mrf.mxu1  ;;  %v9687_v25 = vpop.f32.mrf.mxu0 }
 0xc99   : > { %5970 = vperm.xlu2 %6456, %v5962_v58   ;;  %v9685_v59 = vadd.f32 %v4988_v2, %v4947_v36  ;;  %v5078_v36 = vpop.permute.xlu0 %5077  ;;  %v6322_v58 = vld [vmem:[%s10296_s20] sm:$0xff] }
 0xca0   : > { %v9691_v12 = vpop.f32.mrf.mxu1  ;;  %v9693_v22 = vpop.f32.mrf.mxu0 }
 0xca8   : > { %v9699_v20 = vpop.f32.mrf.mxu1  ;;  %v9704_v37 = vpop.f32.mrf.mxu0 }
 0xca9   : > { %s6338_s12 = spop %6337 }
 0xcaa   : > { %v5562_v52 = vstv %s6338_s12  ;;  %s6311_s12 = sshll.u32 %s10325_s21, 5 }
 0xcab   : > { %v5563_v40 = vmul.f32 %v5562_v52, %v9341_v5  ;;  %v6568_v52 = vld [vmem:[%s10273_s17 + $0x30] sm:$0xff] }
 0xcad   : > { %v5564_v38 = vadd.f32 1e-05, %v5563_v40  ;;  %v5050_v40 = vmul.f32 %v6568_v52, %v5032_v49  ;;  %v6575_v52 = vld [vmem:[%s10273_s17] sm:$0xff] }
 0xcaf   : > { %6523 = vrsqrt.f32 %v5564_v38  ;;  %vm5571_vm2 = vweird.f32 %v5564_v38 }
 0xcb0   : > { %v9706_v4 = vpop.f32.mrf.mxu1  ;;  %v4959_v48 = vpop.f32.mrf.mxu0 }
 0xcb5   : > { %v6524_v32 = vpop.eup %6523 }
 0xcb6   : > { %v5566_v9 = vmul.f32 %v6524_v32, %v5564_v38  ;;  %vm5572_vm14 = vweird.f32 %v6524_v32 }
 0xcb7   : > { %vm5573_vm10 = vmor %vm5571_vm2, %vm5572_vm14 }
 0xcb8   : > { %v5567_v14 = vmul.f32 %v6524_v32, %v5566_v9  ;;  %v5000_v11 = vpop.f32.mrf.mxu1  ;;  %v4962_v15 = vpop.f32.mrf.mxu0  ;;  %vm10311_vm14 = vmmov %vm10297_vm0 }
 0xcb9   : > { %v5001_v49 = vadd.f32 %v5000_v11, %v4959_v48  ;;  %vm10312_vm2 = vmmov %vm10297_vm0 }
 0xcba   : > { %v5568_v54 = vmul.f32 0.5, %v5567_v14 }
 0xcbc   : > { %v5569_v5 = vsub.f32 1.5, %v5568_v54 }
 0xcbe   : > { %v5570_v10 = vmul.f32 %v6524_v32, %v5569_v5 }
 0xcc0   : > { %v5574_v16 = vsel %vm5573_vm10, %v6524_v32, %v5570_v10  ;;  %v5003_v50 = vpop.f32.mrf.mxu1  ;;  %v6569_v32 = vld [vmem:[%s10273_s17 + $0x38] sm:$0xff]  ;;  %v6570_v10 = vld [vmem:[%s10273_s17 + $0x28] sm:$0xff]  ;;  %vm10313_vm10 = vmmov %vm10297_vm0 }
 0xcc1   : > { %v5575_v53 = vmul.f32 %v5574_v16, %v9618_v39  ;;  %v5576_v45 = vmul.f32 %v5574_v16, %v9621_v41  ;;  %v5577_v3 = vmul.f32 %v5574_v16, %v9624_v27  ;;  %v5578_v47 = vmul.f32 %v5574_v16, %v9633_v30  ;;  %v9720_v39 = vpop.permute.xlu2 %5128  ;;  %v5029_v30 = vpop.xlane.xlu1 %5028 }
 0xcc2   : > { %v5004_v14 = vadd.f32 %v5003_v50, %v4962_v15  ;;  %v5049_v16 = vmul.f32 %v6570_v10, %v5029_v30  ;;  %v4998_v50 = vadd.f32 %v9706_v4, %v9704_v37 }
 0xcc3   : > { %v5591_v23 = vmul.f32 %v5584_v51, %v5575_v53  ;;  %v5593_v31 = vmul.f32 %v5589_v34, %v5577_v3  ;;  %v5592_v63 = vmul.f32 %v5584_v51, %v5576_v45  ;;  %v5594_v17 = vmul.f32 %v5589_v34, %v5578_v47  ;;  %v4965_v51 = vpop.f32.mrf.mxu0  ;;  %v5035_v34 = vpop.xlane.xlu0 %5034  ;;  %v6571_v47 = vld [vmem:[%s10273_s17 + $0x20] sm:$0xff] }
 0xcc4   : > { %v5051_v9 = vmul.f32 %v6569_v32, %v5035_v34  ;;  %v5057_v3 = vsub.f32 %v5004_v14, %v5049_v16  ;;  %v5172_v16 = vld [vmem:[%s10305_s4] sm:$0xff] }
 0xcc5   : > { %v5607_v60 = vadd.f32 %v5600_v61, %v5591_v23  ;;  %v5609_v19 = vadd.f32 %v5605_v28, %v5593_v31  ;;  %v5608_v21 = vadd.f32 %v5600_v61, %v5592_v63  ;;  %v5610_v18 = vadd.f32 %v5605_v28, %v5594_v17 }
 0xcc6   : > { %v5105_v15 = vmul.f32 %v9689_v1, %v5057_v3 }
 0xcc7   : > { %v5619_v41 = vpack.c.bf16 %v5609_v19, %v5607_v60  ;;  %v5620_v27 = vpack.c.bf16 %v5610_v18, %v5608_v21  ;;  %v6323_v60 = vld [vmem:[%s10296_s20 + $0x8] sm:$0xff] }
 0xcc8   : > { %v5006_v2 = vpop.f32.mrf.mxu1  ;;  %v5161_v37 = vadd.f32 %v9695_v8, %v5105_v15  ;;  %v4992_v8 = vadd.f32 %v9691_v12, %v9687_v25 }
 0xcc9   : > { %5708 = vmatpush.bf16.msra.mxu3 %v5619_v41  ;;  %5737 = vmatpush.bf16.msra.mxu0 %v5620_v27  ;;  %v5007_v61 = vadd.f32 %v5006_v2, %v4965_v51  ;;  %v5026_v28 = vpop.xlane.xlu2 %5025  ;;  %v5023_v45 = vpop.xlane.xlu1 %5022  ;;  %v6572_v41 = vld [vmem:[%s10273_s17 + $0x18] sm:$0xff] }
 0xcca   : > { %v5048_v23 = vmul.f32 %v6571_v47, %v5026_v28  ;;  %v5047_v27 = vmul.f32 %v6572_v41, %v5023_v45  ;;  %v5169_v2 = vmax.f32 %v5161_v37, 0.0  ;;  %v5173_v45 = vld [vmem:[%s10305_s4 + $0x8] sm:$0xff] }
 0xccb   : > { %v5058_v54 = vsub.f32 %v5007_v61, %v5050_v40  ;;  %v5017_v11 = vpop.xlane.xlu0 %5016 }
 0xccc   : > { %6282 = vmatmul.msk.bf16.vlgmr.msra.gmra.mxu3 %vm10297_vm0, %v6322_v58  ;;  %6286 = vmatmul.msk.bf16.vlgmr.msra.gmra.mxu0 %vm10298_vm12, %v6322_v58  ;;  %v5056_v19 = vsub.f32 %v5001_v49, %v5048_v23  ;;  %vm10314_vm12 = vmmov %vm10297_vm0 }
 0xccd   : > { %v5106_v31 = vmul.f32 %v5093_v33, %v5058_v54  ;;  %v6573_v33 = vld [vmem:[%s10273_s17 + $0x10] sm:$0xff] }
 0xcce   : > { %v5104_v4 = vmul.f32 %v9708_v0, %v5056_v19  ;;  %v6574_v0 = vld [vmem:[%s10273_s17 + $0x8] sm:$0xff] }
 0xccf   : > { %v5162_v21 = vadd.f32 %v9702_v44, %v5106_v31  ;;  %v4995_v44 = vadd.f32 %v9699_v20, %v9693_v22  ;;  %v5045_v34 = vmul.f32 %v6574_v0, %v5017_v11 }
 0xcd0   : > { %v5009_v38 = vpop.f32.mrf.mxu1  ;;  %v5160_v30 = vadd.f32 %v9712_v26, %v5104_v4  ;;  %v6324_v26 = vld [vmem:[%s10296_s20 + $0x10] sm:$0xff] }
 0xcd1   : > { %v5010_v5 = vadd.f32 %v5009_v38, %v9680_v43  ;;  %v5020_v43 = vpop.xlane.xlu2 %5019  ;;  %v5170_v1 = vmax.f32 %v5162_v21, 0.0  ;;  %v5053_v38 = vsub.f32 %v4992_v8, %v5045_v34 }
 0xcd2   : > { %v5046_v48 = vmul.f32 %v6573_v33, %v5020_v43  ;;  %v5168_v22 = vmax.f32 %v5160_v30, 0.0 }
 0xcd3   : > { %v5059_v53 = vsub.f32 %v5010_v5, %v5051_v9 }
 0xcd4   : > { %v5054_v51 = vsub.f32 %v4995_v44, %v5046_v48 }
 0xcd5   : > { %v5107_v63 = vmul.f32 %v9697_v57, %v5059_v53  ;;  %v5055_v57 = vsub.f32 %v4998_v50, %v5047_v27  ;;  %v6325_v53 = vld [vmem:[%s10296_s20 + $0x18] sm:$0xff] }
 0xcd6   : > { %v5102_v20 = vmul.f32 %v9710_v56, %v5054_v51  ;;  %v5124_v56 = vpop.permute.xlu0 %5123 }
 0xcd7   : > { %v5163_v17 = vadd.f32 %v9682_v29, %v5107_v63  ;;  %v5068_v29 = vpop.permute.xlu1 %5067  ;;  %v5103_v58 = vmul.f32 %v5078_v36, %v5055_v57 }
 0xcd8   : > { %v5101_v9 = vmul.f32 %v5068_v29, %v5053_v38  ;;  %v5158_v25 = vadd.f32 %v9720_v39, %v5102_v20 }
 0xcd9   : > { %v5171_v18 = vmax.f32 %v5163_v17, 0.0  ;;  %v5014_v61 = vpop.xlane.xlu2 %5013  ;;  %v5159_v28 = vadd.f32 %v9714_v35, %v5103_v58 }
 0xcda   : > { %v5044_v36 = vmul.f32 %v6575_v52, %v5014_v61  ;;  %v5157_v35 = vadd.f32 %v5124_v56, %v5101_v9  ;;  %v5166_v14 = vmax.f32 %v5158_v25, 0.0 }
 0xcdb   : > { %6250 = vmatpush.xpose.msk.msrb.mxu2 %vm10299_vm6, %v5171_v18  ;;  %v5167_v32 = vmax.f32 %v5159_v28, 0.0  ;;  %vm10315_vm6 = vcmask 523264  }
 0xcdc   : > { %6283 = vmatmul.msk.bf16.gmra.mxu3 %vm10300_vm1, %v6323_v60  ;;  %6287 = vmatmul.msk.bf16.gmra.mxu0 %vm10301_vm11, %v6323_v60  ;;  %v5052_v12 = vsub.f32 %v9685_v59, %v5044_v36  ;;  %v5165_v10 = vmax.f32 %v5157_v35, 0.0  ;;  %vm10316_vm1 = vmmov %vm10315_vm6 }
 0xcdd   : > { %vm10320_vm11 = vmmov %vm10316_vm1 }
 0xcde   : > { %v5662_v23 = vpop.permute.xlu0 %5661 }
 0xcdf   : > { %6251 = vmatpush.xpose.msk.msrb.mxu2 %vm10302_vm5, %v5170_v1  ;;  %v5063_v40 = vpop.permute.xlu1 %5062  ;;  %vm10321_vm5 = vmmov %vm10316_vm1 }
 0xce0   : > { %v5100_v54 = vmul.f32 %v5063_v40, %v5052_v12 }
 0xce1   : > { %v5657_v48 = vpop.permute.xlu2 %5656 }
 0xce3   : > { %6252 = vmatpush.xpose.msk.msrb.mxu2 %vm10303_vm15, %v5169_v2 }
 0xce6   : > { %v5652_v60 = vpop.permute.xlu0 %5651 }
 0xce7   : > { %6253 = vmatpush.xpose.msk.msrb.mxu2 %vm10304_vm7, %v5168_v22  ;;  %v5119_v5 = vpop.permute.xlu1 %5118 }
 0xce8   : > { %v5156_v39 = vadd.f32 %v5119_v5, %v5100_v54 }
 0xcea   : > { %v5164_v59 = vmax.f32 %v5156_v39, 0.0 }
 0xceb   : > { %6254 = vmatpush.xpose.msk.msrb.mxu2 %vm10306_vm8, %v5167_v32 }
 0xcec   : > { %6284 = vmatmul.msk.bf16.gmra.mxu3 %vm10307_vm4, %v6324_v26  ;;  %6288 = vmatmul.msk.bf16.gmra.mxu0 %vm10308_vm13, %v6324_v26 }
 0xcee   : > { %v5647_v19 = vpop.permute.xlu0 %5646 }
 0xcef   : > { %6255 = vmatpush.xpose.msk.msrb.mxu2 %vm10309_vm9, %v5166_v14  ;;  %v9772_v63 = vpop.permute.xlu1 %5666 }
 0xcf3   : > { %6256 = vmatpush.xpose.msk.msrb.mxu2 %vm10310_vm3, %v5165_v10 }
 0xcf6   : > { %v5637_v57 = vpop.permute.xlu0 %5636 }
 0xcf7   : > { %6257 = vmatpush.xpose.msk.msrb.mxu2 %vm10311_vm14, %v5164_v59  ;;  %v5642_v43 = vpop.permute.xlu1 %5641 }
 0xcfa   : > { %6258 = vmatmul.msk.f32.vlgmr.msrb.gmra.mxu2 %vm10312_vm2, %v5172_v16 }
 0xcfc   : > { %6285 = vmatmul.msk.bf16.gmra.mxu3 %vm10313_vm10, %v6325_v53  ;;  %6289 = vmatmul.msk.bf16.gmra.mxu0 %vm10297_vm0, %v6325_v53  ;;  %vm10323_vm10 = vmmov %vm10297_vm0 }
 0xcff   : > { %v5632_v18 = vpop.permute.xlu1 %5631 }
 0xd02   : > { %6259 = vmatmul.msk.f32.gmra.mxu2 %vm10314_vm12, %v5173_v45  ;;  %vm10327_vm12 = vmmov %vm10297_vm0 }
 0xd49   : > { %v5739_v3 = vpop.f32.mrf.mxu0 }
 0xd4a   : > { %v9774_v27 = vadd.f32 %v5739_v3, %v5632_v18 }
 0xd4c   : > { %v5776_v29 = vmul.f32 0.044715, %v9774_v27 }
 0xd4e   : > { %v5792_v33 = vmul.f32 %v5776_v29, %v9774_v27 }
 0xd4f   : > { %v5710_v47 = vpop.f32.mrf.mxu3 }
 0xd50   : > { %v9785_v2 = vadd.f32 %v5710_v47, %v5632_v18  ;;  %v5808_v61 = vmul.f32 %v5792_v33, %v9774_v27 }
 0xd51   : > { %v5741_v31 = vpop.f32.mrf.mxu0 }
 0xd52   : > { %v9777_v4 = vadd.f32 %v5741_v31, %v5637_v57  ;;  %v5775_v22 = vmul.f32 0.044715, %v9785_v2  ;;  %v5824_v26 = vadd.f32 %v5808_v61, %v9774_v27 }
 0xd54   : > { %v5778_v44 = vmul.f32 0.044715, %v9777_v4  ;;  %v9812_v14 = vmul.f32 %v5775_v22, %v9785_v2  ;;  %v5840_v3 = vmul.f32 0.7978846, %v5824_v26 }
 0xd56   : > { %v5794_v8 = vmul.f32 %v5778_v44, %v9777_v4  ;;  %6525 = vtanh.f32 %v5840_v3 }
 0xd57   : > { %v5712_v49 = vpop.f32.mrf.mxu3 }
 0xd58   : > { %v5810_v9 = vmul.f32 %v5794_v8, %v9777_v4  ;;  %v9821_v47 = vadd.f32 %v5712_v49, %v5637_v57 }
 0xd59   : > { %v5744_v17 = vpop.f32.mrf.mxu0 }
 0xd5a   : > { %v9781_v11 = vadd.f32 %v5744_v17, %v5642_v43 }
 0xd5c   : > { %v5780_v0 = vmul.f32 0.044715, %v9781_v11 }
 0xd5e   : > { %v5796_v32 = vmul.f32 %v5780_v0, %v9781_v11 }
 0xd5f   : > { %v5715_v50 = vpop.f32.mrf.mxu3 }
 0xd60   : > { %v9814_v54 = vadd.f32 %v5715_v50, %v5642_v43  ;;  %v5812_v17 = vmul.f32 %v5796_v32, %v9781_v11 }
 0xd61   : > { %v5746_v15 = vpop.f32.mrf.mxu0 }
 0xd62   : > { %v9792_v34 = vadd.f32 %v5746_v15, %v5647_v19 }
 0xd64   : > { %v5782_v25 = vmul.f32 0.044715, %v9792_v34 }
 0xd66   : > { %v5798_v50 = vmul.f32 %v5782_v25, %v9792_v34 }
 0xd67   : > { %v5717_v21 = vpop.f32.mrf.mxu3 }
 0xd68   : > { %v9807_v12 = vadd.f32 %v5717_v21, %v5647_v19  ;;  %v5779_v21 = vmul.f32 0.044715, %v9814_v54  ;;  %v5814_v0 = vmul.f32 %v5798_v50, %v9792_v34 }
 0xd69   : > { %v5749_v41 = vpop.f32.mrf.mxu0 }
 0xd6a   : > { %v9787_v30 = vadd.f32 %v5749_v41, %v5652_v60  ;;  %v5781_v43 = vmul.f32 0.044715, %v9807_v12  ;;  %v5830_v3 = vadd.f32 %v5814_v0, %v9792_v34 }
 0xd6c   : > { %v5784_v20 = vmul.f32 0.044715, %v9787_v30 }
 0xd6e   : > { %v5800_v5 = vmul.f32 %v5784_v20, %v9787_v30 }
 0xd6f   : > { %v5720_v37 = vpop.f32.mrf.mxu3 }
 0xd70   : > { %v9799_v40 = vadd.f32 %v5720_v37, %v5652_v60  ;;  %v5826_v60 = vadd.f32 %v5810_v9, %v9777_v4  ;;  %v5816_v41 = vmul.f32 %v5800_v5, %v9787_v30 }
 0xd71   : > { %v5751_v1 = vpop.f32.mrf.mxu0 }
 0xd72   : > { %v9783_v58 = vadd.f32 %v5751_v1, %v5657_v48  ;;  %v5783_v59 = vmul.f32 0.044715, %v9799_v40  ;;  %v5777_v1 = vmul.f32 0.044715, %v9821_v47  ;;  %v5842_v44 = vmul.f32 0.7978846, %v5826_v60 }
 0xd74   : > { %v5786_v28 = vmul.f32 0.044715, %v9783_v58  ;;  %v5799_v57 = vmul.f32 %v5783_v59, %v9799_v40  ;;  %v5793_v5 = vmul.f32 %v5777_v1, %v9821_v47  ;;  %6527 = vtanh.f32 %v5842_v44 }
 0xd75   : > { %v5807_v44 = vmul.f32 %v9812_v14, %v9785_v2 }
 0xd76   : > { %v5802_v56 = vmul.f32 %v5786_v28, %v9783_v58  ;;  %v5795_v28 = vmul.f32 %v5779_v21, %v9814_v54 }
 0xd77   : > { %v5722_v51 = vpop.f32.mrf.mxu3 }
 0xd78   : > { %v9797_v52 = vadd.f32 %v5722_v51, %v5657_v48  ;;  %v5818_v19 = vmul.f32 %v5802_v56, %v9783_v58  ;;  %v5828_v48 = vadd.f32 %v5812_v17, %v9781_v11  ;;  %v5797_v51 = vmul.f32 %v5781_v43, %v9807_v12 }
 0xd79   : > { %v5754_v36 = vpop.f32.mrf.mxu0 }
 0xd7a   : > { %v9801_v38 = vadd.f32 %v5754_v36, %v5662_v23  ;;  %v5785_v10 = vmul.f32 0.044715, %v9797_v52  ;;  %v5834_v8 = vadd.f32 %v5818_v19, %v9783_v58  ;;  %v5832_v36 = vadd.f32 %v5816_v41, %v9787_v30 }
 0xd7b   : > { %v5844_v59 = vmul.f32 0.7978846, %v5828_v48  ;;  %v5813_v17 = vmul.f32 %v5797_v51, %v9807_v12  ;;  %v5811_v19 = vmul.f32 %v5795_v28, %v9814_v54  ;;  %v5846_v41 = vmul.f32 0.7978846, %v5830_v3 }
 0xd7c   : > { %v5788_v35 = vmul.f32 0.044715, %v9801_v38  ;;  %v5801_v49 = vmul.f32 %v5785_v10, %v9797_v52  ;;  %v5848_v50 = vmul.f32 0.7978846, %v5832_v36 }
 0xd7d   : > { %v5221_v39 = vpop.f32.mrf.mxu2  ;;  %v5827_v48 = vadd.f32 %v5811_v19, %v9814_v54  ;;  %v6062_v19 = vld [vmem:[%s10317_s23 + $0x8] sm:$0xff] }
 0xd7e   : > { %v5804_v16 = vmul.f32 %v5788_v35, %v9801_v38  ;;  %v5227_v53 = vsel %vm10315_vm6, %v5221_v39, 0.0  ;;  %v5817_v26 = vmul.f32 %v5801_v49, %v9797_v52  ;;  %v5815_v35 = vmul.f32 %v5799_v57, %v9799_v40  ;;  %vm10328_vm6 = vmmov %vm10297_vm0 }
 0xd7f   : > { %v5725_v45 = vpop.f32.mrf.mxu3  ;;  %5228 = vadd.xlane.f32.xlu1 %v5227_v53  ;;  %v5829_v57 = vadd.f32 %v5813_v17, %v9807_v12 }
 0xd80   : > { %v9823_v31 = vadd.f32 %v5725_v45, %v5662_v23  ;;  %v5820_v15 = vmul.f32 %v5804_v16, %v9801_v38  ;;  %v9859_v16 = vpop.eup %6525  ;;  %v5850_v45 = vmul.f32 0.7978846, %v5834_v8  ;;  %v5833_v43 = vadd.f32 %v5817_v26, %v9797_v52 }
 0xd81   : > { %v5756_v23 = vpop.f32.mrf.mxu0  ;;  %v6528_v51 = vpop.eup %6527  ;;  %v5845_v0 = vmul.f32 0.7978846, %v5829_v57  ;;  %v5843_v26 = vmul.f32 0.7978846, %v5827_v48  ;;  %v5766_v48 = vmul.f32 0.5, %v9792_v34 }
 0xd82   : > { %v5787_v18 = vmul.f32 0.044715, %v9823_v31  ;;  %v5836_v29 = vadd.f32 %v5820_v15, %v9801_v38  ;;  %v9838_v37 = vadd.f32 %v5756_v23, %v9772_v63  ;;  %v5849_v1 = vmul.f32 0.7978846, %v5833_v43 }
 0xd83   : > { %v5770_v43 = vmul.f32 0.5, %v9783_v58  ;;  %v5771_v57 = vmul.f32 0.5, %v9823_v31 }
 0xd84   : > { %v5803_v33 = vmul.f32 %v5787_v18, %v9823_v31  ;;  %v5790_v61 = vmul.f32 0.044715, %v9838_v37  ;;  %v5852_v32 = vmul.f32 0.7978846, %v5836_v29  ;;  %v5809_v18 = vmul.f32 %v5793_v5, %v9821_v47 }
 0xd85   : > { %v5224_v20 = vpop.f32.mrf.mxu2  ;;  %v5772_v5 = vmul.f32 0.5, %v9801_v38  ;;  %v5768_v38 = vmul.f32 0.5, %v9787_v30  ;;  %v5769_v30 = vmul.f32 0.5, %v9797_v52 }
 0xd86   : > { %v5819_v22 = vmul.f32 %v5803_v33, %v9823_v31  ;;  %v5806_v9 = vmul.f32 %v5790_v61, %v9838_v37  ;;  %v5230_v25 = vsel %vm10316_vm1, %v5224_v20, 0.0  ;;  %6529 = vtanh.f32 %v5852_v32 }
 0xd87   : > { %v5727_v56 = vpop.f32.mrf.mxu3  ;;  %5231 = vadd.xlane.f32.xlu0 %v5230_v25  ;;  %6531 = vtanh.f32 %v5844_v59  ;;  %v5825_v28 = vadd.f32 %v5809_v18, %v9821_v47  ;;  %v5823_v32 = vadd.f32 %v5807_v44, %v9785_v2 }
 0xd88   : > { %v5835_v10 = vadd.f32 %v5819_v22, %v9823_v31  ;;  %v9857_v39 = vadd.f32 %v5727_v56, %v9772_v63  ;;  %v5822_v53 = vmul.f32 %v5806_v9, %v9838_v37  ;;  %v5831_v63 = vadd.f32 %v5815_v35, %v9799_v40 }
 0xd89   : > { %6533 = vtanh.f32 %v5850_v45  ;;  %v5841_v56 = vmul.f32 0.7978846, %v5825_v28  ;;  %v5839_v3 = vmul.f32 0.7978846, %v5823_v32  ;;  %v5764_v31 = vmul.f32 0.5, %v9781_v11 }
 0xd8a   : > { %v5789_v60 = vmul.f32 0.044715, %v9857_v39  ;;  %v5838_v15 = vadd.f32 %v5822_v53, %v9838_v37  ;;  %v5851_v21 = vmul.f32 0.7978846, %v5835_v10  ;;  %6535 = vtanh.f32 %v5848_v50 }
 0xd8b   : > { %v5847_v33 = vmul.f32 0.7978846, %v5831_v63  ;;  %v5774_v10 = vmul.f32 0.5, %v9838_v37 }
 0xd8c   : > { %v5805_v49 = vmul.f32 %v5789_v60, %v9857_v39  ;;  %v5854_v23 = vmul.f32 0.7978846, %v5838_v15  ;;  %v6530_v8 = vpop.eup %6529 }
 0xd8d   : > { %v6532_v22 = vpop.eup %6531  ;;  %v5884_v25 = vadd.f32 1.0, %v6530_v8 }
 0xd8e   : > { %v5821_v29 = vmul.f32 %v5805_v49, %v9857_v39  ;;  %6537 = vtanh.f32 %v5854_v23  ;;  %v5876_v44 = vadd.f32 1.0, %v6532_v22  ;;  %v5762_v22 = vmul.f32 0.5, %v9777_v4 }
 0xd8f   : > { %6539 = vtanh.f32 %v5851_v21  ;;  %v6534_v36 = vpop.eup %6533  ;;  %v5900_v60 = vmul.f32 %v5884_v25, %v5772_v5 }
 0xd90   : > { %v5837_v61 = vadd.f32 %v5821_v29, %v9857_v39  ;;  %6541 = vtanh.f32 %v5846_v41  ;;  %v6536_v9 = vpop.eup %6535  ;;  %v5882_v53 = vadd.f32 1.0, %v6534_v36  ;;  %v5773_v29 = vmul.f32 0.5, %v9857_v39 }
 0xd91   : > { %6543 = vtanh.f32 %v5849_v1  ;;  %v5880_v15 = vadd.f32 1.0, %v6536_v9  ;;  %v5874_v39 = vadd.f32 1.0, %v6528_v51  ;;  %v5767_v9 = vmul.f32 0.5, %v9799_v40 }
 0xd92   : > { %v5853_v20 = vmul.f32 0.7978846, %v5837_v61  ;;  %6545 = vtanh.f32 %v5847_v33  ;;  %v5898_v37 = vmul.f32 %v5882_v53, %v5770_v43  ;;  %v5892_v34 = vmul.f32 %v5876_v44, %v5764_v31  ;;  %v6326_v43 = vld [vmem:[%s10318_s28] sm:$0xff]  ;;  %s1070_s28 = scalar_lea.vmem %s10326_s22, %s6311_s12 }
 0xd93   : > { %v5896_v58 = vmul.f32 %v5880_v15, %v5768_v38  ;;  %v5763_v53 = vmul.f32 0.5, %v9814_v54  ;;  %v5759_v15 = vmul.f32 0.5, %v9785_v2 }
 0xd94   : > { %6547 = vtanh.f32 %v5853_v20  ;;  %v6538_v14 = vpop.eup %6537 }
 0xd95   : > { %6549 = vtanh.f32 %v5845_v0  ;;  %v6540_v35 = vpop.eup %6539  ;;  %v5886_v59 = vadd.f32 1.0, %v6538_v14  ;;  %v5910_v20 = vpack.c.bf16 %v5898_v37, %v5896_v58  ;;  %v5242_v37 = vld [vmem:[%s10319_s11] sm:$0xff] }
 0xd96   : > { %v6542_v45 = vpop.eup %6541  ;;  %6551 = vtanh.f32 %v5843_v26  ;;  %v5883_v21 = vadd.f32 1.0, %v6540_v35  ;;  %v5765_v35 = vmul.f32 0.5, %v9807_v12 }
 0xd97   : > { %v6544_v17 = vpop.eup %6543  ;;  %v5902_v50 = vmul.f32 %v5886_v59, %v5774_v10  ;;  %6553 = vtanh.f32 %v5841_v56  ;;  %v5878_v23 = vadd.f32 1.0, %v6542_v45  ;;  %v5872_v56 = vadd.f32 1.0, %v9859_v16 }
 0xd98   : > { %v6546_v63 = vpop.eup %6545  ;;  %v5881_v33 = vadd.f32 1.0, %v6544_v17  ;;  %6555 = vtanh.f32 %v5839_v3  ;;  %v5899_v8 = vmul.f32 %v5883_v21, %v5771_v57  ;;  %v5760_v10 = vmul.f32 0.5, %v9774_v27 }
 0xd99   : > { %v5912_v18 = vpack.c.bf16 %v5902_v50, %v5900_v60  ;;  %v5879_v28 = vadd.f32 1.0, %v6546_v63  ;;  %v5894_v36 = vmul.f32 %v5878_v23, %v5766_v48  ;;  %v5890_v59 = vmul.f32 %v5874_v39, %v5762_v22 }
 0xd9a   : > { %v6548_v49 = vpop.eup %6547  ;;  %v5897_v25 = vmul.f32 %v5881_v33, %v5769_v30  ;;  %v5888_v4 = vmul.f32 %v5872_v56, %v5760_v10  ;;  %v5761_v17 = vmul.f32 0.5, %v9821_v47  ;;  %v6061_v10 = vld [vmem:[%s10317_s23] sm:$0xff] }
 0xd9b   : > { %v6550_v41 = vpop.eup %6549  ;;  %v5885_v1 = vadd.f32 1.0, %v6548_v49  ;;  %6070 = vperm.xlu0 %6454, %v6062_v19   ;;  %5951 = vmatpush.bf16.msra.mxu2 %v5912_v18  ;;  %v5895_v52 = vmul.f32 %v5879_v28, %v5767_v9  ;;  %v5908_v51 = vpack.c.bf16 %v5894_v36, %v5892_v34  ;;  %v6690_v19 = vmov 64.0  }
 0xd9c   : > { %v6552_v61 = vpop.eup %6551  ;;  %v5877_v14 = vadd.f32 1.0, %v6550_v41  ;;  %v5906_v12 = vpack.c.bf16 %v5890_v59, %v5888_v4  ;;  %6557 = vrcp.f32 %v6690_v19 }
 0xd9d   : > { %v5901_v0 = vmul.f32 %v5885_v1, %v5773_v29  ;;  %v6554_v26 = vpop.eup %6553  ;;  %v5875_v5 = vadd.f32 1.0, %v6552_v61  ;;  %v5909_v40 = vpack.c.bf16 %v5897_v25, %v5895_v52  ;;  %v5243_v1 = vld [vmem:[%s10319_s11 + $0x8] sm:$0xff] }
 0xd9e   : > { %v6556_v11 = vpop.eup %6555  ;;  %v5893_v45 = vmul.f32 %v5877_v14, %v5765_v35  ;;  %v5873_v3 = vadd.f32 1.0, %v6554_v26 }
 0xd9f   : > { %v5911_v32 = vpack.c.bf16 %v5901_v0, %v5899_v8  ;;  %5952 = vmatpush.bf16.msra.mxu2 %v5910_v20  ;;  %v5891_v16 = vmul.f32 %v5875_v5, %v5763_v53  ;;  %v5871_v60 = vadd.f32 1.0, %v6556_v11 }
 0xda0   : > { %v5889_v63 = vmul.f32 %v5873_v3, %v5761_v17 }
 0xda1   : > { %5937 = vmatpush.bf16.msra.mxu1 %v5911_v32  ;;  %v5907_v50 = vpack.c.bf16 %v5893_v45, %v5891_v16  ;;  %v5887_v27 = vmul.f32 %v5871_v60, %v5759_v15 }
 0xda2   : > { %v6558_v47 = vpop.eup %6557 }
 0xda3   : > { %5953 = vmatpush.bf16.msra.mxu2 %v5908_v51  ;;  %v5905_v54 = vpack.c.bf16 %v5889_v63, %v5887_v27  ;;  %v5234_v21 = vmul.f32 64.0, %v6558_v47  ;;  %vm5238_vm15 = vweird.f32 %v6558_v47  ;;  %v5918_v51 = vpop.permute.xlu2 %5917 }
 0xda5   : > { %5938 = vmatpush.bf16.msra.mxu1 %v5909_v40  ;;  %v5235_v49 = vsub.f32 1.0, %v5234_v21 }
 0xda7   : > { %5954 = vmatpush.bf16.msra.mxu2 %v5906_v12  ;;  %v5236_v18 = vmul.f32 %v6558_v47, %v5235_v49 }
 0xda9   : > { %5939 = vmatpush.bf16.msra.mxu1 %v5907_v50  ;;  %v5237_v38 = vadd.f32 %v6558_v47, %v5236_v18 }
 0xdaa   : > { %6295 = vmatmul.msk.bf16.vlgmr.msra.gmra.mxu2 %vm10320_vm11, %v6326_v43 }
 0xdab   : > { %v5239_v2 = vsel %vm5238_vm15, %v6558_v47, %v5237_v38  ;;  %v5923_v45 = vpop.permute.xlu2 %5922 }
 0xdad   : > { %5940 = vmatpush.bf16.msra.mxu1 %v5905_v54 }
 0xdb0   : > { %6294 = vmatmul.msk.bf16.vlgmr.msra.gmra.mxu1 %vm10321_vm5, %v6326_v43 }
 0xdb3   : > { %v5966_v3 = vpop.permute.xlu2 %5965 }
 0xdbb   : > { %v5971_v63 = vpop.permute.xlu2 %5970 }
 0xdf2   : > { %v5229_v23 = vpop.xlane.xlu1 %5228 }
 0xdf3   : > { %v5240_v41 = vmul.f32 %v5239_v2, %v5229_v23  ;;  %v6328_v23 = vld [vmem:[%s10322_s1] sm:$0xff] }
 0xdf5   : > { %v5244_v57 = vadd.f32 %v5242_v37, %v5240_v41 }
 0xdf7   : > { %v6260_v29 = vmul.f32 -1.442695, %v5244_v57 }
 0xdf9   : > { %6559 = vpow2.f32 %v6260_v29 }
 0xdfa   : > { %v5232_v33 = vpop.xlane.xlu0 %5231 }
 0xdfb   : > { %v5241_v58 = vmul.f32 %v5239_v2, %v5232_v33 }
 0xdfd   : > { %v5245_v48 = vadd.f32 %v5243_v1, %v5241_v58 }
 0xdff   : > { %v6560_v44 = vpop.eup %6559  ;;  %v6261_v61 = vmul.f32 -1.442695, %v5245_v48 }
 0xe00   : > { %v5252_v8 = vadd.f32 1.0, %v6560_v44 }
 0xe01   : > { %6561 = vpow2.f32 %v6261_v61 }
 0xe02   : > { %6563 = vrcp.f32 %v5252_v8  ;;  %v5265_v36 = vand.u32 2147483648, %v5252_v8  ;;  %v5263_v26 = vand.u32 2147483647, %v5252_v8  ;;  %vm5259_vm8 = vweird.f32 %v5252_v8 }
 0xe04   : > { %v5266_v25 = vor.u32 1.1754944e-38, %v5265_v36  ;;  %vm5264_vm13 = vcmp.eq.f32.partialorder %v5263_v26, 8.507059e+37 }
 0xe07   : > { %v6562_v0 = vpop.eup %6561 }
 0xe08   : > { %v6564_v30 = vpop.eup %6563  ;;  %v5253_v28 = vadd.f32 1.0, %v6562_v0 }
 0xe09   : > { %v5255_v20 = vmul.f32 %v6564_v30, %v5252_v8  ;;  %vm5260_vm7 = vweird.f32 %v6564_v30 }
 0xe0a   : > { %6565 = vrcp.f32 %v5253_v28  ;;  %vm5261_vm4 = vmor %vm5259_vm8, %vm5260_vm7  ;;  %v5280_v52 = vand.u32 2147483648, %v5253_v28  ;;  %v5278_v5 = vand.u32 2147483647, %v5253_v28  ;;  %vm5274_vm3 = vweird.f32 %v5253_v28 }
 0xe0b   : > { %v5256_v31 = vsub.f32 1.0, %v5255_v20 }
 0xe0c   : > { %v5281_v59 = vor.u32 1.1754944e-38, %v5280_v52  ;;  %vm5279_vm2 = vcmp.eq.f32.partialorder %v5278_v5, 8.507059e+37 }
 0xe0d   : > { %v5257_v39 = vmul.f32 %v6564_v30, %v5256_v31 }
 0xe0f   : > { %v5258_v32 = vadd.f32 %v6564_v30, %v5257_v39 }
 0xe10   : > { %v6566_v9 = vpop.eup %6565 }
 0xe11   : > { %v5262_v14 = vsel %vm5261_vm4, %v6564_v30, %v5258_v32  ;;  %v5270_v34 = vmul.f32 %v6566_v9, %v5253_v28  ;;  %vm5275_vm9 = vweird.f32 %v6566_v9  ;;  %v6327_v28 = vld [vmem:[%s10324_s9] sm:$0xff] }
 0xe12   : > { %v5267_v22 = vsel %vm5264_vm13, %v5266_v25, %v5262_v14  ;;  %vm5276_vm14 = vmor %vm5274_vm3, %vm5275_vm9 }
 0xe13   : > { %5286 = vperm.xlu2 %6456, %v5267_v22   ;;  %v5271_v56 = vsub.f32 1.0, %v5270_v34  ;;  %v6071_v34 = vpop.permute.xlu0 %6070 }
 0xe15   : > { %v5272_v35 = vmul.f32 %v6566_v9, %v5271_v56 }
 0xe17   : > { %v5273_v11 = vadd.f32 %v6566_v9, %v5272_v35 }
 0xe19   : > { %v5277_v40 = vsel %vm5276_vm14, %v6566_v9, %v5273_v11 }
 0xe1a   : > { %v5282_v53 = vsel %vm5279_vm2, %v5281_v59, %v5277_v40 }
 0xe1b   : > { %6065 = vperm.xlu2 %6456, %v6061_v10   ;;  %5291 = vperm.xlu1 %6455, %v5282_v53  }
 0xe2d   : > { %v5942_v4 = vpop.f32.mrf.mxu1  ;;  %v5956_v16 = vpop.f32.mrf.mxu2 }
 0xe2e   : > { %v5943_v17 = vadd.f32 %v5942_v4, %v5918_v51  ;;  %v5957_v60 = vadd.f32 %v5956_v16, %v5918_v51 }
 0xe30   : > { %v5973_v50 = vmul.f32 %v5966_v3, %v5943_v17  ;;  %v5974_v27 = vmul.f32 %v5966_v3, %v5957_v60 }
 0xe32   : > { %v5977_v21 = vadd.f32 %v5973_v50, %v9456_v42  ;;  %v5978_v18 = vadd.f32 %v5974_v27, %v9459_v7 }
 0xe35   : > { %v5944_v12 = vpop.f32.mrf.mxu1  ;;  %v5958_v15 = vpop.f32.mrf.mxu2 }
 0xe36   : > { %v5945_v43 = vadd.f32 %v5944_v12, %v5923_v45  ;;  %v5959_v54 = vadd.f32 %v5958_v15, %v5923_v45 }
 0xe38   : > { %v5975_v19 = vmul.f32 %v5971_v63, %v5945_v43  ;;  %v5976_v47 = vmul.f32 %v5971_v63, %v5959_v54 }
 0xe3a   : > { %v5979_v49 = vadd.f32 %v5975_v19, %v9462_v6  ;;  %v5980_v38 = vadd.f32 %v5976_v47, %v9467_v55 }
 0xe3c   : > { %v5987_v2 = vpack.c.bf16 %v5979_v49, %v5977_v21  ;;  %v5988_v37 = vpack.c.bf16 %v5980_v38, %v5978_v18 }
 0xe3e   : > { %6004 = vmatpush.bf16.msrb.mxu1 %v5987_v2  ;;  %6018 = vmatpush.bf16.msrb.mxu2 %v5988_v37 }
 0xe41   : > { %6300 = vmatmul.msk.bf16.vlgmr.msrb.gmra.mxu1 %vm10323_vm10, %v6328_v23  ;;  %6301 = vmatmul.msk.bf16.vlgmr.msrb.gmra.mxu2 %vm10297_vm0, %v6328_v23 }
 0xe6d   : > { %v5287_v41 = vpop.permute.xlu2 %5286 }
 0xe6e   : > { %v5294_v57 = vmul.f32 %v5287_v41, %v9365_v46  ;;  %v5295_v42 = vmul.f32 %v5287_v41, %v9375_v62 }
 0xe70   : > { %v5298_v7 = vadd.f32 %v5294_v57, %v9365_v46  ;;  %v5299_v55 = vadd.f32 %v5295_v42, %v9375_v62 }
 0xe72   : > { %v5302_v48 = vmax.f32 %v5298_v7, 0.0  ;;  %v5303_v44 = vmax.f32 %v5299_v55, 0.0 }
 0xe75   : > { %v6066_v36 = vpop.permute.xlu2 %6065 }
 0xe8d   : > { %v5292_v6 = vpop.permute.xlu1 %5291 }
 0xe8e   : > { %v5296_v29 = vmul.f32 %v5292_v6, %v9367_v24  ;;  %v5297_v1 = vmul.f32 %v5292_v6, %v9377_v13 }
 0xe90   : > { %v5300_v33 = vadd.f32 %v5296_v29, %v9367_v24  ;;  %v5301_v58 = vadd.f32 %v5297_v1, %v9377_v13 }
 0xe92   : > { %v5304_v61 = vmax.f32 %v5300_v33, 0.0  ;;  %v5305_v8 = vmax.f32 %v5301_v58, 0.0 }
 0xe94   : > { %v5983_v0 = vpack.c.bf16 %v5304_v61, %v5302_v48  ;;  %v5984_v30 = vpack.c.bf16 %v5305_v8, %v5303_v44 }
 0xe96   : > { %6040 = vmatpush.bf16.msra.mxu1 %v5983_v0  ;;  %6054 = vmatpush.bf16.msra.mxu2 %v5984_v30 }
 0xe99   : > { %6306 = vmatmul.msk.bf16.vlgmr.msra.gmra.mxu1 %vm10327_vm12, %v6327_v28  ;;  %6307 = vmatmul.msk.bf16.vlgmr.msra.gmra.mxu2 %vm10328_vm6, %v6327_v28 }
 0xebe   : > { %v6006_v46 = vpop.f32.mrf.mxu1 }
 0xec4   : > { %v6020_v62 = vpop.f32.mrf.mxu2 }
 0xec6   : > { %v6008_v24 = vpop.f32.mrf.mxu1 }
 0xecc   : > { %v6022_v20 = vpop.f32.mrf.mxu2 }
 0xf16   : > { %v6042_v13 = vpop.f32.mrf.mxu1 }
 0xf17   : > { %v6043_v31 = vadd.f32 %v6042_v13, %v6006_v46 }
 0xf19   : > { %v6073_v39 = vadd.f32 %v6066_v36, %v6043_v31 }
 0xf1b   : > { %6077 = vst [vmem:[%s1070_s28] sm:$0xff] %v6073_v39 }
 0xf1c   : > { %v6056_v26 = vpop.f32.mrf.mxu2 }
 0xf1d   : > { %v6057_v32 = vadd.f32 %v6056_v26, %v6020_v62 }
 0xf1e   : > { %v6044_v9 = vpop.f32.mrf.mxu1 }
 0xf1f   : > { %v6074_v25 = vadd.f32 %v6066_v36, %v6057_v32  ;;  %v6045_v14 = vadd.f32 %v6044_v9, %v6008_v24 }
 0xf21   : > { %6078 = vst [vmem:[%s1070_s28 + $0x8] sm:$0xff] %v6074_v25  ;;  %v6075_v22 = vadd.f32 %v6071_v34, %v6045_v14 }
 0xf23   : > { %6079 = vst [vmem:[%s1070_s28 + $0x10] sm:$0xff] %v6075_v22 }
 0xf24   : > { %v6058_v56 = vpop.f32.mrf.mxu2 }
 0xf25   : > { %v6059_v52 = vadd.f32 %v6058_v56, %v6022_v20 }
 0xf27   : > { %v6076_v35 = vadd.f32 %v6071_v34, %v6059_v52 }
 0xf29   : > { %6080 = vst [vmem:[%s1070_s28 + $0x18] sm:$0xff] %v6076_v35 }
 0xf2a PF: > { %s10329_s1 = sld [smem:[#allocation34_spill]] }
 0xf30   : > { %s81_s22 = sadd.s32 1, %s10329_s1  }
 0xf31   : > { %p78_p4 = scmp.ge.s32.totalorder %s81_s22, 4  }
 0xf33   :  { %80 = sbr.rel (!%p78_p4) target bundleno = 68 (0x44), region = 226 }

</bundles_post_ra>
